<compile_context>
chip_gen: v6e
topology: v6e:2x2x1
jax: 0.10.0
libtpu: 0.0.40
codegen_flags: <defaults>
</compile_context>

<pallas_src>
import functools

import jax
import jax.numpy as jnp
from jax import lax
from jax.experimental import pallas as pl
from jax.experimental.pallas import tpu as pltpu


# ---------------------------------------------------------------------------
# Pallas kernel: fused matmul + bias + activation
# ---------------------------------------------------------------------------
def _matmul_bias_act_kernel(x_ref, w_ref, b_ref, o_ref, *, act):
    y = jnp.dot(x_ref[...], w_ref[...], preferred_element_type=jnp.float32)
    y = y + b_ref[...]
    if act == "leaky_relu":
        y = jnp.where(y > 0, y, 0.2 * y)
    elif act == "sigmoid":
        y = 1.0 / (1.0 + jnp.exp(-y))
    o_ref[...] = y.astype(o_ref.dtype)


def _pick_tile_m(M, target=2048):
    """Largest M-tile <= target that divides M (multiple of 8), else whole M."""
    if M <= target:
        return M
    t = target
    while t > 0:
        if M % t == 0 and t % 8 == 0:
            return t
        t -= 8
    return M


def matmul_bias_act(x, w, b, act, out_dtype):
    """y = act(x @ w + b).  x:(M,K), w:(K,N), b:(N,).  Tiled over M only; K and
    N blocks span the full (unpadded) extents so no HBM padding/slicing."""
    M, K = x.shape
    K2, N = w.shape
    assert K == K2
    tile_m = _pick_tile_m(M)
    grid_m = M // tile_m
    b2 = b.reshape(1, N)

    kernel = functools.partial(_matmul_bias_act_kernel, act=act)
    bytes_accessed = (x.size * x.dtype.itemsize
                      + w.size * w.dtype.itemsize
                      + b2.size * b2.dtype.itemsize
                      + M * N * jnp.dtype(out_dtype).itemsize)
    cost = pl.CostEstimate(
        flops=2 * M * K * N,
        transcendentals=(M * N) if act == "sigmoid" else 0,
        bytes_accessed=bytes_accessed,
    )

    return pl.pallas_call(
        kernel,
        out_shape=jax.ShapeDtypeStruct((M, N), out_dtype),
        grid_spec=pltpu.PrefetchScalarGridSpec(
            num_scalar_prefetch=0,
            grid=(grid_m,),
            in_specs=[
                pl.BlockSpec((tile_m, K), lambda i: (i, 0)),   # patches tile
                pl.BlockSpec((K, N), lambda i: (0, 0)),        # full weight
                pl.BlockSpec((1, N), lambda i: (0, 0)),        # bias row
            ],
            out_specs=pl.BlockSpec((tile_m, N), lambda i: (i, 0)),
        ),
        compiler_params=pltpu.CompilerParams(
            dimension_semantics=("parallel",)),
        cost_estimate=cost,
    )(x, w, b2)


# ---------------------------------------------------------------------------
# Conv2d lowered to im2col + Pallas matmul
# ---------------------------------------------------------------------------
def im2col(x, k, stride, pad):
    # x: (N, H, W, C) NHWC (bf16 between layers -> halves the k^2 amplification)
    if pad > 0:
        x = jnp.pad(x, ((0, 0), (pad, pad), (pad, pad), (0, 0)))
    N, H, W, C = x.shape
    Ho = (H - k) // stride + 1
    Wo = (W - k) // stride + 1
    cols = []
    for i in range(k):
        for j in range(k):
            cols.append(x[:, i:i + stride * Ho:stride, j:j + stride * Wo:stride, :])
    patches = jnp.stack(cols, axis=3)              # (N, Ho, Wo, k*k, C)
    return patches.reshape(N * Ho * Wo, k * k * C), N, Ho, Wo


def conv2d_act(x, layer):
    patches, N, Ho, Wo = im2col(x, layer["k"], layer["stride"], layer["pad"])
    y = matmul_bias_act(patches, layer["w_mm"], layer["b"], layer["act"],
                        layer["out_dtype"])
    return y.reshape(N, Ho, Wo, layer["cout"])     # free reshape (row-major)


# ---------------------------------------------------------------------------
# Discriminator: parameter init (weight layout hoisted here) + forward
# ---------------------------------------------------------------------------
def init_discriminator_params(key, channels_img, features_d,
                              compute_dtype=jnp.bfloat16):
    fd = features_d
    layer_cfg = [
        # (Cin,          Cout,   k, stride, pad, has_bias, act)
        (channels_img,   fd * 8, 4, 2,      1,   True,     "leaky_relu"),
        (fd * 8,         fd * 4, 3, 2,      1,   False,    "leaky_relu"),
        (fd * 4,         fd * 2, 4, 2,      1,   False,    "leaky_relu"),
        (fd * 2,         fd,     3, 2,      1,   False,    "leaky_relu"),
        (fd,             fd,     4, 2,      1,   False,    "leaky_relu"),
        (fd,             1,      4, 2,      0,   True,     "sigmoid"),
    ]
    params = []
    n_layers = len(layer_cfg)
    for li, (cin, cout, k, s, p, has_bias, act) in enumerate(layer_cfg):
        key, wk, bk = jax.random.split(key, 3)
        w = 0.05 * jax.random.normal(wk, (cout, cin, k, k), jnp.float32)
        if has_bias:
            b = 0.05 * jax.random.normal(bk, (cout,), jnp.float32)
        else:
            b = jnp.zeros((cout,), jnp.float32)
        # One-time weight layout transform for the Pallas matmul:
        # OIHW -> (kh, kw, Cin, Cout) -> (kh*kw*Cin, Cout), cast to bf16 (MXU).
        w_mm = jnp.transpose(w, (2, 3, 1, 0)).reshape(k * k * cin, cout)
        w_mm = w_mm.astype(compute_dtype)
        out_dtype = jnp.float32 if li == n_layers - 1 else compute_dtype
        params.append(dict(w=w, b=b, w_mm=w_mm, k=k, stride=s, pad=p, act=act,
                           cout=cout, out_dtype=out_dtype))
    return params


def discriminator_forward(params, x_nchw, compute_dtype=jnp.bfloat16):
    # PyTorch input convention is NCHW; convert once to NHWC + bf16.
    x = jnp.transpose(x_nchw, (0, 2, 3, 1)).astype(compute_dtype)
    for p in params:
        x = conv2d_act(x, p)
    # Back to NCHW so the output shape matches nn.Sequential: (N, 1, 1, 1).
    return jnp.transpose(x, (0, 3, 1, 2))


# Pure-JAX f32 reference (correctness check only).
def reference_forward(params, x_nchw):
    x = x_nchw
    for p in params:
        y = lax.conv_general_dilated(
            x, p["w"], window_strides=(p["stride"], p["stride"]),
            padding=[(p["pad"], p["pad"]), (p["pad"], p["pad"])],
            dimension_numbers=("NCHW", "OIHW", "NCHW"))
        y = y + p["b"].reshape(1, -1, 1, 1)
        if p["act"] == "leaky_relu":
            y = jnp.where(y > 0, y, 0.2 * y)
        else:
            y = jax.nn.sigmoid(y)
        x = y
    return x


if __name__ == "__main__":
    key = jax.random.PRNGKey(0)
    key, pkey, xkey = jax.random.split(key, 3)

    # Small channel counts; 128x128 is the minimum spatial size this 6-conv
    # stride-2 stack supports (final conv is k=4, p=0 on a 4x4 map -> 1x1).
    channels_img, features_d = 3, 4
    N, H, W = 2, 128, 128

    params = init_discriminator_params(pkey, channels_img, features_d)
    x = jax.random.normal(xkey, (N, channels_img, H, W), jnp.float32)

    fwd = jax.jit(lambda xx: discriminator_forward(params, xx))
    ref_fn = jax.jit(lambda xx: reference_forward(params, xx))

    out = jax.block_until_ready(fwd(x))
    ref = jax.block_until_ready(ref_fn(x))

    assert out.shape == (N, 1, 1, 1), out.shape
    # bf16 compute path vs f32 reference -> loosened tolerance (per review).
    assert jnp.allclose(out, ref, rtol=1e-2, atol=1e-2), \
        float(jnp.max(jnp.abs(out - ref)))
    print("KERNEL_OK")
</pallas_src>

<mosaic_0001>
module attributes {stable_mosaic.version = 11 : i64} {
  func.func @_matmul_bias_act_kernel(%arg0: i32, %arg1: memref<2048x48xbf16, #tpu.memory_space<vmem>>, %arg2: memref<48x32xbf16, #tpu.memory_space<vmem>>, %arg3: memref<1x32xf32, #tpu.memory_space<vmem>>, %arg4: memref<2048x32xbf16, #tpu.memory_space<vmem>>) attributes {dimension_semantics = [#tpu.dimension_semantics<parallel>], iteration_bounds = array<i64: 4>, scalar_prefetch = 0 : i64, scratch_operands = 0 : i64, tpu.core_type = #tpu.core_type<tc>, window_params = [{transform_indices = @transform_0, window_bounds = array<i64: 2048, 48>}, {pipeline_mode = #tpu.pipeline_mode<synchronous>, transform_indices = @transform_1, window_bounds = array<i64: 48, 32>}, {pipeline_mode = #tpu.pipeline_mode<synchronous>, transform_indices = @transform_2, window_bounds = array<i64: 1, 32>}, {transform_indices = @transform_3, window_bounds = array<i64: 2048, 32>}]} {
    %c0 = arith.constant 0 : index
    %c0_0 = arith.constant 0 : index
    %0 = vector.load %arg1[%c0, %c0_0] : memref<2048x48xbf16, #tpu.memory_space<vmem>>, vector<2048x48xbf16>
    %c0_1 = arith.constant 0 : index
    %c0_2 = arith.constant 0 : index
    %1 = vector.load %arg2[%c0_1, %c0_2] : memref<48x32xbf16, #tpu.memory_space<vmem>>, vector<48x32xbf16>
    %cst = arith.constant dense<0.000000e+00> : vector<2048x32xf32>
    %2 = tpu.matmul %0, %1, %cst {dimension_numbers = #tpu.dot_dimension_numbers<[1], [0], [0], [1], [0, 0, 1, 1], [], []>} : vector<2048x48xbf16>, vector<48x32xbf16>, vector<2048x32xf32> -> vector<2048x32xf32>
    %c0_3 = arith.constant 0 : index
    %c0_4 = arith.constant 0 : index
    %3 = vector.load %arg3[%c0_3, %c0_4] : memref<1x32xf32, #tpu.memory_space<vmem>>, vector<1x32xf32>
    %4 = vector.broadcast %3 : vector<1x32xf32> to vector<2048x32xf32>
    %5 = arith.addf %2, %4 : vector<2048x32xf32>
    %cst_5 = arith.constant 0.000000e+00 : f32
    %6 = vector.broadcast %cst_5 : f32 to vector<2048x32xf32>
    %7 = arith.cmpf ogt, %5, %6 : vector<2048x32xf32>
    %cst_6 = arith.constant 2.000000e-01 : f32
    %8 = vector.broadcast %cst_6 : f32 to vector<2048x32xf32>
    %9 = arith.mulf %8, %5 : vector<2048x32xf32>
    %10 = arith.select %7, %5, %9 : vector<2048x32xi1>, vector<2048x32xf32>
    %11 = arith.truncf %10 : vector<2048x32xf32> to vector<2048x32xbf16>
    %c0_7 = arith.constant 0 : index
    %c0_8 = arith.constant 0 : index
    %12 = vector.load %arg4[%c0_7, %c0_8] : memref<2048x32xbf16, #tpu.memory_space<vmem>>, vector<2048x32xbf16>
    tpu.vector_store %arg4[%c0_7, %c0_8], %11 {strides = array<i32>} : memref<2048x32xbf16, #tpu.memory_space<vmem>>, vector<2048x32xbf16>,
    return
  }
  func.func @transform_0(%arg0: i32) -> (i32, i32) {
    %c0_i32 = arith.constant 0 : i32
    %c0_i32_0 = arith.constant 0 : i32
    return %arg0, %c0_i32 : i32, i32
  }
  func.func @transform_1(%arg0: i32) -> (i32, i32) {
    %c0_i32 = arith.constant 0 : i32
    %c0_i32_0 = arith.constant 0 : i32
    %c0_i32_1 = arith.constant 0 : i32
    return %c0_i32, %c0_i32_0 : i32, i32
  }
  func.func @transform_2(%arg0: i32) -> (i32, i32) {
    %c0_i32 = arith.constant 0 : i32
    %c0_i32_0 = arith.constant 0 : i32
    %c0_i32_1 = arith.constant 0 : i32
    return %c0_i32, %c0_i32_0 : i32, i32
  }
  func.func @transform_3(%arg0: i32) -> (i32, i32) {
    %c0_i32 = arith.constant 0 : i32
    %c0_i32_0 = arith.constant 0 : i32
    return %arg0, %c0_i32 : i32, i32
  }
}

module attributes {stable_mosaic.version = 11 : i64} {
  func.func @_matmul_bias_act_kernel(%arg0: i32, %arg1: memref<2048x288xbf16, #tpu.memory_space<vmem>>, %arg2: memref<288x16xbf16, #tpu.memory_space<vmem>>, %arg3: memref<1x16xf32, #tpu.memory_space<vmem>>, %arg4: memref<2048x16xbf16, #tpu.memory_space<vmem>>) attributes {dimension_semantics = [#tpu.dimension_semantics<parallel>], iteration_bounds = array<i64: 1>, scalar_prefetch = 0 : i64, scratch_operands = 0 : i64, tpu.core_type = #tpu.core_type<tc>, window_params = [{transform_indices = @transform_0, window_bounds = array<i64: 2048, 288>}, {pipeline_mode = #tpu.pipeline_mode<synchronous>, transform_indices = @transform_1, window_bounds = array<i64: 288, 16>}, {pipeline_mode = #tpu.pipeline_mode<synchronous>, transform_indices = @transform_2, window_bounds = array<i64: 1, 16>}, {transform_indices = @transform_3, window_bounds = array<i64: 2048, 16>}]} {
    %c0 = arith.constant 0 : index
    %c0_0 = arith.constant 0 : index
    %0 = vector.load %arg1[%c0, %c0_0] : memref<2048x288xbf16, #tpu.memory_space<vmem>>, vector<2048x288xbf16>
    %c0_1 = arith.constant 0 : index
    %c0_2 = arith.constant 0 : index
    %1 = vector.load %arg2[%c0_1, %c0_2] : memref<288x16xbf16, #tpu.memory_space<vmem>>, vector<288x16xbf16>
    %cst = arith.constant dense<0.000000e+00> : vector<2048x16xf32>
    %2 = tpu.matmul %0, %1, %cst {dimension_numbers = #tpu.dot_dimension_numbers<[1], [0], [0], [1], [0, 0, 1, 1], [], []>} : vector<2048x288xbf16>, vector<288x16xbf16>, vector<2048x16xf32> -> vector<2048x16xf32>
    %c0_3 = arith.constant 0 : index
    %c0_4 = arith.constant 0 : index
    %3 = vector.load %arg3[%c0_3, %c0_4] : memref<1x16xf32, #tpu.memory_space<vmem>>, vector<1x16xf32>
    %4 = vector.broadcast %3 : vector<1x16xf32> to vector<2048x16xf32>
    %5 = arith.addf %2, %4 : vector<2048x16xf32>
    %cst_5 = arith.constant 0.000000e+00 : f32
    %6 = vector.broadcast %cst_5 : f32 to vector<2048x16xf32>
    %7 = arith.cmpf ogt, %5, %6 : vector<2048x16xf32>
    %cst_6 = arith.constant 2.000000e-01 : f32
    %8 = vector.broadcast %cst_6 : f32 to vector<2048x16xf32>
    %9 = arith.mulf %8, %5 : vector<2048x16xf32>
    %10 = arith.select %7, %5, %9 : vector<2048x16xi1>, vector<2048x16xf32>
    %11 = arith.truncf %10 : vector<2048x16xf32> to vector<2048x16xbf16>
    %c0_7 = arith.constant 0 : index
    %c0_8 = arith.constant 0 : index
    %12 = vector.load %arg4[%c0_7, %c0_8] : memref<2048x16xbf16, #tpu.memory_space<vmem>>, vector<2048x16xbf16>
    tpu.vector_store %arg4[%c0_7, %c0_8], %11 {strides = array<i32>} : memref<2048x16xbf16, #tpu.memory_space<vmem>>, vector<2048x16xbf16>,
    return
  }
  func.func @transform_0(%arg0: i32) -> (i32, i32) {
    %c0_i32 = arith.constant 0 : i32
    %c0_i32_0 = arith.constant 0 : i32
    return %arg0, %c0_i32 : i32, i32
  }
  func.func @transform_1(%arg0: i32) -> (i32, i32) {
    %c0_i32 = arith.constant 0 : i32
    %c0_i32_0 = arith.constant 0 : i32
    %c0_i32_1 = arith.constant 0 : i32
    return %c0_i32, %c0_i32_0 : i32, i32
  }
  func.func @transform_2(%arg0: i32) -> (i32, i32) {
    %c0_i32 = arith.constant 0 : i32
    %c0_i32_0 = arith.constant 0 : i32
    %c0_i32_1 = arith.constant 0 : i32
    return %c0_i32, %c0_i32_0 : i32, i32
  }
  func.func @transform_3(%arg0: i32) -> (i32, i32) {
    %c0_i32 = arith.constant 0 : i32
    %c0_i32_0 = arith.constant 0 : i32
    return %arg0, %c0_i32 : i32, i32
  }
}

module attributes {stable_mosaic.version = 11 : i64} {
  func.func @_matmul_bias_act_kernel(%arg0: i32, %arg1: memref<512x256xbf16, #tpu.memory_space<vmem>>, %arg2: memref<256x8xbf16, #tpu.memory_space<vmem>>, %arg3: memref<1x8xf32, #tpu.memory_space<vmem>>, %arg4: memref<512x8xbf16, #tpu.memory_space<vmem>>) attributes {dimension_semantics = [#tpu.dimension_semantics<parallel>], iteration_bounds = array<i64: 1>, scalar_prefetch = 0 : i64, scratch_operands = 0 : i64, tpu.core_type = #tpu.core_type<tc>, window_params = [{transform_indices = @transform_0, window_bounds = array<i64: 512, 256>}, {pipeline_mode = #tpu.pipeline_mode<synchronous>, transform_indices = @transform_1, window_bounds = array<i64: 256, 8>}, {pipeline_mode = #tpu.pipeline_mode<synchronous>, transform_indices = @transform_2, window_bounds = array<i64: 1, 8>}, {transform_indices = @transform_3, window_bounds = array<i64: 512, 8>}]} {
    %c0 = arith.constant 0 : index
    %c0_0 = arith.constant 0 : index
    %0 = vector.load %arg1[%c0, %c0_0] : memref<512x256xbf16, #tpu.memory_space<vmem>>, vector<512x256xbf16>
    %c0_1 = arith.constant 0 : index
    %c0_2 = arith.constant 0 : index
    %1 = vector.load %arg2[%c0_1, %c0_2] : memref<256x8xbf16, #tpu.memory_space<vmem>>, vector<256x8xbf16>
    %cst = arith.constant dense<0.000000e+00> : vector<512x8xf32>
    %2 = tpu.matmul %0, %1, %cst {dimension_numbers = #tpu.dot_dimension_numbers<[1], [0], [0], [1], [0, 0, 1, 1], [], []>} : vector<512x256xbf16>, vector<256x8xbf16>, vector<512x8xf32> -> vector<512x8xf32>
    %c0_3 = arith.constant 0 : index
    %c0_4 = arith.constant 0 : index
    %3 = vector.load %arg3[%c0_3, %c0_4] : memref<1x8xf32, #tpu.memory_space<vmem>>, vector<1x8xf32>
    %4 = vector.broadcast %3 : vector<1x8xf32> to vector<512x8xf32>
    %5 = arith.addf %2, %4 : vector<512x8xf32>
    %cst_5 = arith.constant 0.000000e+00 : f32
    %6 = vector.broadcast %cst_5 : f32 to vector<512x8xf32>
    %7 = arith.cmpf ogt, %5, %6 : vector<512x8xf32>
    %cst_6 = arith.constant 2.000000e-01 : f32
    %8 = vector.broadcast %cst_6 : f32 to vector<512x8xf32>
    %9 = arith.mulf %8, %5 : vector<512x8xf32>
    %10 = arith.select %7, %5, %9 : vector<512x8xi1>, vector<512x8xf32>
    %11 = arith.truncf %10 : vector<512x8xf32> to vector<512x8xbf16>
    %c0_7 = arith.constant 0 : index
    %c0_8 = arith.constant 0 : index
    %12 = vector.load %arg4[%c0_7, %c0_8] : memref<512x8xbf16, #tpu.memory_space<vmem>>, vector<512x8xbf16>
    tpu.vector_store %arg4[%c0_7, %c0_8], %11 {strides = array<i32>} : memref<512x8xbf16, #tpu.memory_space<vmem>>, vector<512x8xbf16>,
    return
  }
  func.func @transform_0(%arg0: i32) -> (i32, i32) {
    %c0_i32 = arith.constant 0 : i32
    %c0_i32_0 = arith.constant 0 : i32
    return %arg0, %c0_i32 : i32, i32
  }
  func.func @transform_1(%arg0: i32) -> (i32, i32) {
    %c0_i32 = arith.constant 0 : i32
    %c0_i32_0 = arith.constant 0 : i32
    %c0_i32_1 = arith.constant 0 : i32
    return %c0_i32, %c0_i32_0 : i32, i32
  }
  func.func @transform_2(%arg0: i32) -> (i32, i32) {
    %c0_i32 = arith.constant 0 : i32
    %c0_i32_0 = arith.constant 0 : i32
    %c0_i32_1 = arith.constant 0 : i32
    return %c0_i32, %c0_i32_0 : i32, i32
  }
  func.func @transform_3(%arg0: i32) -> (i32, i32) {
    %c0_i32 = arith.constant 0 : i32
    %c0_i32_0 = arith.constant 0 : i32
    return %arg0, %c0_i32 : i32, i32
  }
}

module attributes {stable_mosaic.version = 11 : i64} {
  func.func @_matmul_bias_act_kernel(%arg0: i32, %arg1: memref<128x72xbf16, #tpu.memory_space<vmem>>, %arg2: memref<72x4xbf16, #tpu.memory_space<vmem>>, %arg3: memref<1x4xf32, #tpu.memory_space<vmem>>, %arg4: memref<128x4xbf16, #tpu.memory_space<vmem>>) attributes {dimension_semantics = [#tpu.dimension_semantics<parallel>], iteration_bounds = array<i64: 1>, scalar_prefetch = 0 : i64, scratch_operands = 0 : i64, tpu.core_type = #tpu.core_type<tc>, window_params = [{transform_indices = @transform_0, window_bounds = array<i64: 128, 72>}, {pipeline_mode = #tpu.pipeline_mode<synchronous>, transform_indices = @transform_1, window_bounds = array<i64: 72, 4>}, {pipeline_mode = #tpu.pipeline_mode<synchronous>, transform_indices = @transform_2, window_bounds = array<i64: 1, 4>}, {transform_indices = @transform_3, window_bounds = array<i64: 128, 4>}]} {
    %c0 = arith.constant 0 : index
    %c0_0 = arith.constant 0 : index
    %0 = vector.load %arg1[%c0, %c0_0] : memref<128x72xbf16, #tpu.memory_space<vmem>>, vector<128x72xbf16>
    %c0_1 = arith.constant 0 : index
    %c0_2 = arith.constant 0 : index
    %1 = vector.load %arg2[%c0_1, %c0_2] : memref<72x4xbf16, #tpu.memory_space<vmem>>, vector<72x4xbf16>
    %cst = arith.constant dense<0.000000e+00> : vector<128x4xf32>
    %2 = tpu.matmul %0, %1, %cst {dimension_numbers = #tpu.dot_dimension_numbers<[1], [0], [0], [1], [0, 0, 1, 1], [], []>} : vector<128x72xbf16>, vector<72x4xbf16>, vector<128x4xf32> -> vector<128x4xf32>
    %c0_3 = arith.constant 0 : index
    %c0_4 = arith.constant 0 : index
    %3 = vector.load %arg3[%c0_3, %c0_4] : memref<1x4xf32, #tpu.memory_space<vmem>>, vector<1x4xf32>
    %4 = vector.broadcast %3 : vector<1x4xf32> to vector<128x4xf32>
    %5 = arith.addf %2, %4 : vector<128x4xf32>
    %cst_5 = arith.constant 0.000000e+00 : f32
    %6 = vector.broadcast %cst_5 : f32 to vector<128x4xf32>
    %7 = arith.cmpf ogt, %5, %6 : vector<128x4xf32>
    %cst_6 = arith.constant 2.000000e-01 : f32
    %8 = vector.broadcast %cst_6 : f32 to vector<128x4xf32>
    %9 = arith.mulf %8, %5 : vector<128x4xf32>
    %10 = arith.select %7, %5, %9 : vector<128x4xi1>, vector<128x4xf32>
    %11 = arith.truncf %10 : vector<128x4xf32> to vector<128x4xbf16>
    %c0_7 = arith.constant 0 : index
    %c0_8 = arith.constant 0 : index
    %12 = vector.load %arg4[%c0_7, %c0_8] : memref<128x4xbf16, #tpu.memory_space<vmem>>, vector<128x4xbf16>
    tpu.vector_store %arg4[%c0_7, %c0_8], %11 {strides = array<i32>} : memref<128x4xbf16, #tpu.memory_space<vmem>>, vector<128x4xbf16>,
    return
  }
  func.func @transform_0(%arg0: i32) -> (i32, i32) {
    %c0_i32 = arith.constant 0 : i32
    %c0_i32_0 = arith.constant 0 : i32
    return %arg0, %c0_i32 : i32, i32
  }
  func.func @transform_1(%arg0: i32) -> (i32, i32) {
    %c0_i32 = arith.constant 0 : i32
    %c0_i32_0 = arith.constant 0 : i32
    %c0_i32_1 = arith.constant 0 : i32
    return %c0_i32, %c0_i32_0 : i32, i32
  }
  func.func @transform_2(%arg0: i32) -> (i32, i32) {
    %c0_i32 = arith.constant 0 : i32
    %c0_i32_0 = arith.constant 0 : i32
    %c0_i32_1 = arith.constant 0 : i32
    return %c0_i32, %c0_i32_0 : i32, i32
  }
  func.func @transform_3(%arg0: i32) -> (i32, i32) {
    %c0_i32 = arith.constant 0 : i32
    %c0_i32_0 = arith.constant 0 : i32
    return %arg0, %c0_i32 : i32, i32
  }
}

module attributes {stable_mosaic.version = 11 : i64} {
  func.func @_matmul_bias_act_kernel(%arg0: i32, %arg1: memref<32x64xbf16, #tpu.memory_space<vmem>>, %arg2: memref<64x4xbf16, #tpu.memory_space<vmem>>, %arg3: memref<1x4xf32, #tpu.memory_space<vmem>>, %arg4: memref<32x4xbf16, #tpu.memory_space<vmem>>) attributes {dimension_semantics = [#tpu.dimension_semantics<parallel>], iteration_bounds = array<i64: 1>, scalar_prefetch = 0 : i64, scratch_operands = 0 : i64, tpu.core_type = #tpu.core_type<tc>, window_params = [{transform_indices = @transform_0, window_bounds = array<i64: 32, 64>}, {pipeline_mode = #tpu.pipeline_mode<synchronous>, transform_indices = @transform_1, window_bounds = array<i64: 64, 4>}, {pipeline_mode = #tpu.pipeline_mode<synchronous>, transform_indices = @transform_2, window_bounds = array<i64: 1, 4>}, {transform_indices = @transform_3, window_bounds = array<i64: 32, 4>}]} {
    %c0 = arith.constant 0 : index
    %c0_0 = arith.constant 0 : index
    %0 = vector.load %arg1[%c0, %c0_0] : memref<32x64xbf16, #tpu.memory_space<vmem>>, vector<32x64xbf16>
    %c0_1 = arith.constant 0 : index
    %c0_2 = arith.constant 0 : index
    %1 = vector.load %arg2[%c0_1, %c0_2] : memref<64x4xbf16, #tpu.memory_space<vmem>>, vector<64x4xbf16>
    %cst = arith.constant dense<0.000000e+00> : vector<32x4xf32>
    %2 = tpu.matmul %0, %1, %cst {dimension_numbers = #tpu.dot_dimension_numbers<[1], [0], [0], [1], [0, 0, 1, 1], [], []>} : vector<32x64xbf16>, vector<64x4xbf16>, vector<32x4xf32> -> vector<32x4xf32>
    %c0_3 = arith.constant 0 : index
    %c0_4 = arith.constant 0 : index
    %3 = vector.load %arg3[%c0_3, %c0_4] : memref<1x4xf32, #tpu.memory_space<vmem>>, vector<1x4xf32>
    %4 = vector.broadcast %3 : vector<1x4xf32> to vector<32x4xf32>
    %5 = arith.addf %2, %4 : vector<32x4xf32>
    %cst_5 = arith.constant 0.000000e+00 : f32
    %6 = vector.broadcast %cst_5 : f32 to vector<32x4xf32>
    %7 = arith.cmpf ogt, %5, %6 : vector<32x4xf32>
    %cst_6 = arith.constant 2.000000e-01 : f32
    %8 = vector.broadcast %cst_6 : f32 to vector<32x4xf32>
    %9 = arith.mulf %8, %5 : vector<32x4xf32>
    %10 = arith.select %7, %5, %9 : vector<32x4xi1>, vector<32x4xf32>
    %11 = arith.truncf %10 : vector<32x4xf32> to vector<32x4xbf16>
    %c0_7 = arith.constant 0 : index
    %c0_8 = arith.constant 0 : index
    %12 = vector.load %arg4[%c0_7, %c0_8] : memref<32x4xbf16, #tpu.memory_space<vmem>>, vector<32x4xbf16>
    tpu.vector_store %arg4[%c0_7, %c0_8], %11 {strides = array<i32>} : memref<32x4xbf16, #tpu.memory_space<vmem>>, vector<32x4xbf16>,
    return
  }
  func.func @transform_0(%arg0: i32) -> (i32, i32) {
    %c0_i32 = arith.constant 0 : i32
    %c0_i32_0 = arith.constant 0 : i32
    return %arg0, %c0_i32 : i32, i32
  }
  func.func @transform_1(%arg0: i32) -> (i32, i32) {
    %c0_i32 = arith.constant 0 : i32
    %c0_i32_0 = arith.constant 0 : i32
    %c0_i32_1 = arith.constant 0 : i32
    return %c0_i32, %c0_i32_0 : i32, i32
  }
  func.func @transform_2(%arg0: i32) -> (i32, i32) {
    %c0_i32 = arith.constant 0 : i32
    %c0_i32_0 = arith.constant 0 : i32
    %c0_i32_1 = arith.constant 0 : i32
    return %c0_i32, %c0_i32_0 : i32, i32
  }
  func.func @transform_3(%arg0: i32) -> (i32, i32) {
    %c0_i32 = arith.constant 0 : i32
    %c0_i32_0 = arith.constant 0 : i32
    return %arg0, %c0_i32 : i32, i32
  }
}

module attributes {stable_mosaic.version = 11 : i64} {
  func.func @_matmul_bias_act_kernel(%arg0: i32, %arg1: memref<2x64xbf16, #tpu.memory_space<vmem>>, %arg2: memref<64x1xbf16, #tpu.memory_space<vmem>>, %arg3: memref<1x1xf32, #tpu.memory_space<vmem>>, %arg4: memref<2x1xf32, #tpu.memory_space<vmem>>) attributes {dimension_semantics = [#tpu.dimension_semantics<parallel>], iteration_bounds = array<i64: 1>, scalar_prefetch = 0 : i64, scratch_operands = 0 : i64, tpu.core_type = #tpu.core_type<tc>, window_params = [{transform_indices = @transform_0, window_bounds = array<i64: 2, 64>}, {pipeline_mode = #tpu.pipeline_mode<synchronous>, transform_indices = @transform_1, window_bounds = array<i64: 64, 1>}, {pipeline_mode = #tpu.pipeline_mode<synchronous>, transform_indices = @transform_2, window_bounds = array<i64: 1, 1>}, {transform_indices = @transform_3, window_bounds = array<i64: 2, 1>}]} {
    %c0 = arith.constant 0 : index
    %c0_0 = arith.constant 0 : index
    %0 = vector.load %arg1[%c0, %c0_0] : memref<2x64xbf16, #tpu.memory_space<vmem>>, vector<2x64xbf16>
    %c0_1 = arith.constant 0 : index
    %c0_2 = arith.constant 0 : index
    %1 = vector.load %arg2[%c0_1, %c0_2] : memref<64x1xbf16, #tpu.memory_space<vmem>>, vector<64x1xbf16>
    %cst = arith.constant dense<0.000000e+00> : vector<2x1xf32>
    %2 = tpu.matmul %0, %1, %cst {dimension_numbers = #tpu.dot_dimension_numbers<[1], [0], [0], [1], [0, 0, 1, 1], [], []>} : vector<2x64xbf16>, vector<64x1xbf16>, vector<2x1xf32> -> vector<2x1xf32>
    %c0_3 = arith.constant 0 : index
    %c0_4 = arith.constant 0 : index
    %3 = vector.load %arg3[%c0_3, %c0_4] : memref<1x1xf32, #tpu.memory_space<vmem>>, vector<1x1xf32>
    %4 = vector.broadcast %3 : vector<1x1xf32> to vector<2x1xf32>
    %5 = arith.addf %2, %4 : vector<2x1xf32>
    %cst_5 = arith.constant 0.000000e+00 : f32
    %6 = vector.broadcast %cst_5 : f32 to vector<2x1xf32>
    %7 = arith.subf %6, %5 : vector<2x1xf32>
    %8 = math.exp %7 : vector<2x1xf32>
    %cst_6 = arith.constant 1.000000e+00 : f32
    %9 = vector.broadcast %cst_6 : f32 to vector<2x1xf32>
    %10 = arith.addf %9, %8 : vector<2x1xf32>
    %cst_7 = arith.constant 1.000000e+00 : f32
    %11 = vector.broadcast %cst_7 : f32 to vector<2x1xf32>
    %12 = arith.divf %11, %10 : vector<2x1xf32>
    %c0_8 = arith.constant 0 : index
    %c0_9 = arith.constant 0 : index
    %13 = vector.load %arg4[%c0_8, %c0_9] : memref<2x1xf32, #tpu.memory_space<vmem>>, vector<2x1xf32>
    tpu.vector_store %arg4[%c0_8, %c0_9], %12 {strides = array<i32>} : memref<2x1xf32, #tpu.memory_space<vmem>>, vector<2x1xf32>,
    return
  }
  func.func @transform_0(%arg0: i32) -> (i32, i32) {
    %c0_i32 = arith.constant 0 : i32
    %c0_i32_0 = arith.constant 0 : i32
    return %arg0, %c0_i32 : i32, i32
  }
  func.func @transform_1(%arg0: i32) -> (i32, i32) {
    %c0_i32 = arith.constant 0 : i32
    %c0_i32_0 = arith.constant 0 : i32
    %c0_i32_1 = arith.constant 0 : i32
    return %c0_i32, %c0_i32_0 : i32, i32
  }
  func.func @transform_2(%arg0: i32) -> (i32, i32) {
    %c0_i32 = arith.constant 0 : i32
    %c0_i32_0 = arith.constant 0 : i32
    %c0_i32_1 = arith.constant 0 : i32
    return %c0_i32, %c0_i32_0 : i32, i32
  }
  func.func @transform_3(%arg0: i32) -> (i32, i32) {
    %c0_i32 = arith.constant 0 : i32
    %c0_i32_0 = arith.constant 0 : i32
    return %arg0, %c0_i32 : i32, i32
  }
}

</mosaic_0001>

<bundles_post_ra>
// kernel: _lambda_.6
= control target key start
LH: loop header
LB: loop body
LE: loop exit
PB: predicated region body
PF: predicated region fallthrough
CT: control target
= control target key end

     0   :  { %s6001_s12 = smov 0   ;;  %s7714_s0 = inlined_call_operand.vmem [shape: bf16[8192,48], index: 0, kind: input, shape index: {}]   ;;  %s7715_s1 = inlined_call_operand.vmem [shape: bf16[48,32], index: 1, kind: input, shape index: {}]   ;;  %s7716_s2 = inlined_call_operand.vmem [shape: f32[1,32], index: 2, kind: input, shape index: {}]   ;;  %s7717_s3 = inlined_call_operand.vmem [shape: bf16[8192,32], index: 3, kind: output, shape index: {}]  }
   0x1 LB: > { %s4649_s13 = sadd.s32 4294967295, %s5979_s12   ;;  %p4653_p0 = scmp.ge.s32.totalorder %s5979_s12, 1  ;;  %s5979_s12 = sphi %s6001_s12, %s13_s12  }
   0x2   : > { %p138_p1 = scmp.lt.s32.totalorder %s5979_s12, 5 }
   0x4   : > { %p139_p2 = pnand %p4653_p0, %p138_p1 }
   0x5   : > { %s4654_s16 = sshll.u32 (!%p139_p2), %s4649_s13, 8 }
   0x6   : > { %142 = sbr.rel (%p139_p2) target bundleno = 544 (0x220), region = 32  ;;  %p163_p3 = scmp.lt.s32.totalorder (!%p139_p2), %s4654_s16, 1023 }
   0xb   : > { %v5839_v0 = vld [vmem:[%s7715_s1 + $0x10] sm:$0xff]   ;;  %v5840_v1 = vld [vmem:[%s7715_s1 + $0x8] sm:$0xff]   ;;  %s7719_s16 = smov (!%p163_p3, %s4654_s16), 1023  ;;  %v5841_v2 = vld [vmem:[%s7715_s1] sm:$0xff]   ;;  %vm1102_vm0 = vcmask 392192   ;;  %vm4336_vm3 = vcmask 257024  }
   0xc   : > { %5563 = vmatprep.subr.bf16.mxu0 %v5839_v0  ;;  %5825 = vmatprep.subr.bf16.mxu1 %v5839_v0  ;;  %s4655_s21 = sshll.u32 %s7719_s16, 2 }
   0xd   : > { %5564 = vmatpush3.bf16.msra.mxu0 %v5839_v0  ;;  %5828 = vmatpush3.bf16.msra.mxu1 %v5839_v0  ;;  %s6026_s24 = scalar_lea.vmem %s7714_s0, %s4655_s21  ;;  %s6248_s29 = scalar_lea.vmem %s7717_s3, %s4655_s21 }
   0xe   : > { %5565 = vmatprep.subr.bf16.mxu0 %v5840_v1  ;;  %5826 = vmatprep.subr.bf16.mxu1 %v5840_v1  ;;  %v5842_v3 = vld [vmem:[%s6026_s24] sm:$0xff]   ;;  %v5844_v5 = vld [vmem:[%s6026_s24 + $0x8] sm:$0xff]   ;;  %v5846_v7 = vld [vmem:[%s6026_s24 + $0x10] sm:$0xff]  }
   0xf   : > { %v5843_v4 = vld [vmem:[%s6026_s24 + $0x200] sm:$0xff]   ;;  %5569 = vmatprep.mubr.msk.bf16.mxu0 %vm1102_vm0, %v5842_v3  ;;  %v5845_v6 = vld [vmem:[%s6026_s24 + $0x208] sm:$0xff]   ;;  %v5847_v8 = vld [vmem:[%s6026_s24 + $0x210] sm:$0xff]  }
  0x10   : > { %5697 = vmatprep.mubr.msk.bf16.mxu1 %vm1102_vm0, %v5843_v4  ;;  %v5848_v9 = vld [vmem:[%s6026_s24 + $0x18] sm:$0xff]   ;;  %v5850_v11 = vld [vmem:[%s6026_s24 + $0x20] sm:$0xff]   ;;  %v5852_v13 = vld [vmem:[%s6026_s24 + $0x28] sm:$0xff]  }
  0x11   : > { %5566 = vmatpush3.bf16.msra.mxu0 %v5840_v1  ;;  %5829 = vmatpush3.bf16.msra.mxu1 %v5840_v1  ;;  %v5849_v10 = vld [vmem:[%s6026_s24 + $0x218] sm:$0xff]   ;;  %v5851_v12 = vld [vmem:[%s6026_s24 + $0x220] sm:$0xff]   ;;  %v5853_v14 = vld [vmem:[%s6026_s24 + $0x228] sm:$0xff]  }
  0x12   : > { %5567 = vmatprep.subr.bf16.mxu0 %v5841_v2  ;;  %5827 = vmatprep.subr.bf16.mxu1 %v5841_v2  ;;  %v5854_v15 = vld [vmem:[%s6026_s24 + $0x30] sm:$0xff]   ;;  %v5856_v17 = vld [vmem:[%s6026_s24 + $0x38] sm:$0xff]   ;;  %v5858_v19 = vld [vmem:[%s6026_s24 + $0x40] sm:$0xff]  }
  0x13   : > { %v5855_v16 = vld [vmem:[%s6026_s24 + $0x230] sm:$0xff]   ;;  %v5857_v18 = vld [vmem:[%s6026_s24 + $0x238] sm:$0xff]   ;;  %v5859_v20 = vld [vmem:[%s6026_s24 + $0x240] sm:$0xff]  }
  0x14   : > { %v5860_v21 = vld [vmem:[%s6026_s24 + $0x48] sm:$0xff]   ;;  %v5862_v23 = vld [vmem:[%s6026_s24 + $0x50] sm:$0xff]   ;;  %v5864_v25 = vld [vmem:[%s6026_s24 + $0x58] sm:$0xff]  }
  0x15   : > { %5568 = vmatpush3.bf16.msra.mxu0 %v5841_v2  ;;  %5830 = vmatpush3.bf16.msra.mxu1 %v5841_v2  ;;  %v5861_v22 = vld [vmem:[%s6026_s24 + $0x248] sm:$0xff]   ;;  %v5863_v24 = vld [vmem:[%s6026_s24 + $0x250] sm:$0xff]   ;;  %v5865_v26 = vld [vmem:[%s6026_s24 + $0x258] sm:$0xff]  }
  0x16   : > { %v5866_v27 = vld [vmem:[%s6026_s24 + $0x60] sm:$0xff]   ;;  %v5868_v29 = vld [vmem:[%s6026_s24 + $0x68] sm:$0xff]   ;;  %v5870_v31 = vld [vmem:[%s6026_s24 + $0x70] sm:$0xff]  }
  0x17   : > { %v5867_v28 = vld [vmem:[%s6026_s24 + $0x260] sm:$0xff]   ;;  %v5869_v30 = vld [vmem:[%s6026_s24 + $0x268] sm:$0xff]   ;;  %v5871_v32 = vld [vmem:[%s6026_s24 + $0x270] sm:$0xff]  }
  0x18   : > { %5570 = vmatmul.mubr.msk.bf16.vlgmr.msra.gmra.mxu0 %vm1102_vm0, %v5844_v5  ;;  %5698 = vmatmul.mubr.msk.bf16.vlgmr.msra.gmra.mxu1 %vm1102_vm0, %v5845_v6  ;;  %v5872_v33 = vld [vmem:[%s6026_s24 + $0x78] sm:$0xff]   ;;  %v5874_v35 = vld [vmem:[%s6026_s24 + $0x80] sm:$0xff]   ;;  %v5876_v37 = vld [vmem:[%s6026_s24 + $0x88] sm:$0xff]  }
  0x19   : > { %5573 = vmatprep.mubr.msk.bf16.mxu0 %vm1102_vm0, %v5846_v7  ;;  %5701 = vmatprep.mubr.msk.bf16.mxu1 %vm1102_vm0, %v5847_v8  ;;  %v5873_v34 = vld [vmem:[%s6026_s24 + $0x278] sm:$0xff]   ;;  %v5875_v36 = vld [vmem:[%s6026_s24 + $0x280] sm:$0xff]   ;;  %v5877_v38 = vld [vmem:[%s6026_s24 + $0x288] sm:$0xff]  }
  0x1a   : > { %v5878_v39 = vld [vmem:[%s6026_s24 + $0x90] sm:$0xff]   ;;  %v5880_v41 = vld [vmem:[%s6026_s24 + $0x98] sm:$0xff]   ;;  %v5882_v43 = vld [vmem:[%s6026_s24 + $0xa0] sm:$0xff]  }
  0x1b   : > { %v5879_v40 = vld [vmem:[%s6026_s24 + $0x290] sm:$0xff]   ;;  %v5881_v42 = vld [vmem:[%s6026_s24 + $0x298] sm:$0xff]   ;;  %v5883_v44 = vld [vmem:[%s6026_s24 + $0x2a0] sm:$0xff]  }
  0x1c   : > { %v5884_v45 = vld [vmem:[%s6026_s24 + $0xa8] sm:$0xff]   ;;  %v5886_v47 = vld [vmem:[%s6026_s24 + $0xb0] sm:$0xff]   ;;  %v5888_v49 = vld [vmem:[%s6026_s24 + $0xb8] sm:$0xff]  }
  0x1d   : > { %v5885_v46 = vld [vmem:[%s6026_s24 + $0x2a8] sm:$0xff]   ;;  %v5887_v48 = vld [vmem:[%s6026_s24 + $0x2b0] sm:$0xff]   ;;  %v5889_v50 = vld [vmem:[%s6026_s24 + $0x2b8] sm:$0xff]  }
  0x1e   : > { %v5890_v51 = vld [vmem:[%s6026_s24 + $0xc0] sm:$0xff]   ;;  %v5892_v53 = vld [vmem:[%s6026_s24 + $0xc8] sm:$0xff]   ;;  %v5894_v55 = vld [vmem:[%s6026_s24 + $0xd0] sm:$0xff]  }
  0x1f   : > { %v5891_v52 = vld [vmem:[%s6026_s24 + $0x2c0] sm:$0xff]   ;;  %v5893_v54 = vld [vmem:[%s6026_s24 + $0x2c8] sm:$0xff]   ;;  %v5895_v56 = vld [vmem:[%s6026_s24 + $0x2d0] sm:$0xff]  }
  0x20   : > { %5574 = vmatmul.mubr.msk.bf16.gmra.mxu0 %vm1102_vm0, %v5848_v9  ;;  %5702 = vmatmul.mubr.msk.bf16.gmra.mxu1 %vm1102_vm0, %v5849_v10  ;;  %v5896_v57 = vld [vmem:[%s6026_s24 + $0xd8] sm:$0xff]   ;;  %v5898_v59 = vld [vmem:[%s6026_s24 + $0xe0] sm:$0xff]   ;;  %v5900_v61 = vld [vmem:[%s6026_s24 + $0xe8] sm:$0xff]  }
  0x21   : > { %5577 = vmatprep.mubr.msk.bf16.mxu0 %vm1102_vm0, %v5850_v11  ;;  %5705 = vmatprep.mubr.msk.bf16.mxu1 %vm1102_vm0, %v5851_v12  ;;  %v5897_v58 = vld [vmem:[%s6026_s24 + $0x2d8] sm:$0xff]   ;;  %v5899_v60 = vld [vmem:[%s6026_s24 + $0x2e0] sm:$0xff]   ;;  %v5901_v62 = vld [vmem:[%s6026_s24 + $0x2e8] sm:$0xff]  }
  0x22   : > { %v5902_v63 = vld [vmem:[%s6026_s24 + $0xf0] sm:$0xff]   ;;  %v5904_v1 = vld [vmem:[%s6026_s24 + $0xf8] sm:$0xff]   ;;  %v5906_v3 = vld [vmem:[%s6026_s24 + $0x100] sm:$0xff]  }
  0x23   : > { %v5903_v0 = vld [vmem:[%s6026_s24 + $0x2f0] sm:$0xff]   ;;  %v5905_v2 = vld [vmem:[%s6026_s24 + $0x2f8] sm:$0xff]   ;;  %v5907_v4 = vld [vmem:[%s6026_s24 + $0x300] sm:$0xff]  }
  0x24   : > { %v5908_v5 = vld [vmem:[%s6026_s24 + $0x108] sm:$0xff]   ;;  %v5910_v7 = vld [vmem:[%s6026_s24 + $0x110] sm:$0xff]   ;;  %v5912_v9 = vld [vmem:[%s6026_s24 + $0x118] sm:$0xff]  }
  0x25   : > { %v5909_v6 = vld [vmem:[%s6026_s24 + $0x308] sm:$0xff]   ;;  %v5911_v8 = vld [vmem:[%s6026_s24 + $0x310] sm:$0xff]   ;;  %v5913_v10 = vld [vmem:[%s6026_s24 + $0x318] sm:$0xff]  }
  0x26   : > { %v5914_v11 = vld [vmem:[%s6026_s24 + $0x120] sm:$0xff]  }
  0x27   : > { %v5915_v12 = vld [vmem:[%s6026_s24 + $0x320] sm:$0xff]  }
  0x28   : > { %5578 = vmatmul.mubr.msk.bf16.gmra.mxu0 %vm1102_vm0, %v5852_v13  ;;  %5706 = vmatmul.mubr.msk.bf16.gmra.mxu1 %vm1102_vm0, %v5853_v14  ;;  %v5916_v13 = vld [vmem:[%s6026_s24 + $0x128] sm:$0xff]  }
  0x29   : > { %5581 = vmatprep.mubr.msk.bf16.mxu0 %vm1102_vm0, %v5854_v15  ;;  %5709 = vmatprep.mubr.msk.bf16.mxu1 %vm1102_vm0, %v5855_v16  ;;  %v5917_v14 = vld [vmem:[%s6026_s24 + $0x328] sm:$0xff]   ;;  %v5918_v15 = vld [vmem:[%s6026_s24 + $0x130] sm:$0xff]  }
  0x2a   : > { %v5919_v16 = vld [vmem:[%s6026_s24 + $0x330] sm:$0xff]  }
  0x30   : > { %5582 = vmatmul.mubr.msk.bf16.gmra.mxu0 %vm1102_vm0, %v5856_v17  ;;  %5710 = vmatmul.mubr.msk.bf16.gmra.mxu1 %vm1102_vm0, %v5857_v18  ;;  %v5920_v17 = vld [vmem:[%s6026_s24 + $0x138] sm:$0xff]  }
  0x31   : > { %5585 = vmatprep.mubr.msk.bf16.mxu0 %vm1102_vm0, %v5858_v19  ;;  %5713 = vmatprep.mubr.msk.bf16.mxu1 %vm1102_vm0, %v5859_v20  ;;  %v5921_v18 = vld [vmem:[%s6026_s24 + $0x338] sm:$0xff]   ;;  %v5922_v19 = vld [vmem:[%s6026_s24 + $0x140] sm:$0xff]  }
  0x32   : > { %v5923_v20 = vld [vmem:[%s6026_s24 + $0x340] sm:$0xff]  }
  0x38   : > { %5586 = vmatmul.mubr.msk.bf16.gmra.mxu0 %vm1102_vm0, %v5860_v21  ;;  %5714 = vmatmul.mubr.msk.bf16.gmra.mxu1 %vm1102_vm0, %v5861_v22  ;;  %v5924_v21 = vld [vmem:[%s6026_s24 + $0x148] sm:$0xff]  }
  0x39   : > { %5589 = vmatprep.mubr.msk.bf16.mxu0 %vm1102_vm0, %v5862_v23  ;;  %5717 = vmatprep.mubr.msk.bf16.mxu1 %vm1102_vm0, %v5863_v24  ;;  %v5925_v22 = vld [vmem:[%s6026_s24 + $0x348] sm:$0xff]   ;;  %v5926_v23 = vld [vmem:[%s6026_s24 + $0x150] sm:$0xff]  }
  0x3a   : > { %v5927_v24 = vld [vmem:[%s6026_s24 + $0x350] sm:$0xff]  }
  0x40   : > { %5590 = vmatmul.mubr.msk.bf16.gmra.mxu0 %vm1102_vm0, %v5864_v25  ;;  %5718 = vmatmul.mubr.msk.bf16.gmra.mxu1 %vm1102_vm0, %v5865_v26  ;;  %v5928_v25 = vld [vmem:[%s6026_s24 + $0x158] sm:$0xff]  }
  0x41   : > { %5593 = vmatprep.mubr.msk.bf16.mxu0 %vm1102_vm0, %v5866_v27  ;;  %5721 = vmatprep.mubr.msk.bf16.mxu1 %vm1102_vm0, %v5867_v28  ;;  %v5929_v26 = vld [vmem:[%s6026_s24 + $0x358] sm:$0xff]   ;;  %v5930_v27 = vld [vmem:[%s6026_s24 + $0x160] sm:$0xff]  }
  0x42   : > { %v5931_v28 = vld [vmem:[%s6026_s24 + $0x360] sm:$0xff]  }
  0x48   : > { %5594 = vmatmul.mubr.msk.bf16.gmra.mxu0 %vm1102_vm0, %v5868_v29  ;;  %5722 = vmatmul.mubr.msk.bf16.gmra.mxu1 %vm1102_vm0, %v5869_v30  ;;  %v5932_v29 = vld [vmem:[%s6026_s24 + $0x168] sm:$0xff]  }
  0x49   : > { %5597 = vmatprep.mubr.msk.bf16.mxu0 %vm1102_vm0, %v5870_v31  ;;  %5725 = vmatprep.mubr.msk.bf16.mxu1 %vm1102_vm0, %v5871_v32  ;;  %v5933_v30 = vld [vmem:[%s6026_s24 + $0x368] sm:$0xff]   ;;  %v5934_v31 = vld [vmem:[%s6026_s24 + $0x170] sm:$0xff]  }
  0x4a   : > { %v5935_v32 = vld [vmem:[%s6026_s24 + $0x370] sm:$0xff]  }
  0x50   : > { %5598 = vmatmul.mubr.msk.bf16.gmra.mxu0 %vm1102_vm0, %v5872_v33  ;;  %5726 = vmatmul.mubr.msk.bf16.gmra.mxu1 %vm1102_vm0, %v5873_v34  ;;  %v5936_v33 = vld [vmem:[%s6026_s24 + $0x178] sm:$0xff]  }
  0x51   : > { %5601 = vmatprep.mubr.msk.bf16.mxu0 %vm1102_vm0, %v5874_v35  ;;  %5729 = vmatprep.mubr.msk.bf16.mxu1 %vm1102_vm0, %v5875_v36  ;;  %v5937_v34 = vld [vmem:[%s6026_s24 + $0x378] sm:$0xff]   ;;  %v5938_v35 = vld [vmem:[%s6026_s24 + $0x180] sm:$0xff]  }
  0x52   : > { %v5939_v36 = vld [vmem:[%s6026_s24 + $0x380] sm:$0xff]  }
  0x58   : > { %5602 = vmatmul.mubr.msk.bf16.gmra.mxu0 %vm1102_vm0, %v5876_v37  ;;  %5730 = vmatmul.mubr.msk.bf16.gmra.mxu1 %vm1102_vm0, %v5877_v38  ;;  %v5940_v37 = vld [vmem:[%s6026_s24 + $0x188] sm:$0xff]  }
  0x59   : > { %5605 = vmatprep.mubr.msk.bf16.mxu0 %vm1102_vm0, %v5878_v39  ;;  %5733 = vmatprep.mubr.msk.bf16.mxu1 %vm1102_vm0, %v5879_v40  ;;  %v5941_v38 = vld [vmem:[%s6026_s24 + $0x388] sm:$0xff]   ;;  %v5942_v39 = vld [vmem:[%s6026_s24 + $0x190] sm:$0xff]  }
  0x5a   : > { %v5943_v40 = vld [vmem:[%s6026_s24 + $0x390] sm:$0xff]  }
  0x60   : > { %5606 = vmatmul.mubr.msk.bf16.gmra.mxu0 %vm1102_vm0, %v5880_v41  ;;  %5734 = vmatmul.mubr.msk.bf16.gmra.mxu1 %vm1102_vm0, %v5881_v42  ;;  %v6231_v41 = vld [vmem:[%s7716_s2] ss:$0 sm:$0xff] }
  0x61   : > { %5609 = vmatprep.mubr.msk.bf16.mxu0 %vm1102_vm0, %v5882_v43  ;;  %5737 = vmatprep.mubr.msk.bf16.mxu1 %vm1102_vm0, %v5883_v44 }
  0x68   : > { %5610 = vmatmul.mubr.msk.bf16.gmra.mxu0 %vm1102_vm0, %v5884_v45  ;;  %5738 = vmatmul.mubr.msk.bf16.gmra.mxu1 %vm1102_vm0, %v5885_v46 }
  0x69   : > { %5613 = vmatprep.mubr.msk.bf16.mxu0 %vm1102_vm0, %v5886_v47  ;;  %5741 = vmatprep.mubr.msk.bf16.mxu1 %vm1102_vm0, %v5887_v48 }
  0x70   : > { %5614 = vmatmul.mubr.msk.bf16.gmra.mxu0 %vm1102_vm0, %v5888_v49  ;;  %5742 = vmatmul.mubr.msk.bf16.gmra.mxu1 %vm1102_vm0, %v5889_v50 }
  0x71   : > { %5617 = vmatprep.mubr.msk.bf16.mxu0 %vm1102_vm0, %v5890_v51  ;;  %5745 = vmatprep.mubr.msk.bf16.mxu1 %vm1102_vm0, %v5891_v52 }
  0x78   : > { %5618 = vmatmul.mubr.msk.bf16.gmra.mxu0 %vm1102_vm0, %v5892_v53  ;;  %5746 = vmatmul.mubr.msk.bf16.gmra.mxu1 %vm1102_vm0, %v5893_v54  ;;  %v5944_v54 = vld [vmem:[%s6026_s24 + $0x198] sm:$0xff]  }
  0x79   : > { %5621 = vmatprep.mubr.msk.bf16.mxu0 %vm1102_vm0, %v5894_v55  ;;  %5749 = vmatprep.mubr.msk.bf16.mxu1 %vm1102_vm0, %v5895_v56  ;;  %v5945_v55 = vld [vmem:[%s6026_s24 + $0x398] sm:$0xff]  }
  0x80   : > { %5622 = vmatmul.mubr.msk.bf16.gmra.mxu0 %vm1102_vm0, %v5896_v57  ;;  %5750 = vmatmul.mubr.msk.bf16.gmra.mxu1 %vm1102_vm0, %v5897_v58 }
  0x81   : > { %5625 = vmatprep.mubr.msk.bf16.mxu0 %vm1102_vm0, %v5898_v59  ;;  %5753 = vmatprep.mubr.msk.bf16.mxu1 %vm1102_vm0, %v5899_v60  ;;  %v5946_v60 = vld [vmem:[%s6026_s24 + $0x1a0] sm:$0xff]  }
  0x88   : > { %5626 = vmatmul.mubr.msk.bf16.gmra.mxu0 %vm1102_vm0, %v5900_v61  ;;  %5754 = vmatmul.mubr.msk.bf16.gmra.mxu1 %vm1102_vm0, %v5901_v62 }
  0x89   : > { %5629 = vmatprep.mubr.msk.bf16.mxu0 %vm1102_vm0, %v5902_v63  ;;  %5757 = vmatprep.mubr.msk.bf16.mxu1 %vm1102_vm0, %v5903_v0 }
  0x90   : > { %5630 = vmatmul.mubr.msk.bf16.gmra.mxu0 %vm1102_vm0, %v5904_v1  ;;  %5758 = vmatmul.mubr.msk.bf16.gmra.mxu1 %vm1102_vm0, %v5905_v2  ;;  %v5947_v2 = vld [vmem:[%s6026_s24 + $0x3a0] sm:$0xff]  }
  0x91   : > { %5633 = vmatprep.mubr.msk.bf16.mxu0 %vm1102_vm0, %v5906_v3  ;;  %5761 = vmatprep.mubr.msk.bf16.mxu1 %vm1102_vm0, %v5907_v4 }
  0x98   : > { %5634 = vmatmul.mubr.msk.bf16.gmra.mxu0 %vm1102_vm0, %v5908_v5  ;;  %5762 = vmatmul.mubr.msk.bf16.gmra.mxu1 %vm1102_vm0, %v5909_v6 }
  0x99   : > { %5637 = vmatprep.mubr.msk.bf16.mxu0 %vm1102_vm0, %v5910_v7  ;;  %5765 = vmatprep.mubr.msk.bf16.mxu1 %vm1102_vm0, %v5911_v8 }
  0xa0   : > { %5638 = vmatmul.mubr.msk.bf16.gmra.mxu0 %vm1102_vm0, %v5912_v9  ;;  %5766 = vmatmul.mubr.msk.bf16.gmra.mxu1 %vm1102_vm0, %v5913_v10 }
  0xa1   : > { %5641 = vmatprep.mubr.msk.bf16.mxu0 %vm1102_vm0, %v5914_v11  ;;  %5769 = vmatprep.mubr.msk.bf16.mxu1 %vm1102_vm0, %v5915_v12 }
  0xa8   : > { %5642 = vmatmul.mubr.msk.bf16.gmra.mxu0 %vm1102_vm0, %v5916_v13  ;;  %5770 = vmatmul.mubr.msk.bf16.gmra.mxu1 %vm1102_vm0, %v5917_v14 }
  0xa9   : > { %5645 = vmatprep.mubr.msk.bf16.mxu0 %vm1102_vm0, %v5918_v15  ;;  %5773 = vmatprep.mubr.msk.bf16.mxu1 %vm1102_vm0, %v5919_v16 }
  0xb0   : > { %5646 = vmatmul.mubr.msk.bf16.gmra.mxu0 %vm1102_vm0, %v5920_v17  ;;  %5774 = vmatmul.mubr.msk.bf16.gmra.mxu1 %vm1102_vm0, %v5921_v18 }
  0xb1   : > { %5649 = vmatprep.mubr.msk.bf16.mxu0 %vm1102_vm0, %v5922_v19  ;;  %5777 = vmatprep.mubr.msk.bf16.mxu1 %vm1102_vm0, %v5923_v20 }
  0xb8   : > { %5650 = vmatmul.mubr.msk.bf16.gmra.mxu0 %vm1102_vm0, %v5924_v21  ;;  %5778 = vmatmul.mubr.msk.bf16.gmra.mxu1 %vm1102_vm0, %v5925_v22 }
  0xb9   : > { %5653 = vmatprep.mubr.msk.bf16.mxu0 %vm1102_vm0, %v5926_v23  ;;  %5781 = vmatprep.mubr.msk.bf16.mxu1 %vm1102_vm0, %v5927_v24 }
  0xc0   : > { %5654 = vmatmul.mubr.msk.bf16.gmra.mxu0 %vm1102_vm0, %v5928_v25  ;;  %5782 = vmatmul.mubr.msk.bf16.gmra.mxu1 %vm1102_vm0, %v5929_v26 }
  0xc1   : > { %5657 = vmatprep.mubr.msk.bf16.mxu0 %vm1102_vm0, %v5930_v27  ;;  %5785 = vmatprep.mubr.msk.bf16.mxu1 %vm1102_vm0, %v5931_v28  ;;  %v5948_v28 = vld [vmem:[%s6026_s24 + $0x1a8] sm:$0xff]  }
  0xc8   : > { %5658 = vmatmul.mubr.msk.bf16.gmra.mxu0 %vm1102_vm0, %v5932_v29  ;;  %5786 = vmatmul.mubr.msk.bf16.gmra.mxu1 %vm1102_vm0, %v5933_v30  ;;  %v5949_v29 = vld [vmem:[%s6026_s24 + $0x3a8] sm:$0xff]  }
  0xc9   : > { %5661 = vmatprep.mubr.msk.bf16.mxu0 %vm1102_vm0, %v5934_v31  ;;  %5789 = vmatprep.mubr.msk.bf16.mxu1 %vm1102_vm0, %v5935_v32 }
  0xd0   : > { %5662 = vmatmul.mubr.msk.bf16.gmra.mxu0 %vm1102_vm0, %v5936_v33  ;;  %5790 = vmatmul.mubr.msk.bf16.gmra.mxu1 %vm1102_vm0, %v5937_v34  ;;  %v5950_v34 = vld [vmem:[%s6026_s24 + $0x1b0] sm:$0xff]  }
  0xd1   : > { %5665 = vmatprep.mubr.msk.bf16.mxu0 %vm1102_vm0, %v5938_v35  ;;  %5793 = vmatprep.mubr.msk.bf16.mxu1 %vm1102_vm0, %v5939_v36  ;;  %v5951_v35 = vld [vmem:[%s6026_s24 + $0x3b0] sm:$0xff]  }
  0xd8   : > { %v5571_v42 = vpop.f32.mrf.mxu0  ;;  %5666 = vmatmul.mubr.msk.bf16.gmra.mxu0 %vm1102_vm0, %v5940_v37  ;;  %v5699_v43 = vpop.f32.mrf.mxu1  ;;  %5794 = vmatmul.mubr.msk.bf16.gmra.mxu1 %vm1102_vm0, %v5941_v38 }
  0xd9   : > { %v1530_v44 = vadd.f32 %v5571_v42, %v6231_v41  ;;  %v2042_v45 = vadd.f32 %v5699_v43, %v6231_v41  ;;  %5669 = vmatprep.mubr.msk.bf16.mxu0 %vm1102_vm0, %v5942_v39  ;;  %5797 = vmatprep.mubr.msk.bf16.mxu1 %vm1102_vm0, %v5943_v40 }
  0xda   : > { %v1521_v46 = vpop.f32.mrf.mxu0  ;;  %v2033_v47 = vpop.f32.mrf.mxu1 }
  0xdb   : > { %vm2546_vm1 = vcmp.gt.f32.partialorder %v1530_v44, 0.0  ;;  %v2802_v48 = vmul.f32 0.2, %v1530_v44  ;;  %vm2674_vm2 = vcmp.gt.f32.partialorder %v2042_v45, 0.0  ;;  %v2930_v49 = vmul.f32 0.2, %v2042_v45 }
  0xdc   : > { %v1522_v50 = vadd.f32 %v6231_v41, %v1521_v46  ;;  %v2034_v51 = vadd.f32 %v6231_v41, %v2033_v47  ;;  %v5572_v52 = vpop.f32.mrf.mxu0  ;;  %v5700_v53 = vpop.f32.mrf.mxu1 }
  0xdd   : > { %v3058_v56 = vsel %vm2546_vm1, %v1530_v44, %v2802_v48  ;;  %v3186_v57 = vsel %vm2674_vm2, %v2042_v45, %v2930_v49  ;;  %v1533_v58 = vadd.f32 %v5572_v52, %v6231_v41  ;;  %v2045_v59 = vadd.f32 %v5700_v53, %v6231_v41 }
  0xde   : > { %v5178_v61 = vpack.c.bf16 %v3058_v56, %v3058_v56  ;;  %v5306_v62 = vpack.c.bf16 %v3186_v57, %v3186_v57  ;;  %vm2544_vm4 = vcmp.gt.f32.partialorder %v1522_v50, 0.0  ;;  %v2800_v63 = vmul.f32 0.2, %v1522_v50  ;;  %v1524_v0 = vpop.f32.mrf.mxu0  ;;  %v2036_v1 = vpop.f32.mrf.mxu1 }
  0xdf   : > { %vm2672_vm5 = vcmp.gt.f32.partialorder %v2034_v51, 0.0  ;;  %v2928_v3 = vmul.f32 0.2, %v2034_v51  ;;  %vm2547_vm6 = vcmp.gt.f32.partialorder %v1533_v58, 0.0  ;;  %v2803_v4 = vmul.f32 0.2, %v1533_v58 }
  0xe0   : > { %4339 = vst.msk [vmem:[%s6248_s29 + $0x8] sm:$0xf] %vm4336_vm3, %v5178_v61  ;;  %4467 = vst.msk [vmem:[%s6248_s29 + $0x208] sm:$0xf] %vm4336_vm3, %v5306_v62  ;;  %v3056_v5 = vsel %vm2544_vm4, %v1522_v50, %v2800_v63  ;;  %vm2675_vm7 = vcmp.gt.f32.partialorder %v2045_v59, 0.0  ;;  %v1525_v7 = vadd.f32 %v6231_v41, %v1524_v0  ;;  %v5575_v8 = vpop.f32.mrf.mxu0  ;;  %5670 = vmatmul.mubr.msk.bf16.gmra.mxu0 %vm1102_vm0, %v5944_v54  ;;  %v5703_v9 = vpop.f32.mrf.mxu1  ;;  %5798 = vmatmul.mubr.msk.bf16.gmra.mxu1 %vm1102_vm0, %v5945_v55 }
  0xe1   : > { %v2931_v6 = vmul.f32 0.2, %v2045_v59  ;;  %v5176_v10 = vpack.c.bf16 %v3056_v5, %v3056_v5  ;;  %v3184_v11 = vsel %vm2672_vm5, %v2034_v51, %v2928_v3  ;;  %v3059_v12 = vsel %vm2547_vm6, %v1533_v58, %v2803_v4  ;;  %5673 = vmatprep.mubr.msk.bf16.mxu0 %vm1102_vm0, %v5946_v60  ;;  %5801 = vmatprep.mubr.msk.bf16.mxu1 %vm1102_vm0, %v5947_v2  ;;  %v5952_v3 = vld [vmem:[%s6026_s24 + $0x1b8] sm:$0xff]  }
  0xe2   : > { %v2037_v13 = vadd.f32 %v6231_v41, %v2036_v1  ;;  %v5304_v14 = vpack.c.bf16 %v3184_v11, %v3184_v11  ;;  %v5179_v15 = vpack.c.bf16 %v3059_v12, %v3059_v12  ;;  %vm2545_vm8 = vcmp.gt.f32.partialorder %v1525_v7, 0.0  ;;  %v1537_v17 = vpop.f32.mrf.mxu0  ;;  %v2049_v18 = vpop.f32.mrf.mxu1  ;;  %v5953_v4 = vld [vmem:[%s6026_s24 + $0x3b8] sm:$0xff]  }
  0xe3   : > { %v3187_v16 = vsel %vm2675_vm7, %v2045_v59, %v2931_v6  ;;  %4337 = vst.msk [vmem:[%s6248_s29] sm:$0xf] %vm4336_vm3, %v5176_v10  ;;  %v2801_v20 = vmul.f32 0.2, %v1525_v7  ;;  %v1546_v22 = vadd.f32 %v5575_v8, %v6231_v41  ;;  %v2058_v23 = vadd.f32 %v5703_v9, %v6231_v41  ;;  %v5954_v8 = vld [vmem:[%s6026_s24 + $0x1c0] sm:$0xff]  }
  0xe4   : > { %v5307_v19 = vpack.c.bf16 %v3187_v16, %v3187_v16  ;;  %vm2673_vm9 = vcmp.gt.f32.partialorder %v2037_v13, 0.0  ;;  %v2929_v21 = vmul.f32 0.2, %v2037_v13  ;;  %4465 = vst.msk [vmem:[%s6248_s29 + $0x200] sm:$0xf] %vm4336_vm3, %v5304_v14  ;;  %v1538_v24 = vadd.f32 %v6231_v41, %v1537_v17  ;;  %v5576_v26 = vpop.f32.mrf.mxu0  ;;  %v5704_v27 = vpop.f32.mrf.mxu1 }
  0xe5   : > { %4340 = vst.msk [vmem:[%s6248_s29 + $0xc] sm:$0xf] %vm4336_vm3, %v5179_v15  ;;  %v2050_v25 = vadd.f32 %v6231_v41, %v2049_v18  ;;  %v3057_v30 = vsel %vm2545_vm8, %v1525_v7, %v2801_v20  ;;  %v1549_v32 = vadd.f32 %v5576_v26, %v6231_v41  ;;  %v2061_v33 = vadd.f32 %v5704_v27, %v6231_v41 }
  0xe6   : > { %4468 = vst.msk [vmem:[%s6248_s29 + $0x20c] sm:$0xf] %vm4336_vm3, %v5307_v19  ;;  %v3185_v31 = vsel %vm2673_vm9, %v2037_v13, %v2929_v21  ;;  %v5177_v36 = vpack.c.bf16 %v3057_v30, %v3057_v30  ;;  %vm2550_vm10 = vcmp.gt.f32.partialorder %v1546_v22, 0.0  ;;  %v2806_v38 = vmul.f32 0.2, %v1546_v22  ;;  %v1540_v39 = vpop.f32.mrf.mxu0  ;;  %v2052_v40 = vpop.f32.mrf.mxu1  ;;  %v5955_v13 = vld [vmem:[%s6026_s24 + $0x3c0] sm:$0xff]  }
  0xe7   : > { %v5305_v37 = vpack.c.bf16 %v3185_v31, %v3185_v31  ;;  %vm2678_vm11 = vcmp.gt.f32.partialorder %v2058_v23, 0.0  ;;  %v2934_v42 = vmul.f32 0.2, %v2058_v23  ;;  %vm2548_vm12 = vcmp.gt.f32.partialorder %v1538_v24, 0.0 }
  0xe8   : > { %v2804_v43 = vmul.f32 0.2, %v1538_v24  ;;  %4338 = vst.msk [vmem:[%s6248_s29 + $0x4] sm:$0xf] %vm4336_vm3, %v5177_v36  ;;  %v3062_v44 = vsel %vm2550_vm10, %v1546_v22, %v2806_v38  ;;  %vm2676_vm13 = vcmp.gt.f32.partialorder %v2050_v25, 0.0  ;;  %vm2551_vm14 = vcmp.gt.f32.partialorder %v1549_v32, 0.0  ;;  %v5579_v46 = vpop.f32.mrf.mxu0  ;;  %5674 = vmatmul.mubr.msk.bf16.gmra.mxu0 %vm1102_vm0, %v5948_v28  ;;  %v5707_v47 = vpop.f32.mrf.mxu1  ;;  %5802 = vmatmul.mubr.msk.bf16.gmra.mxu1 %vm1102_vm0, %v5949_v29 }
  0xe9   : > { %4466 = vst.msk [vmem:[%s6248_s29 + $0x204] sm:$0xf] %vm4336_vm3, %v5305_v37  ;;  %v2932_v45 = vmul.f32 0.2, %v2050_v25  ;;  %v5182_v48 = vpack.c.bf16 %v3062_v44, %v3062_v44  ;;  %v3190_v49 = vsel %vm2678_vm11, %v2058_v23, %v2934_v42  ;;  %v2807_v51 = vmul.f32 0.2, %v1549_v32  ;;  %5677 = vmatprep.mubr.msk.bf16.mxu0 %vm1102_vm0, %v5950_v34  ;;  %5805 = vmatprep.mubr.msk.bf16.mxu1 %vm1102_vm0, %v5951_v35 }
  0xea   : > { %v3060_v50 = vsel %vm2548_vm12, %v1538_v24, %v2804_v43  ;;  %v5310_v52 = vpack.c.bf16 %v3190_v49, %v3190_v49  ;;  %vm2679_vm15 = vcmp.gt.f32.partialorder %v2061_v33, 0.0  ;;  %v1553_v55 = vpop.f32.mrf.mxu0  ;;  %v2065_v56 = vpop.f32.mrf.mxu1  ;;  %v2935_v59 = vmul.f32 0.2, %v2061_v33  ;;  %v5957_v42 = vld [vmem:[%s6026_s24 + $0x3c8] sm:$0xff]  }
  0xeb   : > { %v5180_v53 = vpack.c.bf16 %v3060_v50, %v3060_v50  ;;  %v3188_v54 = vsel %vm2676_vm13, %v2050_v25, %v2932_v45  ;;  %4343 = vst.msk [vmem:[%s6248_s29 + $0x18] sm:$0xf] %vm4336_vm3, %v5182_v48  ;;  %v3063_v58 = vsel %vm2551_vm14, %v1549_v32, %v2807_v51  ;;  %v1541_v60 = vadd.f32 %v6231_v41, %v1540_v39 }
  0xec   : > { %v5308_v57 = vpack.c.bf16 %v3188_v54, %v3188_v54  ;;  %4471 = vst.msk [vmem:[%s6248_s29 + $0x218] sm:$0xf] %vm4336_vm3, %v5310_v52  ;;  %v5183_v61 = vpack.c.bf16 %v3063_v58, %v3063_v58  ;;  %v2053_v62 = vadd.f32 %v6231_v41, %v2052_v40  ;;  %v1562_v63 = vadd.f32 %v5579_v46, %v6231_v41  ;;  %v5580_v1 = vpop.f32.mrf.mxu0  ;;  %v5708_v2 = vpop.f32.mrf.mxu1  ;;  %v5956_v40 = vld [vmem:[%s6026_s24 + $0x1c8] sm:$0xff]   ;;  %v5958_v46 = vld [vmem:[%s6026_s24 + $0x1d0] sm:$0xff]  }
  0xed   : > { %4341 = vst.msk [vmem:[%s6248_s29 + $0x10] sm:$0xf] %vm4336_vm3, %v5180_v53  ;;  %v2074_v0 = vadd.f32 %v5707_v47, %v6231_v41  ;;  %v3191_v5 = vsel %vm2679_vm15, %v2061_v33, %v2935_v59  ;;  %vm2549_vm1 = vcmp.gt.f32.partialorder %v1541_v60, 0.0  ;;  %v2805_v6 = vmul.f32 0.2, %v1541_v60  ;;  %v5959_v52 = vld [vmem:[%s6026_s24 + $0x3d0] sm:$0xff]  }
  0xee   : > { %4469 = vst.msk [vmem:[%s6248_s29 + $0x210] sm:$0xf] %vm4336_vm3, %v5308_v57  ;;  %v1554_v7 = vadd.f32 %v6231_v41, %v1553_v55  ;;  %4344 = vst.msk [vmem:[%s6248_s29 + $0x1c] sm:$0xf] %vm4336_vm3, %v5183_v61  ;;  %v5311_v9 = vpack.c.bf16 %v3191_v5, %v3191_v5  ;;  %vm2677_vm2 = vcmp.gt.f32.partialorder %v2053_v62, 0.0  ;;  %vm2554_vm4 = vcmp.gt.f32.partialorder %v1562_v63, 0.0  ;;  %v1556_v11 = vpop.f32.mrf.mxu0  ;;  %v2068_v12 = vpop.f32.mrf.mxu1 }
  0xef   : > { %v2933_v10 = vmul.f32 0.2, %v2053_v62  ;;  %v3061_v14 = vsel %vm2549_vm1, %v1541_v60, %v2805_v6  ;;  %v2810_v15 = vmul.f32 0.2, %v1562_v63  ;;  %vm2682_vm5 = vcmp.gt.f32.partialorder %v2074_v0, 0.0 }
  0xf0   : > { %v2938_v16 = vmul.f32 0.2, %v2074_v0  ;;  %4472 = vst.msk [vmem:[%s6248_s29 + $0x21c] sm:$0xf] %vm4336_vm3, %v5311_v9  ;;  %v5181_v17 = vpack.c.bf16 %v3061_v14, %v3061_v14  ;;  %vm2552_vm6 = vcmp.gt.f32.partialorder %v1554_v7, 0.0  ;;  %v5583_v20 = vpop.f32.mrf.mxu0  ;;  %5678 = vmatmul.mubr.msk.bf16.gmra.mxu0 %vm1102_vm0, %v5952_v3  ;;  %v5711_v21 = vpop.f32.mrf.mxu1  ;;  %5806 = vmatmul.mubr.msk.bf16.gmra.mxu1 %vm1102_vm0, %v5953_v4  ;;  %v2066_v25 = vadd.f32 %v6231_v41, %v2065_v56  ;;  %v5960_v9 = vld [vmem:[%s6026_s24 + $0x1d8] sm:$0xff]  }
  0xf1   : > { %v3189_v18 = vsel %vm2677_vm2, %v2053_v62, %v2933_v10  ;;  %v2808_v19 = vmul.f32 0.2, %v1554_v7  ;;  %v3066_v23 = vsel %vm2554_vm4, %v1562_v63, %v2810_v15  ;;  %5681 = vmatprep.mubr.msk.bf16.mxu0 %vm1102_vm0, %v5954_v8  ;;  %v1565_v29 = vadd.f32 %v5580_v1, %v6231_v41  ;;  %5809 = vmatprep.mubr.msk.bf16.mxu1 %vm1102_vm0, %v5955_v13  ;;  %v5961_v10 = vld [vmem:[%s6026_s24 + $0x3d8] sm:$0xff]  }
  0xf2   : > { %v5309_v22 = vpack.c.bf16 %v3189_v18, %v3189_v18  ;;  %v3194_v24 = vsel %vm2682_vm5, %v2074_v0, %v2938_v16  ;;  %4342 = vst.msk [vmem:[%s6248_s29 + $0x14] sm:$0xf] %vm4336_vm3, %v5181_v17  ;;  %v5186_v26 = vpack.c.bf16 %v3066_v23, %v3066_v23  ;;  %v1569_v30 = vpop.f32.mrf.mxu0  ;;  %v2081_v31 = vpop.f32.mrf.mxu1  ;;  %vm2680_vm7 = vcmp.gt.f32.partialorder %v2066_v25, 0.0 }
  0xf3   : > { %v5314_v27 = vpack.c.bf16 %v3194_v24, %v3194_v24  ;;  %v3064_v28 = vsel %vm2552_vm6, %v1554_v7, %v2808_v19  ;;  %v2936_v33 = vmul.f32 0.2, %v2066_v25  ;;  %v2077_v34 = vadd.f32 %v5708_v2, %v6231_v41  ;;  %v5962_v19 = vld [vmem:[%s6026_s24 + $0x1e0] sm:$0xff]  }
  0xf4   : > { %4470 = vst.msk [vmem:[%s6248_s29 + $0x214] sm:$0xf] %vm4336_vm3, %v5309_v22  ;;  %v5184_v32 = vpack.c.bf16 %v3064_v28, %v3064_v28  ;;  %4347 = vst.msk [vmem:[%s6248_s29 + $0x28] sm:$0xf] %vm4336_vm3, %v5186_v26  ;;  %vm2555_vm8 = vcmp.gt.f32.partialorder %v1565_v29, 0.0  ;;  %v1557_v36 = vadd.f32 %v6231_v41, %v1556_v11  ;;  %v2069_v37 = vadd.f32 %v6231_v41, %v2068_v12  ;;  %v5584_v38 = vpop.f32.mrf.mxu0  ;;  %v5712_v39 = vpop.f32.mrf.mxu1 }
  0xf5   : > { %4475 = vst.msk [vmem:[%s6248_s29 + $0x228] sm:$0xf] %vm4336_vm3, %v5314_v27  ;;  %v2811_v35 = vmul.f32 0.2, %v1565_v29  ;;  %v3192_v43 = vsel %vm2680_vm7, %v2066_v25, %v2936_v33  ;;  %vm2683_vm9 = vcmp.gt.f32.partialorder %v2077_v34, 0.0  ;;  %v1578_v45 = vadd.f32 %v5583_v20, %v6231_v41  ;;  %v5963_v20 = vld [vmem:[%s6026_s24 + $0x3e0] sm:$0xff]  }
  0xf6   : > { %4345 = vst.msk [vmem:[%s6248_s29 + $0x20] sm:$0xf] %vm4336_vm3, %v5184_v32  ;;  %v2939_v44 = vmul.f32 0.2, %v2077_v34  ;;  %v5312_v47 = vpack.c.bf16 %v3192_v43, %v3192_v43  ;;  %vm2553_vm10 = vcmp.gt.f32.partialorder %v1557_v36, 0.0  ;;  %v1572_v50 = vpop.f32.mrf.mxu0  ;;  %v2084_v51 = vpop.f32.mrf.mxu1  ;;  %vm2681_vm11 = vcmp.gt.f32.partialorder %v2069_v37, 0.0 }
  0xf7   : > { %v3067_v48 = vsel %vm2555_vm8, %v1565_v29, %v2811_v35  ;;  %v2809_v49 = vmul.f32 0.2, %v1557_v36  ;;  %v2937_v55 = vmul.f32 0.2, %v2069_v37  ;;  %vm2558_vm12 = vcmp.gt.f32.partialorder %v1578_v45, 0.0 }
  0xf8   : > { %v5187_v53 = vpack.c.bf16 %v3067_v48, %v3067_v48  ;;  %v3195_v54 = vsel %vm2683_vm9, %v2077_v34, %v2939_v44  ;;  %4473 = vst.msk [vmem:[%s6248_s29 + $0x220] sm:$0xf] %vm4336_vm3, %v5312_v47  ;;  %v2814_v58 = vmul.f32 0.2, %v1578_v45  ;;  %v5587_v59 = vpop.f32.mrf.mxu0  ;;  %5682 = vmatmul.mubr.msk.bf16.gmra.mxu0 %vm1102_vm0, %v5956_v40  ;;  %v5715_v60 = vpop.f32.mrf.mxu1  ;;  %5810 = vmatmul.mubr.msk.bf16.gmra.mxu1 %vm1102_vm0, %v5957_v42  ;;  %v5964_v48 = vld [vmem:[%s6026_s24 + $0x1e8] sm:$0xff]  }
  0xf9   : > { %v5315_v56 = vpack.c.bf16 %v3195_v54, %v3195_v54  ;;  %v3065_v57 = vsel %vm2553_vm10, %v1557_v36, %v2809_v49  ;;  %v3193_v62 = vsel %vm2681_vm11, %v2069_v37, %v2937_v55  ;;  %v2090_v63 = vadd.f32 %v5711_v21, %v6231_v41  ;;  %5685 = vmatprep.mubr.msk.bf16.mxu0 %vm1102_vm0, %v5958_v46  ;;  %v5965_v49 = vld [vmem:[%s6026_s24 + $0x3e8] sm:$0xff]  }
  0xfa   : > { %4348 = vst.msk [vmem:[%s6248_s29 + $0x2c] sm:$0xf] %vm4336_vm3, %v5187_v53  ;;  %v5185_v61 = vpack.c.bf16 %v3065_v57, %v3065_v57  ;;  %v1570_v0 = vadd.f32 %v6231_v41, %v1569_v30  ;;  %v5313_v1 = vpack.c.bf16 %v3193_v62, %v3193_v62  ;;  %v3070_v2 = vsel %vm2558_vm12, %v1578_v45, %v2814_v58  ;;  %v1585_v5 = vpop.f32.mrf.mxu0  ;;  %v2097_v6 = vpop.f32.mrf.mxu1 }
  0xfb   : > { %4476 = vst.msk [vmem:[%s6248_s29 + $0x22c] sm:$0xf] %vm4336_vm3, %v5315_v56  ;;  %v2082_v3 = vadd.f32 %v6231_v41, %v2081_v31  ;;  %v1581_v4 = vadd.f32 %v5584_v38, %v6231_v41  ;;  %5813 = vmatprep.mubr.msk.bf16.mxu1 %vm1102_vm0, %v5959_v52  ;;  %v5190_v7 = vpack.c.bf16 %v3070_v2, %v3070_v2  ;;  %vm2686_vm13 = vcmp.gt.f32.partialorder %v2090_v63, 0.0  ;;  %v5967_v56 = vld [vmem:[%s6026_s24 + $0x3f0] sm:$0xff]  }
  0xfc   : > { %4346 = vst.msk [vmem:[%s6248_s29 + $0x24] sm:$0xf] %vm4336_vm3, %v5185_v61  ;;  %v2942_v8 = vmul.f32 0.2, %v2090_v63  ;;  %vm2556_vm14 = vcmp.gt.f32.partialorder %v1570_v0, 0.0  ;;  %v6359_v13 = vpop.f32.mrf.mxu0  ;;  %v6361_v14 = vpop.f32.mrf.mxu1  ;;  %v2093_v17 = vadd.f32 %v5712_v39, %v6231_v41  ;;  %v1573_v18 = vadd.f32 %v6231_v41, %v1572_v50  ;;  %v5966_v50 = vld [vmem:[%s6026_s24 + $0x1f0] sm:$0xff]  }
  0xfd   : > { %4474 = vst.msk [vmem:[%s6248_s29 + $0x224] sm:$0xf] %vm4336_vm3, %v5313_v1  ;;  %v2812_v11 = vmul.f32 0.2, %v1570_v0  ;;  %vm2684_vm15 = vcmp.gt.f32.partialorder %v2082_v3, 0.0  ;;  %vm2559_vm1 = vcmp.gt.f32.partialorder %v1581_v4, 0.0  ;;  %v2085_v24 = vadd.f32 %v6231_v41, %v2084_v51 }
  0xfe   : > { %v2940_v12 = vmul.f32 0.2, %v2082_v3  ;;  %4351 = vst.msk [vmem:[%s6248_s29 + $0x38] sm:$0xf] %vm4336_vm3, %v5190_v7  ;;  %v3198_v15 = vsel %vm2686_vm13, %v2090_v63, %v2942_v8  ;;  %v2815_v16 = vmul.f32 0.2, %v1581_v4  ;;  %v6371_v25 = vpop.f32.mrf.mxu0  ;;  %v6373_v26 = vpop.f32.mrf.mxu1  ;;  %v1594_v36 = vadd.f32 %v5587_v59, %v6231_v41 }
  0xff   : > { %v5318_v21 = vpack.c.bf16 %v3198_v15, %v3198_v15  ;;  %v3068_v22 = vsel %vm2556_vm14, %v1570_v0, %v2812_v11  ;;  %vm2687_vm2 = vcmp.gt.f32.partialorder %v2093_v17, 0.0  ;;  %v2943_v31 = vmul.f32 0.2, %v2093_v17 }
 0x100   : > { %v3196_v23 = vsel %vm2684_vm15, %v2082_v3, %v2940_v12  ;;  %v5188_v27 = vpack.c.bf16 %v3068_v22, %v3068_v22  ;;  %v3071_v29 = vsel %vm2559_vm1, %v1581_v4, %v2815_v16  ;;  %vm2557_vm4 = vcmp.gt.f32.partialorder %v1573_v18, 0.0  ;;  %v6378_v33 = vpop.f32.mrf.mxu0  ;;  %5686 = vmatmul.mubr.msk.bf16.gmra.mxu0 %vm1102_vm0, %v5960_v9  ;;  %v6381_v34 = vpop.f32.mrf.mxu1  ;;  %5814 = vmatmul.mubr.msk.bf16.gmra.mxu1 %vm1102_vm0, %v5961_v10 }
 0x101   : > { %v5316_v28 = vpack.c.bf16 %v3196_v23, %v3196_v23  ;;  %4479 = vst.msk [vmem:[%s6248_s29 + $0x238] sm:$0xf] %vm4336_vm3, %v5318_v21  ;;  %v5191_v30 = vpack.c.bf16 %v3071_v29, %v3071_v29  ;;  %v2813_v32 = vmul.f32 0.2, %v1573_v18  ;;  %vm2685_vm5 = vcmp.gt.f32.partialorder %v2085_v24, 0.0  ;;  %5689 = vmatprep.mubr.msk.bf16.mxu0 %vm1102_vm0, %v5962_v19  ;;  %5817 = vmatprep.mubr.msk.bf16.mxu1 %vm1102_vm0, %v5963_v20 }
 0x102   : > { %4349 = vst.msk [vmem:[%s6248_s29 + $0x30] sm:$0xf] %vm4336_vm3, %v5188_v27  ;;  %v2941_v35 = vmul.f32 0.2, %v2085_v24  ;;  %v2106_v37 = vadd.f32 %v5715_v60, %v6231_v41  ;;  %v3199_v38 = vsel %vm2687_vm2, %v2093_v17, %v2943_v31  ;;  %v1586_v40 = vadd.f32 %v6231_v41, %v1585_v5  ;;  %v1601_v43 = vpop.f32.mrf.mxu0  ;;  %v6398_v44 = vpop.f32.mrf.mxu1 }
 0x103   : > { %4477 = vst.msk [vmem:[%s6248_s29 + $0x230] sm:$0xf] %vm4336_vm3, %v5316_v28  ;;  %4352 = vst.msk [vmem:[%s6248_s29 + $0x3c] sm:$0xf] %vm4336_vm3, %v5191_v30  ;;  %v3069_v39 = vsel %vm2557_vm4, %v1573_v18, %v2813_v32  ;;  %v2098_v42 = vadd.f32 %v6231_v41, %v2097_v6  ;;  %v5319_v45 = vpack.c.bf16 %v3199_v38, %v3199_v38  ;;  %vm2562_vm6 = vcmp.gt.f32.partialorder %v1594_v36, 0.0  ;;  %v5969_v30 = vld [vmem:[%s6026_s24 + $0x3f8] sm:$0xff]  }
 0x104   : > { %v5189_v46 = vpack.c.bf16 %v3069_v39, %v3069_v39  ;;  %v3197_v47 = vsel %vm2685_vm5, %v2085_v24, %v2941_v35  ;;  %v2818_v52 = vmul.f32 0.2, %v1594_v36  ;;  %vm2690_vm7 = vcmp.gt.f32.partialorder %v2106_v37, 0.0  ;;  %v6403_v54 = vpop.f32.mrf.mxu0  ;;  %v6405_v55 = vpop.f32.mrf.mxu1 }
 0x105   : > { %v5317_v51 = vpack.c.bf16 %v3197_v47, %v3197_v47  ;;  %v2946_v53 = vmul.f32 0.2, %v2106_v37  ;;  %4480 = vst.msk [vmem:[%s6248_s29 + $0x23c] sm:$0xf] %vm4336_vm3, %v5319_v45  ;;  %vm2560_vm8 = vcmp.gt.f32.partialorder %v1586_v40, 0.0  ;;  %vm2688_vm9 = vcmp.gt.f32.partialorder %v2098_v42, 0.0 }
 0x106   : > { %4350 = vst.msk [vmem:[%s6248_s29 + $0x34] sm:$0xf] %vm4336_vm3, %v5189_v46  ;;  %v2816_v57 = vmul.f32 0.2, %v1586_v40  ;;  %v2944_v58 = vmul.f32 0.2, %v2098_v42  ;;  %v3074_v59 = vsel %vm2562_vm6, %v1594_v36, %v2818_v52  ;;  %v1597_v61 = vadd.f32 %v6359_v13, %v6231_v41  ;;  %v6419_v63 = vpop.f32.mrf.mxu0  ;;  %v6421_v0 = vpop.f32.mrf.mxu1 }
 0x107   : > { %4478 = vst.msk [vmem:[%s6248_s29 + $0x234] sm:$0xf] %vm4336_vm3, %v5317_v51  ;;  %v3202_v60 = vsel %vm2690_vm7, %v2106_v37, %v2946_v53  ;;  %v2109_v62 = vadd.f32 %v6361_v14, %v6231_v41  ;;  %v5194_v1 = vpack.c.bf16 %v3074_v59, %v3074_v59  ;;  %v1589_v11 = vadd.f32 %v6231_v41, %v6371_v25 }
 0x108   : > { %v5322_v2 = vpack.c.bf16 %v3202_v60, %v3202_v60  ;;  %v3072_v3 = vsel %vm2560_vm8, %v1586_v40, %v2816_v57  ;;  %v3200_v4 = vsel %vm2688_vm9, %v2098_v42, %v2944_v58  ;;  %vm2563_vm10 = vcmp.gt.f32.partialorder %v1597_v61, 0.0  ;;  %v6423_v8 = vpop.f32.mrf.mxu0  ;;  %5690 = vmatmul.mubr.msk.bf16.gmra.mxu0 %vm1102_vm0, %v5964_v48  ;;  %v6426_v9 = vpop.f32.mrf.mxu1  ;;  %5818 = vmatmul.mubr.msk.bf16.gmra.mxu1 %vm1102_vm0, %v5965_v49 }
 0x109   : > { %v5192_v5 = vpack.c.bf16 %v3072_v3, %v3072_v3  ;;  %v5320_v6 = vpack.c.bf16 %v3200_v4, %v3200_v4  ;;  %v2819_v7 = vmul.f32 0.2, %v1597_v61  ;;  %4355 = vst.msk [vmem:[%s6248_s29 + $0x48] sm:$0xf] %vm4336_vm3, %v5194_v1  ;;  %vm2691_vm11 = vcmp.gt.f32.partialorder %v2109_v62, 0.0  ;;  %5693 = vmatprep.mubr.msk.bf16.mxu0 %vm1102_vm0, %v5966_v50  ;;  %5821 = vmatprep.mubr.msk.bf16.mxu1 %vm1102_vm0, %v5967_v56 }
 0x10a   : > { %4483 = vst.msk [vmem:[%s6248_s29 + $0x248] sm:$0xf] %vm4336_vm3, %v5322_v2  ;;  %v2947_v10 = vmul.f32 0.2, %v2109_v62  ;;  %v2101_v12 = vadd.f32 %v6231_v41, %v6373_v26  ;;  %v1610_v14 = vadd.f32 %v6378_v33, %v6231_v41  ;;  %v2122_v15 = vadd.f32 %v6381_v34, %v6231_v41  ;;  %v6449_v17 = vpop.f32.mrf.mxu0  ;;  %v6451_v18 = vpop.f32.mrf.mxu1  ;;  %v5968_v26 = vld [vmem:[%s6026_s24 + $0x1f8] sm:$0xff]  }
 0x10b   : > { %4353 = vst.msk [vmem:[%s6248_s29 + $0x40] sm:$0xf] %vm4336_vm3, %v5192_v5  ;;  %4481 = vst.msk [vmem:[%s6248_s29 + $0x240] sm:$0xf] %vm4336_vm3, %v5320_v6  ;;  %v3075_v13 = vsel %vm2563_vm10, %v1597_v61, %v2819_v7  ;;  %v1602_v16 = vadd.f32 %v6231_v41, %v1601_v43  ;;  %vm2561_vm12 = vcmp.gt.f32.partialorder %v1589_v11, 0.0  ;;  %v2114_v39 = vadd.f32 %v6231_v41, %v6398_v44 }
 0x10c   : > { %v5195_v19 = vpack.c.bf16 %v3075_v13, %v3075_v13  ;;  %v3203_v20 = vsel %vm2691_vm11, %v2109_v62, %v2947_v10  ;;  %v2817_v21 = vmul.f32 0.2, %v1589_v11  ;;  %vm2689_vm13 = vcmp.gt.f32.partialorder %v2101_v12, 0.0  ;;  %v6453_v24 = vpop.f32.mrf.mxu0  ;;  %v6455_v25 = vpop.f32.mrf.mxu1 }
 0x10d   : > { %v5323_v22 = vpack.c.bf16 %v3203_v20, %v3203_v20  ;;  %v2945_v23 = vmul.f32 0.2, %v2101_v12  ;;  %vm2566_vm14 = vcmp.gt.f32.partialorder %v1610_v14, 0.0  ;;  %v2822_v28 = vmul.f32 0.2, %v1610_v14 }
 0x10e   : > { %4356 = vst.msk [vmem:[%s6248_s29 + $0x4c] sm:$0xf] %vm4336_vm3, %v5195_v19  ;;  %v3073_v27 = vsel %vm2561_vm12, %v1589_v11, %v2817_v21  ;;  %vm2694_vm15 = vcmp.gt.f32.partialorder %v2122_v15, 0.0  ;;  %v2950_v29 = vmul.f32 0.2, %v2122_v15  ;;  %vm2564_vm1 = vcmp.gt.f32.partialorder %v1602_v16, 0.0  ;;  %v6463_v34 = vpop.f32.mrf.mxu0  ;;  %v6465_v35 = vpop.f32.mrf.mxu1 }
 0x10f   : > { %4484 = vst.msk [vmem:[%s6248_s29 + $0x24c] sm:$0xf] %vm4336_vm3, %v5323_v22  ;;  %v5193_v31 = vpack.c.bf16 %v3073_v27, %v3073_v27  ;;  %v3201_v32 = vsel %vm2689_vm13, %v2101_v12, %v2945_v23  ;;  %v2820_v33 = vmul.f32 0.2, %v1602_v16  ;;  %v3078_v37 = vsel %vm2566_vm14, %v1610_v14, %v2822_v28 }
 0x110   : > { %v5321_v36 = vpack.c.bf16 %v3201_v32, %v3201_v32  ;;  %v3206_v38 = vsel %vm2694_vm15, %v2122_v15, %v2950_v29  ;;  %v5198_v40 = vpack.c.bf16 %v3078_v37, %v3078_v37  ;;  %v1613_v45 = vadd.f32 %v6403_v54, %v6231_v41  ;;  %v6474_v46 = vpop.f32.mrf.mxu0  ;;  %5694 = vmatmul.mubr.msk.bf16.gmra.mxu0 %vm1102_vm0, %v5968_v26  ;;  %v6477_v47 = vpop.f32.mrf.mxu1 }
 0x111   : > { %4354 = vst.msk [vmem:[%s6248_s29 + $0x44] sm:$0xf] %vm4336_vm3, %v5193_v31  ;;  %v5326_v42 = vpack.c.bf16 %v3206_v38, %v3206_v38  ;;  %v3076_v43 = vsel %vm2564_vm1, %v1602_v16, %v2820_v33  ;;  %vm2692_vm2 = vcmp.gt.f32.partialorder %v2114_v39, 0.0  ;;  %v2948_v44 = vmul.f32 0.2, %v2114_v39  ;;  %5822 = vmatmul.mubr.msk.bf16.gmra.mxu1 %vm1102_vm0, %v5969_v30 }
 0x112   : > { %4482 = vst.msk [vmem:[%s6248_s29 + $0x244] sm:$0xf] %vm4336_vm3, %v5321_v36  ;;  %v5196_v48 = vpack.c.bf16 %v3076_v43, %v3076_v43  ;;  %v2125_v49 = vadd.f32 %v6405_v55, %v6231_v41  ;;  %4359 = vst.msk [vmem:[%s6248_s29 + $0x58] sm:$0xf] %vm4336_vm3, %v5198_v40  ;;  %vm2567_vm4 = vcmp.gt.f32.partialorder %v1613_v45, 0.0  ;;  %v1605_v51 = vadd.f32 %v6231_v41, %v6419_v63  ;;  %v6492_v53 = vpop.f32.mrf.mxu0  ;;  %v6494_v54 = vpop.f32.mrf.mxu1 }
 0x113   : > { %4487 = vst.msk [vmem:[%s6248_s29 + $0x258] sm:$0xf] %vm4336_vm3, %v5326_v42  ;;  %v2823_v50 = vmul.f32 0.2, %v1613_v45  ;;  %v2117_v52 = vadd.f32 %v6231_v41, %v6421_v0  ;;  %v3204_v55 = vsel %vm2692_vm2, %v2114_v39, %v2948_v44  ;;  %v1626_v57 = vadd.f32 %v6423_v8, %v6231_v41 }
 0x114   : > { %4357 = vst.msk [vmem:[%s6248_s29 + $0x50] sm:$0xf] %vm4336_vm3, %v5196_v48  ;;  %vm2695_vm0 = vcmp.gt.f32.partialorder %v2125_v49, 0.0  ;;  %v2951_v56 = vmul.f32 0.2, %v2125_v49  ;;  %v5324_v58 = vpack.c.bf16 %v3204_v55, %v3204_v55  ;;  %vm2565_vm5 = vcmp.gt.f32.partialorder %v1605_v51, 0.0  ;;  %v6500_v61 = vpop.f32.mrf.mxu0  ;;  %v6502_v62 = vpop.f32.mrf.mxu1 }
 0x115   : > { %v3079_v59 = vsel %vm2567_vm4, %v1613_v45, %v2823_v50  ;;  %v2821_v60 = vmul.f32 0.2, %v1605_v51  ;;  %vm2693_vm6 = vcmp.gt.f32.partialorder %v2117_v52, 0.0  ;;  %v2949_v1 = vmul.f32 0.2, %v2117_v52 }
 0x116   : > { %v5199_v63 = vpack.c.bf16 %v3079_v59, %v3079_v59  ;;  %v3207_v0 = vsel %vm2695_vm0, %v2125_v49, %v2951_v56  ;;  %4485 = vst.msk [vmem:[%s6248_s29 + $0x250] sm:$0xf] %vm4336_vm3, %v5324_v58  ;;  %vm2570_vm7 = vcmp.gt.f32.partialorder %v1626_v57, 0.0  ;;  %v2826_v4 = vmul.f32 0.2, %v1626_v57  ;;  %v6506_v5 = vpop.f32.mrf.mxu0  ;;  %v6508_v6 = vpop.f32.mrf.mxu1 }
 0x117   : > { %v5327_v2 = vpack.c.bf16 %v3207_v0, %v3207_v0  ;;  %v3077_v3 = vsel %vm2565_vm5, %v1605_v51, %v2821_v60  ;;  %v3205_v8 = vsel %vm2693_vm6, %v2117_v52, %v2949_v1  ;;  %v2138_v10 = vadd.f32 %v6426_v9, %v6231_v41 }
 0x118   : > { %4360 = vst.msk [vmem:[%s6248_s29 + $0x5c] sm:$0xf] %vm4336_vm3, %v5199_v63  ;;  %v5197_v7 = vpack.c.bf16 %v3077_v3, %v3077_v3  ;;  %v1618_v11 = vadd.f32 %v6231_v41, %v6449_v17  ;;  %v5325_v12 = vpack.c.bf16 %v3205_v8, %v3205_v8  ;;  %v3082_v13 = vsel %vm2570_vm7, %v1626_v57, %v2826_v4  ;;  %v6522_v16 = vpop.f32.mrf.mxu0  ;;  %v6524_v19 = vpop.f32.mrf.mxu1 }
 0x119   : > { %4488 = vst.msk [vmem:[%s6248_s29 + $0x25c] sm:$0xf] %vm4336_vm3, %v5327_v2  ;;  %v2130_v14 = vadd.f32 %v6231_v41, %v6451_v18  ;;  %v1629_v15 = vadd.f32 %v6453_v24, %v6231_v41  ;;  %v5202_v9 = vpack.c.bf16 %v3082_v13, %v3082_v13  ;;  %vm2698_vm8 = vcmp.gt.f32.partialorder %v2138_v10, 0.0 }
 0x11a   : > { %4358 = vst.msk [vmem:[%s6248_s29 + $0x54] sm:$0xf] %vm4336_vm3, %v5197_v7  ;;  %v2954_v17 = vmul.f32 0.2, %v2138_v10  ;;  %vm2568_vm9 = vcmp.gt.f32.partialorder %v1618_v11, 0.0  ;;  %v6530_v18 = vpop.f32.mrf.mxu0  ;;  %v6532_v22 = vpop.f32.mrf.mxu1  ;;  %v2141_v26 = vadd.f32 %v6455_v25, %v6231_v41  ;;  %v1621_v27 = vadd.f32 %v6231_v41, %v6463_v34 }
 0x11b   : > { %4486 = vst.msk [vmem:[%s6248_s29 + $0x254] sm:$0xf] %vm4336_vm3, %v5325_v12  ;;  %v2824_v20 = vmul.f32 0.2, %v1618_v11  ;;  %vm2696_vm10 = vcmp.gt.f32.partialorder %v2130_v14, 0.0  ;;  %vm2571_vm11 = vcmp.gt.f32.partialorder %v1629_v15, 0.0  ;;  %v2133_v31 = vadd.f32 %v6231_v41, %v6465_v35 }
 0x11c   : > { %v2952_v21 = vmul.f32 0.2, %v2130_v14  ;;  %4363 = vst.msk [vmem:[%s6248_s29 + $0x68] sm:$0xf] %vm4336_vm3, %v5202_v9  ;;  %v3210_v23 = vsel %vm2698_vm8, %v2138_v10, %v2954_v17  ;;  %v2827_v24 = vmul.f32 0.2, %v1629_v15  ;;  %v6542_v32 = vpop.f32.mrf.mxu0  ;;  %v6544_v33 = vpop.f32.mrf.mxu1  ;;  %v1642_v43 = vadd.f32 %v6474_v46, %v6231_v41 }
 0x11d   : > { %v5330_v28 = vpack.c.bf16 %v3210_v23, %v3210_v23  ;;  %v3080_v29 = vsel %vm2568_vm9, %v1618_v11, %v2824_v20  ;;  %vm2699_vm12 = vcmp.gt.f32.partialorder %v2141_v26, 0.0  ;;  %v2955_v38 = vmul.f32 0.2, %v2141_v26 }
 0x11e   : > { %v3208_v30 = vsel %vm2696_vm10, %v2130_v14, %v2952_v21  ;;  %v5200_v36 = vpack.c.bf16 %v3080_v29, %v3080_v29  ;;  %v3083_v25 = vsel %vm2571_vm11, %v1629_v15, %v2827_v24  ;;  %vm2569_vm13 = vcmp.gt.f32.partialorder %v1621_v27, 0.0  ;;  %v6549_v40 = vpop.f32.mrf.mxu0  ;;  %v6551_v42 = vpop.f32.mrf.mxu1 }
 0x11f   : > { %v5328_v37 = vpack.c.bf16 %v3208_v30, %v3208_v30  ;;  %4491 = vst.msk [vmem:[%s6248_s29 + $0x268] sm:$0xf] %vm4336_vm3, %v5330_v28  ;;  %v5203_v34 = vpack.c.bf16 %v3083_v25, %v3083_v25  ;;  %v2825_v39 = vmul.f32 0.2, %v1621_v27  ;;  %vm2697_vm14 = vcmp.gt.f32.partialorder %v2133_v31, 0.0 }
 0x120   : > { %4361 = vst.msk [vmem:[%s6248_s29 + $0x60] sm:$0xf] %vm4336_vm3, %v5200_v36  ;;  %v2953_v35 = vmul.f32 0.2, %v2133_v31  ;;  %v2154_v45 = vadd.f32 %v6477_v47, %v6231_v41  ;;  %v3211_v48 = vsel %vm2699_vm12, %v2141_v26, %v2955_v38  ;;  %v1634_v49 = vadd.f32 %v6231_v41, %v6492_v53  ;;  %v6567_v51 = vpop.f32.mrf.mxu0  ;;  %v6569_v52 = vpop.f32.mrf.mxu1 }
 0x121   : > { %4489 = vst.msk [vmem:[%s6248_s29 + $0x260] sm:$0xf] %vm4336_vm3, %v5328_v37  ;;  %4364 = vst.msk [vmem:[%s6248_s29 + $0x6c] sm:$0xf] %vm4336_vm3, %v5203_v34  ;;  %v3081_v44 = vsel %vm2569_vm13, %v1621_v27, %v2825_v39  ;;  %v2146_v50 = vadd.f32 %v6231_v41, %v6494_v54  ;;  %v5331_v46 = vpack.c.bf16 %v3211_v48, %v3211_v48  ;;  %vm2574_vm15 = vcmp.gt.f32.partialorder %v1642_v43, 0.0 }
 0x122   : > { %v5201_v55 = vpack.c.bf16 %v3081_v44, %v3081_v44  ;;  %v3209_v47 = vsel %vm2697_vm14, %v2133_v31, %v2953_v35  ;;  %v2830_v57 = vmul.f32 0.2, %v1642_v43  ;;  %vm2702_vm1 = vcmp.gt.f32.partialorder %v2154_v45, 0.0  ;;  %v6571_v59 = vpop.f32.mrf.mxu0  ;;  %v6573_v60 = vpop.f32.mrf.mxu1 }
 0x123   : > { %v5329_v56 = vpack.c.bf16 %v3209_v47, %v3209_v47  ;;  %v2958_v58 = vmul.f32 0.2, %v2154_v45  ;;  %4492 = vst.msk [vmem:[%s6248_s29 + $0x26c] sm:$0xf] %vm4336_vm3, %v5331_v46  ;;  %vm2572_vm2 = vcmp.gt.f32.partialorder %v1634_v49, 0.0  ;;  %vm2700_vm4 = vcmp.gt.f32.partialorder %v2146_v50, 0.0 }
 0x124   : > { %4362 = vst.msk [vmem:[%s6248_s29 + $0x64] sm:$0xf] %vm4336_vm3, %v5201_v55  ;;  %v2828_v53 = vmul.f32 0.2, %v1634_v49  ;;  %v2956_v54 = vmul.f32 0.2, %v2146_v50  ;;  %v3086_v63 = vsel %vm2574_vm15, %v1642_v43, %v2830_v57  ;;  %v1645_v1 = vadd.f32 %v6500_v61, %v6231_v41  ;;  %v6585_v3 = vpop.f32.mrf.mxu0  ;;  %v6587_v4 = vpop.f32.mrf.mxu1 }
 0x125   : > { %4490 = vst.msk [vmem:[%s6248_s29 + $0x264] sm:$0xf] %vm4336_vm3, %v5329_v56  ;;  %v3214_v0 = vsel %vm2702_vm1, %v2154_v45, %v2958_v58  ;;  %v2157_v2 = vadd.f32 %v6502_v62, %v6231_v41  ;;  %v5206_v7 = vpack.c.bf16 %v3086_v63, %v3086_v63  ;;  %v1637_v9 = vadd.f32 %v6231_v41, %v6506_v5  ;;  %v6631_v45 = vld [vmem:[%s7716_s2] ss:$0 sm:$0xff] }
 0x126   : > { %v5334_v8 = vpack.c.bf16 %v3214_v0, %v3214_v0  ;;  %v3084_v10 = vsel %vm2572_vm2, %v1634_v49, %v2828_v53  ;;  %v3212_v11 = vsel %vm2700_vm4, %v2146_v50, %v2956_v54  ;;  %vm2575_vm0 = vcmp.gt.f32.partialorder %v1645_v1, 0.0  ;;  %v6589_v15 = vpop.f32.mrf.mxu0  ;;  %v6591_v61 = vpop.f32.mrf.mxu1 }
 0x127   : > { %v5204_v12 = vpack.c.bf16 %v3084_v10, %v3084_v10  ;;  %v5332_v13 = vpack.c.bf16 %v3212_v11, %v3212_v11  ;;  %v2831_v14 = vmul.f32 0.2, %v1645_v1  ;;  %4367 = vst.msk [vmem:[%s6248_s29 + $0x78] sm:$0xf] %vm4336_vm3, %v5206_v7  ;;  %vm2703_vm5 = vcmp.gt.f32.partialorder %v2157_v2, 0.0 }
 0x128   : > { %4495 = vst.msk [vmem:[%s6248_s29 + $0x278] sm:$0xf] %vm4336_vm3, %v5334_v8  ;;  %v2959_v62 = vmul.f32 0.2, %v2157_v2  ;;  %v2149_v17 = vadd.f32 %v6231_v41, %v6508_v6  ;;  %v1658_v21 = vadd.f32 %v6522_v16, %v6231_v41  ;;  %v2170_v23 = vadd.f32 %v6524_v19, %v6231_v41  ;;  %v6611_v26 = vpop.f32.mrf.mxu0  ;;  %v6613_v5 = vpop.f32.mrf.mxu1 }
 0x129   : > { %4365 = vst.msk [vmem:[%s6248_s29 + $0x70] sm:$0xf] %vm4336_vm3, %v5204_v12  ;;  %4493 = vst.msk [vmem:[%s6248_s29 + $0x270] sm:$0xf] %vm4336_vm3, %v5332_v13  ;;  %v3087_v20 = vsel %vm2575_vm0, %v1645_v1, %v2831_v14  ;;  %v1650_v24 = vadd.f32 %v6231_v41, %v6530_v18  ;;  %vm2573_vm6 = vcmp.gt.f32.partialorder %v1637_v9, 0.0  ;;  %v2162_v48 = vadd.f32 %v6631_v45, %v6532_v22 }
 0x12a   : > { %v5207_v6 = vpack.c.bf16 %v3087_v20, %v3087_v20  ;;  %v3215_v27 = vsel %vm2703_vm5, %v2157_v2, %v2959_v62  ;;  %v2829_v28 = vmul.f32 0.2, %v1637_v9  ;;  %vm2701_vm7 = vcmp.gt.f32.partialorder %v2149_v17, 0.0  ;;  %v6615_v16 = vpop.f32.mrf.mxu0  ;;  %v6617_v31 = vpop.f32.mrf.mxu1 }
 0x12b   : > { %v5335_v29 = vpack.c.bf16 %v3215_v27, %v3215_v27  ;;  %v2957_v30 = vmul.f32 0.2, %v2149_v17  ;;  %vm2578_vm8 = vcmp.gt.f32.partialorder %v1658_v21, 0.0  ;;  %v2834_v19 = vmul.f32 0.2, %v1658_v21 }
 0x12c   : > { %4368 = vst.msk [vmem:[%s6248_s29 + $0x7c] sm:$0xf] %vm4336_vm3, %v5207_v6  ;;  %v3085_v41 = vsel %vm2573_vm6, %v1637_v9, %v2829_v28  ;;  %vm2706_vm9 = vcmp.gt.f32.partialorder %v2170_v23, 0.0  ;;  %v2962_v18 = vmul.f32 0.2, %v2170_v23  ;;  %vm2576_vm10 = vcmp.gt.f32.partialorder %v1650_v24, 0.0  ;;  %v6623_v34 = vpop.f32.mrf.mxu0  ;;  %v6625_v38 = vpop.f32.mrf.mxu1 }
 0x12d   : > { %4496 = vst.msk [vmem:[%s6248_s29 + $0x27c] sm:$0xf] %vm4336_vm3, %v5335_v29  ;;  %v5205_v36 = vpack.c.bf16 %v3085_v41, %v3085_v41  ;;  %v3213_v37 = vsel %vm2701_vm7, %v2149_v17, %v2957_v30  ;;  %v2832_v25 = vmul.f32 0.2, %v1650_v24  ;;  %v3090_v35 = vsel %vm2578_vm8, %v1658_v21, %v2834_v19 }
 0x12e   : > { %v5333_v39 = vpack.c.bf16 %v3213_v37, %v3213_v37  ;;  %v3218_v43 = vsel %vm2706_vm9, %v2170_v23, %v2962_v18  ;;  %v5210_v44 = vpack.c.bf16 %v3090_v35, %v3090_v35  ;;  %v1661_v46 = vadd.f32 %v6631_v45, %v6542_v32  ;;  %v6639_v55 = vpop.f32.mrf.mxu0  ;;  %v6641_v47 = vpop.f32.mrf.mxu1 }
 0x12f   : > { %4366 = vst.msk [vmem:[%s6248_s29 + $0x74] sm:$0xf] %vm4336_vm3, %v5205_v36  ;;  %v5338_v49 = vpack.c.bf16 %v3218_v43, %v3218_v43  ;;  %v3088_v50 = vsel %vm2576_vm10, %v1650_v24, %v2832_v25  ;;  %vm2704_vm11 = vcmp.gt.f32.partialorder %v2162_v48, 0.0  ;;  %v2960_v57 = vmul.f32 0.2, %v2162_v48 }
 0x130   : > { %4494 = vst.msk [vmem:[%s6248_s29 + $0x274] sm:$0xf] %vm4336_vm3, %v5333_v39  ;;  %v5208_v56 = vpack.c.bf16 %v3088_v50, %v3088_v50  ;;  %v2173_v22 = vadd.f32 %v6631_v45, %v6544_v33  ;;  %4371 = vst.msk [vmem:[%s6248_s29 + $0x88] sm:$0xf] %vm4336_vm3, %v5210_v44  ;;  %vm2579_vm12 = vcmp.gt.f32.partialorder %v1661_v46, 0.0  ;;  %v1653_v32 = vadd.f32 %v6631_v45, %v6549_v40  ;;  %v6655_v54 = vpop.f32.mrf.mxu0  ;;  %v6657_v63 = vpop.f32.mrf.mxu1 }
 0x131   : > { %4499 = vst.msk [vmem:[%s6248_s29 + $0x288] sm:$0xf] %vm4336_vm3, %v5338_v49  ;;  %v2835_v58 = vmul.f32 0.2, %v1661_v46  ;;  %v2165_v53 = vadd.f32 %v6631_v45, %v6551_v42  ;;  %v3216_v33 = vsel %vm2704_vm11, %v2162_v48, %v2960_v57  ;;  %v1674_v1 = vadd.f32 %v6631_v45, %v6567_v51 }
 0x132   : > { %4369 = vst.msk [vmem:[%s6248_s29 + $0x80] sm:$0xf] %vm4336_vm3, %v5208_v56  ;;  %vm2707_vm13 = vcmp.gt.f32.partialorder %v2173_v22, 0.0  ;;  %v2963_v0 = vmul.f32 0.2, %v2173_v22  ;;  %v5336_v2 = vpack.c.bf16 %v3216_v33, %v3216_v33  ;;  %vm2577_vm14 = vcmp.gt.f32.partialorder %v1653_v32, 0.0  ;;  %v6663_v8 = vpop.f32.mrf.mxu0  ;;  %v6665_v42 = vpop.f32.mrf.mxu1 }
 0x133   : > { %v3091_v7 = vsel %vm2579_vm12, %v1661_v46, %v2835_v58  ;;  %v2833_v40 = vmul.f32 0.2, %v1653_v32  ;;  %vm2705_vm15 = vcmp.gt.f32.partialorder %v2165_v53, 0.0  ;;  %v2961_v12 = vmul.f32 0.2, %v2165_v53 }
 0x134   : > { %v5211_v10 = vpack.c.bf16 %v3091_v7, %v3091_v7  ;;  %v3219_v11 = vsel %vm2707_vm13, %v2173_v22, %v2963_v0  ;;  %4497 = vst.msk [vmem:[%s6248_s29 + $0x280] sm:$0xf] %vm4336_vm3, %v5336_v2  ;;  %vm2582_vm1 = vcmp.gt.f32.partialorder %v1674_v1, 0.0  ;;  %v2838_v51 = vmul.f32 0.2, %v1674_v1  ;;  %v6669_v62 = vpop.f32.mrf.mxu0  ;;  %v6671_v9 = vpop.f32.mrf.mxu1 }
 0x135   : > { %v5339_v13 = vpack.c.bf16 %v3219_v11, %v3219_v11  ;;  %v3089_v14 = vsel %vm2577_vm14, %v1653_v32, %v2833_v40  ;;  %v3217_v20 = vsel %vm2705_vm15, %v2165_v53, %v2961_v12  ;;  %v2186_v21 = vadd.f32 %v6631_v45, %v6569_v52 }
 0x136   : > { %4372 = vst.msk [vmem:[%s6248_s29 + $0x8c] sm:$0xf] %vm4336_vm3, %v5211_v10  ;;  %v5209_v17 = vpack.c.bf16 %v3089_v14, %v3089_v14  ;;  %v1666_v23 = vadd.f32 %v6631_v45, %v6571_v59  ;;  %v5337_v24 = vpack.c.bf16 %v3217_v20, %v3217_v20  ;;  %v3094_v6 = vsel %vm2582_vm1, %v1674_v1, %v2838_v51  ;;  %v6685_v29 = vpop.f32.mrf.mxu0  ;;  %v6687_v30 = vpop.f32.mrf.mxu1 }
 0x137   : > { %4500 = vst.msk [vmem:[%s6248_s29 + $0x28c] sm:$0xf] %vm4336_vm3, %v5339_v13  ;;  %v2178_v27 = vadd.f32 %v6631_v45, %v6573_v60  ;;  %v1677_v28 = vadd.f32 %v6631_v45, %v6585_v3  ;;  %v5214_v52 = vpack.c.bf16 %v3094_v6, %v3094_v6  ;;  %vm2710_vm2 = vcmp.gt.f32.partialorder %v2186_v21, 0.0 }
 0x138   : > { %4370 = vst.msk [vmem:[%s6248_s29 + $0x84] sm:$0xf] %vm4336_vm3, %v5209_v17  ;;  %v2966_v59 = vmul.f32 0.2, %v2186_v21  ;;  %vm2580_vm4 = vcmp.gt.f32.partialorder %v1666_v23, 0.0  ;;  %v6693_v60 = vpop.f32.mrf.mxu0  ;;  %v6695_v18 = vpop.f32.mrf.mxu1  ;;  %v2189_v37 = vadd.f32 %v6631_v45, %v6587_v4  ;;  %v1669_v25 = vadd.f32 %v6631_v45, %v6589_v15 }
 0x139   : > { %4498 = vst.msk [vmem:[%s6248_s29 + $0x284] sm:$0xf] %vm4336_vm3, %v5337_v24  ;;  %v2836_v41 = vmul.f32 0.2, %v1666_v23  ;;  %vm2708_vm0 = vcmp.gt.f32.partialorder %v2178_v27, 0.0  ;;  %vm2583_vm5 = vcmp.gt.f32.partialorder %v1677_v28, 0.0  ;;  %v2181_v48 = vadd.f32 %v6631_v45, %v6591_v61 }
 0x13a   : > { %v2964_v19 = vmul.f32 0.2, %v2178_v27  ;;  %4375 = vst.msk [vmem:[%s6248_s29 + $0x98] sm:$0xf] %vm4336_vm3, %v5214_v52  ;;  %v3222_v3 = vsel %vm2710_vm2, %v2186_v21, %v2966_v59  ;;  %v2839_v36 = vmul.f32 0.2, %v1677_v28  ;;  %v6705_v44 = vpop.f32.mrf.mxu0  ;;  %v6707_v49 = vpop.f32.mrf.mxu1  ;;  %v1690_v32 = vadd.f32 %v6631_v45, %v6611_v26 }
 0x13b   : > { %v5342_v39 = vpack.c.bf16 %v3222_v3, %v3222_v3  ;;  %v3092_v35 = vsel %vm2580_vm4, %v1666_v23, %v2836_v41  ;;  %vm2711_vm6 = vcmp.gt.f32.partialorder %v2189_v37, 0.0  ;;  %v2967_v56 = vmul.f32 0.2, %v2189_v37 }
 0x13c   : > { %v3220_v43 = vsel %vm2708_vm0, %v2178_v27, %v2964_v19  ;;  %v5212_v50 = vpack.c.bf16 %v3092_v35, %v3092_v35  ;;  %v3095_v4 = vsel %vm2583_vm5, %v1677_v28, %v2839_v36  ;;  %vm2581_vm7 = vcmp.gt.f32.partialorder %v1669_v25, 0.0  ;;  %v6712_v22 = vpop.f32.mrf.mxu0  ;;  %v6714_v58 = vpop.f32.mrf.mxu1 }
 0x13d   : > { %v5340_v46 = vpack.c.bf16 %v3220_v43, %v3220_v43  ;;  %4503 = vst.msk [vmem:[%s6248_s29 + $0x298] sm:$0xf] %vm4336_vm3, %v5342_v39  ;;  %v5215_v15 = vpack.c.bf16 %v3095_v4, %v3095_v4  ;;  %v2837_v57 = vmul.f32 0.2, %v1669_v25  ;;  %vm2709_vm8 = vcmp.gt.f32.partialorder %v2181_v48, 0.0 }
 0x13e   : > { %4373 = vst.msk [vmem:[%s6248_s29 + $0x90] sm:$0xf] %vm4336_vm3, %v5212_v50  ;;  %v2965_v61 = vmul.f32 0.2, %v2181_v48  ;;  %v2202_v53 = vadd.f32 %v6631_v45, %v6613_v5  ;;  %v3223_v33 = vsel %vm2711_vm6, %v2189_v37, %v2967_v56  ;;  %v1682_v1 = vadd.f32 %v6631_v45, %v6615_v16  ;;  %v6730_v7 = vpop.f32.mrf.mxu0  ;;  %v6732_v40 = vpop.f32.mrf.mxu1 }
 0x13f   : > { %4501 = vst.msk [vmem:[%s6248_s29 + $0x290] sm:$0xf] %vm4336_vm3, %v5340_v46  ;;  %4376 = vst.msk [vmem:[%s6248_s29 + $0x9c] sm:$0xf] %vm4336_vm3, %v5215_v15  ;;  %v3093_v0 = vsel %vm2581_vm7, %v1669_v25, %v2837_v57  ;;  %v2194_v2 = vadd.f32 %v6631_v45, %v6617_v31  ;;  %v5343_v26 = vpack.c.bf16 %v3223_v33, %v3223_v33  ;;  %vm2586_vm9 = vcmp.gt.f32.partialorder %v1690_v32, 0.0 }
 0x140   : > { %v5213_v10 = vpack.c.bf16 %v3093_v0, %v3093_v0  ;;  %v3221_v5 = vsel %vm2709_vm8, %v2181_v48, %v2965_v61  ;;  %v2842_v12 = vmul.f32 0.2, %v1690_v32  ;;  %vm2714_vm10 = vcmp.gt.f32.partialorder %v2202_v53, 0.0  ;;  %v6734_v14 = vpop.f32.mrf.mxu0  ;;  %v6736_v51 = vpop.f32.mrf.mxu1 }
 0x141   : > { %v5341_v11 = vpack.c.bf16 %v3221_v5, %v3221_v5  ;;  %v2970_v13 = vmul.f32 0.2, %v2202_v53  ;;  %4504 = vst.msk [vmem:[%s6248_s29 + $0x29c] sm:$0xf] %vm4336_vm3, %v5343_v26  ;;  %vm2584_vm11 = vcmp.gt.f32.partialorder %v1682_v1, 0.0  ;;  %vm2712_vm12 = vcmp.gt.f32.partialorder %v2194_v2, 0.0 }
 0x142   : > { %4374 = vst.msk [vmem:[%s6248_s29 + $0x94] sm:$0xf] %vm4336_vm3, %v5213_v10  ;;  %v2840_v16 = vmul.f32 0.2, %v1682_v1  ;;  %v2968_v31 = vmul.f32 0.2, %v2194_v2  ;;  %v3098_v17 = vsel %vm2586_vm9, %v1690_v32, %v2842_v12  ;;  %v1693_v21 = vadd.f32 %v6631_v45, %v6623_v34  ;;  %v6748_v24 = vpop.f32.mrf.mxu0  ;;  %v6750_v6 = vpop.f32.mrf.mxu1 }
 0x143   : > { %4502 = vst.msk [vmem:[%s6248_s29 + $0x294] sm:$0xf] %vm4336_vm3, %v5341_v11  ;;  %v3226_v20 = vsel %vm2714_vm10, %v2202_v53, %v2970_v13  ;;  %v2205_v23 = vadd.f32 %v6631_v45, %v6625_v38  ;;  %v5218_v27 = vpack.c.bf16 %v3098_v17, %v3098_v17  ;;  %v1685_v37 = vadd.f32 %v6631_v45, %v6639_v55 }
 0x144   : > { %v5346_v28 = vpack.c.bf16 %v3226_v20, %v3226_v20  ;;  %v3096_v52 = vsel %vm2584_vm11, %v1682_v1, %v2840_v16  ;;  %v3224_v59 = vsel %vm2712_vm12, %v2194_v2, %v2968_v31  ;;  %vm2587_vm13 = vcmp.gt.f32.partialorder %v1693_v21, 0.0  ;;  %v6752_v36 = vpop.f32.mrf.mxu0  ;;  %v6754_v34 = vpop.f32.mrf.mxu1 }
 0x145   : > { %v5216_v41 = vpack.c.bf16 %v3096_v52, %v3096_v52  ;;  %v5344_v19 = vpack.c.bf16 %v3224_v59, %v3224_v59  ;;  %v2843_v3 = vmul.f32 0.2, %v1693_v21  ;;  %4379 = vst.msk [vmem:[%s6248_s29 + $0xa8] sm:$0xf] %vm4336_vm3, %v5218_v27  ;;  %vm2715_vm14 = vcmp.gt.f32.partialorder %v2205_v23, 0.0 }
 0x146   : > { %4507 = vst.msk [vmem:[%s6248_s29 + $0x2a8] sm:$0xf] %vm4336_vm3, %v5346_v28  ;;  %v2971_v38 = vmul.f32 0.2, %v2205_v23  ;;  %v2197_v25 = vadd.f32 %v6631_v45, %v6641_v47  ;;  %v1706_v35 = vadd.f32 %v6631_v45, %v6655_v54  ;;  %v2218_v43 = vadd.f32 %v6631_v45, %v6657_v63  ;;  %v6774_v50 = vpop.f32.mrf.mxu0  ;;  %v6776_v55 = vpop.f32.mrf.mxu1 }
 0x147   : > { %4377 = vst.msk [vmem:[%s6248_s29 + $0xa0] sm:$0xf] %vm4336_vm3, %v5216_v41  ;;  %4505 = vst.msk [vmem:[%s6248_s29 + $0x2a0] sm:$0xf] %vm4336_vm3, %v5344_v19  ;;  %v3099_v39 = vsel %vm2587_vm13, %v1693_v21, %v2843_v3  ;;  %v1698_v48 = vadd.f32 %v6631_v45, %v6663_v8  ;;  %vm2585_vm15 = vcmp.gt.f32.partialorder %v1685_v37, 0.0  ;;  %v2210_v5 = vadd.f32 %v6631_v45, %v6665_v42 }
 0x148   : > { %v5219_v47 = vpack.c.bf16 %v3099_v39, %v3099_v39  ;;  %v3227_v46 = vsel %vm2715_vm14, %v2205_v23, %v2971_v38  ;;  %v2841_v4 = vmul.f32 0.2, %v1685_v37  ;;  %vm2713_vm1 = vcmp.gt.f32.partialorder %v2197_v25, 0.0  ;;  %v6778_v54 = vpop.f32.mrf.mxu0  ;;  %v6780_v57 = vpop.f32.mrf.mxu1 }
 0x149   : > { %v5347_v15 = vpack.c.bf16 %v3227_v46, %v3227_v46  ;;  %v2969_v56 = vmul.f32 0.2, %v2197_v25  ;;  %vm2590_vm2 = vcmp.gt.f32.partialorder %v1706_v35, 0.0  ;;  %v2846_v8 = vmul.f32 0.2, %v1706_v35 }
 0x14a   : > { %4380 = vst.msk [vmem:[%s6248_s29 + $0xac] sm:$0xf] %vm4336_vm3, %v5219_v47  ;;  %v3097_v63 = vsel %vm2585_vm15, %v1685_v37, %v2841_v4  ;;  %vm2718_vm4 = vcmp.gt.f32.partialorder %v2218_v43, 0.0  ;;  %v2974_v61 = vmul.f32 0.2, %v2218_v43  ;;  %vm2588_vm0 = vcmp.gt.f32.partialorder %v1698_v48, 0.0  ;;  %v6786_v0 = vpop.f32.mrf.mxu0  ;;  %v6788_v1 = vpop.f32.mrf.mxu1 }
 0x14b   : > { %4508 = vst.msk [vmem:[%s6248_s29 + $0x2ac] sm:$0xf] %vm4336_vm3, %v5347_v15  ;;  %v5217_v32 = vpack.c.bf16 %v3097_v63, %v3097_v63  ;;  %v3225_v53 = vsel %vm2713_vm1, %v2197_v25, %v2969_v56  ;;  %v2844_v33 = vmul.f32 0.2, %v1698_v48  ;;  %v3102_v26 = vsel %vm2590_vm2, %v1706_v35, %v2846_v8 }
 0x14c   : > { %v5345_v2 = vpack.c.bf16 %v3225_v53, %v3225_v53  ;;  %v3230_v10 = vsel %vm2718_vm4, %v2218_v43, %v2974_v61  ;;  %v5222_v11 = vpack.c.bf16 %v3102_v26, %v3102_v26  ;;  %v1709_v16 = vadd.f32 %v6631_v45, %v6669_v62  ;;  %v6797_v31 = vpop.f32.mrf.mxu0  ;;  %v6799_v17 = vpop.f32.mrf.mxu1 }
 0x14d   : > { %4378 = vst.msk [vmem:[%s6248_s29 + $0xa4] sm:$0xf] %vm4336_vm3, %v5217_v32  ;;  %v5350_v12 = vpack.c.bf16 %v3230_v10, %v3230_v10  ;;  %v3100_v13 = vsel %vm2588_vm0, %v1698_v48, %v2844_v33  ;;  %vm2716_vm5 = vcmp.gt.f32.partialorder %v2210_v5, 0.0  ;;  %v2972_v21 = vmul.f32 0.2, %v2210_v5 }
 0x14e   : > { %4506 = vst.msk [vmem:[%s6248_s29 + $0x2a4] sm:$0xf] %vm4336_vm3, %v5345_v2  ;;  %v5220_v20 = vpack.c.bf16 %v3100_v13, %v3100_v13  ;;  %v2221_v42 = vadd.f32 %v6631_v45, %v6671_v9  ;;  %4383 = vst.msk [vmem:[%s6248_s29 + $0xb8] sm:$0xf] %vm4336_vm3, %v5222_v11  ;;  %vm2591_vm6 = vcmp.gt.f32.partialorder %v1709_v16, 0.0  ;;  %v1701_v62 = vadd.f32 %v6631_v45, %v6685_v29  ;;  %v6813_v28 = vpop.f32.mrf.mxu0  ;;  %v6815_v52 = vpop.f32.mrf.mxu1 }
 0x14f   : > { %4511 = vst.msk [vmem:[%s6248_s29 + $0x2b8] sm:$0xf] %vm4336_vm3, %v5350_v12  ;;  %v2847_v23 = vmul.f32 0.2, %v1709_v16  ;;  %v2213_v27 = vadd.f32 %v6631_v45, %v6687_v30  ;;  %v3228_v9 = vsel %vm2716_vm5, %v2210_v5, %v2972_v21  ;;  %v1722_v41 = vadd.f32 %v6631_v45, %v6693_v60 }
 0x150   : > { %4381 = vst.msk [vmem:[%s6248_s29 + $0xb0] sm:$0xf] %vm4336_vm3, %v5220_v20  ;;  %vm2719_vm7 = vcmp.gt.f32.partialorder %v2221_v42, 0.0  ;;  %v2975_v59 = vmul.f32 0.2, %v2221_v42  ;;  %v5348_v19 = vpack.c.bf16 %v3228_v9, %v3228_v9  ;;  %vm2589_vm8 = vcmp.gt.f32.partialorder %v1701_v62, 0.0  ;;  %v6821_v38 = vpop.f32.mrf.mxu0  ;;  %v6823_v30 = vpop.f32.mrf.mxu1 }
 0x151   : > { %v3103_v3 = vsel %vm2591_vm6, %v1709_v16, %v2847_v23  ;;  %v2845_v29 = vmul.f32 0.2, %v1701_v62  ;;  %vm2717_vm9 = vcmp.gt.f32.partialorder %v2213_v27, 0.0  ;;  %v2973_v39 = vmul.f32 0.2, %v2213_v27 }
 0x152   : > { %v5223_v37 = vpack.c.bf16 %v3103_v3, %v3103_v3  ;;  %v3231_v25 = vsel %vm2719_vm7, %v2221_v42, %v2975_v59  ;;  %4509 = vst.msk [vmem:[%s6248_s29 + $0x2b0] sm:$0xf] %vm4336_vm3, %v5348_v19  ;;  %vm2594_vm10 = vcmp.gt.f32.partialorder %v1722_v41, 0.0  ;;  %v2850_v60 = vmul.f32 0.2, %v1722_v41  ;;  %v6827_v48 = vpop.f32.mrf.mxu0  ;;  %v6829_v47 = vpop.f32.mrf.mxu1 }
 0x153   : > { %v5351_v35 = vpack.c.bf16 %v3231_v25, %v3231_v25  ;;  %v3101_v43 = vsel %vm2589_vm8, %v1701_v62, %v2845_v29  ;;  %v3229_v4 = vsel %vm2717_vm9, %v2213_v27, %v2973_v39  ;;  %v2234_v15 = vadd.f32 %v6631_v45, %v6695_v18 }
 0x154   : > { %4384 = vst.msk [vmem:[%s6248_s29 + $0xbc] sm:$0xf] %vm4336_vm3, %v5223_v37  ;;  %v5221_v46 = vpack.c.bf16 %v3101_v43, %v3101_v43  ;;  %v1714_v56 = vadd.f32 %v6631_v45, %v6705_v44  ;;  %v5349_v63 = vpack.c.bf16 %v3229_v4, %v3229_v4  ;;  %v3106_v8 = vsel %vm2594_vm10, %v1722_v41, %v2850_v60  ;;  %v6843_v53 = vpop.f32.mrf.mxu0  ;;  %v6845_v33 = vpop.f32.mrf.mxu1 }
 0x155   : > { %4512 = vst.msk [vmem:[%s6248_s29 + $0x2bc] sm:$0xf] %vm4336_vm3, %v5351_v35  ;;  %v2226_v61 = vadd.f32 %v6631_v45, %v6707_v49  ;;  %v1725_v32 = vadd.f32 %v6631_v45, %v6712_v22  ;;  %v5226_v18 = vpack.c.bf16 %v3106_v8, %v3106_v8  ;;  %vm2722_vm11 = vcmp.gt.f32.partialorder %v2234_v15, 0.0 }
 0x156   : > { %4382 = vst.msk [vmem:[%s6248_s29 + $0xb4] sm:$0xf] %vm4336_vm3, %v5221_v46  ;;  %v2978_v44 = vmul.f32 0.2, %v2234_v15  ;;  %vm2592_vm12 = vcmp.gt.f32.partialorder %v1714_v56, 0.0  ;;  %v6851_v49 = vpop.f32.mrf.mxu0  ;;  %v6853_v10 = vpop.f32.mrf.mxu1  ;;  %v2237_v11 = vadd.f32 %v6631_v45, %v6714_v58  ;;  %v1717_v12 = vadd.f32 %v6631_v45, %v6730_v7 }
 0x157   : > { %4510 = vst.msk [vmem:[%s6248_s29 + $0x2b4] sm:$0xf] %vm4336_vm3, %v5349_v63  ;;  %v2848_v2 = vmul.f32 0.2, %v1714_v56  ;;  %vm2720_vm13 = vcmp.gt.f32.partialorder %v2226_v61, 0.0  ;;  %vm2595_vm14 = vcmp.gt.f32.partialorder %v1725_v32, 0.0  ;;  %v2229_v21 = vadd.f32 %v6631_v45, %v6732_v40 }
 0x158   : > { %v2976_v26 = vmul.f32 0.2, %v2226_v61  ;;  %4387 = vst.msk [vmem:[%s6248_s29 + $0xc8] sm:$0xf] %vm4336_vm3, %v5226_v18  ;;  %v3234_v22 = vsel %vm2722_vm11, %v2234_v15, %v2978_v44  ;;  %v2851_v5 = vmul.f32 0.2, %v1725_v32  ;;  %v6863_v42 = vpop.f32.mrf.mxu0  ;;  %v6865_v23 = vpop.f32.mrf.mxu1  ;;  %v1738_v3 = vadd.f32 %v6631_v45, %v6734_v14 }
 0x159   : > { %v5354_v13 = vpack.c.bf16 %v3234_v22, %v3234_v22  ;;  %v3104_v16 = vsel %vm2592_vm12, %v1714_v56, %v2848_v2  ;;  %vm2723_vm15 = vcmp.gt.f32.partialorder %v2237_v11, 0.0  ;;  %v2979_v9 = vmul.f32 0.2, %v2237_v11 }
 0x15a   : > { %v3232_v20 = vsel %vm2720_vm13, %v2226_v61, %v2976_v26  ;;  %v5224_v62 = vpack.c.bf16 %v3104_v16, %v3104_v16  ;;  %v3107_v58 = vsel %vm2595_vm14, %v1725_v32, %v2851_v5  ;;  %vm2593_vm1 = vcmp.gt.f32.partialorder %v1717_v12, 0.0  ;;  %v6870_v41 = vpop.f32.mrf.mxu0  ;;  %v6872_v19 = vpop.f32.mrf.mxu1 }
 0x15b   : > { %v5352_v27 = vpack.c.bf16 %v3232_v20, %v3232_v20  ;;  %4515 = vst.msk [vmem:[%s6248_s29 + $0x2c8] sm:$0xf] %vm4336_vm3, %v5354_v13  ;;  %v5227_v7 = vpack.c.bf16 %v3107_v58, %v3107_v58  ;;  %v2849_v59 = vmul.f32 0.2, %v1717_v12  ;;  %vm2721_vm2 = vcmp.gt.f32.partialorder %v2229_v21, 0.0 }
 0x15c   : > { %4385 = vst.msk [vmem:[%s6248_s29 + $0xc0] sm:$0xf] %vm4336_vm3, %v5224_v62  ;;  %v2977_v40 = vmul.f32 0.2, %v2229_v21  ;;  %v2250_v29 = vadd.f32 %v6631_v45, %v6736_v51  ;;  %v3235_v37 = vsel %vm2723_vm15, %v2237_v11, %v2979_v9  ;;  %v1730_v39 = vadd.f32 %v6631_v45, %v6748_v24  ;;  %v6888_v43 = vpop.f32.mrf.mxu0  ;;  %v6890_v60 = vpop.f32.mrf.mxu1 }
 0x15d   : > { %4513 = vst.msk [vmem:[%s6248_s29 + $0x2c0] sm:$0xf] %vm4336_vm3, %v5352_v27  ;;  %4388 = vst.msk [vmem:[%s6248_s29 + $0xcc] sm:$0xf] %vm4336_vm3, %v5227_v7  ;;  %v3105_v25 = vsel %vm2593_vm1, %v1717_v12, %v2849_v59  ;;  %v2242_v35 = vadd.f32 %v6631_v45, %v6750_v6  ;;  %v5355_v14 = vpack.c.bf16 %v3235_v37, %v3235_v37  ;;  %vm2598_vm4 = vcmp.gt.f32.partialorder %v1738_v3, 0.0 }
 0x15e   : > { %v5225_v46 = vpack.c.bf16 %v3105_v25, %v3105_v25  ;;  %v3233_v51 = vsel %vm2721_vm2, %v2229_v21, %v2977_v40  ;;  %v2854_v15 = vmul.f32 0.2, %v1738_v3  ;;  %vm2726_vm0 = vcmp.gt.f32.partialorder %v2250_v29, 0.0  ;;  %v6892_v63 = vpop.f32.mrf.mxu0  ;;  %v6894_v8 = vpop.f32.mrf.mxu1 }
 0x15f   : > { %v5353_v4 = vpack.c.bf16 %v3233_v51, %v3233_v51  ;;  %v2982_v56 = vmul.f32 0.2, %v2250_v29  ;;  %4516 = vst.msk [vmem:[%s6248_s29 + $0x2cc] sm:$0xf] %vm4336_vm3, %v5355_v14  ;;  %vm2596_vm5 = vcmp.gt.f32.partialorder %v1730_v39, 0.0  ;;  %vm2724_vm6 = vcmp.gt.f32.partialorder %v2242_v35, 0.0 }
 0x160   : > { %4386 = vst.msk [vmem:[%s6248_s29 + $0xc4] sm:$0xf] %vm4336_vm3, %v5225_v46  ;;  %v2852_v24 = vmul.f32 0.2, %v1730_v39  ;;  %v2980_v6 = vmul.f32 0.2, %v2242_v35  ;;  %v3110_v61 = vsel %vm2598_vm4, %v1738_v3, %v2854_v15  ;;  %v1741_v18 = vadd.f32 %v6631_v45, %v6752_v36  ;;  %v6906_v2 = vpop.f32.mrf.mxu0  ;;  %v6908_v26 = vpop.f32.mrf.mxu1 }
 0x161   : > { %4514 = vst.msk [vmem:[%s6248_s29 + $0x2c4] sm:$0xf] %vm4336_vm3, %v5353_v4  ;;  %v3238_v32 = vsel %vm2726_vm0, %v2250_v29, %v2982_v56  ;;  %v2253_v44 = vadd.f32 %v6631_v45, %v6754_v34  ;;  %v5230_v22 = vpack.c.bf16 %v3110_v61, %v3110_v61  ;;  %v1733_v62 = vadd.f32 %v6631_v45, %v6774_v50 }
 0x162   : > { %v5358_v5 = vpack.c.bf16 %v3238_v32, %v3238_v32  ;;  %v3108_v11 = vsel %vm2596_vm5, %v1730_v39, %v2852_v24  ;;  %v3236_v12 = vsel %vm2724_vm6, %v2242_v35, %v2980_v6  ;;  %vm2599_vm7 = vcmp.gt.f32.partialorder %v1741_v18, 0.0  ;;  %v6910_v21 = vpop.f32.mrf.mxu0  ;;  %v6912_v36 = vpop.f32.mrf.mxu1 }
 0x163   : > { %v5228_v13 = vpack.c.bf16 %v3108_v11, %v3108_v11  ;;  %v5356_v16 = vpack.c.bf16 %v3236_v12, %v3236_v12  ;;  %v2855_v20 = vmul.f32 0.2, %v1741_v18  ;;  %4391 = vst.msk [vmem:[%s6248_s29 + $0xd8] sm:$0xf] %vm4336_vm3, %v5230_v22  ;;  %vm2727_vm8 = vcmp.gt.f32.partialorder %v2253_v44, 0.0 }
 0x164   : > { %4519 = vst.msk [vmem:[%s6248_s29 + $0x2d8] sm:$0xf] %vm4336_vm3, %v5358_v5  ;;  %v2983_v34 = vmul.f32 0.2, %v2253_v44  ;;  %v2245_v27 = vadd.f32 %v6631_v45, %v6776_v55  ;;  %v1754_v7 = vadd.f32 %v6631_v45, %v6778_v54  ;;  %v2266_v9 = vadd.f32 %v6631_v45, %v6780_v57  ;;  %v6932_v40 = vpop.f32.mrf.mxu0  ;;  %v6934_v50 = vpop.f32.mrf.mxu1 }
 0x165   : > { %4389 = vst.msk [vmem:[%s6248_s29 + $0xd0] sm:$0xf] %vm4336_vm3, %v5228_v13  ;;  %4517 = vst.msk [vmem:[%s6248_s29 + $0x2d0] sm:$0xf] %vm4336_vm3, %v5356_v16  ;;  %v3111_v58 = vsel %vm2599_vm7, %v1741_v18, %v2855_v20  ;;  %v1746_v59 = vadd.f32 %v6631_v45, %v6786_v0  ;;  %vm2597_vm9 = vcmp.gt.f32.partialorder %v1733_v62, 0.0  ;;  %v2258_v61 = vadd.f32 %v6631_v45, %v6788_v1 }
 0x166   : > { %v5231_v55 = vpack.c.bf16 %v3111_v58, %v3111_v58  ;;  %v3239_v3 = vsel %vm2727_vm8, %v2253_v44, %v2983_v34  ;;  %v2853_v29 = vmul.f32 0.2, %v1733_v62  ;;  %vm2725_vm10 = vcmp.gt.f32.partialorder %v2245_v27, 0.0  ;;  %v6936_v54 = vpop.f32.mrf.mxu0  ;;  %v6938_v39 = vpop.f32.mrf.mxu1 }
 0x167   : > { %v5359_v37 = vpack.c.bf16 %v3239_v3, %v3239_v3  ;;  %v2981_v25 = vmul.f32 0.2, %v2245_v27  ;;  %vm2602_vm11 = vcmp.gt.f32.partialorder %v1754_v7, 0.0  ;;  %v2858_v0 = vmul.f32 0.2, %v1754_v7 }
 0x168   : > { %4392 = vst.msk [vmem:[%s6248_s29 + $0xdc] sm:$0xf] %vm4336_vm3, %v5231_v55  ;;  %v3109_v57 = vsel %vm2597_vm9, %v1733_v62, %v2853_v29  ;;  %vm2730_vm12 = vcmp.gt.f32.partialorder %v2266_v9, 0.0  ;;  %v2986_v35 = vmul.f32 0.2, %v2266_v9  ;;  %vm2600_vm13 = vcmp.gt.f32.partialorder %v1746_v59, 0.0  ;;  %v6944_v4 = vpop.f32.mrf.mxu0  ;;  %v6946_v15 = vpop.f32.mrf.mxu1 }
 0x169   : > { %4520 = vst.msk [vmem:[%s6248_s29 + $0x2dc] sm:$0xf] %vm4336_vm3, %v5359_v37  ;;  %v5229_v14 = vpack.c.bf16 %v3109_v57, %v3109_v57  ;;  %v3237_v46 = vsel %vm2725_vm10, %v2245_v27, %v2981_v25  ;;  %v2856_v51 = vmul.f32 0.2, %v1746_v59  ;;  %v3114_v24 = vsel %vm2602_vm11, %v1754_v7, %v2858_v0 }
 0x16a   : > { %v5357_v56 = vpack.c.bf16 %v3237_v46, %v3237_v46  ;;  %v3242_v6 = vsel %vm2730_vm12, %v2266_v9, %v2986_v35  ;;  %v5234_v32 = vpack.c.bf16 %v3114_v24, %v3114_v24  ;;  %v1757_v22 = vadd.f32 %v6631_v45, %v6797_v31  ;;  %v6955_v5 = vpop.f32.mrf.mxu0  ;;  %v6957_v11 = vpop.f32.mrf.mxu1 }
 0x16b   : > { %4390 = vst.msk [vmem:[%s6248_s29 + $0xd4] sm:$0xf] %vm4336_vm3, %v5229_v14  ;;  %v5362_v18 = vpack.c.bf16 %v3242_v6, %v3242_v6  ;;  %v3112_v44 = vsel %vm2600_vm13, %v1746_v59, %v2856_v51  ;;  %vm2728_vm14 = vcmp.gt.f32.partialorder %v2258_v61, 0.0  ;;  %v2984_v13 = vmul.f32 0.2, %v2258_v61 }
 0x16c   : > { %4518 = vst.msk [vmem:[%s6248_s29 + $0x2d4] sm:$0xf] %vm4336_vm3, %v5357_v56  ;;  %v5232_v12 = vpack.c.bf16 %v3112_v44, %v3112_v44  ;;  %v2269_v1 = vadd.f32 %v6631_v45, %v6799_v17  ;;  %4395 = vst.msk [vmem:[%s6248_s29 + $0xe8] sm:$0xf] %vm4336_vm3, %v5234_v32  ;;  %vm2603_vm15 = vcmp.gt.f32.partialorder %v1757_v22, 0.0  ;;  %v1749_v31 = vadd.f32 %v6631_v45, %v6813_v28  ;;  %v6971_v34 = vpop.f32.mrf.mxu0  ;;  %v6973_v62 = vpop.f32.mrf.mxu1 }
 0x16d   : > { %4523 = vst.msk [vmem:[%s6248_s29 + $0x2e8] sm:$0xf] %vm4336_vm3, %v5362_v18  ;;  %v2859_v16 = vmul.f32 0.2, %v1757_v22  ;;  %v2261_v20 = vadd.f32 %v6631_v45, %v6815_v52  ;;  %v3240_v17 = vsel %vm2728_vm14, %v2258_v61, %v2984_v13  ;;  %v1770_v58 = vadd.f32 %v6631_v45, %v6821_v38 }
 0x16e   : > { %4393 = vst.msk [vmem:[%s6248_s29 + $0xe0] sm:$0xf] %vm4336_vm3, %v5232_v12  ;;  %vm2731_vm1 = vcmp.gt.f32.partialorder %v2269_v1, 0.0  ;;  %v2987_v27 = vmul.f32 0.2, %v2269_v1  ;;  %v5360_v7 = vpack.c.bf16 %v3240_v17, %v3240_v17  ;;  %vm2601_vm2 = vcmp.gt.f32.partialorder %v1749_v31, 0.0  ;;  %v6979_v59 = vpop.f32.mrf.mxu0  ;;  %v6981_v52 = vpop.f32.mrf.mxu1 }
 0x16f   : > { %v3115_v9 = vsel %vm2603_vm15, %v1757_v22, %v2859_v16  ;;  %v2857_v28 = vmul.f32 0.2, %v1749_v31  ;;  %vm2729_vm4 = vcmp.gt.f32.partialorder %v2261_v20, 0.0  ;;  %v2985_v29 = vmul.f32 0.2, %v2261_v20 }
 0x170   : > { %v5235_v55 = vpack.c.bf16 %v3115_v9, %v3115_v9  ;;  %v3243_v3 = vsel %vm2731_vm1, %v2269_v1, %v2987_v27  ;;  %4521 = vst.msk [vmem:[%s6248_s29 + $0x2e0] sm:$0xf] %vm4336_vm3, %v5360_v7  ;;  %vm2606_vm0 = vcmp.gt.f32.partialorder %v1770_v58, 0.0  ;;  %v2862_v38 = vmul.f32 0.2, %v1770_v58  ;;  %v6985_v57 = vpop.f32.mrf.mxu0  ;;  %v6987_v0 = vpop.f32.mrf.mxu1 }
 0x171   : > { %v5363_v37 = vpack.c.bf16 %v3243_v3, %v3243_v3  ;;  %v3113_v25 = vsel %vm2601_vm2, %v1749_v31, %v2857_v28  ;;  %v3241_v14 = vsel %vm2729_vm4, %v2261_v20, %v2985_v29  ;;  %v2282_v46 = vadd.f32 %v6631_v45, %v6823_v30 }
 0x172   : > { %4396 = vst.msk [vmem:[%s6248_s29 + $0xec] sm:$0xf] %vm4336_vm3, %v5235_v55  ;;  %v5233_v35 = vpack.c.bf16 %v3113_v25, %v3113_v25  ;;  %v1762_v51 = vadd.f32 %v6631_v45, %v6827_v48  ;;  %v5361_v56 = vpack.c.bf16 %v3241_v14, %v3241_v14  ;;  %v3118_v24 = vsel %vm2606_vm0, %v1770_v58, %v2862_v38  ;;  %v7001_v32 = vpop.f32.mrf.mxu0  ;;  %v7003_v18 = vpop.f32.mrf.mxu1 }
 0x173   : > { %4524 = vst.msk [vmem:[%s6248_s29 + $0x2ec] sm:$0xf] %vm4336_vm3, %v5363_v37  ;;  %v2274_v6 = vadd.f32 %v6631_v45, %v6829_v47  ;;  %v1773_v61 = vadd.f32 %v6631_v45, %v6843_v53  ;;  %v5238_v30 = vpack.c.bf16 %v3118_v24, %v3118_v24  ;;  %vm2734_vm5 = vcmp.gt.f32.partialorder %v2282_v46, 0.0 }
 0x174   : > { %4394 = vst.msk [vmem:[%s6248_s29 + $0xe4] sm:$0xf] %vm4336_vm3, %v5233_v35  ;;  %v2990_v48 = vmul.f32 0.2, %v2282_v46  ;;  %vm2604_vm6 = vcmp.gt.f32.partialorder %v1762_v51, 0.0  ;;  %v7009_v47 = vpop.f32.mrf.mxu0  ;;  %v7011_v12 = vpop.f32.mrf.mxu1  ;;  %v2285_v1 = vadd.f32 %v6631_v45, %v6845_v33  ;;  %v1765_v16 = vadd.f32 %v6631_v45, %v6851_v49 }
 0x175   : > { %4522 = vst.msk [vmem:[%s6248_s29 + $0x2e4] sm:$0xf] %vm4336_vm3, %v5361_v56  ;;  %v2860_v44 = vmul.f32 0.2, %v1762_v51  ;;  %vm2732_vm7 = vcmp.gt.f32.partialorder %v2274_v6, 0.0  ;;  %vm2607_vm8 = vcmp.gt.f32.partialorder %v1773_v61, 0.0  ;;  %v2277_v27 = vadd.f32 %v6631_v45, %v6853_v10 }
 0x176   : > { %v2988_v22 = vmul.f32 0.2, %v2274_v6  ;;  %4399 = vst.msk [vmem:[%s6248_s29 + $0xf8] sm:$0xf] %vm4336_vm3, %v5238_v30  ;;  %v3246_v53 = vsel %vm2734_vm5, %v2282_v46, %v2990_v48  ;;  %v2863_v13 = vmul.f32 0.2, %v1773_v61  ;;  %v7021_v58 = vpop.f32.mrf.mxu0  ;;  %v7023_v7 = vpop.f32.mrf.mxu1  ;;  %v1786_v25 = vadd.f32 %v6631_v45, %v6863_v42 }
 0x177   : > { %v5366_v31 = vpack.c.bf16 %v3246_v53, %v3246_v53  ;;  %v3116_v20 = vsel %vm2604_vm6, %v1762_v51, %v2860_v44  ;;  %vm2735_vm9 = vcmp.gt.f32.partialorder %v2285_v1, 0.0  ;;  %v2991_v55 = vmul.f32 0.2, %v2285_v1 }
 0x178   : > { %v3244_v17 = vsel %vm2732_vm7, %v2274_v6, %v2988_v22  ;;  %v5236_v9 = vpack.c.bf16 %v3116_v20, %v3116_v20  ;;  %v3119_v33 = vsel %vm2607_vm8, %v1773_v61, %v2863_v13  ;;  %vm2605_vm10 = vcmp.gt.f32.partialorder %v1765_v16, 0.0  ;;  %v7028_v29 = vpop.f32.mrf.mxu0  ;;  %v7030_v37 = vpop.f32.mrf.mxu1 }
 0x179   : > { %v5364_v28 = vpack.c.bf16 %v3244_v17, %v3244_v17  ;;  %4527 = vst.msk [vmem:[%s6248_s29 + $0x2f8] sm:$0xf] %vm4336_vm3, %v5366_v31  ;;  %v5239_v49 = vpack.c.bf16 %v3119_v33, %v3119_v33  ;;  %v2861_v3 = vmul.f32 0.2, %v1765_v16  ;;  %vm2733_vm11 = vcmp.gt.f32.partialorder %v2277_v27, 0.0 }
 0x17a   : > { %4397 = vst.msk [vmem:[%s6248_s29 + $0xf0] sm:$0xf] %vm4336_vm3, %v5236_v9  ;;  %v2989_v10 = vmul.f32 0.2, %v2277_v27  ;;  %v2298_v38 = vadd.f32 %v6631_v45, %v6865_v23  ;;  %v3247_v35 = vsel %vm2735_vm9, %v2285_v1, %v2991_v55  ;;  %v1778_v46 = vadd.f32 %v6631_v45, %v6870_v41  ;;  %v7046_v56 = vpop.f32.mrf.mxu0  ;;  %v7048_v24 = vpop.f32.mrf.mxu1 }
 0x17b   : > { %4525 = vst.msk [vmem:[%s6248_s29 + $0x2f0] sm:$0xf] %vm4336_vm3, %v5364_v28  ;;  %4400 = vst.msk [vmem:[%s6248_s29 + $0xfc] sm:$0xf] %vm4336_vm3, %v5239_v49  ;;  %v3117_v14 = vsel %vm2605_vm10, %v1765_v16, %v2861_v3  ;;  %v2290_v51 = vadd.f32 %v6631_v45, %v6872_v19  ;;  %v5367_v42 = vpack.c.bf16 %v3247_v35, %v3247_v35  ;;  %vm2610_vm12 = vcmp.gt.f32.partialorder %v1786_v25, 0.0 }
 0x17c   : > { %v5237_v6 = vpack.c.bf16 %v3117_v14, %v3117_v14  ;;  %v3245_v23 = vsel %vm2733_vm11, %v2277_v27, %v2989_v10  ;;  %v2866_v30 = vmul.f32 0.2, %v1786_v25  ;;  %vm2738_vm13 = vcmp.gt.f32.partialorder %v2298_v38, 0.0  ;;  %v7050_v44 = vpop.f32.mrf.mxu0  ;;  %v7052_v22 = vpop.f32.mrf.mxu1 }
 0x17d   : > { %v5365_v61 = vpack.c.bf16 %v3245_v23, %v3245_v23  ;;  %v2994_v48 = vmul.f32 0.2, %v2298_v38  ;;  %4528 = vst.msk [vmem:[%s6248_s29 + $0x2fc] sm:$0xf] %vm4336_vm3, %v5367_v42  ;;  %vm2608_vm14 = vcmp.gt.f32.partialorder %v1778_v46, 0.0  ;;  %vm2736_vm15 = vcmp.gt.f32.partialorder %v2290_v51, 0.0 }
 0x17e   : > { %4398 = vst.msk [vmem:[%s6248_s29 + $0xf4] sm:$0xf] %vm4336_vm3, %v5237_v6  ;;  %v2864_v41 = vmul.f32 0.2, %v1778_v46  ;;  %v2992_v19 = vmul.f32 0.2, %v2290_v51  ;;  %v3122_v53 = vsel %vm2610_vm12, %v1786_v25, %v2866_v30  ;;  %v1789_v1 = vadd.f32 %v6631_v45, %v6888_v43  ;;  %v7064_v31 = vpop.f32.mrf.mxu0  ;;  %v7066_v20 = vpop.f32.mrf.mxu1 }
 0x17f   : > { %4526 = vst.msk [vmem:[%s6248_s29 + $0x2f4] sm:$0xf] %vm4336_vm3, %v5365_v61  ;;  %v3250_v13 = vsel %vm2738_vm13, %v2298_v38, %v2994_v48  ;;  %v2301_v16 = vadd.f32 %v6631_v45, %v6890_v60  ;;  %v5242_v17 = vpack.c.bf16 %v3122_v53, %v3122_v53  ;;  %v1781_v10 = vadd.f32 %v6631_v45, %v6892_v63 }
 0x180   : > { %v5370_v27 = vpack.c.bf16 %v3250_v13, %v3250_v13  ;;  %v3120_v9 = vsel %vm2608_vm14, %v1778_v46, %v2864_v41  ;;  %v3248_v28 = vsel %vm2736_vm15, %v2290_v51, %v2992_v19  ;;  %vm2611_vm1 = vcmp.gt.f32.partialorder %v1789_v1, 0.0  ;;  %v7068_v3 = vpop.f32.mrf.mxu0  ;;  %v7070_v43 = vpop.f32.mrf.mxu1 }
 0x181   : > { %v5240_v33 = vpack.c.bf16 %v3120_v9, %v3120_v9  ;;  %v5368_v49 = vpack.c.bf16 %v3248_v28, %v3248_v28  ;;  %v2867_v55 = vmul.f32 0.2, %v1789_v1  ;;  %4403 = vst.msk [vmem:[%s6248_s29 + $0x108] sm:$0xf] %vm4336_vm3, %v5242_v17  ;;  %vm2739_vm2 = vcmp.gt.f32.partialorder %v2301_v16, 0.0 }
 0x182   : > { %4531 = vst.msk [vmem:[%s6248_s29 + $0x308] sm:$0xf] %vm4336_vm3, %v5370_v27  ;;  %v2995_v60 = vmul.f32 0.2, %v2301_v16  ;;  %v2293_v25 = vadd.f32 %v6631_v45, %v6894_v8  ;;  %v1802_v35 = vadd.f32 %v6631_v45, %v6906_v2  ;;  %v2314_v14 = vadd.f32 %v6631_v45, %v6908_v26  ;;  %v7090_v51 = vpop.f32.mrf.mxu0  ;;  %v7092_v63 = vpop.f32.mrf.mxu1  ;;  %v7110_v27 = vld [vmem:[%s7716_s2] ss:$0 sm:$0xff] }
 0x183   : > { %4401 = vst.msk [vmem:[%s6248_s29 + $0x100] sm:$0xf] %vm4336_vm3, %v5240_v33  ;;  %4529 = vst.msk [vmem:[%s6248_s29 + $0x300] sm:$0xf] %vm4336_vm3, %v5368_v49  ;;  %v3123_v38 = vsel %vm2611_vm1, %v1789_v1, %v2867_v55  ;;  %v1794_v46 = vadd.f32 %v6631_v45, %v6910_v21  ;;  %vm2609_vm4 = vcmp.gt.f32.partialorder %v1781_v10, 0.0  ;;  %v2306_v9 = vadd.f32 %v7110_v27, %v6912_v36 }
 0x184   : > { %v5243_v8 = vpack.c.bf16 %v3123_v38, %v3123_v38  ;;  %v3251_v42 = vsel %vm2739_vm2, %v2301_v16, %v2995_v60  ;;  %v2865_v6 = vmul.f32 0.2, %v1781_v10  ;;  %vm2737_vm0 = vcmp.gt.f32.partialorder %v2293_v25, 0.0  ;;  %v7094_v2 = vpop.f32.mrf.mxu0  ;;  %v7096_v30 = vpop.f32.mrf.mxu1 }
 0x185   : > { %v5371_v23 = vpack.c.bf16 %v3251_v42, %v3251_v42  ;;  %v2993_v61 = vmul.f32 0.2, %v2293_v25  ;;  %vm2614_vm5 = vcmp.gt.f32.partialorder %v1802_v35, 0.0  ;;  %v2870_v26 = vmul.f32 0.2, %v1802_v35 }
 0x186   : > { %4404 = vst.msk [vmem:[%s6248_s29 + $0x10c] sm:$0xf] %vm4336_vm3, %v5243_v8  ;;  %v3121_v45 = vsel %vm2609_vm4, %v1781_v10, %v2865_v6  ;;  %vm2742_vm6 = vcmp.gt.f32.partialorder %v2314_v14, 0.0  ;;  %v2998_v21 = vmul.f32 0.2, %v2314_v14  ;;  %vm2612_vm7 = vcmp.gt.f32.partialorder %v1794_v46, 0.0  ;;  %v7102_v53 = vpop.f32.mrf.mxu0  ;;  %v7104_v13 = vpop.f32.mrf.mxu1 }
 0x187   : > { %4532 = vst.msk [vmem:[%s6248_s29 + $0x30c] sm:$0xf] %vm4336_vm3, %v5371_v23  ;;  %v5241_v48 = vpack.c.bf16 %v3121_v45, %v3121_v45  ;;  %v3249_v41 = vsel %vm2737_vm0, %v2293_v25, %v2993_v61  ;;  %v2868_v19 = vmul.f32 0.2, %v1794_v46  ;;  %v3126_v16 = vsel %vm2614_vm5, %v1802_v35, %v2870_v26 }
 0x188   : > { %v5369_v1 = vpack.c.bf16 %v3249_v41, %v3249_v41  ;;  %v3254_v17 = vsel %vm2742_vm6, %v2314_v14, %v2998_v21  ;;  %v5246_v28 = vpack.c.bf16 %v3126_v16, %v3126_v16  ;;  %v1805_v55 = vadd.f32 %v7110_v27, %v6932_v40  ;;  %v7118_v60 = vpop.f32.mrf.mxu0  ;;  %v7120_v10 = vpop.f32.mrf.mxu1 }
 0x189   : > { %4402 = vst.msk [vmem:[%s6248_s29 + $0x104] sm:$0xf] %vm4336_vm3, %v5241_v48  ;;  %v5374_v33 = vpack.c.bf16 %v3254_v17, %v3254_v17  ;;  %v3124_v49 = vsel %vm2612_vm7, %v1794_v46, %v2868_v19  ;;  %vm2740_vm8 = vcmp.gt.f32.partialorder %v2306_v9, 0.0  ;;  %v2996_v38 = vmul.f32 0.2, %v2306_v9 }
 0x18a   : > { %4530 = vst.msk [vmem:[%s6248_s29 + $0x304] sm:$0xf] %vm4336_vm3, %v5369_v1  ;;  %v5244_v25 = vpack.c.bf16 %v3124_v49, %v3124_v49  ;;  %v2317_v36 = vadd.f32 %v7110_v27, %v6934_v50  ;;  %4407 = vst.msk [vmem:[%s6248_s29 + $0x118] sm:$0xf] %vm4336_vm3, %v5246_v28  ;;  %vm2615_vm9 = vcmp.gt.f32.partialorder %v1805_v55, 0.0  ;;  %v1797_v40 = vadd.f32 %v7110_v27, %v6936_v54  ;;  %v7134_v46 = vpop.f32.mrf.mxu0  ;;  %v7136_v8 = vpop.f32.mrf.mxu1 }
 0x18b   : > { %4535 = vst.msk [vmem:[%s6248_s29 + $0x318] sm:$0xf] %vm4336_vm3, %v5374_v33  ;;  %v2871_v35 = vmul.f32 0.2, %v1805_v55  ;;  %v2309_v14 = vadd.f32 %v7110_v27, %v6938_v39  ;;  %v3252_v50 = vsel %vm2740_vm8, %v2306_v9, %v2996_v38  ;;  %v1818_v6 = vadd.f32 %v7110_v27, %v6944_v4 }
 0x18c   : > { %4405 = vst.msk [vmem:[%s6248_s29 + $0x110] sm:$0xf] %vm4336_vm3, %v5244_v25  ;;  %vm2743_vm10 = vcmp.gt.f32.partialorder %v2317_v36, 0.0  ;;  %v2999_v42 = vmul.f32 0.2, %v2317_v36  ;;  %v5372_v23 = vpack.c.bf16 %v3252_v50, %v3252_v50  ;;  %vm2613_vm11 = vcmp.gt.f32.partialorder %v1797_v40, 0.0  ;;  %v7142_v45 = vpop.f32.mrf.mxu0  ;;  %v7144_v39 = vpop.f32.mrf.mxu1 }
 0x18d   : > { %v3127_v61 = vsel %vm2615_vm9, %v1805_v55, %v2871_v35  ;;  %v2869_v54 = vmul.f32 0.2, %v1797_v40  ;;  %vm2741_vm12 = vcmp.gt.f32.partialorder %v2309_v14, 0.0  ;;  %v2997_v48 = vmul.f32 0.2, %v2309_v14 }
 0x18e   : > { %v5247_v26 = vpack.c.bf16 %v3127_v61, %v3127_v61  ;;  %v3255_v21 = vsel %vm2743_vm10, %v2317_v36, %v2999_v42  ;;  %4533 = vst.msk [vmem:[%s6248_s29 + $0x310] sm:$0xf] %vm4336_vm3, %v5372_v23  ;;  %vm2618_vm13 = vcmp.gt.f32.partialorder %v1818_v6, 0.0  ;;  %v2874_v4 = vmul.f32 0.2, %v1818_v6  ;;  %v7148_v1 = vpop.f32.mrf.mxu0  ;;  %v7150_v16 = vpop.f32.mrf.mxu1 }
 0x18f   : > { %v5375_v41 = vpack.c.bf16 %v3255_v21, %v3255_v21  ;;  %v3125_v19 = vsel %vm2613_vm11, %v1797_v40, %v2869_v54  ;;  %v3253_v9 = vsel %vm2741_vm12, %v2309_v14, %v2997_v48  ;;  %v2330_v28 = vadd.f32 %v7110_v27, %v6946_v15 }
 0x190   : > { %4408 = vst.msk [vmem:[%s6248_s29 + $0x11c] sm:$0xf] %vm4336_vm3, %v5247_v26  ;;  %v5245_v17 = vpack.c.bf16 %v3125_v19, %v3125_v19  ;;  %v1810_v33 = vadd.f32 %v7110_v27, %v6955_v5  ;;  %v5373_v49 = vpack.c.bf16 %v3253_v9, %v3253_v9  ;;  %v3130_v55 = vsel %vm2618_vm13, %v1818_v6, %v2874_v4  ;;  %v7164_v36 = vpop.f32.mrf.mxu0  ;;  %v7166_v35 = vpop.f32.mrf.mxu1 }
 0x191   : > { %4536 = vst.msk [vmem:[%s6248_s29 + $0x31c] sm:$0xf] %vm4336_vm3, %v5375_v41  ;;  %v2322_v25 = vadd.f32 %v7110_v27, %v6957_v11  ;;  %v1821_v38 = vadd.f32 %v7110_v27, %v6971_v34  ;;  %v5250_v15 = vpack.c.bf16 %v3130_v55, %v3130_v55  ;;  %vm2746_vm14 = vcmp.gt.f32.partialorder %v2330_v28, 0.0 }
 0x192   : > { %4406 = vst.msk [vmem:[%s6248_s29 + $0x114] sm:$0xf] %vm4336_vm3, %v5245_v17  ;;  %v3002_v5 = vmul.f32 0.2, %v2330_v28  ;;  %vm2616_vm15 = vcmp.gt.f32.partialorder %v1810_v33, 0.0  ;;  %v7172_v11 = vpop.f32.mrf.mxu0  ;;  %v7174_v50 = vpop.f32.mrf.mxu1  ;;  %v2333_v6 = vadd.f32 %v7110_v27, %v6973_v62  ;;  %v1813_v23 = vadd.f32 %v7110_v27, %v6979_v59 }
 0x193   : > { %4534 = vst.msk [vmem:[%s6248_s29 + $0x314] sm:$0xf] %vm4336_vm3, %v5373_v49  ;;  %v2872_v40 = vmul.f32 0.2, %v1810_v33  ;;  %vm2744_vm1 = vcmp.gt.f32.partialorder %v2322_v25, 0.0  ;;  %vm2619_vm2 = vcmp.gt.f32.partialorder %v1821_v38, 0.0  ;;  %v2325_v21 = vadd.f32 %v7110_v27, %v6981_v52 }
 0x194   : > { %v3000_v14 = vmul.f32 0.2, %v2322_v25  ;;  %4411 = vst.msk [vmem:[%s6248_s29 + $0x128] sm:$0xf] %vm4336_vm3, %v5250_v15  ;;  %v3258_v34 = vsel %vm2746_vm14, %v2330_v28, %v3002_v5  ;;  %v2875_v42 = vmul.f32 0.2, %v1821_v38  ;;  %v7184_v48 = vpop.f32.mrf.mxu0  ;;  %v7186_v41 = vpop.f32.mrf.mxu1  ;;  %v1834_v49 = vadd.f32 %v7110_v27, %v6985_v57 }
 0x195   : > { %v5378_v61 = vpack.c.bf16 %v3258_v34, %v3258_v34  ;;  %v3128_v54 = vsel %vm2616_vm15, %v1810_v33, %v2872_v40  ;;  %vm2747_vm4 = vcmp.gt.f32.partialorder %v2333_v6, 0.0  ;;  %v3003_v17 = vmul.f32 0.2, %v2333_v6 }
 0x196   : > { %v3256_v26 = vsel %vm2744_vm1, %v2322_v25, %v3000_v14  ;;  %v5248_v19 = vpack.c.bf16 %v3128_v54, %v3128_v54  ;;  %v3131_v62 = vsel %vm2619_vm2, %v1821_v38, %v2875_v42  ;;  %vm2617_vm0 = vcmp.gt.f32.partialorder %v1813_v23, 0.0  ;;  %v7191_v28 = vpop.f32.mrf.mxu0  ;;  %v7193_v33 = vpop.f32.mrf.mxu1 }
 0x197   : > { %v5376_v4 = vpack.c.bf16 %v3256_v26, %v3256_v26  ;;  %4539 = vst.msk [vmem:[%s6248_s29 + $0x328] sm:$0xf] %vm4336_vm3, %v5378_v61  ;;  %v5251_v59 = vpack.c.bf16 %v3131_v62, %v3131_v62  ;;  %v2873_v9 = vmul.f32 0.2, %v1813_v23  ;;  %vm2745_vm5 = vcmp.gt.f32.partialorder %v2325_v21, 0.0 }
 0x198   : > { %4409 = vst.msk [vmem:[%s6248_s29 + $0x120] sm:$0xf] %vm4336_vm3, %v5248_v19  ;;  %v3001_v52 = vmul.f32 0.2, %v2325_v21  ;;  %v2346_v55 = vadd.f32 %v7110_v27, %v6987_v0  ;;  %v3259_v25 = vsel %vm2747_vm4, %v2333_v6, %v3003_v17  ;;  %v1826_v15 = vadd.f32 %v7110_v27, %v7001_v32  ;;  %v7209_v40 = vpop.f32.mrf.mxu0  ;;  %v7211_v14 = vpop.f32.mrf.mxu1 }
 0x199   : > { %4537 = vst.msk [vmem:[%s6248_s29 + $0x320] sm:$0xf] %vm4336_vm3, %v5376_v4  ;;  %4412 = vst.msk [vmem:[%s6248_s29 + $0x12c] sm:$0xf] %vm4336_vm3, %v5251_v59  ;;  %v3129_v38 = vsel %vm2617_vm0, %v1813_v23, %v2873_v9  ;;  %v2338_v5 = vadd.f32 %v7110_v27, %v7003_v18  ;;  %v5379_v57 = vpack.c.bf16 %v3259_v25, %v3259_v25  ;;  %vm2622_vm6 = vcmp.gt.f32.partialorder %v1834_v49, 0.0 }
 0x19a   : > { %v5249_v34 = vpack.c.bf16 %v3129_v38, %v3129_v38  ;;  %v3257_v0 = vsel %vm2745_vm5, %v2325_v21, %v3001_v52  ;;  %v2878_v61 = vmul.f32 0.2, %v1834_v49  ;;  %vm2750_vm7 = vcmp.gt.f32.partialorder %v2346_v55, 0.0  ;;  %v7223_v19 = vpop.f32.mrf.mxu0  ;;  %v7225_v4 = vpop.f32.mrf.mxu1 }
 0x19b   : > { %v5377_v42 = vpack.c.bf16 %v3257_v0, %v3257_v0  ;;  %v3006_v6 = vmul.f32 0.2, %v2346_v55  ;;  %4540 = vst.msk [vmem:[%s6248_s29 + $0x32c] sm:$0xf] %vm4336_vm3, %v5379_v57  ;;  %vm2620_vm8 = vcmp.gt.f32.partialorder %v1826_v15, 0.0  ;;  %vm2748_vm9 = vcmp.gt.f32.partialorder %v2338_v5, 0.0 }
 0x19c   : > { %4410 = vst.msk [vmem:[%s6248_s29 + $0x124] sm:$0xf] %vm4336_vm3, %v5249_v34  ;;  %v2876_v32 = vmul.f32 0.2, %v1826_v15  ;;  %v3004_v18 = vmul.f32 0.2, %v2338_v5  ;;  %v3134_v23 = vsel %vm2622_vm6, %v1834_v49, %v2878_v61  ;;  %v1837_v26 = vadd.f32 %v7110_v27, %v7009_v47  ;;  %v7247_v34 = vpop.f32.mrf.mxu1 }
 0x19d   : > { %4538 = vst.msk [vmem:[%s6248_s29 + $0x324] sm:$0xf] %vm4336_vm3, %v5377_v42  ;;  %v3262_v54 = vsel %vm2750_vm7, %v2346_v55, %v3006_v6  ;;  %v2349_v21 = vadd.f32 %v7110_v27, %v7011_v12  ;;  %v5254_v62 = vpack.c.bf16 %v3134_v23, %v3134_v23  ;;  %v1829_v12 = vadd.f32 %v7110_v27, %v7021_v58  ;;  %v7245_v58 = vpop.f32.mrf.mxu0 }
 0x19e   : > { %v5382_v59 = vpack.c.bf16 %v3262_v54, %v3262_v54  ;;  %v3132_v17 = vsel %vm2620_vm8, %v1826_v15, %v2876_v32  ;;  %v3260_v9 = vsel %vm2748_vm9, %v2338_v5, %v3004_v18  ;;  %vm2623_vm10 = vcmp.gt.f32.partialorder %v1837_v26, 0.0 }
 0x19f   : > { %v5252_v52 = vpack.c.bf16 %v3132_v17, %v3132_v17  ;;  %v5380_v25 = vpack.c.bf16 %v3260_v9, %v3260_v9  ;;  %v2879_v49 = vmul.f32 0.2, %v1837_v26  ;;  %4415 = vst.msk [vmem:[%s6248_s29 + $0x138] sm:$0xf] %vm4336_vm3, %v5254_v62  ;;  %vm2751_vm11 = vcmp.gt.f32.partialorder %v2349_v21, 0.0  ;;  %v7253_v54 = vpop.f32.mrf.mxu0 }
 0x1a0   : > { %4543 = vst.msk [vmem:[%s6248_s29 + $0x338] sm:$0xf] %vm4336_vm3, %v5382_v59  ;;  %v3007_v47 = vmul.f32 0.2, %v2349_v21  ;;  %v2341_v55 = vadd.f32 %v7110_v27, %v7023_v7  ;;  %v1850_v15 = vadd.f32 %v7110_v27, %v7028_v29  ;;  %v2362_v5 = vadd.f32 %v7110_v27, %v7030_v37 }
 0x1a1   : > { %4413 = vst.msk [vmem:[%s6248_s29 + $0x130] sm:$0xf] %vm4336_vm3, %v5252_v52  ;;  %4541 = vst.msk [vmem:[%s6248_s29 + $0x330] sm:$0xf] %vm4336_vm3, %v5380_v25  ;;  %v3135_v38 = vsel %vm2623_vm10, %v1837_v26, %v2879_v49  ;;  %v1842_v57 = vadd.f32 %v7110_v27, %v7046_v56  ;;  %vm2621_vm12 = vcmp.gt.f32.partialorder %v1829_v12, 0.0  ;;  %v7255_v26 = vpop.f32.mrf.mxu1  ;;  %v2354_v17 = vadd.f32 %v7110_v27, %v7048_v24 }
 0x1a2   : > { %v5255_v7 = vpack.c.bf16 %v3135_v38, %v3135_v38  ;;  %v3263_v0 = vsel %vm2751_vm11, %v2349_v21, %v3007_v47  ;;  %v2877_v42 = vmul.f32 0.2, %v1829_v12  ;;  %vm2749_vm13 = vcmp.gt.f32.partialorder %v2341_v55, 0.0 }
 0x1a3   : > { %v5383_v61 = vpack.c.bf16 %v3263_v0, %v3263_v0  ;;  %v3005_v6 = vmul.f32 0.2, %v2341_v55  ;;  %vm2626_vm14 = vcmp.gt.f32.partialorder %v1850_v15, 0.0  ;;  %v2882_v37 = vmul.f32 0.2, %v1850_v15 }
 0x1a4   : > { %4416 = vst.msk [vmem:[%s6248_s29 + $0x13c] sm:$0xf] %vm4336_vm3, %v5255_v7  ;;  %v3133_v29 = vsel %vm2621_vm12, %v1829_v12, %v2877_v42  ;;  %vm2754_vm15 = vcmp.gt.f32.partialorder %v2362_v5, 0.0  ;;  %v3010_v56 = vmul.f32 0.2, %v2362_v5  ;;  %vm2624_vm1 = vcmp.gt.f32.partialorder %v1842_v57, 0.0 }
 0x1a5   : > { %4544 = vst.msk [vmem:[%s6248_s29 + $0x33c] sm:$0xf] %vm4336_vm3, %v5383_v61  ;;  %v5253_v32 = vpack.c.bf16 %v3133_v29, %v3133_v29  ;;  %v3261_v18 = vsel %vm2749_vm13, %v2341_v55, %v3005_v6  ;;  %v2880_v23 = vmul.f32 0.2, %v1842_v57  ;;  %v3138_v62 = vsel %vm2626_vm14, %v1850_v15, %v2882_v37  ;;  %v7275_v15 = vpop.f32.mrf.mxu0 }
 0x1a6   : > { %v5381_v21 = vpack.c.bf16 %v3261_v18, %v3261_v18  ;;  %v3266_v59 = vsel %vm2754_vm15, %v2362_v5, %v3010_v56  ;;  %v5258_v9 = vpack.c.bf16 %v3138_v62, %v3138_v62  ;;  %v1853_v49 = vadd.f32 %v7110_v27, %v7050_v44  ;;  %v7277_v5 = vpop.f32.mrf.mxu1 }
 0x1a7   : > { %4414 = vst.msk [vmem:[%s6248_s29 + $0x134] sm:$0xf] %vm4336_vm3, %v5253_v32  ;;  %v5386_v52 = vpack.c.bf16 %v3266_v59, %v3266_v59  ;;  %v3136_v25 = vsel %vm2624_vm1, %v1842_v57, %v2880_v23  ;;  %vm2752_vm2 = vcmp.gt.f32.partialorder %v2354_v17, 0.0  ;;  %v3008_v12 = vmul.f32 0.2, %v2354_v17  ;;  %v7285_v32 = vpop.f32.mrf.mxu0 }
 0x1a8   : > { %4542 = vst.msk [vmem:[%s6248_s29 + $0x334] sm:$0xf] %vm4336_vm3, %v5381_v21  ;;  %v5256_v47 = vpack.c.bf16 %v3136_v25, %v3136_v25  ;;  %v2365_v55 = vadd.f32 %v7110_v27, %v7052_v22  ;;  %4419 = vst.msk [vmem:[%s6248_s29 + $0x148] sm:$0xf] %vm4336_vm3, %v5258_v9  ;;  %vm2627_vm4 = vcmp.gt.f32.partialorder %v1853_v49, 0.0  ;;  %v1845_v38 = vadd.f32 %v7110_v27, %v7064_v31 }
 0x1a9   : > { %4547 = vst.msk [vmem:[%s6248_s29 + $0x348] sm:$0xf] %vm4336_vm3, %v5386_v52  ;;  %v2883_v24 = vmul.f32 0.2, %v1853_v49  ;;  %v2357_v44 = vadd.f32 %v7110_v27, %v7066_v20  ;;  %v3264_v22 = vsel %vm2752_vm2, %v2354_v17, %v3008_v12  ;;  %v1866_v7 = vadd.f32 %v7110_v27, %v7068_v3  ;;  %v7287_v3 = vpop.f32.mrf.mxu1 }
 0x1aa   : > { %4417 = vst.msk [vmem:[%s6248_s29 + $0x140] sm:$0xf] %vm4336_vm3, %v5256_v47  ;;  %vm2755_vm0 = vcmp.gt.f32.partialorder %v2365_v55, 0.0  ;;  %v3011_v57 = vmul.f32 0.2, %v2365_v55  ;;  %v5384_v0 = vpack.c.bf16 %v3264_v22, %v3264_v22  ;;  %vm2625_vm5 = vcmp.gt.f32.partialorder %v1845_v38, 0.0  ;;  %v7305_v47 = vpop.f32.mrf.mxu0 }
 0x1ab   : > { %v3139_v42 = vsel %vm2627_vm4, %v1853_v49, %v2883_v24  ;;  %v2881_v31 = vmul.f32 0.2, %v1845_v38  ;;  %vm2753_vm6 = vcmp.gt.f32.partialorder %v2357_v44, 0.0  ;;  %v3009_v6 = vmul.f32 0.2, %v2357_v44  ;;  %v7307_v12 = vpop.f32.mrf.mxu1 }
 0x1ac   : > { %v5259_v61 = vpack.c.bf16 %v3139_v42, %v3139_v42  ;;  %v3267_v20 = vsel %vm2755_vm0, %v2365_v55, %v3011_v57  ;;  %4545 = vst.msk [vmem:[%s6248_s29 + $0x340] sm:$0xf] %vm4336_vm3, %v5384_v0  ;;  %vm2630_vm7 = vcmp.gt.f32.partialorder %v1866_v7, 0.0  ;;  %v2886_v56 = vmul.f32 0.2, %v1866_v7 }
 0x1ad   : > { %v5387_v29 = vpack.c.bf16 %v3267_v20, %v3267_v20  ;;  %v3137_v37 = vsel %vm2625_vm5, %v1845_v38, %v2881_v31  ;;  %v3265_v23 = vsel %vm2753_vm6, %v2357_v44, %v3009_v6  ;;  %v2378_v21 = vadd.f32 %v7110_v27, %v7070_v43  ;;  %v7321_v20 = vpop.f32.mrf.mxu1 }
 0x1ae   : > { %4420 = vst.msk [vmem:[%s6248_s29 + $0x14c] sm:$0xf] %vm4336_vm3, %v5259_v61  ;;  %v5257_v18 = vpack.c.bf16 %v3137_v37, %v3137_v37  ;;  %v1858_v62 = vadd.f32 %v7110_v27, %v7090_v51  ;;  %v5385_v59 = vpack.c.bf16 %v3265_v23, %v3265_v23  ;;  %v3142_v17 = vsel %vm2630_vm7, %v1866_v7, %v2886_v56 }
 0x1af   : > { %4548 = vst.msk [vmem:[%s6248_s29 + $0x34c] sm:$0xf] %vm4336_vm3, %v5387_v29  ;;  %v2370_v9 = vadd.f32 %v7110_v27, %v7092_v63  ;;  %v1869_v52 = vadd.f32 %v7110_v27, %v7094_v2  ;;  %v5262_v25 = vpack.c.bf16 %v3142_v17, %v3142_v17  ;;  %vm2758_vm8 = vcmp.gt.f32.partialorder %v2378_v21, 0.0 }
 0x1b0   : > { %4418 = vst.msk [vmem:[%s6248_s29 + $0x144] sm:$0xf] %vm4336_vm3, %v5257_v18  ;;  %v3014_v49 = vmul.f32 0.2, %v2378_v21  ;;  %vm2628_vm9 = vcmp.gt.f32.partialorder %v1858_v62, 0.0  ;;  %v2381_v55 = vadd.f32 %v7110_v27, %v7096_v30  ;;  %v1861_v24 = vadd.f32 %v7110_v27, %v7102_v53  ;;  %v7319_v53 = vpop.f32.mrf.mxu0 }
 0x1b1   : > { %4546 = vst.msk [vmem:[%s6248_s29 + $0x344] sm:$0xf] %vm4336_vm3, %v5385_v59  ;;  %v2884_v43 = vmul.f32 0.2, %v1858_v62  ;;  %vm2756_vm10 = vcmp.gt.f32.partialorder %v2370_v9, 0.0  ;;  %vm2631_vm11 = vcmp.gt.f32.partialorder %v1869_v52, 0.0  ;;  %v2373_v57 = vadd.f32 %v7110_v27, %v7104_v13 }
 0x1b2   : > { %v3012_v51 = vmul.f32 0.2, %v2370_v9  ;;  %4423 = vst.msk [vmem:[%s6248_s29 + $0x158] sm:$0xf] %vm4336_vm3, %v5262_v25  ;;  %v3270_v63 = vsel %vm2758_vm8, %v2378_v21, %v3014_v49  ;;  %v2887_v2 = vmul.f32 0.2, %v1869_v52  ;;  %v1882_v6 = vadd.f32 %v7110_v27, %v7118_v60 }
 0x1b3   : > { %v5390_v38 = vpack.c.bf16 %v3270_v63, %v3270_v63  ;;  %v3140_v44 = vsel %vm2628_vm9, %v1858_v62, %v2884_v43  ;;  %vm2759_vm12 = vcmp.gt.f32.partialorder %v2381_v55, 0.0  ;;  %v3015_v30 = vmul.f32 0.2, %v2381_v55 }
 0x1b4   : > { %v3268_v22 = vsel %vm2756_vm10, %v2370_v9, %v3012_v51  ;;  %v5260_v7 = vpack.c.bf16 %v3140_v44, %v3140_v44  ;;  %v3143_v42 = vsel %vm2631_vm11, %v1869_v52, %v2887_v2  ;;  %vm2629_vm13 = vcmp.gt.f32.partialorder %v1861_v24, 0.0  ;;  %v7337_v9 = vpop.f32.mrf.mxu0  ;;  %v7339_v52 = vpop.f32.mrf.mxu1 }
 0x1b5   : > { %v5388_v0 = vpack.c.bf16 %v3268_v22, %v3268_v22  ;;  %4551 = vst.msk [vmem:[%s6248_s29 + $0x358] sm:$0xf] %vm4336_vm3, %v5390_v38  ;;  %v5263_v31 = vpack.c.bf16 %v3143_v42, %v3143_v42  ;;  %v2885_v61 = vmul.f32 0.2, %v1861_v24  ;;  %vm2757_vm14 = vcmp.gt.f32.partialorder %v2373_v57, 0.0 }
 0x1b6   : > { %4421 = vst.msk [vmem:[%s6248_s29 + $0x150] sm:$0xf] %vm4336_vm3, %v5260_v7  ;;  %v3013_v13 = vmul.f32 0.2, %v2373_v57  ;;  %v2394_v29 = vadd.f32 %v7110_v27, %v7120_v10  ;;  %v3271_v37 = vsel %vm2759_vm12, %v2381_v55, %v3015_v30  ;;  %v1874_v18 = vadd.f32 %v7110_v27, %v7134_v46  ;;  %v7353_v7 = vpop.f32.mrf.mxu1 }
 0x1b7   : > { %4549 = vst.msk [vmem:[%s6248_s29 + $0x350] sm:$0xf] %vm4336_vm3, %v5388_v0  ;;  %4424 = vst.msk [vmem:[%s6248_s29 + $0x15c] sm:$0xf] %vm4336_vm3, %v5263_v31  ;;  %v3141_v56 = vsel %vm2629_vm13, %v1861_v24, %v2885_v61  ;;  %v2386_v23 = vadd.f32 %v7110_v27, %v7136_v8  ;;  %v5391_v21 = vpack.c.bf16 %v3271_v37, %v3271_v37  ;;  %vm2634_vm15 = vcmp.gt.f32.partialorder %v1882_v6, 0.0 }
 0x1b8   : > { %v5261_v62 = vpack.c.bf16 %v3141_v56, %v3141_v56  ;;  %v3269_v59 = vsel %vm2757_vm14, %v2373_v57, %v3013_v13  ;;  %v2890_v17 = vmul.f32 0.2, %v1882_v6  ;;  %vm2762_vm1 = vcmp.gt.f32.partialorder %v2394_v29, 0.0  ;;  %v7351_v57 = vpop.f32.mrf.mxu0  ;;  %v7375_v56 = vpop.f32.mrf.mxu1 }
 0x1b9   : > { %v5389_v60 = vpack.c.bf16 %v3269_v59, %v3269_v59  ;;  %v3018_v10 = vmul.f32 0.2, %v2394_v29  ;;  %4552 = vst.msk [vmem:[%s6248_s29 + $0x35c] sm:$0xf] %vm4336_vm3, %v5391_v21  ;;  %vm2632_vm2 = vcmp.gt.f32.partialorder %v1874_v18, 0.0  ;;  %vm2760_vm4 = vcmp.gt.f32.partialorder %v2386_v23, 0.0 }
 0x1ba   : > { %4422 = vst.msk [vmem:[%s6248_s29 + $0x154] sm:$0xf] %vm4336_vm3, %v5261_v62  ;;  %v2888_v46 = vmul.f32 0.2, %v1874_v18  ;;  %v3016_v8 = vmul.f32 0.2, %v2386_v23  ;;  %v3146_v25 = vsel %vm2634_vm15, %v1882_v6, %v2890_v17  ;;  %v1885_v43 = vadd.f32 %v7110_v27, %v7142_v45  ;;  %v7373_v37 = vpop.f32.mrf.mxu0 }
 0x1bb   : > { %4550 = vst.msk [vmem:[%s6248_s29 + $0x354] sm:$0xf] %vm4336_vm3, %v5389_v60  ;;  %v3274_v49 = vsel %vm2762_vm1, %v2394_v29, %v3018_v10  ;;  %v2397_v51 = vadd.f32 %v7110_v27, %v7144_v39  ;;  %v5266_v63 = vpack.c.bf16 %v3146_v25, %v3146_v25  ;;  %v1877_v39 = vadd.f32 %v7110_v27, %v7148_v1 }
 0x1bc   : > { %v5394_v2 = vpack.c.bf16 %v3274_v49, %v3274_v49  ;;  %v3144_v55 = vsel %vm2632_vm2, %v1874_v18, %v2888_v46  ;;  %v3272_v24 = vsel %vm2760_vm4, %v2386_v23, %v3016_v8  ;;  %vm2635_vm0 = vcmp.gt.f32.partialorder %v1885_v43, 0.0  ;;  %v7387_v49 = vpop.f32.mrf.mxu0 }
 0x1bd   : > { %v5264_v38 = vpack.c.bf16 %v3144_v55, %v3144_v55  ;;  %v5392_v44 = vpack.c.bf16 %v3272_v24, %v3272_v24  ;;  %v2891_v22 = vmul.f32 0.2, %v1885_v43  ;;  %4427 = vst.msk [vmem:[%s6248_s29 + $0x168] sm:$0xf] %vm4336_vm3, %v5266_v63  ;;  %vm2763_vm5 = vcmp.gt.f32.partialorder %v2397_v51, 0.0 }
 0x1be   : > { %4555 = vst.msk [vmem:[%s6248_s29 + $0x368] sm:$0xf] %vm4336_vm3, %v5394_v2  ;;  %v3019_v45 = vmul.f32 0.2, %v2397_v51  ;;  %v2389_v0 = vadd.f32 %v7110_v27, %v7150_v16  ;;  %v1898_v31 = vadd.f32 %v7110_v27, %v7164_v36  ;;  %v2410_v30 = vadd.f32 %v7110_v27, %v7166_v35 }
 0x1bf   : > { %4425 = vst.msk [vmem:[%s6248_s29 + $0x160] sm:$0xf] %vm4336_vm3, %v5264_v38  ;;  %4553 = vst.msk [vmem:[%s6248_s29 + $0x360] sm:$0xf] %vm4336_vm3, %v5392_v44  ;;  %v3147_v42 = vsel %vm2635_vm0, %v1885_v43, %v2891_v22  ;;  %v1890_v61 = vadd.f32 %v7110_v27, %v7172_v11  ;;  %vm2633_vm6 = vcmp.gt.f32.partialorder %v1877_v39, 0.0  ;;  %v2402_v17 = vadd.f32 %v7110_v27, %v7174_v50  ;;  %v7389_v43 = vpop.f32.mrf.mxu1 }
 0x1c0   : > { %v5267_v1 = vpack.c.bf16 %v3147_v42, %v3147_v42  ;;  %v3275_v13 = vsel %vm2763_vm5, %v2397_v51, %v3019_v45  ;;  %v2889_v16 = vmul.f32 0.2, %v1877_v39  ;;  %vm2761_vm7 = vcmp.gt.f32.partialorder %v2389_v0, 0.0 }
 0x1c1   : > { %v5395_v6 = vpack.c.bf16 %v3275_v13, %v3275_v13  ;;  %v3017_v29 = vmul.f32 0.2, %v2389_v0  ;;  %vm2638_vm8 = vcmp.gt.f32.partialorder %v1898_v31, 0.0  ;;  %v2894_v35 = vmul.f32 0.2, %v1898_v31 }
 0x1c2   : > { %4428 = vst.msk [vmem:[%s6248_s29 + $0x16c] sm:$0xf] %vm4336_vm3, %v5267_v1  ;;  %v3145_v36 = vsel %vm2633_vm6, %v1877_v39, %v2889_v16  ;;  %vm2766_vm9 = vcmp.gt.f32.partialorder %v2410_v30, 0.0  ;;  %v3022_v11 = vmul.f32 0.2, %v2410_v30  ;;  %vm2636_vm10 = vcmp.gt.f32.partialorder %v1890_v61, 0.0  ;;  %v7407_v39 = vpop.f32.mrf.mxu0 }
 0x1c3   : > { %4556 = vst.msk [vmem:[%s6248_s29 + $0x36c] sm:$0xf] %vm4336_vm3, %v5395_v6  ;;  %v5265_v18 = vpack.c.bf16 %v3145_v36, %v3145_v36  ;;  %v3273_v23 = vsel %vm2761_vm7, %v2389_v0, %v3017_v29  ;;  %v2892_v21 = vmul.f32 0.2, %v1890_v61  ;;  %v3150_v59 = vsel %vm2638_vm8, %v1898_v31, %v2894_v35 }
 0x1c4   : > { %v5393_v62 = vpack.c.bf16 %v3273_v23, %v3273_v23  ;;  %v3278_v60 = vsel %vm2766_vm9, %v2410_v30, %v3022_v11  ;;  %v5270_v10 = vpack.c.bf16 %v3150_v59, %v3150_v59  ;;  %v1901_v25 = vadd.f32 %v7110_v27, %v7184_v48  ;;  %v7425_v11 = vpop.f32.mrf.mxu0 }
 0x1c5   : > { %4426 = vst.msk [vmem:[%s6248_s29 + $0x164] sm:$0xf] %vm4336_vm3, %v5265_v18  ;;  %v5398_v46 = vpack.c.bf16 %v3278_v60, %v3278_v60  ;;  %v3148_v8 = vsel %vm2636_vm10, %v1890_v61, %v2892_v21  ;;  %vm2764_vm11 = vcmp.gt.f32.partialorder %v2402_v17, 0.0  ;;  %v3020_v63 = vmul.f32 0.2, %v2402_v17 }
 0x1c6   : > { %4554 = vst.msk [vmem:[%s6248_s29 + $0x364] sm:$0xf] %vm4336_vm3, %v5393_v62  ;;  %v5268_v51 = vpack.c.bf16 %v3148_v8, %v3148_v8  ;;  %v2413_v50 = vadd.f32 %v7110_v27, %v7186_v41  ;;  %4431 = vst.msk [vmem:[%s6248_s29 + $0x178] sm:$0xf] %vm4336_vm3, %v5270_v10  ;;  %vm2639_vm12 = vcmp.gt.f32.partialorder %v1901_v25, 0.0  ;;  %v1893_v48 = vadd.f32 %v7110_v27, %v7191_v28  ;;  %v7409_v28 = vpop.f32.mrf.mxu1  ;;  %v7441_v8 = vpop.f32.mrf.mxu0 }
 0x1c7   : > { %4559 = vst.msk [vmem:[%s6248_s29 + $0x378] sm:$0xf] %vm4336_vm3, %v5398_v46  ;;  %v2895_v2 = vmul.f32 0.2, %v1901_v25  ;;  %v2405_v55 = vadd.f32 %v7110_v27, %v7193_v33  ;;  %v3276_v24 = vsel %vm2764_vm11, %v2402_v17, %v3020_v63  ;;  %v1914_v41 = vadd.f32 %v7110_v27, %v7209_v40 }
 0x1c8   : > { %4429 = vst.msk [vmem:[%s6248_s29 + $0x170] sm:$0xf] %vm4336_vm3, %v5268_v51  ;;  %vm2767_vm13 = vcmp.gt.f32.partialorder %v2413_v50, 0.0  ;;  %v3023_v38 = vmul.f32 0.2, %v2413_v50  ;;  %v5396_v44 = vpack.c.bf16 %v3276_v24, %v3276_v24  ;;  %vm2637_vm14 = vcmp.gt.f32.partialorder %v1893_v48, 0.0  ;;  %v7427_v18 = vpop.f32.mrf.mxu1 }
 0x1c9   : > { %v3151_v22 = vsel %vm2639_vm12, %v1901_v25, %v2895_v2  ;;  %v2893_v45 = vmul.f32 0.2, %v1893_v48  ;;  %vm2765_vm15 = vcmp.gt.f32.partialorder %v2405_v55, 0.0  ;;  %v3021_v42 = vmul.f32 0.2, %v2405_v55 }
 0x1ca   : > { %v5271_v33 = vpack.c.bf16 %v3151_v22, %v3151_v22  ;;  %v3279_v0 = vsel %vm2767_vm13, %v2413_v50, %v3023_v38  ;;  %4557 = vst.msk [vmem:[%s6248_s29 + $0x370] sm:$0xf] %vm4336_vm3, %v5396_v44  ;;  %vm2642_vm1 = vcmp.gt.f32.partialorder %v1914_v41, 0.0  ;;  %v2898_v40 = vmul.f32 0.2, %v1914_v41  ;;  %v7443_v25 = vpop.f32.mrf.mxu1  ;;  %v7461_v22 = vpop.f32.mrf.mxu0 }
 0x1cb   : > { %v5399_v31 = vpack.c.bf16 %v3279_v0, %v3279_v0  ;;  %v3149_v30 = vsel %vm2637_vm14, %v1893_v48, %v2893_v45  ;;  %v3277_v1 = vsel %vm2765_vm15, %v2405_v55, %v3021_v42  ;;  %v2426_v13 = vadd.f32 %v7110_v27, %v7211_v14 }
 0x1cc   : > { %4432 = vst.msk [vmem:[%s6248_s29 + $0x17c] sm:$0xf] %vm4336_vm3, %v5271_v33  ;;  %v5269_v61 = vpack.c.bf16 %v3149_v30, %v3149_v30  ;;  %v1906_v16 = vadd.f32 %v7110_v27, %v7223_v19  ;;  %v5397_v6 = vpack.c.bf16 %v3277_v1, %v3277_v1  ;;  %v3154_v29 = vsel %vm2642_vm1, %v1914_v41, %v2898_v40  ;;  %v7463_v45 = vpop.f32.mrf.mxu1 }
 0x1cd   : > { %4560 = vst.msk [vmem:[%s6248_s29 + $0x37c] sm:$0xf] %vm4336_vm3, %v5399_v31  ;;  %v2418_v36 = vadd.f32 %v7110_v27, %v7225_v4  ;;  %v1917_v35 = vadd.f32 %v7110_v27, %v7245_v58  ;;  %v5274_v14 = vpack.c.bf16 %v3154_v29, %v3154_v29  ;;  %vm2770_vm2 = vcmp.gt.f32.partialorder %v2426_v13, 0.0 }
 0x1ce   : > { %4430 = vst.msk [vmem:[%s6248_s29 + $0x174] sm:$0xf] %vm4336_vm3, %v5269_v61  ;;  %v3026_v19 = vmul.f32 0.2, %v2426_v13  ;;  %vm2640_vm4 = vcmp.gt.f32.partialorder %v1906_v16, 0.0  ;;  %v2429_v62 = vadd.f32 %v7110_v27, %v7247_v34  ;;  %v1909_v59 = vadd.f32 %v7110_v27, %v7253_v54 }
 0x1cf   : > { %4558 = vst.msk [vmem:[%s6248_s29 + $0x374] sm:$0xf] %vm4336_vm3, %v5397_v6  ;;  %v2896_v23 = vmul.f32 0.2, %v1906_v16  ;;  %vm2768_vm0 = vcmp.gt.f32.partialorder %v2418_v36, 0.0  ;;  %vm2643_vm5 = vcmp.gt.f32.partialorder %v1917_v35, 0.0  ;;  %v2421_v46 = vadd.f32 %v7110_v27, %v7255_v26 }
 0x1d0   : > { %v3024_v21 = vmul.f32 0.2, %v2418_v36  ;;  %4435 = vst.msk [vmem:[%s6248_s29 + $0x188] sm:$0xf] %vm4336_vm3, %v5274_v14  ;;  %v3282_v4 = vsel %vm2770_vm2, %v2426_v13, %v3026_v19  ;;  %v2899_v58 = vmul.f32 0.2, %v1917_v35  ;;  %v1930_v48 = vadd.f32 %v7110_v27, %v7275_v15  ;;  %v7475_v13 = vpop.f32.mrf.mxu0 }
 0x1d1   : > { %v5402_v60 = vpack.c.bf16 %v3282_v4, %v3282_v4  ;;  %v3152_v17 = vsel %vm2640_vm4, %v1906_v16, %v2896_v23  ;;  %vm2771_vm6 = vcmp.gt.f32.partialorder %v2429_v62, 0.0  ;;  %v3027_v54 = vmul.f32 0.2, %v2429_v62  ;;  %v7477_v16 = vpop.f32.mrf.mxu1 }
 0x1d2   : > { %v3280_v10 = vsel %vm2768_vm0, %v2418_v36, %v3024_v21  ;;  %v5272_v51 = vpack.c.bf16 %v3152_v17, %v3152_v17  ;;  %v3155_v50 = vsel %vm2643_vm5, %v1917_v35, %v2899_v58  ;;  %vm2641_vm7 = vcmp.gt.f32.partialorder %v1909_v59, 0.0 }
 0x1d3   : > { %v5400_v63 = vpack.c.bf16 %v3280_v10, %v3280_v10  ;;  %4563 = vst.msk [vmem:[%s6248_s29 + $0x388] sm:$0xf] %vm4336_vm3, %v5402_v60  ;;  %v5275_v34 = vpack.c.bf16 %v3155_v50, %v3155_v50  ;;  %v2897_v2 = vmul.f32 0.2, %v1909_v59  ;;  %vm2769_vm8 = vcmp.gt.f32.partialorder %v2421_v46, 0.0  ;;  %v7499_v60 = vpop.f32.mrf.mxu1 }
 0x1d4   : > { %4433 = vst.msk [vmem:[%s6248_s29 + $0x180] sm:$0xf] %vm4336_vm3, %v5272_v51  ;;  %v3025_v26 = vmul.f32 0.2, %v2421_v46  ;;  %v2442_v55 = vadd.f32 %v7110_v27, %v7277_v5  ;;  %v3283_v24 = vsel %vm2771_vm6, %v2429_v62, %v3027_v54  ;;  %v1922_v41 = vadd.f32 %v7110_v27, %v7285_v32 }
 0x1d5   : > { %4561 = vst.msk [vmem:[%s6248_s29 + $0x380] sm:$0xf] %vm4336_vm3, %v5400_v63  ;;  %4436 = vst.msk [vmem:[%s6248_s29 + $0x18c] sm:$0xf] %vm4336_vm3, %v5275_v34  ;;  %v3153_v38 = vsel %vm2641_vm7, %v1909_v59, %v2897_v2  ;;  %v2434_v44 = vadd.f32 %v7110_v27, %v7287_v3  ;;  %v5403_v15 = vpack.c.bf16 %v3283_v24, %v3283_v24  ;;  %vm2646_vm9 = vcmp.gt.f32.partialorder %v1930_v48, 0.0  ;;  %v7507_v2 = vpop.f32.mrf.mxu1 }
 0x1d6   : > { %v5273_v33 = vpack.c.bf16 %v3153_v38, %v3153_v38  ;;  %v3281_v5 = vsel %vm2769_vm8, %v2421_v46, %v3025_v26  ;;  %v2902_v42 = vmul.f32 0.2, %v1930_v48  ;;  %vm2774_vm10 = vcmp.gt.f32.partialorder %v2442_v55, 0.0 }
 0x1d7   : > { %v5401_v0 = vpack.c.bf16 %v3281_v5, %v3281_v5  ;;  %v3030_v31 = vmul.f32 0.2, %v2442_v55  ;;  %4564 = vst.msk [vmem:[%s6248_s29 + $0x38c] sm:$0xf] %vm4336_vm3, %v5403_v15  ;;  %vm2644_vm11 = vcmp.gt.f32.partialorder %v1922_v41, 0.0  ;;  %vm2772_vm12 = vcmp.gt.f32.partialorder %v2434_v44, 0.0 }
 0x1d8   : > { %4434 = vst.msk [vmem:[%s6248_s29 + $0x184] sm:$0xf] %vm4336_vm3, %v5273_v33  ;;  %v2900_v32 = vmul.f32 0.2, %v1922_v41  ;;  %v3028_v3 = vmul.f32 0.2, %v2434_v44  ;;  %v3158_v30 = vsel %vm2646_vm9, %v1930_v48, %v2902_v42  ;;  %v1933_v61 = vadd.f32 %v7110_v27, %v7305_v47 }
 0x1d9   : > { %4562 = vst.msk [vmem:[%s6248_s29 + $0x384] sm:$0xf] %vm4336_vm3, %v5401_v0  ;;  %v3286_v40 = vsel %vm2774_vm10, %v2442_v55, %v3030_v31  ;;  %v2445_v1 = vadd.f32 %v7110_v27, %v7307_v12  ;;  %v5278_v6 = vpack.c.bf16 %v3158_v30, %v3158_v30  ;;  %v1925_v12 = vadd.f32 %v7110_v27, %v7319_v53  ;;  %v7497_v53 = vpop.f32.mrf.mxu0 }
 0x1da   : > { %v5406_v29 = vpack.c.bf16 %v3286_v40, %v3286_v40  ;;  %v3156_v36 = vsel %vm2644_vm11, %v1922_v41, %v2900_v32  ;;  %v3284_v35 = vsel %vm2772_vm12, %v2434_v44, %v3028_v3  ;;  %vm2647_vm13 = vcmp.gt.f32.partialorder %v1933_v61, 0.0  ;;  %v7529_v32 = vpop.f32.mrf.mxu1 }
 0x1db   : > { %v5276_v14 = vpack.c.bf16 %v3156_v36, %v3156_v36  ;;  %v5404_v19 = vpack.c.bf16 %v3284_v35, %v3284_v35  ;;  %v2903_v23 = vmul.f32 0.2, %v1933_v61  ;;  %4439 = vst.msk [vmem:[%s6248_s29 + $0x198] sm:$0xf] %vm4336_vm3, %v5278_v6  ;;  %vm2775_vm14 = vcmp.gt.f32.partialorder %v2445_v1, 0.0  ;;  %v7505_v54 = vpop.f32.mrf.mxu0 }
 0x1dc   : > { %4567 = vst.msk [vmem:[%s6248_s29 + $0x398] sm:$0xf] %vm4336_vm3, %v5406_v29  ;;  %v3031_v47 = vmul.f32 0.2, %v2445_v1  ;;  %v2437_v21 = vadd.f32 %v7110_v27, %v7321_v20  ;;  %v1946_v58 = vadd.f32 %v7110_v27, %v7337_v9  ;;  %v2458_v62 = vadd.f32 %v7110_v27, %v7339_v52 }
 0x1dd   : > { %4437 = vst.msk [vmem:[%s6248_s29 + $0x190] sm:$0xf] %vm4336_vm3, %v5276_v14  ;;  %4565 = vst.msk [vmem:[%s6248_s29 + $0x390] sm:$0xf] %vm4336_vm3, %v5404_v19  ;;  %v3159_v4 = vsel %vm2647_vm13, %v1933_v61, %v2903_v23  ;;  %v1938_v59 = vadd.f32 %v7110_v27, %v7351_v57  ;;  %vm2645_vm15 = vcmp.gt.f32.partialorder %v1925_v12, 0.0  ;;  %v2450_v24 = vadd.f32 %v7110_v27, %v7353_v7  ;;  %v7527_v31 = vpop.f32.mrf.mxu0 }
 0x1de   : > { %v5279_v20 = vpack.c.bf16 %v3159_v4, %v3159_v4  ;;  %v3287_v17 = vsel %vm2775_vm14, %v2445_v1, %v3031_v47  ;;  %v2901_v10 = vmul.f32 0.2, %v1925_v12  ;;  %vm2773_vm1 = vcmp.gt.f32.partialorder %v2437_v21, 0.0  ;;  %v7546_v23 = vld [vmem:[%s7716_s2] ss:$0 sm:$0xff] }
 0x1df   : > { %v5407_v46 = vpack.c.bf16 %v3287_v17, %v3287_v17  ;;  %v3029_v51 = vmul.f32 0.2, %v2437_v21  ;;  %vm2650_vm2 = vcmp.gt.f32.partialorder %v1946_v58, 0.0  ;;  %v2906_v52 = vmul.f32 0.2, %v1946_v58  ;;  %v7537_v14 = vpop.f32.mrf.mxu0 }
 0x1e0   : > { %4440 = vst.msk [vmem:[%s6248_s29 + $0x19c] sm:$0xf] %vm4336_vm3, %v5279_v20  ;;  %v3157_v9 = vsel %vm2645_vm15, %v1925_v12, %v2901_v10  ;;  %vm2778_vm4 = vcmp.gt.f32.partialorder %v2458_v62, 0.0  ;;  %v3034_v57 = vmul.f32 0.2, %v2458_v62  ;;  %vm2648_vm0 = vcmp.gt.f32.partialorder %v1938_v59, 0.0 }
 0x1e1   : > { %4568 = vst.msk [vmem:[%s6248_s29 + $0x39c] sm:$0xf] %vm4336_vm3, %v5407_v46  ;;  %v5277_v63 = vpack.c.bf16 %v3157_v9, %v3157_v9  ;;  %v3285_v50 = vsel %vm2773_vm1, %v2437_v21, %v3029_v51  ;;  %v2904_v34 = vmul.f32 0.2, %v1938_v59  ;;  %v3162_v48 = vsel %vm2650_vm2, %v1946_v58, %v2906_v52  ;;  %v7562_v17 = vpop.f32.mrf.mxu0 }
 0x1e2   : > { %v5405_v26 = vpack.c.bf16 %v3285_v50, %v3285_v50  ;;  %v3290_v55 = vsel %vm2778_vm4, %v2458_v62, %v3034_v57  ;;  %v5282_v38 = vpack.c.bf16 %v3162_v48, %v3162_v48  ;;  %v1949_v15 = vadd.f32 %v7110_v27, %v7373_v37 }
 0x1e3   : > { %4438 = vst.msk [vmem:[%s6248_s29 + $0x194] sm:$0xf] %vm4336_vm3, %v5277_v63  ;;  %v5410_v41 = vpack.c.bf16 %v3290_v55, %v3290_v55  ;;  %v3160_v44 = vsel %vm2648_vm0, %v1938_v59, %v2904_v34  ;;  %vm2776_vm5 = vcmp.gt.f32.partialorder %v2450_v24, 0.0  ;;  %v3032_v5 = vmul.f32 0.2, %v2450_v24 }
 0x1e4   : > { %4566 = vst.msk [vmem:[%s6248_s29 + $0x394] sm:$0xf] %vm4336_vm3, %v5405_v26  ;;  %v5280_v33 = vpack.c.bf16 %v3160_v44, %v3160_v44  ;;  %v2461_v0 = vadd.f32 %v7110_v27, %v7375_v56  ;;  %4443 = vst.msk [vmem:[%s6248_s29 + $0x1a8] sm:$0xf] %vm4336_vm3, %v5282_v38  ;;  %vm2651_vm6 = vcmp.gt.f32.partialorder %v1949_v15, 0.0  ;;  %v1941_v42 = vadd.f32 %v7110_v27, %v7387_v49 }
 0x1e5   : > { %4571 = vst.msk [vmem:[%s6248_s29 + $0x3a8] sm:$0xf] %vm4336_vm3, %v5410_v41  ;;  %v2907_v7 = vmul.f32 0.2, %v1949_v15  ;;  %v2453_v37 = vadd.f32 %v7110_v27, %v7389_v43  ;;  %v3288_v56 = vsel %vm2776_vm5, %v2450_v24, %v3032_v5  ;;  %v1962_v30 = vadd.f32 %v7110_v27, %v7407_v39  ;;  %v7539_v27 = vpop.f32.mrf.mxu1 }
 0x1e6   : > { %4441 = vst.msk [vmem:[%s6248_s29 + $0x1a0] sm:$0xf] %vm4336_vm3, %v5280_v33  ;;  %vm2779_vm7 = vcmp.gt.f32.partialorder %v2461_v0, 0.0  ;;  %v3035_v3 = vmul.f32 0.2, %v2461_v0  ;;  %v5408_v40 = vpack.c.bf16 %v3288_v56, %v3288_v56  ;;  %vm2649_vm8 = vcmp.gt.f32.partialorder %v1941_v42, 0.0 }
 0x1e7   : > { %v3163_v61 = vsel %vm2651_vm6, %v1949_v15, %v2907_v7  ;;  %v2905_v49 = vmul.f32 0.2, %v1941_v42  ;;  %vm2777_vm9 = vcmp.gt.f32.partialorder %v2453_v37, 0.0  ;;  %v3033_v6 = vmul.f32 0.2, %v2453_v37  ;;  %v7564_v10 = vpop.f32.mrf.mxu1 }
 0x1e8   : > { %v5283_v1 = vpack.c.bf16 %v3163_v61, %v3163_v61  ;;  %v3291_v43 = vsel %vm2779_vm7, %v2461_v0, %v3035_v3  ;;  %4569 = vst.msk [vmem:[%s6248_s29 + $0x3a0] sm:$0xf] %vm4336_vm3, %v5408_v40  ;;  %vm2654_vm10 = vcmp.gt.f32.partialorder %v1962_v30, 0.0  ;;  %v2910_v35 = vmul.f32 0.2, %v1962_v30 }
 0x1e9   : > { %v5411_v29 = vpack.c.bf16 %v3291_v43, %v3291_v43  ;;  %v3161_v36 = vsel %vm2649_vm8, %v1941_v42, %v2905_v49  ;;  %v3289_v19 = vsel %vm2777_vm9, %v2453_v37, %v3033_v6  ;;  %v2474_v47 = vadd.f32 %v7546_v23, %v7409_v28  ;;  %v7578_v24 = vpop.f32.mrf.mxu1 }
 0x1ea   : > { %4444 = vst.msk [vmem:[%s6248_s29 + $0x1ac] sm:$0xf] %vm4336_vm3, %v5283_v1  ;;  %v5281_v39 = vpack.c.bf16 %v3161_v36, %v3161_v36  ;;  %v1954_v12 = vadd.f32 %v7546_v23, %v7425_v11  ;;  %v5409_v21 = vpack.c.bf16 %v3289_v19, %v3289_v19  ;;  %v3166_v4 = vsel %vm2654_vm10, %v1962_v30, %v2910_v35 }
 0x1eb   : > { %4572 = vst.msk [vmem:[%s6248_s29 + $0x3ac] sm:$0xf] %vm4336_vm3, %v5411_v29  ;;  %v2466_v58 = vadd.f32 %v7546_v23, %v7427_v18  ;;  %v1965_v62 = vadd.f32 %v7546_v23, %v7441_v8  ;;  %v5286_v59 = vpack.c.bf16 %v3166_v4, %v3166_v4  ;;  %vm2782_vm11 = vcmp.gt.f32.partialorder %v2474_v47, 0.0  ;;  %v7596_v3 = vpop.f32.mrf.mxu1 }
 0x1ec   : > { %4442 = vst.msk [vmem:[%s6248_s29 + $0x1a4] sm:$0xf] %vm4336_vm3, %v5281_v39  ;;  %v3038_v20 = vmul.f32 0.2, %v2474_v47  ;;  %vm2652_vm12 = vcmp.gt.f32.partialorder %v1954_v12, 0.0  ;;  %v2477_v46 = vadd.f32 %v7546_v23, %v7443_v25  ;;  %v1957_v51 = vadd.f32 %v7546_v23, %v7461_v22  ;;  %v7576_v22 = vpop.f32.mrf.mxu0 }
 0x1ed   : > { %4570 = vst.msk [vmem:[%s6248_s29 + $0x3a4] sm:$0xf] %vm4336_vm3, %v5409_v21  ;;  %v2908_v28 = vmul.f32 0.2, %v1954_v12  ;;  %vm2780_vm13 = vcmp.gt.f32.partialorder %v2466_v58, 0.0  ;;  %vm2655_vm14 = vcmp.gt.f32.partialorder %v1965_v62, 0.0  ;;  %v2469_v63 = vadd.f32 %v7546_v23, %v7463_v45 }
 0x1ee   : > { %v3036_v11 = vmul.f32 0.2, %v2466_v58  ;;  %4447 = vst.msk [vmem:[%s6248_s29 + $0x1b8] sm:$0xf] %vm4336_vm3, %v5286_v59  ;;  %v3294_v18 = vsel %vm2782_vm11, %v2474_v47, %v3038_v20  ;;  %v2911_v8 = vmul.f32 0.2, %v1965_v62  ;;  %v1978_v38 = vadd.f32 %v7546_v23, %v7475_v13  ;;  %v7594_v56 = vpop.f32.mrf.mxu0  ;;  %v7608_v47 = vpop.f32.mrf.mxu1 }
 0x1ef   : > { %v5414_v9 = vpack.c.bf16 %v3294_v18, %v3294_v18  ;;  %v3164_v52 = vsel %vm2652_vm12, %v1954_v12, %v2908_v28  ;;  %vm2783_vm15 = vcmp.gt.f32.partialorder %v2477_v46, 0.0  ;;  %v3039_v25 = vmul.f32 0.2, %v2477_v46 }
 0x1f0   : > { %v3292_v57 = vsel %vm2780_vm13, %v2466_v58, %v3036_v11  ;;  %v5284_v50 = vpack.c.bf16 %v3164_v52, %v3164_v52  ;;  %v3167_v26 = vsel %vm2655_vm14, %v1965_v62, %v2911_v8  ;;  %vm2653_vm1 = vcmp.gt.f32.partialorder %v1957_v51, 0.0  ;;  %v5691_v19 = vpop.f32.mrf.mxu0  ;;  %v2513_v18 = vpop.f32.mrf.mxu1 }
 0x1f1   : > { %v5412_v34 = vpack.c.bf16 %v3292_v57, %v3292_v57  ;;  %4575 = vst.msk [vmem:[%s6248_s29 + $0x3b8] sm:$0xf] %vm4336_vm3, %v5414_v9  ;;  %v5287_v48 = vpack.c.bf16 %v3167_v26, %v3167_v26  ;;  %v2909_v55 = vmul.f32 0.2, %v1957_v51  ;;  %vm2781_vm2 = vcmp.gt.f32.partialorder %v2469_v63, 0.0 }
 0x1f2   : > { %4445 = vst.msk [vmem:[%s6248_s29 + $0x1b0] sm:$0xf] %vm4336_vm3, %v5284_v50  ;;  %v3037_v45 = vmul.f32 0.2, %v2469_v63  ;;  %v2490_v41 = vadd.f32 %v7546_v23, %v7477_v16  ;;  %v3295_v44 = vsel %vm2783_vm15, %v2477_v46, %v3039_v25  ;;  %v1970_v33 = vadd.f32 %v7546_v23, %v7497_v53  ;;  %v2001_v11 = vpop.f32.mrf.mxu0 }
 0x1f3   : > { %4573 = vst.msk [vmem:[%s6248_s29 + $0x3b0] sm:$0xf] %vm4336_vm3, %v5412_v34  ;;  %4448 = vst.msk [vmem:[%s6248_s29 + $0x1bc] sm:$0xf] %vm4336_vm3, %v5287_v48  ;;  %v3165_v15 = vsel %vm2653_vm1, %v1957_v51, %v2909_v55  ;;  %v2482_v5 = vadd.f32 %v7546_v23, %v7499_v60  ;;  %v5415_v0 = vpack.c.bf16 %v3295_v44, %v3295_v44  ;;  %vm2658_vm4 = vcmp.gt.f32.partialorder %v1978_v38, 0.0  ;;  %v5820_v55 = vpop.f32.mrf.mxu1 }
 0x1f4   : > { %v5285_v7 = vpack.c.bf16 %v3165_v15, %v3165_v15  ;;  %v3293_v42 = vsel %vm2781_vm2, %v2469_v63, %v3037_v45  ;;  %v2914_v37 = vmul.f32 0.2, %v1978_v38  ;;  %vm2786_vm0 = vcmp.gt.f32.partialorder %v2490_v41, 0.0  ;;  %v5692_v25 = vpop.f32.mrf.mxu0 }
 0x1f5   : > { %v5413_v13 = vpack.c.bf16 %v3293_v42, %v3293_v42  ;;  %v3042_v16 = vmul.f32 0.2, %v2490_v41  ;;  %4576 = vst.msk [vmem:[%s6248_s29 + $0x3bc] sm:$0xf] %vm4336_vm3, %v5415_v0  ;;  %vm2656_vm5 = vcmp.gt.f32.partialorder %v1970_v33, 0.0  ;;  %vm2784_vm6 = vcmp.gt.f32.partialorder %v2482_v5, 0.0 }
 0x1f6   : > { %4446 = vst.msk [vmem:[%s6248_s29 + $0x1b4] sm:$0xf] %vm4336_vm3, %v5285_v7  ;;  %v2912_v53 = vmul.f32 0.2, %v1970_v33  ;;  %v3040_v60 = vmul.f32 0.2, %v2482_v5  ;;  %v3170_v30 = vsel %vm2658_vm4, %v1978_v38, %v2914_v37  ;;  %v1981_v61 = vadd.f32 %v7546_v23, %v7505_v54  ;;  %v2004_v42 = vpop.f32.mrf.mxu0 }
 0x1f7   : > { %4574 = vst.msk [vmem:[%s6248_s29 + $0x3b4] sm:$0xf] %vm4336_vm3, %v5413_v13  ;;  %v3298_v40 = vsel %vm2786_vm0, %v2490_v41, %v3042_v16  ;;  %v2493_v49 = vadd.f32 %v7546_v23, %v7507_v2  ;;  %v5290_v1 = vpack.c.bf16 %v3170_v30, %v3170_v30  ;;  %v1973_v2 = vadd.f32 %v7546_v23, %v7527_v31  ;;  %v2516_v13 = vpop.f32.mrf.mxu1 }
 0x1f8   : > { %v5418_v43 = vpack.c.bf16 %v3298_v40, %v3298_v40  ;;  %v3168_v6 = vsel %vm2656_vm5, %v1970_v33, %v2912_v53  ;;  %v3296_v29 = vsel %vm2784_vm6, %v2482_v5, %v3040_v60  ;;  %vm2659_vm7 = vcmp.gt.f32.partialorder %v1981_v61, 0.0 }
 0x1f9   : > { %v5288_v36 = vpack.c.bf16 %v3168_v6, %v3168_v6  ;;  %v5416_v35 = vpack.c.bf16 %v3296_v29, %v3296_v29  ;;  %v2915_v39 = vmul.f32 0.2, %v1981_v61  ;;  %4451 = vst.msk [vmem:[%s6248_s29 + $0x1c8] sm:$0xf] %vm4336_vm3, %v5290_v1  ;;  %vm2787_vm8 = vcmp.gt.f32.partialorder %v2493_v49, 0.0 }
 0x1fa   : > { %4579 = vst.msk [vmem:[%s6248_s29 + $0x3c8] sm:$0xf] %vm4336_vm3, %v5418_v43  ;;  %v3043_v54 = vmul.f32 0.2, %v2493_v49  ;;  %v2485_v12 = vadd.f32 %v7546_v23, %v7529_v32  ;;  %v1994_v4 = vadd.f32 %v7546_v23, %v7537_v14  ;;  %v2506_v58 = vadd.f32 %v7546_v23, %v7539_v27 }
 0x1fb   : > { %4449 = vst.msk [vmem:[%s6248_s29 + $0x1c0] sm:$0xf] %vm4336_vm3, %v5288_v36  ;;  %4577 = vst.msk [vmem:[%s6248_s29 + $0x3c0] sm:$0xf] %vm4336_vm3, %v5416_v35  ;;  %v3171_v21 = vsel %vm2659_vm7, %v1981_v61, %v2915_v39  ;;  %v1986_v62 = vadd.f32 %v7546_v23, %v7562_v17  ;;  %vm2657_vm9 = vcmp.gt.f32.partialorder %v1973_v2, 0.0  ;;  %v2498_v63 = vadd.f32 %v7546_v23, %v7564_v10  ;;  %v5695_v36 = vpop.f32.mrf.mxu0  ;;  %v5823_v35 = vpop.f32.mrf.mxu1 }
 0x1fc   : > { %v5291_v31 = vpack.c.bf16 %v3171_v21, %v3171_v21  ;;  %v3299_v59 = vsel %vm2787_vm8, %v2493_v49, %v3043_v54  ;;  %v2913_v32 = vmul.f32 0.2, %v1973_v2  ;;  %vm2785_vm10 = vcmp.gt.f32.partialorder %v2485_v12, 0.0 }
 0x1fd   : > { %v5419_v20 = vpack.c.bf16 %v3299_v59, %v3299_v59  ;;  %v3041_v28 = vmul.f32 0.2, %v2485_v12  ;;  %vm2662_vm11 = vcmp.gt.f32.partialorder %v1994_v4, 0.0  ;;  %v2918_v8 = vmul.f32 0.2, %v1994_v4 }
 0x1fe   : > { %4452 = vst.msk [vmem:[%s6248_s29 + $0x1cc] sm:$0xf] %vm4336_vm3, %v5291_v31  ;;  %v3169_v14 = vsel %vm2657_vm9, %v1973_v2, %v2913_v32  ;;  %vm2790_vm12 = vcmp.gt.f32.partialorder %v2506_v58, 0.0  ;;  %v3046_v27 = vmul.f32 0.2, %v2506_v58  ;;  %vm2660_vm13 = vcmp.gt.f32.partialorder %v1986_v62, 0.0  ;;  %v2017_v32 = vpop.f32.mrf.mxu0 }
 0x1ff   : > { %4580 = vst.msk [vmem:[%s6248_s29 + $0x3cc] sm:$0xf] %vm4336_vm3, %v5419_v20  ;;  %v5289_v17 = vpack.c.bf16 %v3169_v14, %v3169_v14  ;;  %v3297_v46 = vsel %vm2785_vm10, %v2485_v12, %v3041_v28  ;;  %v2916_v51 = vmul.f32 0.2, %v1986_v62  ;;  %v3174_v52 = vsel %vm2662_vm11, %v1994_v4, %v2918_v8  ;;  %v2529_v20 = vpop.f32.mrf.mxu1 }
 0x200   : > { %v5417_v9 = vpack.c.bf16 %v3297_v46, %v3297_v46  ;;  %v3302_v57 = vsel %vm2790_vm12, %v2506_v58, %v3046_v27  ;;  %v5294_v50 = vpack.c.bf16 %v3174_v52, %v3174_v52  ;;  %v1997_v48 = vadd.f32 %v7546_v23, %v7576_v22 }
 0x201   : > { %4450 = vst.msk [vmem:[%s6248_s29 + $0x1c4] sm:$0xf] %vm4336_vm3, %v5289_v17  ;;  %v5422_v34 = vpack.c.bf16 %v3302_v57, %v3302_v57  ;;  %v3172_v26 = vsel %vm2660_vm13, %v1986_v62, %v2916_v51  ;;  %vm2788_vm14 = vcmp.gt.f32.partialorder %v2498_v63, 0.0  ;;  %v3044_v38 = vmul.f32 0.2, %v2498_v63 }
 0x202   : > { %4578 = vst.msk [vmem:[%s6248_s29 + $0x3c4] sm:$0xf] %vm4336_vm3, %v5417_v9  ;;  %v5292_v45 = vpack.c.bf16 %v3172_v26, %v3172_v26  ;;  %v2509_v41 = vadd.f32 %v7546_v23, %v7578_v24  ;;  %4455 = vst.msk [vmem:[%s6248_s29 + $0x1d8] sm:$0xf] %vm4336_vm3, %v5294_v50  ;;  %vm2663_vm15 = vcmp.gt.f32.partialorder %v1997_v48, 0.0  ;;  %v1989_v44 = vadd.f32 %v7546_v23, %v7594_v56  ;;  %v5696_v50 = vpop.f32.mrf.mxu0 }
 0x203   : > { %4583 = vst.msk [vmem:[%s6248_s29 + $0x3d8] sm:$0xf] %vm4336_vm3, %v5422_v34  ;;  %v2919_v10 = vmul.f32 0.2, %v1997_v48  ;;  %v2501_v22 = vadd.f32 %v7546_v23, %v7596_v3  ;;  %v3300_v15 = vsel %vm2788_vm14, %v2498_v63, %v3044_v38  ;;  %v2010_v24 = vadd.f32 %v7546_v23, %v5691_v19  ;;  %v5824_v34 = vpop.f32.mrf.mxu1 }
 0x204   : > { %4453 = vst.msk [vmem:[%s6248_s29 + $0x1d0] sm:$0xf] %vm4336_vm3, %v5292_v45  ;;  %vm2791_vm1 = vcmp.gt.f32.partialorder %v2509_v41, 0.0  ;;  %v3047_v33 = vmul.f32 0.2, %v2509_v41  ;;  %v5420_v5 = vpack.c.bf16 %v3300_v15, %v3300_v15  ;;  %vm2661_vm2 = vcmp.gt.f32.partialorder %v1989_v44, 0.0 }
 0x205   : > { %v3175_v0 = vsel %vm2663_vm15, %v1997_v48, %v2919_v10  ;;  %v2917_v7 = vmul.f32 0.2, %v1989_v44  ;;  %vm2789_vm4 = vcmp.gt.f32.partialorder %v2501_v22, 0.0  ;;  %v3045_v56 = vmul.f32 0.2, %v2501_v22 }
 0x206   : > { %v5295_v37 = vpack.c.bf16 %v3175_v0, %v3175_v0  ;;  %v3303_v16 = vsel %vm2791_vm1, %v2509_v41, %v3047_v33  ;;  %4581 = vst.msk [vmem:[%s6248_s29 + $0x3d0] sm:$0xf] %vm4336_vm3, %v5420_v5  ;;  %vm2666_vm0 = vcmp.gt.f32.partialorder %v2010_v24, 0.0  ;;  %v2922_v60 = vmul.f32 0.2, %v2010_v24  ;;  %v2532_v5 = vpop.f32.mrf.mxu1 }
 0x207   : > { %v5423_v3 = vpack.c.bf16 %v3303_v16, %v3303_v16  ;;  %v3173_v53 = vsel %vm2661_vm2, %v1989_v44, %v2917_v7  ;;  %v3301_v40 = vsel %vm2789_vm4, %v2501_v22, %v3045_v56  ;;  %v2522_v61 = vadd.f32 %v7546_v23, %v7608_v47 }
 0x208   : > { %4456 = vst.msk [vmem:[%s6248_s29 + $0x1dc] sm:$0xf] %vm4336_vm3, %v5295_v37  ;;  %v5293_v30 = vpack.c.bf16 %v3173_v53, %v3173_v53  ;;  %v2002_v49 = vadd.f32 %v7546_v23, %v2001_v11  ;;  %v5421_v1 = vpack.c.bf16 %v3301_v40, %v3301_v40  ;;  %v3178_v43 = vsel %vm2666_vm0, %v2010_v24, %v2922_v60  ;;  %v2020_v24 = vpop.f32.mrf.mxu0 }
 0x209   : > { %4584 = vst.msk [vmem:[%s6248_s29 + $0x3dc] sm:$0xf] %vm4336_vm3, %v5423_v3  ;;  %v2514_v6 = vadd.f32 %v7546_v23, %v2513_v18  ;;  %v2013_v29 = vadd.f32 %v7546_v23, %v5692_v25  ;;  %v5298_v39 = vpack.c.bf16 %v3178_v43, %v3178_v43  ;;  %vm2794_vm5 = vcmp.gt.f32.partialorder %v2522_v61, 0.0 }
 0x20a   : > { %4454 = vst.msk [vmem:[%s6248_s29 + $0x1d4] sm:$0xf] %vm4336_vm3, %v5293_v30  ;;  %v3050_v19 = vmul.f32 0.2, %v2522_v61  ;;  %vm2664_vm6 = vcmp.gt.f32.partialorder %v2002_v49, 0.0  ;;  %v2525_v21 = vadd.f32 %v7546_v23, %v5820_v55  ;;  %v2005_v4 = vadd.f32 %v7546_v23, %v2004_v42 }
 0x20b   : > { %4582 = vst.msk [vmem:[%s6248_s29 + $0x3d4] sm:$0xf] %vm4336_vm3, %v5421_v1  ;;  %v2920_v47 = vmul.f32 0.2, %v2002_v49  ;;  %vm2792_vm7 = vcmp.gt.f32.partialorder %v2514_v6, 0.0  ;;  %vm2667_vm8 = vcmp.gt.f32.partialorder %v2013_v29, 0.0  ;;  %v2517_v59 = vadd.f32 %v7546_v23, %v2516_v13 }
 0x20c   : > { %v3048_v54 = vmul.f32 0.2, %v2514_v6  ;;  %4459 = vst.msk [vmem:[%s6248_s29 + $0x1e8] sm:$0xf] %vm4336_vm3, %v5298_v39  ;;  %v3306_v2 = vsel %vm2794_vm5, %v2522_v61, %v3050_v19  ;;  %v2923_v12 = vmul.f32 0.2, %v2013_v29  ;;  %v2026_v46 = vadd.f32 %v7546_v23, %v5695_v36 }
 0x20d   : > { %v5426_v58 = vpack.c.bf16 %v3306_v2, %v3306_v2  ;;  %v3176_v62 = vsel %vm2664_vm6, %v2002_v49, %v2920_v47  ;;  %vm2795_vm9 = vcmp.gt.f32.partialorder %v2525_v21, 0.0  ;;  %v3051_v8 = vmul.f32 0.2, %v2525_v21 }
 0x20e   : > { %v3304_v31 = vsel %vm2792_vm7, %v2514_v6, %v3048_v54  ;;  %v5296_v28 = vpack.c.bf16 %v3176_v62, %v3176_v62  ;;  %v3179_v18 = vsel %vm2667_vm8, %v2013_v29, %v2923_v12  ;;  %vm2665_vm10 = vcmp.gt.f32.partialorder %v2005_v4, 0.0 }
 0x20f   : > { %v5424_v11 = vpack.c.bf16 %v3304_v31, %v3304_v31  ;;  %4587 = vst.msk [vmem:[%s6248_s29 + $0x3e8] sm:$0xf] %vm4336_vm3, %v5426_v58  ;;  %v5299_v14 = vpack.c.bf16 %v3179_v18, %v3179_v18  ;;  %v2921_v27 = vmul.f32 0.2, %v2005_v4  ;;  %vm2793_vm11 = vcmp.gt.f32.partialorder %v2517_v59, 0.0 }
 0x210   : > { %4457 = vst.msk [vmem:[%s6248_s29 + $0x1e0] sm:$0xf] %vm4336_vm3, %v5296_v28  ;;  %v3049_v17 = vmul.f32 0.2, %v2517_v59  ;;  %v2538_v51 = vadd.f32 %v7546_v23, %v5823_v35  ;;  %v3307_v9 = vsel %vm2795_vm9, %v2525_v21, %v3051_v8  ;;  %v2018_v57 = vadd.f32 %v7546_v23, %v2017_v32 }
 0x211   : > { %4585 = vst.msk [vmem:[%s6248_s29 + $0x3e0] sm:$0xf] %vm4336_vm3, %v5424_v11  ;;  %4460 = vst.msk [vmem:[%s6248_s29 + $0x1ec] sm:$0xf] %vm4336_vm3, %v5299_v14  ;;  %v3177_v52 = vsel %vm2665_vm10, %v2005_v4, %v2921_v27  ;;  %v2530_v63 = vadd.f32 %v7546_v23, %v2529_v20  ;;  %v5427_v26 = vpack.c.bf16 %v3307_v9, %v3307_v9  ;;  %vm2670_vm12 = vcmp.gt.f32.partialorder %v2026_v46, 0.0 }
 0x212   : > { %v5297_v48 = vpack.c.bf16 %v3177_v52, %v3177_v52  ;;  %v3305_v25 = vsel %vm2793_vm11, %v2517_v59, %v3049_v17  ;;  %v2926_v45 = vmul.f32 0.2, %v2026_v46  ;;  %vm2798_vm13 = vcmp.gt.f32.partialorder %v2538_v51, 0.0 }
 0x213   : > { %v5425_v55 = vpack.c.bf16 %v3305_v25, %v3305_v25  ;;  %v3054_v38 = vmul.f32 0.2, %v2538_v51  ;;  %4588 = vst.msk [vmem:[%s6248_s29 + $0x3ec] sm:$0xf] %vm4336_vm3, %v5427_v26  ;;  %vm2668_vm14 = vcmp.gt.f32.partialorder %v2018_v57, 0.0  ;;  %vm2796_vm15 = vcmp.gt.f32.partialorder %v2530_v63, 0.0 }
 0x214   : > { %4458 = vst.msk [vmem:[%s6248_s29 + $0x1e4] sm:$0xf] %vm4336_vm3, %v5297_v48  ;;  %v2924_v41 = vmul.f32 0.2, %v2018_v57  ;;  %v3052_v10 = vmul.f32 0.2, %v2530_v63  ;;  %v3182_v44 = vsel %vm2670_vm12, %v2026_v46, %v2926_v45  ;;  %v2029_v15 = vadd.f32 %v7546_v23, %v5696_v50 }
 0x215   : > { %4586 = vst.msk [vmem:[%s6248_s29 + $0x3e4] sm:$0xf] %vm4336_vm3, %v5425_v55  ;;  %v3310_v22 = vsel %vm2798_vm13, %v2538_v51, %v3054_v38  ;;  %v2541_v33 = vadd.f32 %v7546_v23, %v5824_v34  ;;  %v5302_v0 = vpack.c.bf16 %v3182_v44, %v3182_v44  ;;  %v2021_v53 = vadd.f32 %v7546_v23, %v2020_v24 }
 0x216   : > { %v5430_v7 = vpack.c.bf16 %v3310_v22, %v3310_v22  ;;  %v3180_v42 = vsel %vm2668_vm14, %v2018_v57, %v2924_v41  ;;  %v3308_v13 = vsel %vm2796_vm15, %v2530_v63, %v3052_v10  ;;  %vm2671_vm1 = vcmp.gt.f32.partialorder %v2029_v15, 0.0 }
 0x217   : > { %v5300_v37 = vpack.c.bf16 %v3180_v42, %v3180_v42  ;;  %v5428_v16 = vpack.c.bf16 %v3308_v13, %v3308_v13  ;;  %v2927_v56 = vmul.f32 0.2, %v2029_v15  ;;  %4463 = vst.msk [vmem:[%s6248_s29 + $0x1f8] sm:$0xf] %vm4336_vm3, %v5302_v0  ;;  %vm2799_vm2 = vcmp.gt.f32.partialorder %v2541_v33, 0.0 }
 0x218   : > { %4591 = vst.msk [vmem:[%s6248_s29 + $0x3f8] sm:$0xf] %vm4336_vm3, %v5430_v7  ;;  %v3055_v3 = vmul.f32 0.2, %v2541_v33  ;;  %v2533_v60 = vadd.f32 %v7546_v23, %v2532_v5  ;;  %vm2669_vm4 = vcmp.gt.f32.partialorder %v2021_v53, 0.0 }
 0x219   : > { %4461 = vst.msk [vmem:[%s6248_s29 + $0x1f0] sm:$0xf] %vm4336_vm3, %v5300_v37  ;;  %4589 = vst.msk [vmem:[%s6248_s29 + $0x3f0] sm:$0xf] %vm4336_vm3, %v5428_v16  ;;  %v3183_v30 = vsel %vm2671_vm1, %v2029_v15, %v2927_v56  ;;  %v2925_v49 = vmul.f32 0.2, %v2021_v53 }
 0x21a   : > { %v5303_v40 = vpack.c.bf16 %v3183_v30, %v3183_v30  ;;  %v3311_v61 = vsel %vm2799_vm2, %v2541_v33, %v3055_v3  ;;  %vm2797_vm0 = vcmp.gt.f32.partialorder %v2533_v60, 0.0  ;;  %v3053_v43 = vmul.f32 0.2, %v2533_v60 }
 0x21b   : > { %v5431_v1 = vpack.c.bf16 %v3311_v61, %v3311_v61  ;;  %v3181_v6 = vsel %vm2669_vm4, %v2021_v53, %v2925_v49 }
 0x21c   : > { %4464 = vst.msk [vmem:[%s6248_s29 + $0x1fc] sm:$0xf] %vm4336_vm3, %v5303_v40  ;;  %v5301_v23 = vpack.c.bf16 %v3181_v6, %v3181_v6  ;;  %v3309_v29 = vsel %vm2797_vm0, %v2533_v60, %v3053_v43 }
 0x21d   : > { %4592 = vst.msk [vmem:[%s6248_s29 + $0x3fc] sm:$0xf] %vm4336_vm3, %v5431_v1  ;;  %v5429_v36 = vpack.c.bf16 %v3309_v29, %v3309_v29 }
 0x21e   : > { %4462 = vst.msk [vmem:[%s6248_s29 + $0x1f4] sm:$0xf] %vm4336_vm3, %v5301_v23 }
 0x21f   : > { %4590 = vst.msk [vmem:[%s6248_s29 + $0x3f4] sm:$0xf] %vm4336_vm3, %v5429_v36 }
 0x220 PF: > { %s13_s12 = sadd.s32 1, %s5979_s12  }
 0x221   : > { %p10_p4 = scmp.ge.s32.totalorder %s13_s12, 6  }
 0x223   :  { %12 = sbr.rel (!%p10_p4) target bundleno = 1 (0x1), region = 62 }

// kernel: _lambda_.7
= control target key start
LH: loop header
LB: loop body
LE: loop exit
PB: predicated region body
PF: predicated region fallthrough
CT: control target
= control target key end

     0   :  { %v9150_v0 = vmov 0   ;;  %vm2598_vm0 = vcmask 261120   ;;  %vm6889_vm2 = vcmask 125952   ;;  %s12801_s1 = inlined_call_operand.vmem [shape: bf16[288,16], index: 1, kind: input, shape index: {}]   ;;  %s12802_s0 = inlined_call_operand.vmem [shape: bf16[2048,288], index: 0, kind: input, shape index: {}]   ;;  %s12803_s2 = inlined_call_operand.vmem [shape: f32[1,16], index: 2, kind: input, shape index: {}]   ;;  %s12804_s3 = inlined_call_operand.vmem [shape: bf16[2048,16], index: 3, kind: output, shape index: {}]  }
   0x1   :  { %2983 = vmatprep.subr.bf16.mxu0 %v9150_v0  ;;  %8583 = vmatprep.subr.bf16.mxu1 %v9150_v0  ;;  %v8616_v1 = vld [vmem:[%s12801_s1 + $0x38] sm:$0xff]   ;;  %v8617_v2 = vld [vmem:[%s12801_s1 + $0x30] sm:$0xff]   ;;  %v8618_v3 = vld [vmem:[%s12801_s1 + $0x28] sm:$0xff]  }
   0x2   :  { %2984 = vmatpush1.bf16.msra.mxu0 %v8616_v1  ;;  %8599 = vmatpush1.bf16.msra.mxu1 %v8616_v1  ;;  %v8619_v4 = vld [vmem:[%s12801_s1 + $0x20] sm:$0xff]   ;;  %v8620_v5 = vld [vmem:[%s12801_s1 + $0x18] sm:$0xff]   ;;  %v8621_v7 = vld [vmem:[%s12801_s1 + $0x10] sm:$0xff]  }
   0x3   :  { %2985 = vmatprep.subr.bf16.mxu0 %v9150_v0  ;;  %8584 = vmatprep.subr.bf16.mxu1 %v9150_v0  ;;  %v8634_v6 = vld [vmem:[%s12802_s0 + $0x4] ss:$12 sps:$4 sm:$0xff]   ;;  %v8622_v9 = vld [vmem:[%s12801_s1 + $0x8] sm:$0xff]   ;;  %v8624_v11 = vld [vmem:[%s12801_s1 + $0x78] sm:$0xff]  }
   0x4   :  { %v8637_v8 = vld [vmem:[%s12802_s0 + $0x904] ss:$12 sps:$4 sm:$0xff]   ;;  %3015 = vmatprep.mubr.bf16.mxu0 %v8634_v6  ;;  %v8626_v13 = vld [vmem:[%s12801_s1 + $0x68] sm:$0xff]   ;;  %v8628_v15 = vld [vmem:[%s12801_s1 + $0x58] sm:$0xff]  }
   0x5   :  { %3783 = vmatprep.mubr.bf16.mxu1 %v8637_v8  ;;  %v8623_v10 = vld [vmem:[%s12801_s1] sm:$0xff]   ;;  %v8625_v12 = vld [vmem:[%s12801_s1 + $0x70] sm:$0xff]   ;;  %v8630_v17 = vld [vmem:[%s12801_s1 + $0x48] sm:$0xff]  }
   0x6   :  { %2986 = vmatpush1.bf16.msra.mxu0 %v8617_v2  ;;  %8600 = vmatpush1.bf16.msra.mxu1 %v8617_v2  ;;  %v8627_v14 = vld [vmem:[%s12801_s1 + $0x60] sm:$0xff]   ;;  %v8629_v16 = vld [vmem:[%s12801_s1 + $0x50] sm:$0xff]   ;;  %v8638_v19 = vld [vmem:[%s12801_s1 + $0x88] sm:$0xff]  }
   0x7   :  { %2987 = vmatprep.subr.bf16.mxu0 %v9150_v0  ;;  %8585 = vmatprep.subr.bf16.mxu1 %v9150_v0  ;;  %v8631_v18 = vld [vmem:[%s12801_s1 + $0x40] sm:$0xff]   ;;  %v8639_v22 = vld [vmem:[%s12802_s0 + $0x1c] ss:$12 sps:$4 sm:$0xff]   ;;  %v8651_v31 = vld [vmem:[%s12802_s0 + $0x4c] ss:$12 sps:$4 sm:$0xff]  }
   0x8   :  { %v8632_v20 = vld [vmem:[%s12802_s0] ss:$12 sps:$4 sm:$0xff]   ;;  %v8641_v23 = vld [vmem:[%s12802_s0 + $0x91c] ss:$12 sps:$4 sm:$0xff]   ;;  %v8643_v25 = vld [vmem:[%s12802_s0 + $0x18] ss:$12 sps:$4 sm:$0xff]  }
   0x9   :  { %v8635_v21 = vld [vmem:[%s12802_s0 + $0x900] ss:$12 sps:$4 sm:$0xff]   ;;  %v8644_v26 = vld [vmem:[%s12802_s0 + $0x918] ss:$12 sps:$4 sm:$0xff]   ;;  %v8649_v29 = vld [vmem:[%s12802_s0 + $0x30] ss:$12 sps:$4 sm:$0xff]  }
   0xa   :  { %2988 = vmatpush1.bf16.msra.mxu0 %v8618_v3  ;;  %8601 = vmatpush1.bf16.msra.mxu1 %v8618_v3  ;;  %v8735_v24 = vld [vmem:[%s12801_s1 + $0x80] sm:$0xff]   ;;  %v8650_v30 = vld [vmem:[%s12802_s0 + $0x930] ss:$12 sps:$4 sm:$0xff]   ;;  %v8653_v32 = vld [vmem:[%s12802_s0 + $0x94c] ss:$12 sps:$4 sm:$0xff]  }
   0xb   :  { %2989 = vmatprep.subr.bf16.mxu0 %v9150_v0  ;;  %8586 = vmatprep.subr.bf16.mxu1 %v9150_v0  ;;  %v8645_v27 = vld [vmem:[%s12802_s0 + $0x34] ss:$12 sps:$4 sm:$0xff]   ;;  %v8657_v35 = vld [vmem:[%s12802_s0 + $0x64] ss:$12 sps:$4 sm:$0xff]   ;;  %v8663_v39 = vld [vmem:[%s12802_s0 + $0x7c] ss:$12 sps:$4 sm:$0xff]  }
   0xc   :  { %v8647_v28 = vld [vmem:[%s12802_s0 + $0x934] ss:$12 sps:$4 sm:$0xff]   ;;  %v8659_v36 = vld [vmem:[%s12802_s0 + $0x964] ss:$12 sps:$4 sm:$0xff]   ;;  %v8665_v40 = vld [vmem:[%s12802_s0 + $0x97c] ss:$12 sps:$4 sm:$0xff]  }
   0xd   :  { %v8655_v33 = vld [vmem:[%s12802_s0 + $0x48] ss:$12 sps:$4 sm:$0xff]   ;;  %v8661_v37 = vld [vmem:[%s12802_s0 + $0x60] ss:$12 sps:$4 sm:$0xff]   ;;  %v8667_v41 = vld [vmem:[%s12802_s0 + $0x78] ss:$12 sps:$4 sm:$0xff]  }
   0xe   :  { %2990 = vmatpush1.bf16.msra.mxu0 %v8619_v4  ;;  %8602 = vmatpush1.bf16.msra.mxu1 %v8619_v4  ;;  %v8656_v34 = vld [vmem:[%s12802_s0 + $0x948] ss:$12 sps:$4 sm:$0xff]   ;;  %v8662_v38 = vld [vmem:[%s12802_s0 + $0x960] ss:$12 sps:$4 sm:$0xff]   ;;  %v8668_v42 = vld [vmem:[%s12802_s0 + $0x978] ss:$12 sps:$4 sm:$0xff]  }
   0xf   :  { %2991 = vmatprep.subr.bf16.mxu0 %v9150_v0  ;;  %8587 = vmatprep.subr.bf16.mxu1 %v9150_v0  ;;  %v8669_v43 = vld [vmem:[%s12802_s0 + $0x94] ss:$12 sps:$4 sm:$0xff]   ;;  %v8673_v45 = vld [vmem:[%s12802_s0 + $0x90] ss:$12 sps:$4 sm:$0xff]   ;;  %v8675_v47 = vld [vmem:[%s12802_s0 + $0xac] ss:$12 sps:$4 sm:$0xff]  }
  0x10   :  { %v8671_v44 = vld [vmem:[%s12802_s0 + $0x994] ss:$12 sps:$4 sm:$0xff]   ;;  %v8674_v46 = vld [vmem:[%s12802_s0 + $0x990] ss:$12 sps:$4 sm:$0xff]   ;;  %v8677_v48 = vld [vmem:[%s12802_s0 + $0x9ac] ss:$12 sps:$4 sm:$0xff]  }
  0x11   :  { %v8679_v49 = vld [vmem:[%s12802_s0 + $0xa8] ss:$12 sps:$4 sm:$0xff]   ;;  %v8681_v51 = vld [vmem:[%s12802_s0 + $0xc4] ss:$12 sps:$4 sm:$0xff]   ;;  %v8685_v53 = vld [vmem:[%s12802_s0 + $0xc0] ss:$12 sps:$4 sm:$0xff]  }
  0x12   :  { %2992 = vmatpush1.bf16.msra.mxu0 %v8620_v5  ;;  %8603 = vmatpush1.bf16.msra.mxu1 %v8620_v5  ;;  %v8680_v50 = vld [vmem:[%s12802_s0 + $0x9a8] ss:$12 sps:$4 sm:$0xff]   ;;  %v8683_v52 = vld [vmem:[%s12802_s0 + $0x9c4] ss:$12 sps:$4 sm:$0xff]   ;;  %v8686_v54 = vld [vmem:[%s12802_s0 + $0x9c0] ss:$12 sps:$4 sm:$0xff]  }
  0x13   :  { %2993 = vmatprep.subr.bf16.mxu0 %v9150_v0  ;;  %8588 = vmatprep.subr.bf16.mxu1 %v9150_v0  ;;  %v8687_v55 = vld [vmem:[%s12802_s0 + $0xdc] ss:$12 sps:$4 sm:$0xff]   ;;  %v8691_v57 = vld [vmem:[%s12802_s0 + $0xd8] ss:$12 sps:$4 sm:$0xff]   ;;  %v8693_v59 = vld [vmem:[%s12802_s0 + $0xf4] ss:$12 sps:$4 sm:$0xff]  }
  0x14   :  { %v8689_v56 = vld [vmem:[%s12802_s0 + $0x9dc] ss:$12 sps:$4 sm:$0xff]   ;;  %v8692_v58 = vld [vmem:[%s12802_s0 + $0x9d8] ss:$12 sps:$4 sm:$0xff]   ;;  %v8695_v60 = vld [vmem:[%s12802_s0 + $0x9f4] ss:$12 sps:$4 sm:$0xff]  }
  0x15   :  { %v8697_v61 = vld [vmem:[%s12802_s0 + $0xf0] ss:$12 sps:$4 sm:$0xff]   ;;  %v8699_v63 = vld [vmem:[%s12802_s0 + $0x10c] ss:$12 sps:$4 sm:$0xff]   ;;  %v8703_v1 = vld [vmem:[%s12802_s0 + $0x108] ss:$12 sps:$4 sm:$0xff]  }
  0x16   :  { %2994 = vmatpush1.bf16.msra.mxu0 %v8621_v7  ;;  %8604 = vmatpush1.bf16.msra.mxu1 %v8621_v7  ;;  %v8698_v62 = vld [vmem:[%s12802_s0 + $0x9f0] ss:$12 sps:$4 sm:$0xff]   ;;  %v8704_v2 = vld [vmem:[%s12802_s0 + $0xa08] ss:$12 sps:$4 sm:$0xff]   ;;  %v8709_v5 = vld [vmem:[%s12802_s0 + $0x120] ss:$12 sps:$4 sm:$0xff]  }
  0x17   :  { %2995 = vmatprep.subr.bf16.mxu0 %v9150_v0  ;;  %8589 = vmatprep.subr.bf16.mxu1 %v9150_v0  ;;  %v8705_v3 = vld [vmem:[%s12802_s0 + $0x124] ss:$12 sps:$4 sm:$0xff]   ;;  %v8710_v6 = vld [vmem:[%s12802_s0 + $0xa20] ss:$12 sps:$4 sm:$0xff]   ;;  %v8711_v7 = vld [vmem:[%s12802_s0 + $0x13c] ss:$12 sps:$4 sm:$0xff]  }
  0x18   :  { %v8707_v4 = vld [vmem:[%s12802_s0 + $0xa24] ss:$12 sps:$4 sm:$0xff]   ;;  %v8713_v8 = vld [vmem:[%s12802_s0 + $0xa3c] ss:$12 sps:$4 sm:$0xff]  }
  0x1a   :  { %2996 = vmatpush1.bf16.msra.mxu0 %v8622_v9  ;;  %8605 = vmatpush1.bf16.msra.mxu1 %v8622_v9  ;;  %v8715_v9 = vld [vmem:[%s12802_s0 + $0x138] ss:$12 sps:$4 sm:$0xff]  }
  0x1b   :  { %2997 = vmatprep.subr.bf16.mxu0 %v9150_v0  ;;  %8590 = vmatprep.subr.bf16.mxu1 %v9150_v0 }
  0x1e   :  { %2998 = vmatpush1.bf16.msra.mxu0 %v8623_v10  ;;  %8606 = vmatpush1.bf16.msra.mxu1 %v8623_v10  ;;  %v8716_v10 = vld [vmem:[%s12802_s0 + $0xa38] ss:$12 sps:$4 sm:$0xff]  }
  0x1f   :  { %2999 = vmatprep.subr.bf16.mxu0 %v9150_v0  ;;  %8591 = vmatprep.subr.bf16.mxu1 %v9150_v0 }
  0x22   :  { %3000 = vmatpush2.bf16.msra.mxu0 %v8624_v11  ;;  %8607 = vmatpush2.bf16.msra.mxu1 %v8624_v11  ;;  %v8717_v11 = vld [vmem:[%s12802_s0 + $0x154] ss:$12 sps:$4 sm:$0xff]  }
  0x23   :  { %3001 = vmatprep.subr.bf16.mxu0 %v9150_v0  ;;  %8592 = vmatprep.subr.bf16.mxu1 %v9150_v0 }
  0x26   :  { %3002 = vmatpush2.bf16.msra.mxu0 %v8625_v12  ;;  %8608 = vmatpush2.bf16.msra.mxu1 %v8625_v12  ;;  %v8719_v12 = vld [vmem:[%s12802_s0 + $0xa54] ss:$12 sps:$4 sm:$0xff]  }
  0x27   :  { %3003 = vmatprep.subr.bf16.mxu0 %v9150_v0  ;;  %8593 = vmatprep.subr.bf16.mxu1 %v9150_v0 }
  0x2a   :  { %3004 = vmatpush2.bf16.msra.mxu0 %v8626_v13  ;;  %8609 = vmatpush2.bf16.msra.mxu1 %v8626_v13  ;;  %v8721_v13 = vld [vmem:[%s12802_s0 + $0x150] ss:$12 sps:$4 sm:$0xff]  }
  0x2b   :  { %3005 = vmatprep.subr.bf16.mxu0 %v9150_v0  ;;  %8594 = vmatprep.subr.bf16.mxu1 %v9150_v0 }
  0x2e   :  { %3006 = vmatpush2.bf16.msra.mxu0 %v8627_v14  ;;  %8610 = vmatpush2.bf16.msra.mxu1 %v8627_v14  ;;  %v8722_v14 = vld [vmem:[%s12802_s0 + $0xa50] ss:$12 sps:$4 sm:$0xff]  }
  0x2f   :  { %3007 = vmatprep.subr.bf16.mxu0 %v9150_v0  ;;  %8595 = vmatprep.subr.bf16.mxu1 %v9150_v0 }
  0x32   :  { %3008 = vmatpush2.bf16.msra.mxu0 %v8628_v15  ;;  %8611 = vmatpush2.bf16.msra.mxu1 %v8628_v15  ;;  %v8723_v15 = vld [vmem:[%s12802_s0 + $0x16c] ss:$12 sps:$4 sm:$0xff]  }
  0x33   :  { %3009 = vmatprep.subr.bf16.mxu0 %v9150_v0  ;;  %8596 = vmatprep.subr.bf16.mxu1 %v9150_v0 }
  0x36   :  { %3010 = vmatpush2.bf16.msra.mxu0 %v8629_v16  ;;  %8612 = vmatpush2.bf16.msra.mxu1 %v8629_v16  ;;  %v8725_v16 = vld [vmem:[%s12802_s0 + $0xa6c] ss:$12 sps:$4 sm:$0xff]  }
  0x37   :  { %3011 = vmatprep.subr.bf16.mxu0 %v9150_v0  ;;  %8597 = vmatprep.subr.bf16.mxu1 %v9150_v0 }
  0x3a   :  { %3012 = vmatpush2.bf16.msra.mxu0 %v8630_v17  ;;  %8613 = vmatpush2.bf16.msra.mxu1 %v8630_v17  ;;  %v8727_v17 = vld [vmem:[%s12802_s0 + $0x168] ss:$12 sps:$4 sm:$0xff]  }
  0x3b   :  { %3013 = vmatprep.subr.bf16.mxu0 %v9150_v0  ;;  %8598 = vmatprep.subr.bf16.mxu1 %v9150_v0  ;;  %v8701_v0 = vld [vmem:[%s12802_s0 + $0xa0c] ss:$12 sps:$4 sm:$0xff]  }
  0x3e   :  { %3014 = vmatpush2.bf16.msra.mxu0 %v8631_v18  ;;  %8614 = vmatpush2.bf16.msra.mxu1 %v8631_v18  ;;  %v8728_v18 = vld [vmem:[%s12802_s0 + $0xa68] ss:$12 sps:$4 sm:$0xff]  }
  0x3f   :  { %8323 = vmatprep.subr.bf16.mxu1 %v8638_v19 }
  0x41   :  { %3016 = vmatmul.mubr.bf16.vlgmr.msra.gmra.mxu0 %v8632_v20  ;;  %3784 = vmatmul.mubr.bf16.vlgmr.msra.gmra.mxu1 %v8635_v21  ;;  %v8731_v20 = vld [vmem:[%s12802_s0 + $0xa84] ss:$12 sps:$4 sm:$0xff]   ;;  %v8733_v21 = vld [vmem:[%s12802_s0 + $0x180] ss:$12 sps:$4 sm:$0xff]  }
  0x42   :  { %8324 = vmatpush3.bf16.msra.mxu1 %v8638_v19  ;;  %3023 = vmatprep.mubr.bf16.mxu0 %v8639_v22  ;;  %v8729_v19 = vld [vmem:[%s12802_s0 + $0x184] ss:$12 sps:$4 sm:$0xff]   ;;  %v8734_v22 = vld [vmem:[%s12802_s0 + $0xa80] ss:$12 sps:$4 sm:$0xff]  }
  0x43   :  { %3791 = vmatprep.mubr.bf16.mxu1 %v8641_v23  ;;  %8325 = vmatprep.subr.bf16.mxu1 %v8735_v24  ;;  %v8736_v23 = vld [vmem:[%s12802_s0 + $0x19c] ss:$12 sps:$4 sm:$0xff]  }
  0x46   :  { %8326 = vmatpush3.bf16.msra.mxu1 %v8735_v24  ;;  %v8738_v24 = vld [vmem:[%s12802_s0 + $0xa9c] ss:$12 sps:$4 sm:$0xff]  }
  0x49   :  { %3024 = vmatmul.mubr.bf16.gmra.mxu0 %v8643_v25  ;;  %3792 = vmatmul.mubr.bf16.gmra.mxu1 %v8644_v26  ;;  %v8740_v25 = vld [vmem:[%s12802_s0 + $0x198] ss:$12 sps:$4 sm:$0xff]  }
  0x4a   :  { %3031 = vmatprep.mubr.bf16.mxu0 %v8645_v27  ;;  %3799 = vmatprep.mubr.bf16.mxu1 %v8647_v28  ;;  %v8741_v26 = vld [vmem:[%s12802_s0 + $0xa98] ss:$12 sps:$4 sm:$0xff]   ;;  %v8742_v27 = vld [vmem:[%s12802_s0 + $0x1b4] ss:$12 sps:$4 sm:$0xff]  }
  0x4b   :  { %v8744_v28 = vld [vmem:[%s12802_s0 + $0xab4] ss:$12 sps:$4 sm:$0xff]  }
  0x51   :  { %3032 = vmatmul.mubr.bf16.gmra.mxu0 %v8649_v29  ;;  %3800 = vmatmul.mubr.bf16.gmra.mxu1 %v8650_v30  ;;  %v8746_v29 = vld [vmem:[%s12802_s0 + $0x1b0] ss:$12 sps:$4 sm:$0xff]  }
  0x52   :  { %3039 = vmatprep.mubr.bf16.mxu0 %v8651_v31  ;;  %3807 = vmatprep.mubr.bf16.mxu1 %v8653_v32  ;;  %v8747_v30 = vld [vmem:[%s12802_s0 + $0xab0] ss:$12 sps:$4 sm:$0xff]   ;;  %v8748_v31 = vld [vmem:[%s12802_s0 + $0x1cc] ss:$12 sps:$4 sm:$0xff]  }
  0x53   :  { %v8750_v32 = vld [vmem:[%s12802_s0 + $0xacc] ss:$12 sps:$4 sm:$0xff]  }
  0x59   :  { %3040 = vmatmul.mubr.bf16.gmra.mxu0 %v8655_v33  ;;  %3808 = vmatmul.mubr.bf16.gmra.mxu1 %v8656_v34  ;;  %v8752_v33 = vld [vmem:[%s12802_s0 + $0x1c8] ss:$12 sps:$4 sm:$0xff]  }
  0x5a   :  { %3047 = vmatprep.mubr.bf16.mxu0 %v8657_v35  ;;  %3815 = vmatprep.mubr.bf16.mxu1 %v8659_v36  ;;  %v8753_v34 = vld [vmem:[%s12802_s0 + $0xac8] ss:$12 sps:$4 sm:$0xff]   ;;  %v8754_v35 = vld [vmem:[%s12802_s0 + $0x1e4] ss:$12 sps:$4 sm:$0xff]  }
  0x5b   :  { %v8756_v36 = vld [vmem:[%s12802_s0 + $0xae4] ss:$12 sps:$4 sm:$0xff]  }
  0x61   :  { %3048 = vmatmul.mubr.bf16.gmra.mxu0 %v8661_v37  ;;  %3816 = vmatmul.mubr.bf16.gmra.mxu1 %v8662_v38  ;;  %v8758_v37 = vld [vmem:[%s12802_s0 + $0x1e0] ss:$12 sps:$4 sm:$0xff]  }
  0x62   :  { %3055 = vmatprep.mubr.bf16.mxu0 %v8663_v39  ;;  %3823 = vmatprep.mubr.bf16.mxu1 %v8665_v40  ;;  %v8759_v38 = vld [vmem:[%s12802_s0 + $0xae0] ss:$12 sps:$4 sm:$0xff]   ;;  %v8760_v39 = vld [vmem:[%s12802_s0 + $0x1fc] ss:$12 sps:$4 sm:$0xff]  }
  0x63   :  { %v8762_v40 = vld [vmem:[%s12802_s0 + $0xafc] ss:$12 sps:$4 sm:$0xff]  }
  0x69   :  { %3056 = vmatmul.mubr.bf16.gmra.mxu0 %v8667_v41  ;;  %3824 = vmatmul.mubr.bf16.gmra.mxu1 %v8668_v42  ;;  %v8764_v41 = vld [vmem:[%s12802_s0 + $0x1f8] ss:$12 sps:$4 sm:$0xff]  }
  0x6a   :  { %3063 = vmatprep.mubr.bf16.mxu0 %v8669_v43  ;;  %3831 = vmatprep.mubr.bf16.mxu1 %v8671_v44  ;;  %v8765_v42 = vld [vmem:[%s12802_s0 + $0xaf8] ss:$12 sps:$4 sm:$0xff]   ;;  %v8766_v43 = vld [vmem:[%s12802_s0 + $0x214] ss:$12 sps:$4 sm:$0xff]  }
  0x6b   :  { %v8768_v44 = vld [vmem:[%s12802_s0 + $0xb14] ss:$12 sps:$4 sm:$0xff]  }
  0x71   :  { %3064 = vmatmul.mubr.bf16.gmra.mxu0 %v8673_v45  ;;  %3832 = vmatmul.mubr.bf16.gmra.mxu1 %v8674_v46  ;;  %v8770_v45 = vld [vmem:[%s12802_s0 + $0x210] ss:$12 sps:$4 sm:$0xff]  }
  0x72   :  { %3071 = vmatprep.mubr.bf16.mxu0 %v8675_v47  ;;  %3839 = vmatprep.mubr.bf16.mxu1 %v8677_v48  ;;  %v8771_v46 = vld [vmem:[%s12802_s0 + $0xb10] ss:$12 sps:$4 sm:$0xff]   ;;  %v8772_v47 = vld [vmem:[%s12802_s0 + $0x22c] ss:$12 sps:$4 sm:$0xff]  }
  0x73   :  { %v8774_v48 = vld [vmem:[%s12802_s0 + $0xb2c] ss:$12 sps:$4 sm:$0xff]  }
  0x79   :  { %3072 = vmatmul.mubr.bf16.gmra.mxu0 %v8679_v49  ;;  %3840 = vmatmul.mubr.bf16.gmra.mxu1 %v8680_v50  ;;  %v8776_v49 = vld [vmem:[%s12802_s0 + $0x228] ss:$12 sps:$4 sm:$0xff]  }
  0x7a   :  { %3079 = vmatprep.mubr.bf16.mxu0 %v8681_v51  ;;  %3847 = vmatprep.mubr.bf16.mxu1 %v8683_v52  ;;  %v8777_v50 = vld [vmem:[%s12802_s0 + $0xb28] ss:$12 sps:$4 sm:$0xff]   ;;  %v8778_v51 = vld [vmem:[%s12802_s0 + $0x244] ss:$12 sps:$4 sm:$0xff]  }
  0x7b   :  { %v8780_v52 = vld [vmem:[%s12802_s0 + $0xb44] ss:$12 sps:$4 sm:$0xff]  }
  0x81   :  { %3080 = vmatmul.mubr.bf16.gmra.mxu0 %v8685_v53  ;;  %3848 = vmatmul.mubr.bf16.gmra.mxu1 %v8686_v54  ;;  %v8782_v53 = vld [vmem:[%s12802_s0 + $0x240] ss:$12 sps:$4 sm:$0xff]  }
  0x82   :  { %3087 = vmatprep.mubr.bf16.mxu0 %v8687_v55  ;;  %3855 = vmatprep.mubr.bf16.mxu1 %v8689_v56  ;;  %v8783_v54 = vld [vmem:[%s12802_s0 + $0xb40] ss:$12 sps:$4 sm:$0xff]   ;;  %v8784_v55 = vld [vmem:[%s12802_s0 + $0x25c] ss:$12 sps:$4 sm:$0xff]  }
  0x83   :  { %v8786_v56 = vld [vmem:[%s12802_s0 + $0xb5c] ss:$12 sps:$4 sm:$0xff]  }
  0x89   :  { %3088 = vmatmul.mubr.bf16.gmra.mxu0 %v8691_v57  ;;  %3856 = vmatmul.mubr.bf16.gmra.mxu1 %v8692_v58 }
  0x8a   :  { %3095 = vmatprep.mubr.bf16.mxu0 %v8693_v59  ;;  %3863 = vmatprep.mubr.bf16.mxu1 %v8695_v60 }
  0x91   :  { %3096 = vmatmul.mubr.bf16.gmra.mxu0 %v8697_v61  ;;  %3864 = vmatmul.mubr.bf16.gmra.mxu1 %v8698_v62 }
  0x92   :  { %3103 = vmatprep.mubr.bf16.mxu0 %v8699_v63  ;;  %3871 = vmatprep.mubr.bf16.mxu1 %v8701_v0  ;;  %v8788_v63 = vld [vmem:[%s12802_s0 + $0x258] ss:$12 sps:$4 sm:$0xff]  }
  0x93   :  { %v8789_v0 = vld [vmem:[%s12802_s0 + $0xb58] ss:$12 sps:$4 sm:$0xff]  }
  0x99   :  { %3104 = vmatmul.mubr.bf16.gmra.mxu0 %v8703_v1  ;;  %3872 = vmatmul.mubr.bf16.gmra.mxu1 %v8704_v2  ;;  %v8790_v1 = vld [vmem:[%s12802_s0 + $0x274] ss:$12 sps:$4 sm:$0xff]  }
  0x9a   :  { %3111 = vmatprep.mubr.bf16.mxu0 %v8705_v3  ;;  %3879 = vmatprep.mubr.bf16.mxu1 %v8707_v4  ;;  %v8792_v2 = vld [vmem:[%s12802_s0 + $0xb74] ss:$12 sps:$4 sm:$0xff]  }
  0xa1   :  { %3112 = vmatmul.mubr.bf16.gmra.mxu0 %v8709_v5  ;;  %3880 = vmatmul.mubr.bf16.gmra.mxu1 %v8710_v6 }
  0xa2   :  { %3119 = vmatprep.mubr.bf16.mxu0 %v8711_v7  ;;  %3887 = vmatprep.mubr.bf16.mxu1 %v8713_v8 }
  0xa9   :  { %3120 = vmatmul.mubr.bf16.gmra.mxu0 %v8715_v9  ;;  %3888 = vmatmul.mubr.bf16.gmra.mxu1 %v8716_v10 }
  0xaa   :  { %3127 = vmatprep.mubr.bf16.mxu0 %v8717_v11  ;;  %3895 = vmatprep.mubr.bf16.mxu1 %v8719_v12  ;;  %v8794_v11 = vld [vmem:[%s12802_s0 + $0x270] ss:$12 sps:$4 sm:$0xff]  }
  0xab   :  { %v8795_v12 = vld [vmem:[%s12802_s0 + $0xb70] ss:$12 sps:$4 sm:$0xff]  }
  0xb1   :  { %3128 = vmatmul.mubr.bf16.gmra.mxu0 %v8721_v13  ;;  %3896 = vmatmul.mubr.bf16.gmra.mxu1 %v8722_v14  ;;  %v8796_v13 = vld [vmem:[%s12802_s0 + $0x28c] ss:$12 sps:$4 sm:$0xff]  }
  0xb2   :  { %3135 = vmatprep.mubr.bf16.mxu0 %v8723_v15  ;;  %3903 = vmatprep.mubr.bf16.mxu1 %v8725_v16  ;;  %v8798_v14 = vld [vmem:[%s12802_s0 + $0xb8c] ss:$12 sps:$4 sm:$0xff]  }
  0xb9   :  { %3136 = vmatmul.mubr.bf16.gmra.mxu0 %v8727_v17  ;;  %3904 = vmatmul.mubr.bf16.gmra.mxu1 %v8728_v18 }
  0xba   :  { %3143 = vmatprep.mubr.bf16.mxu0 %v8729_v19  ;;  %3911 = vmatprep.mubr.bf16.mxu1 %v8731_v20 }
  0xc1   :  { %3144 = vmatmul.mubr.bf16.gmra.mxu0 %v8733_v21  ;;  %3912 = vmatmul.mubr.bf16.gmra.mxu1 %v8734_v22 }
  0xc2   :  { %3151 = vmatprep.mubr.bf16.mxu0 %v8736_v23  ;;  %3919 = vmatprep.mubr.bf16.mxu1 %v8738_v24  ;;  %v8800_v23 = vld [vmem:[%s12802_s0 + $0x288] ss:$12 sps:$4 sm:$0xff]  }
  0xc3   :  { %v8801_v24 = vld [vmem:[%s12802_s0 + $0xb88] ss:$12 sps:$4 sm:$0xff]  }
  0xc9   :  { %3152 = vmatmul.mubr.bf16.gmra.mxu0 %v8740_v25  ;;  %3920 = vmatmul.mubr.bf16.gmra.mxu1 %v8741_v26  ;;  %v8804_v25 = vld [vmem:[%s12802_s0 + $0x2a4] ss:$12 sps:$4 sm:$0xff]  }
  0xca   :  { %3159 = vmatprep.mubr.bf16.mxu0 %v8742_v27  ;;  %3927 = vmatprep.mubr.bf16.mxu1 %v8744_v28  ;;  %v8807_v26 = vld [vmem:[%s12802_s0 + $0xba4] ss:$12 sps:$4 sm:$0xff]  }
  0xd1   :  { %3160 = vmatmul.mubr.bf16.gmra.mxu0 %v8746_v29  ;;  %3928 = vmatmul.mubr.bf16.gmra.mxu1 %v8747_v30 }
  0xd2   :  { %3167 = vmatprep.mubr.bf16.mxu0 %v8748_v31  ;;  %3935 = vmatprep.mubr.bf16.mxu1 %v8750_v32 }
  0xd9   :  { %3168 = vmatmul.mubr.bf16.gmra.mxu0 %v8752_v33  ;;  %3936 = vmatmul.mubr.bf16.gmra.mxu1 %v8753_v34 }
  0xda   :  { %3175 = vmatprep.mubr.bf16.mxu0 %v8754_v35  ;;  %3943 = vmatprep.mubr.bf16.mxu1 %v8756_v36  ;;  %v8802_v35 = vld [vmem:[%s12802_s0 + $0x2a0] ss:$12 sps:$4 sm:$0xff]  }
  0xdb   :  { %v8805_v36 = vld [vmem:[%s12802_s0 + $0xba0] ss:$12 sps:$4 sm:$0xff]  }
  0xe1   :  { %3176 = vmatmul.mubr.bf16.gmra.mxu0 %v8758_v37  ;;  %3944 = vmatmul.mubr.bf16.gmra.mxu1 %v8759_v38  ;;  %v8810_v37 = vld [vmem:[%s12802_s0 + $0x2bc] ss:$12 sps:$4 sm:$0xff]  }
  0xe2   :  { %3183 = vmatprep.mubr.bf16.mxu0 %v8760_v39  ;;  %3951 = vmatprep.mubr.bf16.mxu1 %v8762_v40  ;;  %v8813_v38 = vld [vmem:[%s12802_s0 + $0xbbc] ss:$12 sps:$4 sm:$0xff]  }
  0xe9   :  { %3184 = vmatmul.mubr.bf16.gmra.mxu0 %v8764_v41  ;;  %3952 = vmatmul.mubr.bf16.gmra.mxu1 %v8765_v42 }
  0xea   :  { %3191 = vmatprep.mubr.bf16.mxu0 %v8766_v43  ;;  %3959 = vmatprep.mubr.bf16.mxu1 %v8768_v44 }
  0xf1   :  { %3192 = vmatmul.mubr.bf16.gmra.mxu0 %v8770_v45  ;;  %3960 = vmatmul.mubr.bf16.gmra.mxu1 %v8771_v46 }
  0xf2   :  { %3199 = vmatprep.mubr.bf16.mxu0 %v8772_v47  ;;  %3967 = vmatprep.mubr.bf16.mxu1 %v8774_v48  ;;  %v8808_v47 = vld [vmem:[%s12802_s0 + $0x2b8] ss:$12 sps:$4 sm:$0xff]  }
  0xf3   :  { %v8811_v48 = vld [vmem:[%s12802_s0 + $0xbb8] ss:$12 sps:$4 sm:$0xff]  }
  0xf9   :  { %3200 = vmatmul.mubr.bf16.gmra.mxu0 %v8776_v49  ;;  %3968 = vmatmul.mubr.bf16.gmra.mxu1 %v8777_v50  ;;  %v8816_v49 = vld [vmem:[%s12802_s0 + $0x2d4] ss:$12 sps:$4 sm:$0xff]  }
  0xfa   :  { %3207 = vmatprep.mubr.bf16.mxu0 %v8778_v51  ;;  %3975 = vmatprep.mubr.bf16.mxu1 %v8780_v52  ;;  %v8819_v50 = vld [vmem:[%s12802_s0 + $0xbd4] ss:$12 sps:$4 sm:$0xff]  }
 0x101   :  { %v9563_v57 = vpop.f32.mrf.mxu0  ;;  %3208 = vmatmul.mubr.bf16.gmra.mxu0 %v8782_v53  ;;  %v9565_v58 = vpop.f32.mrf.mxu1  ;;  %3976 = vmatmul.mubr.bf16.gmra.mxu1 %v8783_v54 }
 0x102   :  { %12805 = vst [vmem:[#allocation2_spill] sm:$0xff] %v9565_v58  ;;  %3215 = vmatprep.mubr.bf16.mxu0 %v8784_v55  ;;  %3983 = vmatprep.mubr.bf16.mxu1 %v8786_v56 }
 0x103   :  { %v3019_v59 = vpop.f32.mrf.mxu0  ;;  %v3787_v60 = vpop.f32.mrf.mxu1 }
 0x105   :  { %v9567_v61 = vpop.f32.mrf.mxu0  ;;  %v9569_v62 = vpop.f32.mrf.mxu1 }
 0x106   :  { %12806 = vst [vmem:[#allocation3_spill] sm:$0xff] %v9569_v62 }
 0x107   :  { %v3022_v3 = vpop.f32.mrf.mxu0  ;;  %v3790_v4 = vpop.f32.mrf.mxu1 }
 0x109   :  { %v9583_v5 = vpop.f32.mrf.mxu0  ;;  %3216 = vmatmul.mubr.bf16.gmra.mxu0 %v8788_v63  ;;  %v9585_v6 = vpop.f32.mrf.mxu1  ;;  %3984 = vmatmul.mubr.bf16.gmra.mxu1 %v8789_v0  ;;  %v8814_v63 = vld [vmem:[%s12802_s0 + $0x2d0] ss:$12 sps:$4 sm:$0xff]  }
 0x10a   :  { %12807 = vst [vmem:[#allocation4_spill] sm:$0xff] %v9585_v6  ;;  %3223 = vmatprep.mubr.bf16.mxu0 %v8790_v1  ;;  %3991 = vmatprep.mubr.bf16.mxu1 %v8792_v2  ;;  %v8817_v0 = vld [vmem:[%s12802_s0 + $0xbd0] ss:$12 sps:$4 sm:$0xff]   ;;  %v8822_v1 = vld [vmem:[%s12802_s0 + $0x2ec] ss:$12 sps:$4 sm:$0xff]  }
 0x10b   :  { %v3027_v7 = vpop.f32.mrf.mxu0  ;;  %v3795_v8 = vpop.f32.mrf.mxu1  ;;  %v8825_v2 = vld [vmem:[%s12802_s0 + $0xbec] ss:$12 sps:$4 sm:$0xff]  }
 0x10d   :  { %v9587_v9 = vpop.f32.mrf.mxu0  ;;  %v9589_v10 = vpop.f32.mrf.mxu1 }
 0x10e   :  { %12808 = vst [vmem:[#allocation5_spill] sm:$0xff] %v9589_v10 }
 0x10f   :  { %v3030_v15 = vpop.f32.mrf.mxu0  ;;  %v3798_v16 = vpop.f32.mrf.mxu1 }
 0x110   :  { %v8820_v15 = vld [vmem:[%s12802_s0 + $0x2e8] ss:$12 sps:$4 sm:$0xff]  }
 0x111   :  { %v9603_v17 = vpop.f32.mrf.mxu0  ;;  %3224 = vmatmul.mubr.bf16.gmra.mxu0 %v8794_v11  ;;  %v9605_v18 = vpop.f32.mrf.mxu1  ;;  %3992 = vmatmul.mubr.bf16.gmra.mxu1 %v8795_v12  ;;  %v8823_v16 = vld [vmem:[%s12802_s0 + $0xbe8] ss:$12 sps:$4 sm:$0xff]  }
 0x112   :  { %12809 = vst [vmem:[#allocation6_spill] sm:$0xff] %v9605_v18  ;;  %3231 = vmatprep.mubr.bf16.mxu0 %v8796_v13  ;;  %3999 = vmatprep.mubr.bf16.mxu1 %v8798_v14 }
 0x113   :  { %v3035_v19 = vpop.f32.mrf.mxu0  ;;  %v3803_v20 = vpop.f32.mrf.mxu1 }
 0x114   :  { %v8828_v19 = vld [vmem:[%s12802_s0 + $0x304] ss:$12 sps:$4 sm:$0xff]   ;;  %v8829_v20 = vld [vmem:[%s12802_s0 + $0x8] ss:$12 sps:$4 sm:$0xff]  }
 0x115   :  { %v9607_v21 = vpop.f32.mrf.mxu0  ;;  %v9609_v22 = vpop.f32.mrf.mxu1 }
 0x116   :  { %12810 = vst [vmem:[#allocation7_spill] sm:$0xff] %v9609_v22 }
 0x117   :  { %v3038_v27 = vpop.f32.mrf.mxu0  ;;  %v3806_v28 = vpop.f32.mrf.mxu1 }
 0x119   :  { %v9623_v29 = vpop.f32.mrf.mxu0  ;;  %3232 = vmatmul.mubr.bf16.gmra.mxu0 %v8800_v23  ;;  %v9625_v30 = vpop.f32.mrf.mxu1  ;;  %4000 = vmatmul.mubr.bf16.gmra.mxu1 %v8801_v24 }
 0x11a   :  { %12811 = vst [vmem:[#allocation8_spill] sm:$0xff] %v9625_v30  ;;  %3239 = vmatprep.mubr.bf16.mxu0 %v8804_v25  ;;  %4007 = vmatprep.mubr.bf16.mxu1 %v8807_v26 }
 0x11b   :  { %v3043_v31 = vpop.f32.mrf.mxu0  ;;  %v3811_v32 = vpop.f32.mrf.mxu1 }
 0x11d   :  { %v9627_v33 = vpop.f32.mrf.mxu0  ;;  %v9629_v34 = vpop.f32.mrf.mxu1 }
 0x11e   :  { %12812 = vst [vmem:[#allocation9_spill] sm:$0xff] %v9629_v34 }
 0x11f   :  { %v3046_v39 = vpop.f32.mrf.mxu0  ;;  %v3814_v40 = vpop.f32.mrf.mxu1 }
 0x121   :  { %v9643_v41 = vpop.f32.mrf.mxu0  ;;  %3240 = vmatmul.mubr.bf16.gmra.mxu0 %v8802_v35  ;;  %v9645_v42 = vpop.f32.mrf.mxu1  ;;  %4008 = vmatmul.mubr.bf16.gmra.mxu1 %v8805_v36  ;;  %v8826_v35 = vld [vmem:[%s12802_s0 + $0x300] ss:$12 sps:$4 sm:$0xff]  }
 0x122   :  { %12813 = vst [vmem:[#allocation10_spill] sm:$0xff] %v9645_v42  ;;  %3247 = vmatprep.mubr.bf16.mxu0 %v8810_v37  ;;  %4015 = vmatprep.mubr.bf16.mxu1 %v8813_v38  ;;  %v8830_v36 = vld [vmem:[%s12802_s0 + $0x20] ss:$12 sps:$4 sm:$0xff]   ;;  %v8833_v37 = vld [vmem:[%s12802_s0 + $0x31c] ss:$12 sps:$4 sm:$0xff]  }
 0x123   :  { %v3051_v43 = vpop.f32.mrf.mxu0  ;;  %v3819_v44 = vpop.f32.mrf.mxu1  ;;  %v8834_v38 = vld [vmem:[%s12802_s0 + $0x38] ss:$12 sps:$4 sm:$0xff]  }
 0x125   :  { %v9647_v45 = vpop.f32.mrf.mxu0  ;;  %v9649_v46 = vpop.f32.mrf.mxu1 }
 0x126   :  { %12814 = vst [vmem:[#allocation11_spill] sm:$0xff] %v9649_v46 }
 0x127   :  { %v3054_v51 = vpop.f32.mrf.mxu0  ;;  %v3822_v52 = vpop.f32.mrf.mxu1 }
 0x128   :  { %v8831_v51 = vld [vmem:[%s12802_s0 + $0x318] ss:$12 sps:$4 sm:$0xff]   ;;  %v8835_v52 = vld [vmem:[%s12802_s0 + $0x50] ss:$12 sps:$4 sm:$0xff]  }
 0x129   :  { %v9663_v53 = vpop.f32.mrf.mxu0  ;;  %3248 = vmatmul.mubr.bf16.gmra.mxu0 %v8808_v47  ;;  %v9665_v54 = vpop.f32.mrf.mxu1  ;;  %4016 = vmatmul.mubr.bf16.gmra.mxu1 %v8811_v48 }
 0x12a   :  { %12815 = vst [vmem:[#allocation12_spill] sm:$0xff] %v9665_v54  ;;  %3255 = vmatprep.mubr.bf16.mxu0 %v8816_v49  ;;  %4023 = vmatprep.mubr.bf16.mxu1 %v8819_v50 }
 0x12b   :  { %v3059_v55 = vpop.f32.mrf.mxu0  ;;  %v3827_v56 = vpop.f32.mrf.mxu1 }
 0x12c   :  { %v8838_v55 = vld [vmem:[%s12802_s0 + $0x334] ss:$12 sps:$4 sm:$0xff]  }
 0x12d   :  { %v9667_v59 = vpop.f32.mrf.mxu0  ;;  %v9669_v60 = vpop.f32.mrf.mxu1  ;;  %v8839_v56 = vld [vmem:[%s12802_s0 + $0x68] ss:$12 sps:$4 sm:$0xff]  }
 0x12e   :  { %12816 = vst [vmem:[#allocation13_spill] sm:$0xff] %v9669_v60 }
 0x12f   :  { %v3062_v3 = vpop.f32.mrf.mxu0  ;;  %v3830_v4 = vpop.f32.mrf.mxu1 }
 0x131   :  { %v9683_v7 = vpop.f32.mrf.mxu0  ;;  %3256 = vmatmul.mubr.bf16.gmra.mxu0 %v8814_v63  ;;  %v9685_v8 = vpop.f32.mrf.mxu1  ;;  %4024 = vmatmul.mubr.bf16.gmra.mxu1 %v8817_v0 }
 0x132   :  { %12817 = vst [vmem:[#allocation14_spill] sm:$0xff] %v9685_v8  ;;  %3263 = vmatprep.mubr.bf16.mxu0 %v8822_v1  ;;  %4031 = vmatprep.mubr.bf16.mxu1 %v8825_v2 }
 0x133   :  { %v3067_v11 = vpop.f32.mrf.mxu0  ;;  %v3835_v12 = vpop.f32.mrf.mxu1 }
 0x135   :  { %v9687_v13 = vpop.f32.mrf.mxu0  ;;  %v9689_v14 = vpop.f32.mrf.mxu1 }
 0x136   :  { %12818 = vst [vmem:[#allocation15_spill] sm:$0xff] %v9689_v14 }
 0x137   :  { %v3070_v23 = vpop.f32.mrf.mxu0  ;;  %v3838_v24 = vpop.f32.mrf.mxu1 }
 0x139   :  { %v9703_v25 = vpop.f32.mrf.mxu0  ;;  %3264 = vmatmul.mubr.bf16.gmra.mxu0 %v8820_v15  ;;  %v9705_v26 = vpop.f32.mrf.mxu1  ;;  %4032 = vmatmul.mubr.bf16.gmra.mxu1 %v8823_v16  ;;  %v8836_v15 = vld [vmem:[%s12802_s0 + $0x330] ss:$12 sps:$4 sm:$0xff]   ;;  %v8840_v16 = vld [vmem:[%s12802_s0 + $0x80] ss:$12 sps:$4 sm:$0xff]  }
 0x13a   :  { %12819 = vst [vmem:[#allocation16_spill] sm:$0xff] %v9705_v26  ;;  %3271 = vmatprep.mubr.bf16.mxu0 %v8828_v19  ;;  %8327 = vmatprep.mubr.msk.bf16.mxu1 %vm2598_vm0, %v8829_v20  ;;  %v8843_v19 = vld [vmem:[%s12802_s0 + $0x34c] ss:$12 sps:$4 sm:$0xff]  }
 0x13b   :  { %v3075_v27 = vpop.f32.mrf.mxu0  ;;  %v3843_v28 = vpop.f32.mrf.mxu1  ;;  %v8844_v20 = vld [vmem:[%s12802_s0 + $0x98] ss:$12 sps:$4 sm:$0xff]  }
 0x13d   :  { %v9708_v31 = vpop.f32.mrf.mxu0  ;;  %v9710_v32 = vpop.f32.mrf.mxu1 }
 0x13e   :  { %12820 = vst [vmem:[#allocation17_spill] sm:$0xff] %v9710_v32 }
 0x13f   :  { %v3078_v39 = vpop.f32.mrf.mxu0  ;;  %v3846_v40 = vpop.f32.mrf.mxu1 }
 0x140   :  { %v8841_v39 = vld [vmem:[%s12802_s0 + $0x348] ss:$12 sps:$4 sm:$0xff]   ;;  %v8845_v40 = vld [vmem:[%s12802_s0 + $0xb0] ss:$12 sps:$4 sm:$0xff]  }
 0x141   :  { %v9724_v43 = vpop.f32.mrf.mxu0  ;;  %3272 = vmatmul.mubr.bf16.gmra.mxu0 %v8826_v35  ;;  %v9726_v44 = vpop.f32.mrf.mxu1  ;;  %8328 = vmatmul.mubr.msk.bf16.vlgmr.msra.gmra.mxu1 %vm2598_vm0, %v8830_v36 }
 0x142   :  { %12821 = vst [vmem:[#allocation18_spill] sm:$0xff] %v9726_v44  ;;  %3279 = vmatprep.mubr.bf16.mxu0 %v8833_v37  ;;  %8331 = vmatprep.mubr.msk.bf16.mxu1 %vm2598_vm0, %v8834_v38 }
 0x143   :  { %v3083_v47 = vpop.f32.mrf.mxu0  ;;  %v3851_v48 = vpop.f32.mrf.mxu1 }
 0x144   :  { %v8848_v47 = vld [vmem:[%s12802_s0 + $0x364] ss:$12 sps:$4 sm:$0xff]   ;;  %v8849_v48 = vld [vmem:[%s12802_s0 + $0xc8] ss:$12 sps:$4 sm:$0xff]  }
 0x145   :  { %v9730_v49 = vpop.f32.mrf.mxu0  ;;  %v9732_v50 = vpop.f32.mrf.mxu1 }
 0x146   :  { %12822 = vst [vmem:[#allocation19_spill] sm:$0xff] %v9732_v50 }
 0x147   :  { %v3086_v63 = vpop.f32.mrf.mxu0  ;;  %v3854_v0 = vpop.f32.mrf.mxu1 }
 0x149   :  { %v9746_v1 = vpop.f32.mrf.mxu0  ;;  %3280 = vmatmul.mubr.bf16.gmra.mxu0 %v8831_v51  ;;  %v9748_v2 = vpop.f32.mrf.mxu1  ;;  %8332 = vmatmul.mubr.msk.bf16.gmra.mxu1 %vm2598_vm0, %v8835_v52 }
 0x14a   :  { %12823 = vst [vmem:[#allocation20_spill] sm:$0xff] %v9748_v2  ;;  %3287 = vmatprep.mubr.bf16.mxu0 %v8838_v55  ;;  %8335 = vmatprep.mubr.msk.bf16.mxu1 %vm2598_vm0, %v8839_v56 }
 0x14b   :  { %v3091_v3 = vpop.f32.mrf.mxu0  ;;  %v3859_v4 = vpop.f32.mrf.mxu1 }
 0x14d   :  { %v9752_v11 = vpop.f32.mrf.mxu0  ;;  %v9754_v12 = vpop.f32.mrf.mxu1 }
 0x14e   :  { %12824 = vst [vmem:[#allocation21_spill] sm:$0xff] %v9754_v12 }
 0x14f   :  { %v3094_v23 = vpop.f32.mrf.mxu0  ;;  %v3862_v24 = vpop.f32.mrf.mxu1 }
 0x151   :  { %v9768_v27 = vpop.f32.mrf.mxu0  ;;  %3288 = vmatmul.mubr.bf16.gmra.mxu0 %v8836_v15  ;;  %v9770_v28 = vpop.f32.mrf.mxu1  ;;  %8336 = vmatmul.mubr.msk.bf16.gmra.mxu1 %vm2598_vm0, %v8840_v16  ;;  %v8846_v15 = vld [vmem:[%s12802_s0 + $0x360] ss:$12 sps:$4 sm:$0xff]  }
 0x152   :  { %12825 = vst [vmem:[#allocation22_spill] sm:$0xff] %v9770_v28  ;;  %3295 = vmatprep.mubr.bf16.mxu0 %v8843_v19  ;;  %8339 = vmatprep.mubr.msk.bf16.mxu1 %vm2598_vm0, %v8844_v20  ;;  %v8850_v16 = vld [vmem:[%s12802_s0 + $0xe0] ss:$12 sps:$4 sm:$0xff]   ;;  %v8853_v19 = vld [vmem:[%s12802_s0 + $0x37c] ss:$12 sps:$4 sm:$0xff]  }
 0x153   :  { %v3099_v35 = vpop.f32.mrf.mxu0  ;;  %v3867_v36 = vpop.f32.mrf.mxu1  ;;  %v8854_v20 = vld [vmem:[%s12802_s0 + $0xf8] ss:$12 sps:$4 sm:$0xff]  }
 0x155   :  { %v9774_v37 = vpop.f32.mrf.mxu0  ;;  %v9776_v38 = vpop.f32.mrf.mxu1 }
 0x156   :  { %12826 = vst [vmem:[#allocation23_spill] sm:$0xff] %v9776_v38 }
 0x157   :  { %v3102_v51 = vpop.f32.mrf.mxu0  ;;  %v3870_v52 = vpop.f32.mrf.mxu1 }
 0x158   :  { %v8851_v51 = vld [vmem:[%s12802_s0 + $0x378] ss:$12 sps:$4 sm:$0xff]   ;;  %v8855_v52 = vld [vmem:[%s12802_s0 + $0x110] ss:$12 sps:$4 sm:$0xff]  }
 0x159   :  { %v9790_v55 = vpop.f32.mrf.mxu0  ;;  %3296 = vmatmul.mubr.bf16.gmra.mxu0 %v8841_v39  ;;  %v9792_v56 = vpop.f32.mrf.mxu1  ;;  %8340 = vmatmul.mubr.msk.bf16.gmra.mxu1 %vm2598_vm0, %v8845_v40 }
 0x15a   :  { %12827 = vst [vmem:[#allocation24_spill] sm:$0xff] %v9792_v56  ;;  %3303 = vmatprep.mubr.bf16.mxu0 %v8848_v47  ;;  %8343 = vmatprep.mubr.msk.bf16.mxu1 %vm2598_vm0, %v8849_v48 }
 0x15b   :  { %v3107_v63 = vpop.f32.mrf.mxu0  ;;  %v3875_v0 = vpop.f32.mrf.mxu1 }
 0x15c   :  { %v8858_v63 = vld [vmem:[%s12802_s0 + $0x394] ss:$12 sps:$4 sm:$0xff]  }
 0x15d   :  { %v9796_v3 = vpop.f32.mrf.mxu0  ;;  %v9798_v4 = vpop.f32.mrf.mxu1  ;;  %v8859_v0 = vld [vmem:[%s12802_s0 + $0x128] ss:$12 sps:$4 sm:$0xff]  }
 0x15e   :  { %12828 = vst [vmem:[#allocation25_spill] sm:$0xff] %v9798_v4 }
 0x15f   :  { %v3110_v23 = vpop.f32.mrf.mxu0  ;;  %v3878_v24 = vpop.f32.mrf.mxu1 }
 0x161   :  { %v9812_v35 = vpop.f32.mrf.mxu0  ;;  %3304 = vmatmul.mubr.bf16.gmra.mxu0 %v8846_v15  ;;  %v9814_v36 = vpop.f32.mrf.mxu1  ;;  %8344 = vmatmul.mubr.msk.bf16.gmra.mxu1 %vm2598_vm0, %v8850_v16 }
 0x162   :  { %12829 = vst [vmem:[#allocation26_spill] sm:$0xff] %v9814_v36  ;;  %3311 = vmatprep.mubr.bf16.mxu0 %v8853_v19  ;;  %8347 = vmatprep.mubr.msk.bf16.mxu1 %vm2598_vm0, %v8854_v20 }
 0x163   :  { %v3115_v39 = vpop.f32.mrf.mxu0  ;;  %v3883_v40 = vpop.f32.mrf.mxu1 }
 0x165   :  { %v9818_v47 = vpop.f32.mrf.mxu0  ;;  %v9820_v48 = vpop.f32.mrf.mxu1 }
 0x166   :  { %12830 = vst [vmem:[#allocation27_spill] sm:$0xff] %v9820_v48 }
 0x167   :  { %v3118_v15 = vpop.f32.mrf.mxu0  ;;  %v3886_v16 = vpop.f32.mrf.mxu1 }
 0x168   :  { %v8856_v15 = vld [vmem:[%s12802_s0 + $0x390] ss:$12 sps:$4 sm:$0xff]  }
 0x169   :  { %v9834_v19 = vpop.f32.mrf.mxu0  ;;  %3312 = vmatmul.mubr.bf16.gmra.mxu0 %v8851_v51  ;;  %v9836_v20 = vpop.f32.mrf.mxu1  ;;  %8348 = vmatmul.mubr.msk.bf16.gmra.mxu1 %vm2598_vm0, %v8855_v52  ;;  %v8860_v51 = vld [vmem:[%s12802_s0 + $0x140] ss:$12 sps:$4 sm:$0xff]  }
 0x16a   :  { %12831 = vst [vmem:[#allocation28_spill] sm:$0xff] %v9836_v20  ;;  %3319 = vmatprep.mubr.bf16.mxu0 %v8858_v63  ;;  %8351 = vmatprep.mubr.msk.bf16.mxu1 %vm2598_vm0, %v8859_v0  ;;  %v8863_v52 = vld [vmem:[%s12802_s0 + $0x3ac] ss:$12 sps:$4 sm:$0xff]  }
 0x16b   :  { %v3123_v23 = vpop.f32.mrf.mxu0  ;;  %v3891_v24 = vpop.f32.mrf.mxu1  ;;  %v8864_v63 = vld [vmem:[%s12802_s0 + $0x158] ss:$12 sps:$4 sm:$0xff]  }
 0x16d   :  { %v9840_v39 = vpop.f32.mrf.mxu0  ;;  %v9842_v40 = vpop.f32.mrf.mxu1 }
 0x16e   :  { %12832 = vst [vmem:[#allocation29_spill] sm:$0xff] %v9842_v40 }
 0x16f   :  { %v3126_v0 = vpop.f32.mrf.mxu0  ;;  %v3894_v16 = vpop.f32.mrf.mxu1 }
 0x170   :  { %v8861_v0 = vld [vmem:[%s12802_s0 + $0x3a8] ss:$12 sps:$4 sm:$0xff]  }
 0x171   :  { %v9856_v23 = vpop.f32.mrf.mxu0  ;;  %3320 = vmatmul.mubr.bf16.gmra.mxu0 %v8856_v15  ;;  %v9858_v24 = vpop.f32.mrf.mxu1  ;;  %8352 = vmatmul.mubr.msk.bf16.gmra.mxu1 %vm2598_vm0, %v8860_v51  ;;  %v8865_v15 = vld [vmem:[%s12802_s0 + $0x170] ss:$12 sps:$4 sm:$0xff]  }
 0x172   :  { %12833 = vst [vmem:[#allocation30_spill] sm:$0xff] %v9858_v24  ;;  %3327 = vmatprep.mubr.bf16.mxu0 %v8863_v52  ;;  %8355 = vmatprep.mubr.msk.bf16.mxu1 %vm2598_vm0, %v8864_v63  ;;  %v8868_v51 = vld [vmem:[%s12802_s0 + $0x3c4] ss:$12 sps:$4 sm:$0xff]  }
 0x173   :  { %v3131_v40 = vpop.f32.mrf.mxu0  ;;  %v3899_v20 = vpop.f32.mrf.mxu1 }
 0x174   :  { %v8869_v20 = vld [vmem:[%s12802_s0 + $0x188] ss:$12 sps:$4 sm:$0xff]  }
 0x175   :  { %v9862_v48 = vpop.f32.mrf.mxu0  ;;  %v9864_v36 = vpop.f32.mrf.mxu1 }
 0x176   :  { %12834 = vst [vmem:[#allocation31_spill] sm:$0xff] %v9864_v36 }
 0x177   :  { %v3134_v40 = vpop.f32.mrf.mxu0  ;;  %v3902_v52 = vpop.f32.mrf.mxu1 }
 0x178   :  { %v8866_v40 = vld [vmem:[%s12802_s0 + $0x3c0] ss:$12 sps:$4 sm:$0xff]  }
 0x179   :  { %v9878_v63 = vpop.f32.mrf.mxu0  ;;  %3328 = vmatmul.mubr.bf16.gmra.mxu0 %v8861_v0  ;;  %v9880_v16 = vpop.f32.mrf.mxu1  ;;  %8356 = vmatmul.mubr.msk.bf16.gmra.mxu1 %vm2598_vm0, %v8865_v15  ;;  %v8870_v0 = vld [vmem:[%s12802_s0 + $0x1a0] ss:$12 sps:$4 sm:$0xff]   ;;  %v8873_v15 = vld [vmem:[%s12802_s0 + $0x3dc] ss:$12 sps:$4 sm:$0xff]  }
 0x17a   :  { %12835 = vst [vmem:[#allocation32_spill] sm:$0xff] %v9880_v16  ;;  %3335 = vmatprep.mubr.bf16.mxu0 %v8868_v51  ;;  %8359 = vmatprep.mubr.msk.bf16.mxu1 %vm2598_vm0, %v8869_v20 }
 0x17b   :  { %v3139_v36 = vpop.f32.mrf.mxu0  ;;  %v3907_v24 = vpop.f32.mrf.mxu1 }
 0x17c   :  { %v8874_v36 = vld [vmem:[%s12802_s0 + $0x1b8] ss:$12 sps:$4 sm:$0xff]  }
 0x17d   :  { %v9884_v4 = vpop.f32.mrf.mxu0  ;;  %v9886_v56 = vpop.f32.mrf.mxu1 }
 0x17e   :  { %12836 = vst [vmem:[#allocation33_spill] sm:$0xff] %v9886_v56 }
 0x17f   :  { %v3142_v24 = vpop.f32.mrf.mxu0  ;;  %v3910_v51 = vpop.f32.mrf.mxu1 }
 0x180   :  { %v8871_v24 = vld [vmem:[%s12802_s0 + $0x3d8] ss:$12 sps:$4 sm:$0xff]  }
 0x181   :  { %v9900_v20 = vpop.f32.mrf.mxu0  ;;  %3336 = vmatmul.mubr.bf16.gmra.mxu0 %v8866_v40  ;;  %v9902_v52 = vpop.f32.mrf.mxu1  ;;  %8360 = vmatmul.mubr.msk.bf16.gmra.mxu1 %vm2598_vm0, %v8870_v0  ;;  %v8875_v40 = vld [vmem:[%s12802_s0 + $0x1d0] ss:$12 sps:$4 sm:$0xff]   ;;  %v8878_v0 = vld [vmem:[%s12802_s0 + $0x3f4] ss:$12 sps:$4 sm:$0xff]  }
 0x182   :  { %12837 = vst [vmem:[#allocation34_spill] sm:$0xff] %v9902_v52  ;;  %3343 = vmatprep.mubr.bf16.mxu0 %v8873_v15  ;;  %8363 = vmatprep.mubr.msk.bf16.mxu1 %vm2598_vm0, %v8874_v36 }
 0x183   :  { %v3147_v56 = vpop.f32.mrf.mxu0  ;;  %v3915_v16 = vpop.f32.mrf.mxu1 }
 0x184   :  { %v8879_v56 = vld [vmem:[%s12802_s0 + $0x1e8] ss:$12 sps:$4 sm:$0xff]  }
 0x185   :  { %v9906_v38 = vpop.f32.mrf.mxu0  ;;  %v9908_v28 = vpop.f32.mrf.mxu1 }
 0x186   :  { %12838 = vst [vmem:[#allocation35_spill] sm:$0xff] %v9908_v28 }
 0x187   :  { %v3150_v16 = vpop.f32.mrf.mxu0  ;;  %v3918_v15 = vpop.f32.mrf.mxu1 }
 0x188   :  { %v8876_v16 = vld [vmem:[%s12802_s0 + $0x3f0] ss:$12 sps:$4 sm:$0xff]  }
 0x189   :  { %v9922_v36 = vpop.f32.mrf.mxu0  ;;  %3344 = vmatmul.mubr.bf16.gmra.mxu0 %v8871_v24  ;;  %v9924_v51 = vpop.f32.mrf.mxu1  ;;  %8364 = vmatmul.mubr.msk.bf16.gmra.mxu1 %vm2598_vm0, %v8875_v40  ;;  %v8880_v24 = vld [vmem:[%s12802_s0 + $0x200] ss:$12 sps:$4 sm:$0xff]  }
 0x18a   :  { %12839 = vst [vmem:[#allocation36_spill] sm:$0xff] %v9924_v51  ;;  %3351 = vmatprep.mubr.bf16.mxu0 %v8878_v0  ;;  %8367 = vmatprep.mubr.msk.bf16.mxu1 %vm2598_vm0, %v8879_v56  ;;  %v8883_v40 = vld [vmem:[%s12802_s0 + $0x40c] ss:$12 sps:$4 sm:$0xff]  }
 0x18b   :  { %v3155_v28 = vpop.f32.mrf.mxu0  ;;  %v3923_v52 = vpop.f32.mrf.mxu1 }
 0x18c   :  { %v8884_v28 = vld [vmem:[%s12802_s0 + $0x218] ss:$12 sps:$4 sm:$0xff]  }
 0x18d   :  { %v9928_v12 = vpop.f32.mrf.mxu0  ;;  %v9930_v2 = vpop.f32.mrf.mxu1 }
 0x18e   :  { %12840 = vst [vmem:[#allocation37_spill] sm:$0xff] %v9930_v2 }
 0x18f   :  { %v3158_v52 = vpop.f32.mrf.mxu0  ;;  %v3926_v0 = vpop.f32.mrf.mxu1 }
 0x190   :  { %v8881_v52 = vld [vmem:[%s12802_s0 + $0x408] ss:$12 sps:$4 sm:$0xff]  }
 0x191   :  { %v9944_v56 = vpop.f32.mrf.mxu0  ;;  %3352 = vmatmul.mubr.bf16.gmra.mxu0 %v8876_v16  ;;  %v9946_v15 = vpop.f32.mrf.mxu1  ;;  %8368 = vmatmul.mubr.msk.bf16.gmra.mxu1 %vm2598_vm0, %v8880_v24  ;;  %v8885_v16 = vld [vmem:[%s12802_s0 + $0x230] ss:$12 sps:$4 sm:$0xff]  }
 0x192   :  { %12841 = vst [vmem:[#allocation38_spill] sm:$0xff] %v9946_v15  ;;  %3359 = vmatprep.mubr.bf16.mxu0 %v8883_v40  ;;  %8371 = vmatprep.mubr.msk.bf16.mxu1 %vm2598_vm0, %v8884_v28  ;;  %v8888_v24 = vld [vmem:[%s12802_s0 + $0x424] ss:$12 sps:$4 sm:$0xff]  }
 0x193   :  { %v3163_v2 = vpop.f32.mrf.mxu0  ;;  %v3931_v51 = vpop.f32.mrf.mxu1 }
 0x194   :  { %v8889_v2 = vld [vmem:[%s12802_s0 + $0x248] ss:$12 sps:$4 sm:$0xff]  }
 0x195   :  { %v9950_v50 = vpop.f32.mrf.mxu0  ;;  %v9952_v44 = vpop.f32.mrf.mxu1 }
 0x196   :  { %12842 = vst [vmem:[#allocation39_spill] sm:$0xff] %v9952_v44 }
 0x197   :  { %v3166_v51 = vpop.f32.mrf.mxu0  ;;  %v3934_v40 = vpop.f32.mrf.mxu1 }
 0x198   :  { %v8886_v51 = vld [vmem:[%s12802_s0 + $0x420] ss:$12 sps:$4 sm:$0xff]  }
 0x199   :  { %v9966_v28 = vpop.f32.mrf.mxu0  ;;  %3360 = vmatmul.mubr.bf16.gmra.mxu0 %v8881_v52  ;;  %v9968_v0 = vpop.f32.mrf.mxu1  ;;  %8372 = vmatmul.mubr.msk.bf16.gmra.mxu1 %vm2598_vm0, %v8885_v16  ;;  %v8890_v52 = vld [vmem:[%s12802_s0 + $0x260] ss:$12 sps:$4 sm:$0xff]   ;;  %v8893_v16 = vld [vmem:[%s12802_s0 + $0x43c] ss:$12 sps:$4 sm:$0xff]  }
 0x19a   :  { %12843 = vst [vmem:[#allocation40_spill] sm:$0xff] %v9968_v0  ;;  %3367 = vmatprep.mubr.bf16.mxu0 %v8888_v24  ;;  %8375 = vmatprep.mubr.msk.bf16.mxu1 %vm2598_vm0, %v8889_v2 }
 0x19b   :  { %v3171_v44 = vpop.f32.mrf.mxu0  ;;  %v3939_v15 = vpop.f32.mrf.mxu1 }
 0x19c   :  { %v8894_v44 = vld [vmem:[%s12802_s0 + $0x278] ss:$12 sps:$4 sm:$0xff]  }
 0x19d   :  { %v9972_v32 = vpop.f32.mrf.mxu0  ;;  %v9974_v26 = vpop.f32.mrf.mxu1 }
 0x19e   :  { %12844 = vst [vmem:[#allocation41_spill] sm:$0xff] %v9974_v26 }
 0x19f   :  { %v3174_v15 = vpop.f32.mrf.mxu0  ;;  %v3942_v24 = vpop.f32.mrf.mxu1 }
 0x1a0   :  { %v8891_v15 = vld [vmem:[%s12802_s0 + $0x438] ss:$12 sps:$4 sm:$0xff]  }
 0x1a1   :  { %v9988_v2 = vpop.f32.mrf.mxu0  ;;  %3368 = vmatmul.mubr.bf16.gmra.mxu0 %v8886_v51  ;;  %v9990_v40 = vpop.f32.mrf.mxu1  ;;  %8376 = vmatmul.mubr.msk.bf16.gmra.mxu1 %vm2598_vm0, %v8890_v52  ;;  %v8895_v51 = vld [vmem:[%s12802_s0 + $0x290] ss:$12 sps:$4 sm:$0xff]   ;;  %v8898_v52 = vld [vmem:[%s12802_s0 + $0x454] ss:$12 sps:$4 sm:$0xff]  }
 0x1a2   :  { %12845 = vst [vmem:[#allocation42_spill] sm:$0xff] %v9990_v40  ;;  %3375 = vmatprep.mubr.bf16.mxu0 %v8893_v16  ;;  %8379 = vmatprep.mubr.msk.bf16.mxu1 %vm2598_vm0, %v8894_v44 }
 0x1a3   :  { %v3179_v26 = vpop.f32.mrf.mxu0  ;;  %v3947_v0 = vpop.f32.mrf.mxu1 }
 0x1a4   :  { %v8899_v26 = vld [vmem:[%s12802_s0 + $0x2a8] ss:$12 sps:$4 sm:$0xff]  }
 0x1a5   :  { %v9994_v14 = vpop.f32.mrf.mxu0  ;;  %v9996_v8 = vpop.f32.mrf.mxu1 }
 0x1a6   :  { %12846 = vst [vmem:[#allocation43_spill] sm:$0xff] %v9996_v8 }
 0x1a7   :  { %v3182_v0 = vpop.f32.mrf.mxu0  ;;  %v3950_v16 = vpop.f32.mrf.mxu1 }
 0x1a8   :  { %v8896_v0 = vld [vmem:[%s12802_s0 + $0x450] ss:$12 sps:$4 sm:$0xff]  }
 0x1a9   :  { %v10010_v44 = vpop.f32.mrf.mxu0  ;;  %3376 = vmatmul.mubr.bf16.gmra.mxu0 %v8891_v15  ;;  %v10012_v24 = vpop.f32.mrf.mxu1  ;;  %8380 = vmatmul.mubr.msk.bf16.gmra.mxu1 %vm2598_vm0, %v8895_v51  ;;  %v8900_v15 = vld [vmem:[%s12802_s0 + $0x2c0] ss:$12 sps:$4 sm:$0xff]  }
 0x1aa   :  { %12847 = vst [vmem:[#allocation44_spill] sm:$0xff] %v10012_v24  ;;  %3383 = vmatprep.mubr.bf16.mxu0 %v8898_v52  ;;  %8383 = vmatprep.mubr.msk.bf16.mxu1 %vm2598_vm0, %v8899_v26  ;;  %v8903_v51 = vld [vmem:[%s12802_s0 + $0x46c] ss:$12 sps:$4 sm:$0xff]  }
 0x1ab   :  { %v3187_v8 = vpop.f32.mrf.mxu0  ;;  %v3955_v40 = vpop.f32.mrf.mxu1 }
 0x1ac   :  { %v8904_v8 = vld [vmem:[%s12802_s0 + $0x2d8] ss:$12 sps:$4 sm:$0xff]  }
 0x1ad   :  { %v10016_v60 = vpop.f32.mrf.mxu0  ;;  %v10018_v54 = vpop.f32.mrf.mxu1 }
 0x1ae   :  { %12848 = vst [vmem:[#allocation45_spill] sm:$0xff] %v10018_v54 }
 0x1af   :  { %v3190_v40 = vpop.f32.mrf.mxu0  ;;  %v3958_v52 = vpop.f32.mrf.mxu1 }
 0x1b0   :  { %v8901_v40 = vld [vmem:[%s12802_s0 + $0x468] ss:$12 sps:$4 sm:$0xff]  }
 0x1b1   :  { %v10032_v26 = vpop.f32.mrf.mxu0  ;;  %3384 = vmatmul.mubr.bf16.gmra.mxu0 %v8896_v0  ;;  %v10034_v16 = vpop.f32.mrf.mxu1  ;;  %8384 = vmatmul.mubr.msk.bf16.gmra.mxu1 %vm2598_vm0, %v8900_v15  ;;  %v8905_v0 = vld [vmem:[%s12802_s0 + $0x2f0] ss:$12 sps:$4 sm:$0xff]  }
 0x1b2   :  { %12849 = vst [vmem:[#allocation46_spill] sm:$0xff] %v10034_v16  ;;  %3391 = vmatprep.mubr.bf16.mxu0 %v8903_v51  ;;  %8387 = vmatprep.mubr.msk.bf16.mxu1 %vm2598_vm0, %v8904_v8  ;;  %v8908_v15 = vld [vmem:[%s12802_s0 + $0x484] ss:$12 sps:$4 sm:$0xff]  }
 0x1b3   :  { %v3195_v54 = vpop.f32.mrf.mxu0  ;;  %v3963_v24 = vpop.f32.mrf.mxu1 }
 0x1b4   :  { %v8909_v54 = vld [vmem:[%s12802_s0 + $0x308] ss:$12 sps:$4 sm:$0xff]  }
 0x1b5   :  { %v10038_v46 = vpop.f32.mrf.mxu0  ;;  %v10040_v42 = vpop.f32.mrf.mxu1 }
 0x1b6   :  { %12850 = vst [vmem:[#allocation47_spill] sm:$0xff] %v10038_v46  ;;  %12851 = vst [vmem:[#allocation48_spill] sm:$0xff] %v10040_v42 }
 0x1b7   :  { %v3198_v24 = vpop.f32.mrf.mxu0  ;;  %v3966_v51 = vpop.f32.mrf.mxu1 }
 0x1b8   :  { %v8906_v24 = vld [vmem:[%s12802_s0 + $0x480] ss:$12 sps:$4 sm:$0xff]  }
 0x1b9   :  { %v10054_v8 = vpop.f32.mrf.mxu0  ;;  %3392 = vmatmul.mubr.bf16.gmra.mxu0 %v8901_v40  ;;  %v10056_v52 = vpop.f32.mrf.mxu1  ;;  %8388 = vmatmul.mubr.msk.bf16.gmra.mxu1 %vm2598_vm0, %v8905_v0  ;;  %v8910_v40 = vld [vmem:[%s12802_s0 + $0x320] ss:$12 sps:$4 sm:$0xff]   ;;  %v8913_v0 = vld [vmem:[%s12802_s0 + $0x49c] ss:$12 sps:$4 sm:$0xff]  }
 0x1ba   :  { %12852 = vst [vmem:[#allocation49_spill] sm:$0xff] %v10056_v52  ;;  %3399 = vmatprep.mubr.bf16.mxu0 %v8908_v15  ;;  %8391 = vmatprep.mubr.msk.bf16.mxu1 %vm2598_vm0, %v8909_v54 }
 0x1bb   :  { %v3203_v42 = vpop.f32.mrf.mxu0  ;;  %v3971_v16 = vpop.f32.mrf.mxu1 }
 0x1bc   :  { %v8914_v42 = vld [vmem:[%s12802_s0 + $0x338] ss:$12 sps:$4 sm:$0xff]  }
 0x1bd   :  { %v10060_v34 = vpop.f32.mrf.mxu0  ;;  %v10062_v30 = vpop.f32.mrf.mxu1 }
 0x1be   :  { %12853 = vst [vmem:[#allocation50_spill] sm:$0xff] %v10062_v30 }
 0x1bf   :  { %v3206_v16 = vpop.f32.mrf.mxu0  ;;  %v3974_v15 = vpop.f32.mrf.mxu1 }
 0x1c0   :  { %v8911_v16 = vld [vmem:[%s12802_s0 + $0x498] ss:$12 sps:$4 sm:$0xff]  }
 0x1c1   :  { %v10076_v54 = vpop.f32.mrf.mxu0  ;;  %3400 = vmatmul.mubr.bf16.gmra.mxu0 %v8906_v24  ;;  %v10078_v51 = vpop.f32.mrf.mxu1  ;;  %8392 = vmatmul.mubr.msk.bf16.gmra.mxu1 %vm2598_vm0, %v8910_v40  ;;  %v8915_v24 = vld [vmem:[%s12802_s0 + $0x350] ss:$12 sps:$4 sm:$0xff]   ;;  %v8918_v40 = vld [vmem:[%s12802_s0 + $0x4b4] ss:$12 sps:$4 sm:$0xff]  }
 0x1c2   :  { %12854 = vst [vmem:[#allocation51_spill] sm:$0xff] %v10076_v54  ;;  %12855 = vst [vmem:[#allocation52_spill] sm:$0xff] %v10078_v51  ;;  %3407 = vmatprep.mubr.bf16.mxu0 %v8913_v0  ;;  %8395 = vmatprep.mubr.msk.bf16.mxu1 %vm2598_vm0, %v8914_v42 }
 0x1c3   :  { %v3211_v30 = vpop.f32.mrf.mxu0  ;;  %v3979_v52 = vpop.f32.mrf.mxu1 }
 0x1c4   :  { %v8919_v30 = vld [vmem:[%s12802_s0 + $0x368] ss:$12 sps:$4 sm:$0xff]  }
 0x1c5   :  { %v10082_v22 = vpop.f32.mrf.mxu0  ;;  %v10084_v18 = vpop.f32.mrf.mxu1 }
 0x1c6   :  { %12856 = vst [vmem:[#allocation53_spill] sm:$0xff] %v10082_v22  ;;  %12857 = vst [vmem:[#allocation54_spill] sm:$0xff] %v10084_v18 }
 0x1c7   :  { %v3214_v52 = vpop.f32.mrf.mxu0  ;;  %v3982_v0 = vpop.f32.mrf.mxu1 }
 0x1c8   :  { %v8916_v52 = vld [vmem:[%s12802_s0 + $0x4b0] ss:$12 sps:$4 sm:$0xff]  }
 0x1c9   :  { %v10098_v42 = vpop.f32.mrf.mxu0  ;;  %3408 = vmatmul.mubr.bf16.gmra.mxu0 %v8911_v16  ;;  %v10100_v15 = vpop.f32.mrf.mxu1  ;;  %8396 = vmatmul.mubr.msk.bf16.gmra.mxu1 %vm2598_vm0, %v8915_v24  ;;  %v8920_v16 = vld [vmem:[%s12802_s0 + $0x380] ss:$12 sps:$4 sm:$0xff]  }
 0x1ca   :  { %12858 = vst [vmem:[#allocation55_spill] sm:$0xff] %v10098_v42  ;;  %12859 = vst [vmem:[#allocation56_spill] sm:$0xff] %v10100_v15  ;;  %3415 = vmatprep.mubr.bf16.mxu0 %v8918_v40  ;;  %8399 = vmatprep.mubr.msk.bf16.mxu1 %vm2598_vm0, %v8919_v30  ;;  %v8923_v24 = vld [vmem:[%s12802_s0 + $0x4cc] ss:$12 sps:$4 sm:$0xff]  }
 0x1cb   :  { %v3219_v18 = vpop.f32.mrf.mxu0  ;;  %v3987_v51 = vpop.f32.mrf.mxu1 }
 0x1cc   :  { %v8924_v18 = vld [vmem:[%s12802_s0 + $0x398] ss:$12 sps:$4 sm:$0xff]  }
 0x1cd   :  { %v10104_v10 = vpop.f32.mrf.mxu0  ;;  %v10106_v6 = vpop.f32.mrf.mxu1 }
 0x1ce   :  { %12860 = vst [vmem:[#allocation57_spill] sm:$0xff] %v10104_v10  ;;  %12861 = vst [vmem:[#allocation58_spill] sm:$0xff] %v10106_v6 }
 0x1cf   :  { %v3222_v51 = vpop.f32.mrf.mxu0  ;;  %v3990_v40 = vpop.f32.mrf.mxu1 }
 0x1d0   :  { %v8921_v51 = vld [vmem:[%s12802_s0 + $0x4c8] ss:$12 sps:$4 sm:$0xff]  }
 0x1d1   :  { %v10120_v30 = vpop.f32.mrf.mxu0  ;;  %3416 = vmatmul.mubr.bf16.gmra.mxu0 %v8916_v52  ;;  %v10122_v0 = vpop.f32.mrf.mxu1  ;;  %8400 = vmatmul.mubr.msk.bf16.gmra.mxu1 %vm2598_vm0, %v8920_v16  ;;  %v8925_v52 = vld [vmem:[%s12802_s0 + $0x3b0] ss:$12 sps:$4 sm:$0xff]  }
 0x1d2   :  { %12862 = vst [vmem:[#allocation59_spill] sm:$0xff] %v10120_v30  ;;  %12863 = vst [vmem:[#allocation60_spill] sm:$0xff] %v10122_v0  ;;  %3423 = vmatprep.mubr.bf16.mxu0 %v8923_v24  ;;  %8403 = vmatprep.mubr.msk.bf16.mxu1 %vm2598_vm0, %v8924_v18  ;;  %v8928_v16 = vld [vmem:[%s12802_s0 + $0x4e4] ss:$12 sps:$4 sm:$0xff]  }
 0x1d3   :  { %v3227_v6 = vpop.f32.mrf.mxu0  ;;  %v3995_v15 = vpop.f32.mrf.mxu1 }
 0x1d4   :  { %v8929_v6 = vld [vmem:[%s12802_s0 + $0x3c8] ss:$12 sps:$4 sm:$0xff]  }
 0x1d5   :  { %v10126_v62 = vpop.f32.mrf.mxu0  ;;  %v10128_v58 = vpop.f32.mrf.mxu1 }
 0x1d6   :  { %12864 = vst [vmem:[#allocation61_spill] sm:$0xff] %v10126_v62  ;;  %12865 = vst [vmem:[#allocation62_spill] sm:$0xff] %v10128_v58 }
 0x1d7   :  { %v3230_v15 = vpop.f32.mrf.mxu0  ;;  %v3998_v24 = vpop.f32.mrf.mxu1 }
 0x1d8   :  { %v8926_v15 = vld [vmem:[%s12802_s0 + $0x4e0] ss:$12 sps:$4 sm:$0xff]  }
 0x1d9   :  { %v10142_v18 = vpop.f32.mrf.mxu0  ;;  %3424 = vmatmul.mubr.bf16.gmra.mxu0 %v8921_v51  ;;  %v10144_v40 = vpop.f32.mrf.mxu1  ;;  %8404 = vmatmul.mubr.msk.bf16.gmra.mxu1 %vm2598_vm0, %v8925_v52  ;;  %v8930_v51 = vld [vmem:[%s12802_s0 + $0x3e0] ss:$12 sps:$4 sm:$0xff]   ;;  %v8933_v52 = vld [vmem:[%s12802_s0 + $0x4fc] ss:$12 sps:$4 sm:$0xff]  }
 0x1da   :  { %12866 = vst [vmem:[#allocation63_spill] sm:$0xff] %v10142_v18  ;;  %12867 = vst [vmem:[#allocation64_spill] sm:$0xff] %v10144_v40  ;;  %3431 = vmatprep.mubr.bf16.mxu0 %v8928_v16  ;;  %8407 = vmatprep.mubr.msk.bf16.mxu1 %vm2598_vm0, %v8929_v6 }
 0x1db   :  { %v3235_v58 = vpop.f32.mrf.mxu0  ;;  %v4003_v0 = vpop.f32.mrf.mxu1 }
 0x1dc   :  { %v8934_v58 = vld [vmem:[%s12802_s0 + $0x3f8] ss:$12 sps:$4 sm:$0xff]  }
 0x1dd   :  { %v10148_v62 = vpop.f32.mrf.mxu0  ;;  %v10150_v30 = vpop.f32.mrf.mxu1 }
 0x1de   :  { %12868 = vst [vmem:[#allocation65_spill] sm:$0xff] %v10148_v62  ;;  %12869 = vst [vmem:[#allocation66_spill] sm:$0xff] %v10150_v30 }
 0x1df   :  { %v3238_v0 = vpop.f32.mrf.mxu0  ;;  %v4006_v16 = vpop.f32.mrf.mxu1 }
 0x1e0   :  { %v8931_v0 = vld [vmem:[%s12802_s0 + $0x4f8] ss:$12 sps:$4 sm:$0xff]  }
 0x1e1   :  { %v10164_v6 = vpop.f32.mrf.mxu0  ;;  %3432 = vmatmul.mubr.bf16.gmra.mxu0 %v8926_v15  ;;  %v10166_v24 = vpop.f32.mrf.mxu1  ;;  %8408 = vmatmul.mubr.msk.bf16.gmra.mxu1 %vm2598_vm0, %v8930_v51  ;;  %v8935_v15 = vld [vmem:[%s12802_s0 + $0x410] ss:$12 sps:$4 sm:$0xff]   ;;  %v8938_v51 = vld [vmem:[%s12802_s0 + $0x514] ss:$12 sps:$4 sm:$0xff]  }
 0x1e2   :  { %12870 = vst [vmem:[#allocation67_spill] sm:$0xff] %v10164_v6  ;;  %12871 = vst [vmem:[#allocation68_spill] sm:$0xff] %v10166_v24  ;;  %3439 = vmatprep.mubr.bf16.mxu0 %v8933_v52  ;;  %8411 = vmatprep.mubr.msk.bf16.mxu1 %vm2598_vm0, %v8934_v58 }
 0x1e3   :  { %v3243_v30 = vpop.f32.mrf.mxu0  ;;  %v4011_v40 = vpop.f32.mrf.mxu1 }
 0x1e4   :  { %v8939_v30 = vld [vmem:[%s12802_s0 + $0x428] ss:$12 sps:$4 sm:$0xff]  }
 0x1e5   :  { %v10170_v62 = vpop.f32.mrf.mxu0  ;;  %v10172_v18 = vpop.f32.mrf.mxu1 }
 0x1e6   :  { %12872 = vst [vmem:[#allocation69_spill] sm:$0xff] %v10170_v62  ;;  %12873 = vst [vmem:[#allocation70_spill] sm:$0xff] %v10172_v18 }
 0x1e7   :  { %v3246_v40 = vpop.f32.mrf.mxu0  ;;  %v4014_v52 = vpop.f32.mrf.mxu1 }
 0x1e8   :  { %v8936_v40 = vld [vmem:[%s12802_s0 + $0x510] ss:$12 sps:$4 sm:$0xff]  }
 0x1e9   :  { %v10186_v58 = vpop.f32.mrf.mxu0  ;;  %3440 = vmatmul.mubr.bf16.gmra.mxu0 %v8931_v0  ;;  %v10188_v16 = vpop.f32.mrf.mxu1  ;;  %8412 = vmatmul.mubr.msk.bf16.gmra.mxu1 %vm2598_vm0, %v8935_v15  ;;  %v8940_v0 = vld [vmem:[%s12802_s0 + $0x440] ss:$12 sps:$4 sm:$0xff]  }
 0x1ea   :  { %12874 = vst [vmem:[#allocation71_spill] sm:$0xff] %v10186_v58  ;;  %12875 = vst [vmem:[#allocation72_spill] sm:$0xff] %v10188_v16  ;;  %3447 = vmatprep.mubr.bf16.mxu0 %v8938_v51  ;;  %8415 = vmatprep.mubr.msk.bf16.mxu1 %vm2598_vm0, %v8939_v30  ;;  %v8943_v15 = vld [vmem:[%s12802_s0 + $0x52c] ss:$12 sps:$4 sm:$0xff]  }
 0x1eb   :  { %v3251_v18 = vpop.f32.mrf.mxu0  ;;  %v4019_v24 = vpop.f32.mrf.mxu1 }
 0x1ec   :  { %v8944_v18 = vld [vmem:[%s12802_s0 + $0x458] ss:$12 sps:$4 sm:$0xff]  }
 0x1ed   :  { %v10192_v62 = vpop.f32.mrf.mxu0  ;;  %v10194_v6 = vpop.f32.mrf.mxu1 }
 0x1ee   :  { %12876 = vst [vmem:[#allocation73_spill] sm:$0xff] %v10192_v62  ;;  %12877 = vst [vmem:[#allocation74_spill] sm:$0xff] %v10194_v6 }
 0x1ef   :  { %v3254_v24 = vpop.f32.mrf.mxu0  ;;  %v4022_v51 = vpop.f32.mrf.mxu1 }
 0x1f0   :  { %v8941_v24 = vld [vmem:[%s12802_s0 + $0x528] ss:$12 sps:$4 sm:$0xff]  }
 0x1f1   :  { %v10208_v30 = vpop.f32.mrf.mxu0  ;;  %3448 = vmatmul.mubr.bf16.gmra.mxu0 %v8936_v40  ;;  %v10210_v52 = vpop.f32.mrf.mxu1  ;;  %8416 = vmatmul.mubr.msk.bf16.gmra.mxu1 %vm2598_vm0, %v8940_v0  ;;  %v8945_v40 = vld [vmem:[%s12802_s0 + $0x470] ss:$12 sps:$4 sm:$0xff]  }
 0x1f2   :  { %12878 = vst [vmem:[#allocation75_spill] sm:$0xff] %v10208_v30  ;;  %12879 = vst [vmem:[#allocation76_spill] sm:$0xff] %v10210_v52  ;;  %3455 = vmatprep.mubr.bf16.mxu0 %v8943_v15  ;;  %8419 = vmatprep.mubr.msk.bf16.mxu1 %vm2598_vm0, %v8944_v18  ;;  %v8948_v0 = vld [vmem:[%s12802_s0 + $0x544] ss:$12 sps:$4 sm:$0xff]  }
 0x1f3   :  { %v3259_v6 = vpop.f32.mrf.mxu0  ;;  %v4027_v16 = vpop.f32.mrf.mxu1 }
 0x1f4   :  { %v8949_v6 = vld [vmem:[%s12802_s0 + $0x488] ss:$12 sps:$4 sm:$0xff]  }
 0x1f5   :  { %v10214_v62 = vpop.f32.mrf.mxu0  ;;  %v10216_v58 = vpop.f32.mrf.mxu1 }
 0x1f6   :  { %12880 = vst [vmem:[#allocation77_spill] sm:$0xff] %v10214_v62  ;;  %12881 = vst [vmem:[#allocation78_spill] sm:$0xff] %v10216_v58 }
 0x1f7   :  { %v3262_v16 = vpop.f32.mrf.mxu0  ;;  %v4030_v15 = vpop.f32.mrf.mxu1 }
 0x1f8   :  { %v8946_v16 = vld [vmem:[%s12802_s0 + $0x540] ss:$12 sps:$4 sm:$0xff]  }
 0x1f9   :  { %v10230_v18 = vpop.f32.mrf.mxu0  ;;  %3456 = vmatmul.mubr.bf16.gmra.mxu0 %v8941_v24  ;;  %v10232_v51 = vpop.f32.mrf.mxu1  ;;  %8420 = vmatmul.mubr.msk.bf16.gmra.mxu1 %vm2598_vm0, %v8945_v40  ;;  %v8950_v24 = vld [vmem:[%s12802_s0 + $0x4a0] ss:$12 sps:$4 sm:$0xff]   ;;  %v8953_v40 = vld [vmem:[%s12802_s0 + $0x55c] ss:$12 sps:$4 sm:$0xff]  }
 0x1fa   :  { %12882 = vst [vmem:[#allocation79_spill] sm:$0xff] %v10230_v18  ;;  %12883 = vst [vmem:[#allocation80_spill] sm:$0xff] %v10232_v51  ;;  %3463 = vmatprep.mubr.bf16.mxu0 %v8948_v0  ;;  %8423 = vmatprep.mubr.msk.bf16.mxu1 %vm2598_vm0, %v8949_v6 }
 0x1fb   :  { %v3267_v58 = vpop.f32.mrf.mxu0  ;;  %v4035_v52 = vpop.f32.mrf.mxu1 }
 0x1fc   :  { %v8954_v58 = vld [vmem:[%s12802_s0 + $0x4b8] ss:$12 sps:$4 sm:$0xff]   ;;  %v10255_v52 = vld [vmem:[%s12803_s2] ss:$0 sm:$0xff] }
 0x1fd   :  { %v10236_v62 = vpop.f32.mrf.mxu0  ;;  %v10238_v30 = vpop.f32.mrf.mxu1  ;;  %v3026_v15 = vadd.f32 %v10255_v52, %v9583_v5  ;;  %v3021_v5 = vadd.f32 %v10255_v52, %v9567_v61 }
 0x1fe   :  { %12884 = vst [vmem:[#allocation81_spill] sm:$0xff] %v10236_v62  ;;  %12885 = vst [vmem:[#allocation82_spill] sm:$0xff] %v10238_v30  ;;  %v3018_v62 = vadd.f32 %v10255_v52, %v9563_v57  ;;  %v8951_v57 = vld [vmem:[%s12802_s0 + $0x558] ss:$12 sps:$4 sm:$0xff]  }
 0x1ff   :  { %v3270_v0 = vpop.f32.mrf.mxu0  ;;  %v4038_v6 = vpop.f32.mrf.mxu1 }
 0x201   :  { %v10259_v30 = vpop.f32.mrf.mxu0  ;;  %3464 = vmatmul.mubr.bf16.gmra.mxu0 %v8946_v16  ;;  %v8329_v51 = vpop.f32.mrf.mxu1  ;;  %8424 = vmatmul.mubr.msk.bf16.gmra.mxu1 %vm2598_vm0, %v8950_v24  ;;  %v3029_v16 = vadd.f32 %v10255_v52, %v9587_v9  ;;  %v8959_v9 = vld [vmem:[%s12802_s0 + $0x4e8] ss:$12 sps:$4 sm:$0xff]  }
 0x202   :  { %12886 = vst [vmem:[#allocation83_spill] sm:$0xff] %v10259_v30  ;;  %v4083_v18 = vadd.f32 %v8329_v51, %v3026_v15  ;;  %3471 = vmatprep.mubr.bf16.mxu0 %v8953_v40  ;;  %8427 = vmatprep.mubr.msk.bf16.mxu1 %vm2598_vm0, %v8954_v58 }
 0x203   :  { %v3275_v10 = vpop.f32.mrf.mxu0  ;;  %v4074_v22 = vpop.f32.mrf.mxu1 }
 0x204   :  { %vm5099_vm1 = vcmp.gt.f32.partialorder %v4083_v18, 0.0  ;;  %v5355_v0 = vmul.f32 0.2, %v4083_v18  ;;  %v4075_v6 = vadd.f32 %v4074_v22, %v3018_v62  ;;  %v8955_v10 = vld [vmem:[%s12802_s0 + $0x4d0] ss:$12 sps:$4 sm:$0xff]  }
 0x205   :  { %v10269_v30 = vpop.f32.mrf.mxu0  ;;  %v8330_v24 = vpop.f32.mrf.mxu1  ;;  %v8958_v62 = vld [vmem:[%s12802_s0 + $0x574] ss:$12 sps:$4 sm:$0xff]  }
 0x206   :  { %12887 = vst [vmem:[#allocation84_spill] sm:$0xff] %v10269_v30  ;;  %v5611_v22 = vsel %vm5099_vm1, %v4083_v18, %v5355_v0  ;;  %vm5097_vm3 = vcmp.gt.f32.partialorder %v4075_v6, 0.0  ;;  %v5353_v61 = vmul.f32 0.2, %v4075_v6  ;;  %v4086_v40 = vadd.f32 %v8330_v24, %v3029_v16 }
 0x207   :  { %v7939_v51 = vpack.c.bf16 %v5611_v22, %v5611_v22  ;;  %v3278_v58 = vpop.f32.mrf.mxu0  ;;  %v4077_v15 = vpop.f32.mrf.mxu1  ;;  %v3042_v30 = vadd.f32 %v10255_v52, %v9623_v29  ;;  %v3034_v29 = vadd.f32 %v10255_v52, %v9603_v17 }
 0x208   :  { %v5609_v54 = vsel %vm5097_vm3, %v4075_v6, %v5353_v61  ;;  %v4078_v42 = vadd.f32 %v4077_v15, %v3021_v5  ;;  %vm5100_vm4 = vcmp.gt.f32.partialorder %v4086_v40, 0.0  ;;  %v5356_v0 = vmul.f32 0.2, %v4086_v40  ;;  %v8960_v58 = vld [vmem:[%s12802_s0 + $0x500] ss:$12 sps:$4 sm:$0xff]  }
 0x209   :  { %6892 = vst.msk [vmem:[%s12804_s3 + $0x8] sm:$0xf] %vm6889_vm2, %v7939_v51  ;;  %v7937_v18 = vpack.c.bf16 %v5609_v54, %v5609_v54  ;;  %v10289_v46 = vpop.f32.mrf.mxu0  ;;  %3472 = vmatmul.mubr.bf16.gmra.mxu0 %v8951_v57  ;;  %v8333_v22 = vpop.f32.mrf.mxu1  ;;  %8428 = vmatmul.mubr.msk.bf16.gmra.mxu1 %vm2598_vm0, %v8955_v10  ;;  %v3045_v54 = vadd.f32 %v10255_v52, %v9627_v33  ;;  %v8956_v33 = vld [vmem:[%s12802_s0 + $0x570] ss:$12 sps:$4 sm:$0xff]  }
 0x20a   :  { %vm5098_vm5 = vcmp.gt.f32.partialorder %v4078_v42, 0.0  ;;  %v5354_v16 = vmul.f32 0.2, %v4078_v42  ;;  %v4099_v24 = vadd.f32 %v8333_v22, %v3042_v30  ;;  %3479 = vmatprep.mubr.bf16.mxu0 %v8958_v62  ;;  %8431 = vmatprep.mubr.msk.bf16.mxu1 %vm2598_vm0, %v8959_v9  ;;  %v5612_v6 = vsel %vm5100_vm4, %v4086_v40, %v5356_v0  ;;  %v8964_v0 = vld [vmem:[%s12802_s0 + $0x518] ss:$12 sps:$4 sm:$0xff]  }
 0x20b   :  { %6890 = vst.msk [vmem:[%s12804_s3] sm:$0xf] %vm6889_vm2, %v7937_v18  ;;  %v3283_v5 = vpop.f32.mrf.mxu0  ;;  %v4090_v57 = vpop.f32.mrf.mxu1  ;;  %v7940_v10 = vpack.c.bf16 %v5612_v6, %v5612_v6  ;;  %v3037_v40 = vadd.f32 %v10255_v52, %v9607_v21  ;;  %v8963_v18 = vld [vmem:[%s12802_s0 + $0x58c] ss:$12 sps:$4 sm:$0xff]   ;;  %v3050_v6 = vadd.f32 %v10255_v52, %v9643_v41 }
 0x20c   :  { %v5610_v61 = vsel %vm5098_vm5, %v4078_v42, %v5354_v16  ;;  %vm5103_vm6 = vcmp.gt.f32.partialorder %v4099_v24, 0.0  ;;  %v5359_v30 = vmul.f32 0.2, %v4099_v24  ;;  %v4091_v9 = vadd.f32 %v4090_v57, %v3034_v29 }
 0x20d   :  { %v7938_v62 = vpack.c.bf16 %v5610_v61, %v5610_v61  ;;  %v10301_v51 = vpop.f32.mrf.mxu0  ;;  %v8334_v17 = vpop.f32.mrf.mxu1  ;;  %6893 = vst.msk [vmem:[%s12804_s3 + $0xc] sm:$0xf] %vm6889_vm2, %v7940_v10  ;;  %v3058_v5 = vadd.f32 %v10255_v52, %v9663_v53 }
 0x20e   :  { %v5615_v42 = vsel %vm5103_vm6, %v4099_v24, %v5359_v30  ;;  %v4102_v15 = vadd.f32 %v8334_v17, %v3045_v54  ;;  %vm5101_vm7 = vcmp.gt.f32.partialorder %v4091_v9, 0.0  ;;  %v5357_v22 = vmul.f32 0.2, %v4091_v9 }
 0x20f   :  { %6891 = vst.msk [vmem:[%s12804_s3 + $0x4] sm:$0xf] %vm6889_vm2, %v7938_v62  ;;  %v7943_v21 = vpack.c.bf16 %v5615_v42, %v5615_v42  ;;  %v3286_v16 = vpop.f32.mrf.mxu0  ;;  %v4093_v29 = vpop.f32.mrf.mxu1 }
 0x210   :  { %vm5104_vm8 = vcmp.gt.f32.partialorder %v4102_v15, 0.0  ;;  %v5360_v24 = vmul.f32 0.2, %v4102_v15  ;;  %v4094_v54 = vadd.f32 %v4093_v29, %v3037_v40  ;;  %v5613_v57 = vsel %vm5101_vm7, %v4091_v9, %v5357_v22  ;;  %v8968_v16 = vld [vmem:[%s12802_s0 + $0x5a4] ss:$12 sps:$4 sm:$0xff]  }
 0x211   :  { %6896 = vst.msk [vmem:[%s12804_s3 + $0x18] sm:$0xf] %vm6889_vm2, %v7943_v21  ;;  %v10333_v10 = vpop.f32.mrf.mxu0  ;;  %3480 = vmatmul.mubr.bf16.gmra.mxu0 %v8956_v33  ;;  %v8337_v61 = vpop.f32.mrf.mxu1  ;;  %8432 = vmatmul.mubr.msk.bf16.gmra.mxu1 %vm2598_vm0, %v8960_v58  ;;  %v7941_v30 = vpack.c.bf16 %v5613_v57, %v5613_v57  ;;  %v3061_v9 = vadd.f32 %v10255_v52, %v9667_v59 }
 0x212   :  { %v5616_v62 = vsel %vm5104_vm8, %v4102_v15, %v5360_v24  ;;  %vm5102_vm9 = vcmp.gt.f32.partialorder %v4094_v54, 0.0  ;;  %v5358_v17 = vmul.f32 0.2, %v4094_v54  ;;  %3487 = vmatprep.mubr.bf16.mxu0 %v8963_v18  ;;  %8435 = vmatprep.mubr.msk.bf16.mxu1 %vm2598_vm0, %v8964_v0  ;;  %v4115_v53 = vadd.f32 %v8337_v61, %v3058_v5  ;;  %v8961_v15 = vld [vmem:[%s12802_s0 + $0x588] ss:$12 sps:$4 sm:$0xff]  }
 0x213   :  { %v7944_v41 = vpack.c.bf16 %v5616_v62, %v5616_v62  ;;  %v3291_v40 = vpop.f32.mrf.mxu0  ;;  %v4106_v42 = vpop.f32.mrf.mxu1  ;;  %6894 = vst.msk [vmem:[%s12804_s3 + $0x10] sm:$0xf] %vm6889_vm2, %v7941_v30  ;;  %v8965_v18 = vld [vmem:[%s12802_s0 + $0x530] ss:$12 sps:$4 sm:$0xff]   ;;  %v3074_v5 = vadd.f32 %v10255_v52, %v9703_v25  ;;  %v3066_v25 = vadd.f32 %v10255_v52, %v9683_v7 }
 0x214   :  { %v5614_v33 = vsel %vm5102_vm9, %v4094_v54, %v5358_v17  ;;  %v4107_v58 = vadd.f32 %v4106_v42, %v3050_v6  ;;  %vm5107_vm10 = vcmp.gt.f32.partialorder %v4115_v53, 0.0  ;;  %v5363_v0 = vmul.f32 0.2, %v4115_v53  ;;  %v8969_v54 = vld [vmem:[%s12802_s0 + $0x548] ss:$12 sps:$4 sm:$0xff]  }
 0x215   :  { %6897 = vst.msk [vmem:[%s12804_s3 + $0x1c] sm:$0xf] %vm6889_vm2, %v7944_v41  ;;  %v7942_v59 = vpack.c.bf16 %v5614_v33, %v5614_v33  ;;  %v10353_v21 = vpop.f32.mrf.mxu0  ;;  %v8338_v22 = vpop.f32.mrf.mxu1  ;;  %v3053_v6 = vadd.f32 %v10255_v52, %v9647_v45 }
 0x216   :  { %vm5105_vm11 = vcmp.gt.f32.partialorder %v4107_v58, 0.0  ;;  %v5361_v29 = vmul.f32 0.2, %v4107_v58  ;;  %v4118_v24 = vadd.f32 %v8338_v22, %v3061_v9  ;;  %v5619_v57 = vsel %vm5107_vm10, %v4115_v53, %v5363_v0 }
 0x217   :  { %6895 = vst.msk [vmem:[%s12804_s3 + $0x14] sm:$0xf] %vm6889_vm2, %v7942_v59  ;;  %v3294_v61 = vpop.f32.mrf.mxu0  ;;  %v4109_v30 = vpop.f32.mrf.mxu1  ;;  %v7947_v62 = vpack.c.bf16 %v5619_v57, %v5619_v57  ;;  %v3069_v22 = vadd.f32 %v10255_v52, %v9687_v13  ;;  %v8970_v13 = vld [vmem:[%s12802_s0 + $0x560] ss:$12 sps:$4 sm:$0xff]  }
 0x218   :  { %v5617_v17 = vsel %vm5105_vm11, %v4107_v58, %v5361_v29  ;;  %vm5108_vm12 = vcmp.gt.f32.partialorder %v4118_v24, 0.0  ;;  %v5364_v41 = vmul.f32 0.2, %v4118_v24  ;;  %v4110_v42 = vadd.f32 %v4109_v30, %v3053_v6  ;;  %v8966_v6 = vld [vmem:[%s12802_s0 + $0x5a0] ss:$12 sps:$4 sm:$0xff]  }
 0x219   :  { %v7945_v40 = vpack.c.bf16 %v5617_v17, %v5617_v17  ;;  %v10369_v9 = vpop.f32.mrf.mxu0  ;;  %3488 = vmatmul.mubr.bf16.gmra.mxu0 %v8961_v15  ;;  %v8341_v45 = vpop.f32.mrf.mxu1  ;;  %8436 = vmatmul.mubr.msk.bf16.gmra.mxu1 %vm2598_vm0, %v8965_v18  ;;  %6900 = vst.msk [vmem:[%s12804_s3 + $0x28] sm:$0xf] %vm6889_vm2, %v7947_v62  ;;  %v8974_v30 = vld [vmem:[%s12802_s0 + $0x578] ss:$12 sps:$4 sm:$0xff]  }
 0x21a   :  { %v5620_v53 = vsel %vm5108_vm12, %v4118_v24, %v5364_v41  ;;  %v4131_v33 = vadd.f32 %v8341_v45, %v3074_v5  ;;  %3495 = vmatprep.mubr.bf16.mxu0 %v8968_v16  ;;  %8439 = vmatprep.mubr.msk.bf16.mxu1 %vm2598_vm0, %v8969_v54  ;;  %vm5106_vm13 = vcmp.gt.f32.partialorder %v4110_v42, 0.0  ;;  %v5362_v15 = vmul.f32 0.2, %v4110_v42 }
 0x21b   :  { %6898 = vst.msk [vmem:[%s12804_s3 + $0x20] sm:$0xf] %vm6889_vm2, %v7945_v40  ;;  %v7948_v58 = vpack.c.bf16 %v5620_v53, %v5620_v53  ;;  %v3299_v18 = vpop.f32.mrf.mxu0  ;;  %v4122_v7 = vpop.f32.mrf.mxu1  ;;  %v3077_v16 = vadd.f32 %v10255_v52, %v9708_v31  ;;  %v8973_v31 = vld [vmem:[%s12802_s0 + $0x5bc] ss:$12 sps:$4 sm:$0xff]  }
 0x21c   :  { %vm5111_vm14 = vcmp.gt.f32.partialorder %v4131_v33, 0.0  ;;  %v5367_v59 = vmul.f32 0.2, %v4131_v33  ;;  %v4123_v0 = vadd.f32 %v4122_v7, %v3066_v25  ;;  %v5618_v29 = vsel %vm5106_vm13, %v4110_v42, %v5362_v15 }
 0x21d   :  { %6901 = vst.msk [vmem:[%s12804_s3 + $0x2c] sm:$0xf] %vm6889_vm2, %v7948_v58  ;;  %v10391_v24 = vpop.f32.mrf.mxu0  ;;  %v8342_v54 = vpop.f32.mrf.mxu1  ;;  %v7946_v5 = vpack.c.bf16 %v5618_v29, %v5618_v29  ;;  %v3090_v42 = vadd.f32 %v10255_v52, %v9746_v1  ;;  %v3082_v7 = vadd.f32 %v10255_v52, %v9724_v43 }
 0x21e   :  { %v5623_v57 = vsel %vm5111_vm14, %v4131_v33, %v5367_v59  ;;  %vm5109_vm15 = vcmp.gt.f32.partialorder %v4123_v0, 0.0  ;;  %v5365_v61 = vmul.f32 0.2, %v4123_v0  ;;  %v4134_v17 = vadd.f32 %v8342_v54, %v3077_v16 }
 0x21f   :  { %v7951_v62 = vpack.c.bf16 %v5623_v57, %v5623_v57  ;;  %v3302_v41 = vpop.f32.mrf.mxu0  ;;  %v4125_v40 = vpop.f32.mrf.mxu1  ;;  %6899 = vst.msk [vmem:[%s12804_s3 + $0x24] sm:$0xf] %vm6889_vm2, %v7946_v5  ;;  %v3093_v59 = vadd.f32 %v10255_v52, %v9752_v11  ;;  %v8971_v11 = vld [vmem:[%s12802_s0 + $0x5b8] ss:$12 sps:$4 sm:$0xff]   ;;  %v8975_v57 = vld [vmem:[%s12802_s0 + $0x590] ss:$12 sps:$4 sm:$0xff]  }
 0x220   :  { %v5621_v45 = vsel %vm5109_vm15, %v4123_v0, %v5365_v61  ;;  %v4126_v25 = vadd.f32 %v4125_v40, %v3069_v22  ;;  %vm5112_vm1 = vcmp.gt.f32.partialorder %v4134_v17, 0.0  ;;  %v5368_v33 = vmul.f32 0.2, %v4134_v17  ;;  %v8979_v41 = vld [vmem:[%s12802_s0 + $0x5a8] ss:$12 sps:$4 sm:$0xff]  }
 0x221   :  { %6904 = vst.msk [vmem:[%s12804_s3 + $0x38] sm:$0xf] %vm6889_vm2, %v7951_v62  ;;  %v7949_v53 = vpack.c.bf16 %v5621_v45, %v5621_v45  ;;  %v10415_v58 = vpop.f32.mrf.mxu0  ;;  %3496 = vmatmul.mubr.bf16.gmra.mxu0 %v8966_v6  ;;  %v8345_v15 = vpop.f32.mrf.mxu1  ;;  %8440 = vmatmul.mubr.msk.bf16.gmra.mxu1 %vm2598_vm0, %v8970_v13  ;;  %v3085_v61 = vadd.f32 %v10255_v52, %v9730_v49 }
 0x222   :  { %vm5110_vm3 = vcmp.gt.f32.partialorder %v4126_v25, 0.0  ;;  %v5366_v1 = vmul.f32 0.2, %v4126_v25  ;;  %v4147_v18 = vadd.f32 %v8345_v15, %v3090_v42  ;;  %3503 = vmatprep.mubr.bf16.mxu0 %v8973_v31  ;;  %8443 = vmatprep.mubr.msk.bf16.mxu1 %vm2598_vm0, %v8974_v30  ;;  %v5624_v0 = vsel %vm5112_vm1, %v4134_v17, %v5368_v33  ;;  %v8978_v17 = vld [vmem:[%s12802_s0 + $0x5d4] ss:$12 sps:$4 sm:$0xff]  }
 0x223   :  { %6902 = vst.msk [vmem:[%s12804_s3 + $0x30] sm:$0xf] %vm6889_vm2, %v7949_v53  ;;  %v3307_v22 = vpop.f32.mrf.mxu0  ;;  %v4138_v16 = vpop.f32.mrf.mxu1  ;;  %v7952_v29 = vpack.c.bf16 %v5624_v0, %v5624_v0  ;;  %v3098_v33 = vadd.f32 %v10255_v52, %v9768_v27  ;;  %v3106_v15 = vadd.f32 %v10255_v52, %v9790_v55 }
 0x224   :  { %v5622_v54 = vsel %vm5110_vm3, %v4126_v25, %v5366_v1  ;;  %vm5115_vm4 = vcmp.gt.f32.partialorder %v4147_v18, 0.0  ;;  %v5371_v6 = vmul.f32 0.2, %v4147_v18  ;;  %v4139_v31 = vadd.f32 %v4138_v16, %v3082_v7 }
 0x225   :  { %v7950_v13 = vpack.c.bf16 %v5622_v54, %v5622_v54  ;;  %v10427_v5 = vpop.f32.mrf.mxu0  ;;  %v8346_v43 = vpop.f32.mrf.mxu1  ;;  %6905 = vst.msk [vmem:[%s12804_s3 + $0x3c] sm:$0xf] %vm6889_vm2, %v7952_v29  ;;  %v3109_v54 = vadd.f32 %v10255_v52, %v9796_v3 }
 0x226   :  { %v5627_v30 = vsel %vm5115_vm4, %v4147_v18, %v5371_v6  ;;  %v4150_v62 = vadd.f32 %v8346_v43, %v3093_v59  ;;  %vm5113_vm5 = vcmp.gt.f32.partialorder %v4139_v31, 0.0  ;;  %v5369_v40 = vmul.f32 0.2, %v4139_v31  ;;  %v8980_v43 = vld [vmem:[%s12802_s0 + $0x5c0] ss:$12 sps:$4 sm:$0xff]  }
 0x227   :  { %6903 = vst.msk [vmem:[%s12804_s3 + $0x34] sm:$0xf] %vm6889_vm2, %v7950_v13  ;;  %v7955_v49 = vpack.c.bf16 %v5627_v30, %v5627_v30  ;;  %v3310_v42 = vpop.f32.mrf.mxu0  ;;  %v4141_v45 = vpop.f32.mrf.mxu1  ;;  %v8983_v30 = vld [vmem:[%s12802_s0 + $0x5ec] ss:$12 sps:$4 sm:$0xff]  }
 0x228   :  { %vm5116_vm6 = vcmp.gt.f32.partialorder %v4150_v62, 0.0  ;;  %v5372_v25 = vmul.f32 0.2, %v4150_v62  ;;  %v4142_v53 = vadd.f32 %v4141_v45, %v3085_v61  ;;  %v5625_v1 = vsel %vm5113_vm5, %v4139_v31, %v5369_v40  ;;  %v8976_v31 = vld [vmem:[%s12802_s0 + $0x5d0] ss:$12 sps:$4 sm:$0xff]  }
 0x229   :  { %6908 = vst.msk [vmem:[%s12804_s3 + $0x48] sm:$0xf] %vm6889_vm2, %v7955_v49  ;;  %v10459_v18 = vpop.f32.mrf.mxu0  ;;  %3504 = vmatmul.mubr.bf16.gmra.mxu0 %v8971_v11  ;;  %v8349_v7 = vpop.f32.mrf.mxu1  ;;  %8444 = vmatmul.mubr.msk.bf16.gmra.mxu1 %vm2598_vm0, %v8975_v57  ;;  %v7953_v59 = vpack.c.bf16 %v5625_v1, %v5625_v1  ;;  %v3101_v49 = vadd.f32 %v10255_v52, %v9774_v37 }
 0x22a   :  { %v5628_v0 = vsel %vm5116_vm6, %v4150_v62, %v5372_v25  ;;  %vm5114_vm7 = vcmp.gt.f32.partialorder %v4142_v53, 0.0  ;;  %v5370_v22 = vmul.f32 0.2, %v4142_v53  ;;  %3511 = vmatprep.mubr.bf16.mxu0 %v8978_v17  ;;  %8447 = vmatprep.mubr.msk.bf16.mxu1 %vm2598_vm0, %v8979_v41  ;;  %v4163_v55 = vadd.f32 %v8349_v7, %v3106_v15  ;;  %v8984_v41 = vld [vmem:[%s12802_s0 + $0x5d8] ss:$12 sps:$4 sm:$0xff]  }
 0x22b   :  { %v7956_v27 = vpack.c.bf16 %v5628_v0, %v5628_v0  ;;  %v3315_v16 = vpop.f32.mrf.mxu0  ;;  %v4154_v29 = vpop.f32.mrf.mxu1  ;;  %6906 = vst.msk [vmem:[%s12804_s3 + $0x40] sm:$0xf] %vm6889_vm2, %v7953_v59  ;;  %v3122_v40 = vadd.f32 %v10255_v52, %v9834_v19  ;;  %v3114_v19 = vadd.f32 %v10255_v52, %v9812_v35 }
 0x22c   :  { %v5626_v6 = vsel %vm5114_vm7, %v4142_v53, %v5370_v22  ;;  %v4155_v13 = vadd.f32 %v4154_v29, %v3098_v33  ;;  %vm5119_vm8 = vcmp.gt.f32.partialorder %v4163_v55, 0.0  ;;  %v5375_v11 = vmul.f32 0.2, %v4163_v55 }
 0x22d   :  { %6909 = vst.msk [vmem:[%s12804_s3 + $0x4c] sm:$0xf] %vm6889_vm2, %v7956_v27  ;;  %v7954_v3 = vpack.c.bf16 %v5626_v6, %v5626_v6  ;;  %v10479_v57 = vpop.f32.mrf.mxu0  ;;  %v8350_v61 = vpop.f32.mrf.mxu1  ;;  %v3117_v6 = vadd.f32 %v10255_v52, %v9818_v47  ;;  %v8985_v47 = vld [vmem:[%s12802_s0 + $0x5f0] ss:$12 sps:$4 sm:$0xff]  }
 0x22e   :  { %vm5117_vm9 = vcmp.gt.f32.partialorder %v4155_v13, 0.0  ;;  %v5373_v62 = vmul.f32 0.2, %v4155_v13  ;;  %v4166_v17 = vadd.f32 %v8350_v61, %v3109_v54  ;;  %v5631_v42 = vsel %vm5119_vm8, %v4163_v55, %v5375_v11  ;;  %v8981_v11 = vld [vmem:[%s12802_s0 + $0x5e8] ss:$12 sps:$4 sm:$0xff]  }
 0x22f   :  { %6907 = vst.msk [vmem:[%s12804_s3 + $0x44] sm:$0xf] %vm6889_vm2, %v7954_v3  ;;  %v3318_v45 = vpop.f32.mrf.mxu0  ;;  %v4157_v25 = vpop.f32.mrf.mxu1  ;;  %v7959_v53 = vpack.c.bf16 %v5631_v42, %v5631_v42 }
 0x230   :  { %v5629_v33 = vsel %vm5117_vm9, %v4155_v13, %v5373_v62  ;;  %vm5120_vm10 = vcmp.gt.f32.partialorder %v4166_v17, 0.0  ;;  %v5376_v15 = vmul.f32 0.2, %v4166_v17  ;;  %v4158_v7 = vadd.f32 %v4157_v25, %v3101_v49 }
 0x231   :  { %v7957_v1 = vpack.c.bf16 %v5629_v33, %v5629_v33  ;;  %v10495_v59 = vpop.f32.mrf.mxu0  ;;  %3512 = vmatmul.mubr.bf16.gmra.mxu0 %v8976_v31  ;;  %v8353_v37 = vpop.f32.mrf.mxu1  ;;  %8448 = vmatmul.mubr.msk.bf16.gmra.mxu1 %vm2598_vm0, %v8980_v43  ;;  %6912 = vst.msk [vmem:[%s12804_s3 + $0x58] sm:$0xf] %vm6889_vm2, %v7959_v53  ;;  %v3125_v13 = vadd.f32 %v10255_v52, %v9840_v39  ;;  %v8988_v39 = vld [vmem:[%s12802_s0 + $0x604] ss:$12 sps:$4 sm:$0xff]  }
 0x232   :  { %v5632_v0 = vsel %vm5120_vm10, %v4166_v17, %v5376_v15  ;;  %v4179_v22 = vadd.f32 %v8353_v37, %v3122_v40  ;;  %3519 = vmatprep.mubr.bf16.mxu0 %v8983_v30  ;;  %8451 = vmatprep.mubr.msk.bf16.mxu1 %vm2598_vm0, %v8984_v41  ;;  %vm5118_vm11 = vcmp.gt.f32.partialorder %v4158_v7, 0.0  ;;  %v5374_v55 = vmul.f32 0.2, %v4158_v7  ;;  %v8989_v17 = vld [vmem:[%s12802_s0 + $0x608] ss:$12 sps:$4 sm:$0xff]  }
 0x233   :  { %6910 = vst.msk [vmem:[%s12804_s3 + $0x50] sm:$0xf] %vm6889_vm2, %v7957_v1  ;;  %v7960_v27 = vpack.c.bf16 %v5632_v0, %v5632_v0  ;;  %v3323_v16 = vpop.f32.mrf.mxu0  ;;  %v4170_v35 = vpop.f32.mrf.mxu1  ;;  %v3138_v45 = vadd.f32 %v10255_v52, %v9878_v63  ;;  %v3141_v0 = vadd.f32 %v10255_v52, %v9884_v4  ;;  %v8986_v4 = vld [vmem:[%s12802_s0 + $0x600] ss:$12 sps:$4 sm:$0xff]  }
 0x234   :  { %vm5123_vm12 = vcmp.gt.f32.partialorder %v4179_v22, 0.0  ;;  %v5379_v29 = vmul.f32 0.2, %v4179_v22  ;;  %v4171_v54 = vadd.f32 %v4170_v35, %v3114_v19  ;;  %v5630_v31 = vsel %vm5118_vm11, %v4158_v7, %v5374_v55 }
 0x235   :  { %6913 = vst.msk [vmem:[%s12804_s3 + $0x5c] sm:$0xf] %vm6889_vm2, %v7960_v27  ;;  %v10517_v43 = vpop.f32.mrf.mxu0  ;;  %v8354_v3 = vpop.f32.mrf.mxu1  ;;  %v7958_v61 = vpack.c.bf16 %v5630_v31, %v5630_v31  ;;  %v3130_v19 = vadd.f32 %v10255_v52, %v9856_v23  ;;  %v8990_v31 = vld [vmem:[%s12802_s0 + $0x620] ss:$12 sps:$4 sm:$0xff]  }
 0x236   :  { %v5635_v30 = vsel %vm5123_vm12, %v4179_v22, %v5379_v29  ;;  %vm5121_vm13 = vcmp.gt.f32.partialorder %v4171_v54, 0.0  ;;  %v5377_v62 = vmul.f32 0.2, %v4171_v54  ;;  %v4182_v49 = vadd.f32 %v8354_v3, %v3125_v13 }
 0x237   :  { %v7963_v41 = vpack.c.bf16 %v5635_v30, %v5635_v30  ;;  %v3326_v40 = vpop.f32.mrf.mxu0  ;;  %v4173_v42 = vpop.f32.mrf.mxu1  ;;  %6911 = vst.msk [vmem:[%s12804_s3 + $0x54] sm:$0xf] %vm6889_vm2, %v7958_v61  ;;  %v3133_v3 = vadd.f32 %v10255_v52, %v9862_v48  ;;  %v8994_v61 = vld [vmem:[%s12802_s0 + $0x638] ss:$12 sps:$4 sm:$0xff]  }
 0x238   :  { %v5633_v25 = vsel %vm5121_vm13, %v4171_v54, %v5377_v62  ;;  %v4174_v53 = vadd.f32 %v4173_v42, %v3117_v6  ;;  %vm5124_vm14 = vcmp.gt.f32.partialorder %v4182_v49, 0.0  ;;  %v5380_v15 = vmul.f32 0.2, %v4182_v49 }
 0x239   :  { %6916 = vst.msk [vmem:[%s12804_s3 + $0x68] sm:$0xf] %vm6889_vm2, %v7963_v41  ;;  %v7961_v33 = vpack.c.bf16 %v5633_v25, %v5633_v25  ;;  %v10541_v1 = vpop.f32.mrf.mxu0  ;;  %3520 = vmatmul.mubr.bf16.gmra.mxu0 %v8981_v11  ;;  %v8357_v7 = vpop.f32.mrf.mxu1  ;;  %8452 = vmatmul.mubr.msk.bf16.gmra.mxu1 %vm2598_vm0, %v8985_v47  ;;  %v3146_v40 = vadd.f32 %v10255_v52, %v9900_v20 }
 0x23a   :  { %vm5122_vm15 = vcmp.gt.f32.partialorder %v4174_v53, 0.0  ;;  %v5378_v63 = vmul.f32 0.2, %v4174_v53  ;;  %v4195_v37 = vadd.f32 %v8357_v7, %v3138_v45  ;;  %3527 = vmatprep.mubr.bf16.mxu0 %v8988_v39  ;;  %8455 = vmatprep.mubr.msk.bf16.mxu1 %vm2598_vm0, %v8989_v17  ;;  %v5636_v22 = vsel %vm5124_vm14, %v4182_v49, %v5380_v15  ;;  %v8993_v39 = vld [vmem:[%s12802_s0 + $0x61c] ss:$12 sps:$4 sm:$0xff]  }
 0x23b   :  { %6914 = vst.msk [vmem:[%s12804_s3 + $0x60] sm:$0xf] %vm6889_vm2, %v7961_v33  ;;  %v3331_v27 = vpop.f32.mrf.mxu0  ;;  %v4186_v55 = vpop.f32.mrf.mxu1  ;;  %v7964_v16 = vpack.c.bf16 %v5636_v22, %v5636_v22  ;;  %v3154_v42 = vadd.f32 %v10255_v52, %v9922_v36 }
 0x23c   :  { %v5634_v35 = vsel %vm5122_vm15, %v4174_v53, %v5378_v63  ;;  %vm5127_vm1 = vcmp.gt.f32.partialorder %v4195_v37, 0.0  ;;  %v5383_v29 = vmul.f32 0.2, %v4195_v37  ;;  %v4187_v6 = vadd.f32 %v4186_v55, %v3130_v19  ;;  %v8991_v27 = vld [vmem:[%s12802_s0 + $0x618] ss:$12 sps:$4 sm:$0xff]  }
 0x23d   :  { %v7962_v54 = vpack.c.bf16 %v5634_v35, %v5634_v35  ;;  %v10553_v13 = vpop.f32.mrf.mxu0  ;;  %v8358_v23 = vpop.f32.mrf.mxu1  ;;  %6917 = vst.msk [vmem:[%s12804_s3 + $0x6c] sm:$0xf] %vm6889_vm2, %v7964_v16  ;;  %v3157_v19 = vadd.f32 %v10255_v52, %v9928_v12  ;;  %v8995_v55 = vld [vmem:[%s12802_s0 + $0x650] ss:$12 sps:$4 sm:$0xff]  }
 0x23e   :  { %v5639_v11 = vsel %vm5127_vm1, %v4195_v37, %v5383_v29  ;;  %v4198_v47 = vadd.f32 %v8358_v23, %v3141_v0  ;;  %vm5125_vm3 = vcmp.gt.f32.partialorder %v4187_v6, 0.0  ;;  %v5381_v30 = vmul.f32 0.2, %v4187_v6 }
 0x23f   :  { %6915 = vst.msk [vmem:[%s12804_s3 + $0x64] sm:$0xf] %vm6889_vm2, %v7962_v54  ;;  %v7967_v48 = vpack.c.bf16 %v5639_v11, %v5639_v11  ;;  %v3334_v62 = vpop.f32.mrf.mxu0  ;;  %v4189_v17 = vpop.f32.mrf.mxu1  ;;  %v8998_v54 = vld [vmem:[%s12802_s0 + $0x634] ss:$12 sps:$4 sm:$0xff]  }
 0x240   :  { %vm5128_vm4 = vcmp.gt.f32.partialorder %v4198_v47, 0.0  ;;  %v5384_v41 = vmul.f32 0.2, %v4198_v47  ;;  %v4190_v49 = vadd.f32 %v4189_v17, %v3133_v3  ;;  %v5637_v45 = vsel %vm5125_vm3, %v4187_v6, %v5381_v30 }
 0x241   :  { %6920 = vst.msk [vmem:[%s12804_s3 + $0x78] sm:$0xf] %vm6889_vm2, %v7967_v48  ;;  %v10585_v25 = vpop.f32.mrf.mxu0  ;;  %3528 = vmatmul.mubr.bf16.gmra.mxu0 %v8986_v4  ;;  %v8361_v53 = vpop.f32.mrf.mxu1  ;;  %8456 = vmatmul.mubr.msk.bf16.gmra.mxu1 %vm2598_vm0, %v8990_v31  ;;  %v7965_v33 = vpack.c.bf16 %v5637_v45, %v5637_v45  ;;  %v8999_v4 = vld [vmem:[%s12802_s0 + $0x668] ss:$12 sps:$4 sm:$0xff]   ;;  %v3149_v31 = vadd.f32 %v10255_v52, %v9906_v38 }
 0x242   :  { %v5640_v15 = vsel %vm5128_vm4, %v4198_v47, %v5384_v41  ;;  %vm5126_vm5 = vcmp.gt.f32.partialorder %v4190_v49, 0.0  ;;  %v5382_v7 = vmul.f32 0.2, %v4190_v49  ;;  %3535 = vmatprep.mubr.bf16.mxu0 %v8993_v39  ;;  %8459 = vmatprep.mubr.msk.bf16.mxu1 %vm2598_vm0, %v8994_v61  ;;  %v4211_v36 = vadd.f32 %v8361_v53, %v3154_v42 }
 0x243   :  { %v7968_v20 = vpack.c.bf16 %v5640_v15, %v5640_v15  ;;  %v3339_v63 = vpop.f32.mrf.mxu0  ;;  %v4202_v37 = vpop.f32.mrf.mxu1  ;;  %6918 = vst.msk [vmem:[%s12804_s3 + $0x70] sm:$0xf] %vm6889_vm2, %v7965_v33  ;;  %v3170_v3 = vadd.f32 %v10255_v52, %v9966_v28  ;;  %v3162_v28 = vadd.f32 %v10255_v52, %v9944_v56 }
 0x244   :  { %v5638_v0 = vsel %vm5126_vm5, %v4190_v49, %v5382_v7  ;;  %v4203_v22 = vadd.f32 %v4202_v37, %v3146_v40  ;;  %vm5131_vm6 = vcmp.gt.f32.partialorder %v4211_v36, 0.0  ;;  %v5387_v16 = vmul.f32 0.2, %v4211_v36 }
 0x245   :  { %6921 = vst.msk [vmem:[%s12804_s3 + $0x7c] sm:$0xf] %vm6889_vm2, %v7968_v20  ;;  %v7966_v12 = vpack.c.bf16 %v5638_v0, %v5638_v0  ;;  %v10605_v35 = vpop.f32.mrf.mxu0  ;;  %v8362_v29 = vpop.f32.mrf.mxu1  ;;  %v3165_v7 = vadd.f32 %v10255_v52, %v9950_v50  ;;  %v3173_v20 = vadd.f32 %v10255_v52, %v9972_v32  ;;  %v9000_v50 = vld [vmem:[%s12802_s0 + $0x680] ss:$12 sps:$4 sm:$0xff]  }
 0x246   :  { %vm5129_vm7 = vcmp.gt.f32.partialorder %v4203_v22, 0.0  ;;  %v5385_v6 = vmul.f32 0.2, %v4203_v22  ;;  %v4214_v23 = vadd.f32 %v8362_v29, %v3157_v19  ;;  %v5643_v11 = vsel %vm5131_vm6, %v4211_v36, %v5387_v16  ;;  %v8996_v19 = vld [vmem:[%s12802_s0 + $0x630] ss:$12 sps:$4 sm:$0xff]  }
 0x247   :  { %6919 = vst.msk [vmem:[%s12804_s3 + $0x74] sm:$0xf] %vm6889_vm2, %v7966_v12  ;;  %v3342_v47 = vpop.f32.mrf.mxu0  ;;  %v4205_v39 = vpop.f32.mrf.mxu1  ;;  %v7971_v61 = vpack.c.bf16 %v5643_v11, %v5643_v11  ;;  %v9003_v32 = vld [vmem:[%s12802_s0 + $0x64c] ss:$12 sps:$4 sm:$0xff]  }
 0x248   :  { %v5641_v48 = vsel %vm5129_vm7, %v4203_v22, %v5385_v6  ;;  %vm5132_vm8 = vcmp.gt.f32.partialorder %v4214_v23, 0.0  ;;  %v5388_v30 = vmul.f32 0.2, %v4214_v23  ;;  %v4206_v17 = vadd.f32 %v4205_v39, %v3149_v31 }
 0x249   :  { %v7969_v62 = vpack.c.bf16 %v5641_v48, %v5641_v48  ;;  %v10621_v41 = vpop.f32.mrf.mxu0  ;;  %3536 = vmatmul.mubr.bf16.gmra.mxu0 %v8991_v27  ;;  %v8365_v38 = vpop.f32.mrf.mxu1  ;;  %8460 = vmatmul.mubr.msk.bf16.gmra.mxu1 %vm2598_vm0, %v8995_v55  ;;  %6924 = vst.msk [vmem:[%s12804_s3 + $0x88] sm:$0xf] %vm6889_vm2, %v7971_v61  ;;  %v9004_v55 = vld [vmem:[%s12802_s0 + $0x698] ss:$12 sps:$4 sm:$0xff]   ;;  %v3186_v6 = vadd.f32 %v10255_v52, %v10010_v44 }
 0x24a   :  { %v5644_v49 = vsel %vm5132_vm8, %v4214_v23, %v5388_v30  ;;  %v4227_v40 = vadd.f32 %v8365_v38, %v3170_v3  ;;  %3543 = vmatprep.mubr.bf16.mxu0 %v8998_v54  ;;  %8463 = vmatprep.mubr.msk.bf16.mxu1 %vm2598_vm0, %v8999_v4  ;;  %vm5130_vm9 = vcmp.gt.f32.partialorder %v4206_v17, 0.0  ;;  %v5386_v45 = vmul.f32 0.2, %v4206_v17 }
 0x24b   :  { %6922 = vst.msk [vmem:[%s12804_s3 + $0x80] sm:$0xf] %vm6889_vm2, %v7969_v62  ;;  %v7972_v42 = vpack.c.bf16 %v5644_v49, %v5644_v49  ;;  %v3347_v53 = vpop.f32.mrf.mxu0  ;;  %v4218_v56 = vpop.f32.mrf.mxu1  ;;  %v3178_v61 = vadd.f32 %v10255_v52, %v9988_v2  ;;  %v3189_v48 = vadd.f32 %v10255_v52, %v10016_v60  ;;  %v9001_v60 = vld [vmem:[%s12802_s0 + $0x648] ss:$12 sps:$4 sm:$0xff]  }
 0x24c   :  { %vm5135_vm10 = vcmp.gt.f32.partialorder %v4227_v40, 0.0  ;;  %v5391_v33 = vmul.f32 0.2, %v4227_v40  ;;  %v4219_v15 = vadd.f32 %v4218_v56, %v3162_v28  ;;  %v5642_v36 = vsel %vm5130_vm9, %v4206_v17, %v5386_v45  ;;  %v9005_v53 = vld [vmem:[%s12802_s0 + $0x6b0] ss:$12 sps:$4 sm:$0xff]  }
 0x24d   :  { %6925 = vst.msk [vmem:[%s12804_s3 + $0x8c] sm:$0xf] %vm6889_vm2, %v7972_v42  ;;  %v10643_v63 = vpop.f32.mrf.mxu0  ;;  %v8366_v37 = vpop.f32.mrf.mxu1  ;;  %v7970_v0 = vpack.c.bf16 %v5642_v36, %v5642_v36  ;;  %v3181_v56 = vadd.f32 %v10255_v52, %v9994_v14 }
 0x24e   :  { %v5647_v22 = vsel %vm5135_vm10, %v4227_v40, %v5391_v33  ;;  %vm5133_vm11 = vcmp.gt.f32.partialorder %v4219_v15, 0.0  ;;  %v5389_v27 = vmul.f32 0.2, %v4219_v15  ;;  %v4230_v16 = vadd.f32 %v8366_v37, %v3173_v20  ;;  %v9009_v20 = vld [vmem:[%s12802_s0 + $0x6c8] ss:$12 sps:$4 sm:$0xff]  }
 0x24f   :  { %v7975_v12 = vpack.c.bf16 %v5647_v22, %v5647_v22  ;;  %v3350_v29 = vpop.f32.mrf.mxu0  ;;  %v4221_v54 = vpop.f32.mrf.mxu1  ;;  %6923 = vst.msk [vmem:[%s12804_s3 + $0x84] sm:$0xf] %vm6889_vm2, %v7970_v0  ;;  %v3194_v0 = vadd.f32 %v10255_v52, %v10032_v26  ;;  %v3202_v22 = vadd.f32 %v10255_v52, %v10054_v8 }
 0x250   :  { %v5645_v23 = vsel %vm5133_vm11, %v4219_v15, %v5389_v27  ;;  %v4222_v4 = vadd.f32 %v4221_v54, %v3165_v7  ;;  %vm5136_vm12 = vcmp.gt.f32.partialorder %v4230_v16, 0.0  ;;  %v5392_v3 = vmul.f32 0.2, %v4230_v16  ;;  %v9008_v7 = vld [vmem:[%s12802_s0 + $0x664] ss:$12 sps:$4 sm:$0xff]  }
 0x251   :  { %6928 = vst.msk [vmem:[%s12804_s3 + $0x98] sm:$0xf] %vm6889_vm2, %v7975_v12  ;;  %v7973_v31 = vpack.c.bf16 %v5645_v23, %v5645_v23  ;;  %v10667_v11 = vpop.f32.mrf.mxu0  ;;  %3544 = vmatmul.mubr.bf16.gmra.mxu0 %v8996_v19  ;;  %v8369_v47 = vpop.f32.mrf.mxu1  ;;  %8464 = vmatmul.mubr.msk.bf16.gmra.mxu1 %vm2598_vm0, %v9000_v50 }
 0x252   :  { %vm5134_vm13 = vcmp.gt.f32.partialorder %v4222_v4, 0.0  ;;  %v5390_v44 = vmul.f32 0.2, %v4222_v4  ;;  %v4243_v39 = vadd.f32 %v8369_v47, %v3186_v6  ;;  %3551 = vmatprep.mubr.bf16.mxu0 %v9003_v32  ;;  %8467 = vmatprep.mubr.msk.bf16.mxu1 %vm2598_vm0, %v9004_v55  ;;  %v5648_v30 = vsel %vm5136_vm12, %v4230_v16, %v5392_v3  ;;  %v9006_v47 = vld [vmem:[%s12802_s0 + $0x660] ss:$12 sps:$4 sm:$0xff]  }
 0x253   :  { %6926 = vst.msk [vmem:[%s12804_s3 + $0x90] sm:$0xf] %vm6889_vm2, %v7973_v31  ;;  %v3355_v62 = vpop.f32.mrf.mxu0  ;;  %v4234_v17 = vpop.f32.mrf.mxu1  ;;  %v7976_v38 = vpack.c.bf16 %v5648_v30, %v5648_v30 }
 0x254   :  { %v5646_v28 = vsel %vm5134_vm13, %v4222_v4, %v5390_v44  ;;  %vm5139_vm14 = vcmp.gt.f32.partialorder %v4243_v39, 0.0  ;;  %v5395_v49 = vmul.f32 0.2, %v4243_v39  ;;  %v4235_v42 = vadd.f32 %v4234_v17, %v3178_v61  ;;  %v9010_v44 = vld [vmem:[%s12802_s0 + $0x6e0] ss:$12 sps:$4 sm:$0xff]  }
 0x255   :  { %v7974_v40 = vpack.c.bf16 %v5646_v28, %v5646_v28  ;;  %v10679_v45 = vpop.f32.mrf.mxu0  ;;  %v8370_v2 = vpop.f32.mrf.mxu1  ;;  %6929 = vst.msk [vmem:[%s12804_s3 + $0x9c] sm:$0xf] %vm6889_vm2, %v7976_v38  ;;  %v3205_v4 = vadd.f32 %v10255_v52, %v10060_v34  ;;  %v9014_v17 = vld [vmem:[%s12802_s0 + $0x6f8] ss:$12 sps:$4 sm:$0xff]   ;;  %v10742_v38 = vld [vmem:[%s12803_s2] ss:$0 sm:$0xff] }
 0x256   :  { %v5651_v33 = vsel %vm5139_vm14, %v4243_v39, %v5395_v49  ;;  %v4246_v15 = vadd.f32 %v8370_v2, %v3189_v48  ;;  %vm5137_vm15 = vcmp.gt.f32.partialorder %v4235_v42, 0.0  ;;  %v5393_v36 = vmul.f32 0.2, %v4235_v42  ;;  %v9013_v48 = vld [vmem:[%s12802_s0 + $0x67c] ss:$12 sps:$4 sm:$0xff]  }
 0x257   :  { %6927 = vst.msk [vmem:[%s12804_s3 + $0x94] sm:$0xf] %vm6889_vm2, %v7974_v40  ;;  %v7979_v14 = vpack.c.bf16 %v5651_v33, %v5651_v33  ;;  %v3358_v37 = vpop.f32.mrf.mxu0  ;;  %v4237_v19 = vpop.f32.mrf.mxu1  ;;  %v12888_v28 = vld [vmem:[#allocation47_spill] sm:$0xff] }
 0x258   :  { %vm5140_vm1 = vcmp.gt.f32.partialorder %v4246_v15, 0.0  ;;  %v5396_v50 = vmul.f32 0.2, %v4246_v15  ;;  %v4238_v32 = vadd.f32 %v4237_v19, %v3181_v56  ;;  %v5649_v27 = vsel %vm5137_vm15, %v4235_v42, %v5393_v36  ;;  %v12889_v40 = vld [vmem:[#allocation55_spill] sm:$0xff] }
 0x259   :  { %6932 = vst.msk [vmem:[%s12804_s3 + $0xa8] sm:$0xf] %vm6889_vm2, %v7979_v14  ;;  %v10711_v55 = vpop.f32.mrf.mxu0  ;;  %3552 = vmatmul.mubr.bf16.gmra.mxu0 %v9001_v60  ;;  %v8373_v12 = vpop.f32.mrf.mxu1  ;;  %8468 = vmatmul.mubr.msk.bf16.gmra.mxu1 %vm2598_vm0, %v9005_v53  ;;  %v7977_v16 = vpack.c.bf16 %v5649_v27, %v5649_v27  ;;  %v3197_v49 = vadd.f32 %v10742_v38, %v12888_v28  ;;  %v12890_v37 = vld [vmem:[#allocation51_spill] sm:$0xff] }
 0x25a   :  { %v5652_v29 = vsel %vm5140_vm1, %v4246_v15, %v5396_v50  ;;  %vm5138_vm3 = vcmp.gt.f32.partialorder %v4238_v32, 0.0  ;;  %v5394_v54 = vmul.f32 0.2, %v4238_v32  ;;  %3559 = vmatprep.mubr.bf16.mxu0 %v9008_v7  ;;  %8471 = vmatprep.mubr.msk.bf16.mxu1 %vm2598_vm0, %v9009_v20  ;;  %v4259_v8 = vadd.f32 %v8373_v12, %v3202_v22 }
 0x25b   :  { %v7980_v26 = vpack.c.bf16 %v5652_v29, %v5652_v29  ;;  %v3363_v6 = vpop.f32.mrf.mxu0  ;;  %v4250_v23 = vpop.f32.mrf.mxu1  ;;  %6930 = vst.msk [vmem:[%s12804_s3 + $0xa0] sm:$0xf] %vm6889_vm2, %v7977_v16  ;;  %v3218_v42 = vadd.f32 %v10742_v38, %v12889_v40  ;;  %v3210_v19 = vadd.f32 %v10742_v38, %v12890_v37  ;;  %v12895_v37 = vld [vmem:[#allocation65_spill] sm:$0xff] }
 0x25c   :  { %v5650_v31 = vsel %vm5138_vm3, %v4238_v32, %v5394_v54  ;;  %v4251_v3 = vadd.f32 %v4250_v23, %v3194_v0  ;;  %vm5143_vm4 = vcmp.gt.f32.partialorder %v4259_v8, 0.0  ;;  %v5399_v52 = vmul.f32 0.2, %v4259_v8  ;;  %v12891_v54 = vld [vmem:[#allocation53_spill] sm:$0xff] }
 0x25d   :  { %6933 = vst.msk [vmem:[%s12804_s3 + $0xac] sm:$0xf] %vm6889_vm2, %v7980_v26  ;;  %v7978_v34 = vpack.c.bf16 %v5650_v31, %v5650_v31  ;;  %v10731_v39 = vpop.f32.mrf.mxu0  ;;  %v8374_v61 = vpop.f32.mrf.mxu1  ;;  %v3213_v26 = vadd.f32 %v10742_v38, %v12891_v54 }
 0x25e   :  { %vm5141_vm5 = vcmp.gt.f32.partialorder %v4251_v3, 0.0  ;;  %v5397_v30 = vmul.f32 0.2, %v4251_v3  ;;  %v4262_v62 = vadd.f32 %v8374_v61, %v3205_v4  ;;  %v5655_v2 = vsel %vm5143_vm4, %v4259_v8, %v5399_v52  ;;  %v12892_v8 = vld [vmem:[#allocation57_spill] sm:$0xff] }
 0x25f   :  { %6931 = vst.msk [vmem:[%s12804_s3 + $0xa4] sm:$0xf] %vm6889_vm2, %v7978_v34  ;;  %v3366_v60 = vpop.f32.mrf.mxu0  ;;  %v4253_v53 = vpop.f32.mrf.mxu1  ;;  %v7983_v56 = vpack.c.bf16 %v5655_v2, %v5655_v2  ;;  %v3221_v6 = vadd.f32 %v10742_v38, %v12892_v8  ;;  %v9016_v8 = vld [vmem:[%s12802_s0 + $0x690] ss:$12 sps:$4 sm:$0xff]  }
 0x260   :  { %v5653_v33 = vsel %vm5141_vm5, %v4251_v3, %v5397_v30  ;;  %vm5144_vm6 = vcmp.gt.f32.partialorder %v4262_v62, 0.0  ;;  %v5400_v15 = vmul.f32 0.2, %v4262_v62  ;;  %v4254_v20 = vadd.f32 %v4253_v53, %v3197_v49  ;;  %v9011_v3 = vld [vmem:[%s12802_s0 + $0x678] ss:$12 sps:$4 sm:$0xff]   ;;  %v12893_v49 = vld [vmem:[#allocation63_spill] sm:$0xff] }
 0x261   :  { %v7981_v7 = vpack.c.bf16 %v5653_v33, %v5653_v33  ;;  %v10752_v14 = vpop.f32.mrf.mxu0  ;;  %3560 = vmatmul.mubr.bf16.gmra.mxu0 %v9006_v47  ;;  %v8377_v36 = vpop.f32.mrf.mxu1  ;;  %8472 = vmatmul.mubr.msk.bf16.gmra.mxu1 %vm2598_vm0, %v9010_v44  ;;  %6936 = vst.msk [vmem:[%s12804_s3 + $0xb8] sm:$0xf] %vm6889_vm2, %v7983_v56  ;;  %v9015_v47 = vld [vmem:[%s12802_s0 + $0x710] ss:$12 sps:$4 sm:$0xff]   ;;  %v9018_v44 = vld [vmem:[%s12802_s0 + $0x694] ss:$12 sps:$4 sm:$0xff]   ;;  %v3234_v40 = vadd.f32 %v10742_v38, %v12893_v49 }
 0x262   :  { %v5656_v50 = vsel %vm5144_vm6, %v4262_v62, %v5400_v15  ;;  %v4275_v32 = vadd.f32 %v8377_v36, %v3218_v42  ;;  %3567 = vmatprep.mubr.bf16.mxu0 %v9013_v48  ;;  %8475 = vmatprep.mubr.msk.bf16.mxu1 %vm2598_vm0, %v9014_v17  ;;  %vm5142_vm7 = vcmp.gt.f32.partialorder %v4254_v20, 0.0  ;;  %v5398_v22 = vmul.f32 0.2, %v4254_v20  ;;  %v9019_v48 = vld [vmem:[%s12802_s0 + $0x728] ss:$12 sps:$4 sm:$0xff]  }
 0x263   :  { %6934 = vst.msk [vmem:[%s12804_s3 + $0xb0] sm:$0xf] %vm6889_vm2, %v7981_v7  ;;  %v7984_v0 = vpack.c.bf16 %v5656_v50, %v5656_v50  ;;  %v3371_v27 = vpop.f32.mrf.mxu0  ;;  %v4266_v12 = vpop.f32.mrf.mxu1 }
 0x264   :  { %vm5147_vm8 = vcmp.gt.f32.partialorder %v4275_v32, 0.0  ;;  %v5403_v16 = vmul.f32 0.2, %v4275_v32  ;;  %v4267_v29 = vadd.f32 %v4266_v12, %v3210_v19  ;;  %v5654_v23 = vsel %vm5142_vm7, %v4254_v20, %v5398_v22  ;;  %v12894_v20 = vld [vmem:[#allocation59_spill] sm:$0xff] }
 0x265   :  { %6937 = vst.msk [vmem:[%s12804_s3 + $0xbc] sm:$0xf] %vm6889_vm2, %v7984_v0  ;;  %v10774_v4 = vpop.f32.mrf.mxu0  ;;  %v8378_v31 = vpop.f32.mrf.mxu1  ;;  %v7982_v34 = vpack.c.bf16 %v5654_v23, %v5654_v23  ;;  %v3226_v36 = vadd.f32 %v10742_v38, %v12894_v20  ;;  %v3237_v19 = vadd.f32 %v10742_v38, %v12895_v37  ;;  %v12896_v23 = vld [vmem:[#allocation61_spill] sm:$0xff] }
 0x266   :  { %v5659_v52 = vsel %vm5147_vm8, %v4275_v32, %v5403_v16  ;;  %vm5145_vm9 = vcmp.gt.f32.partialorder %v4267_v29, 0.0  ;;  %v5401_v61 = vmul.f32 0.2, %v4267_v29  ;;  %v4278_v62 = vadd.f32 %v8378_v31, %v3221_v6  ;;  %v9020_v6 = vld [vmem:[%s12802_s0 + $0x740] ss:$12 sps:$4 sm:$0xff]  }
 0x267   :  { %v7987_v30 = vpack.c.bf16 %v5659_v52, %v5659_v52  ;;  %v3374_v17 = vpop.f32.mrf.mxu0  ;;  %v4269_v28 = vpop.f32.mrf.mxu1  ;;  %6935 = vst.msk [vmem:[%s12804_s3 + $0xb4] sm:$0xf] %vm6889_vm2, %v7982_v34  ;;  %v3229_v31 = vadd.f32 %v10742_v38, %v12896_v23  ;;  %v9024_v34 = vld [vmem:[%s12802_s0 + $0x758] ss:$12 sps:$4 sm:$0xff]  }
 0x268   :  { %v5657_v42 = vsel %vm5145_vm9, %v4267_v29, %v5401_v61  ;;  %v4270_v2 = vadd.f32 %v4269_v28, %v3213_v26  ;;  %vm5148_vm10 = vcmp.gt.f32.partialorder %v4278_v62, 0.0  ;;  %v5404_v53 = vmul.f32 0.2, %v4278_v62  ;;  %v12897_v28 = vld [vmem:[#allocation67_spill] sm:$0xff] }
 0x269   :  { %6940 = vst.msk [vmem:[%s12804_s3 + $0xc8] sm:$0xf] %vm6889_vm2, %v7987_v30  ;;  %v7985_v60 = vpack.c.bf16 %v5657_v42, %v5657_v42  ;;  %v10798_v56 = vpop.f32.mrf.mxu0  ;;  %3568 = vmatmul.mubr.bf16.gmra.mxu0 %v9011_v3  ;;  %v8381_v33 = vpop.f32.mrf.mxu1  ;;  %8476 = vmatmul.mubr.msk.bf16.gmra.mxu1 %vm2598_vm0, %v9015_v47  ;;  %v3242_v49 = vadd.f32 %v10742_v38, %v12897_v28 }
 0x26a   :  { %vm5146_vm11 = vcmp.gt.f32.partialorder %v4270_v2, 0.0  ;;  %v5402_v15 = vmul.f32 0.2, %v4270_v2  ;;  %v4291_v7 = vadd.f32 %v8381_v33, %v3234_v40  ;;  %3575 = vmatprep.mubr.bf16.mxu0 %v9018_v44  ;;  %8479 = vmatprep.mubr.msk.bf16.mxu1 %vm2598_vm0, %v9019_v48  ;;  %v5660_v50 = vsel %vm5148_vm10, %v4278_v62, %v5404_v53  ;;  %v9023_v44 = vld [vmem:[%s12802_s0 + $0x6ac] ss:$12 sps:$4 sm:$0xff]  }
 0x26b   :  { %6938 = vst.msk [vmem:[%s12804_s3 + $0xc0] sm:$0xf] %vm6889_vm2, %v7985_v60  ;;  %v3379_v32 = vpop.f32.mrf.mxu0  ;;  %v4282_v0 = vpop.f32.mrf.mxu1  ;;  %v7988_v22 = vpack.c.bf16 %v5660_v50, %v5660_v50  ;;  %v12898_v40 = vld [vmem:[#allocation71_spill] sm:$0xff]  ;;  %v12899_v50 = vld [vmem:[#allocation73_spill] sm:$0xff] }
 0x26c   :  { %v5658_v27 = vsel %vm5146_vm11, %v4270_v2, %v5402_v15  ;;  %vm5151_vm12 = vcmp.gt.f32.partialorder %v4291_v7, 0.0  ;;  %v5407_v12 = vmul.f32 0.2, %v4291_v7  ;;  %v4283_v29 = vadd.f32 %v4282_v0, %v3226_v36 }
 0x26d   :  { %v7986_v16 = vpack.c.bf16 %v5658_v27, %v5658_v27  ;;  %v10810_v54 = vpop.f32.mrf.mxu0  ;;  %v8382_v26 = vpop.f32.mrf.mxu1  ;;  %6941 = vst.msk [vmem:[%s12804_s3 + $0xcc] sm:$0xf] %vm6889_vm2, %v7988_v22  ;;  %v3250_v42 = vadd.f32 %v10742_v38, %v12898_v40  ;;  %v3253_v32 = vadd.f32 %v10742_v38, %v12899_v50  ;;  %v9021_v27 = vld [vmem:[%s12802_s0 + $0x6a8] ss:$12 sps:$4 sm:$0xff]  }
 0x26e   :  { %v5663_v3 = vsel %vm5151_vm12, %v4291_v7, %v5407_v12  ;;  %v4294_v47 = vadd.f32 %v8382_v26, %v3237_v19  ;;  %vm5149_vm13 = vcmp.gt.f32.partialorder %v4283_v29, 0.0  ;;  %v5405_v61 = vmul.f32 0.2, %v4283_v29  ;;  %v9025_v12 = vld [vmem:[%s12802_s0 + $0x770] ss:$12 sps:$4 sm:$0xff]  }
 0x26f   :  { %6939 = vst.msk [vmem:[%s12804_s3 + $0xc4] sm:$0xf] %vm6889_vm2, %v7986_v16  ;;  %v7991_v52 = vpack.c.bf16 %v5663_v3, %v5663_v3  ;;  %v3382_v48 = vpop.f32.mrf.mxu0  ;;  %v4285_v30 = vpop.f32.mrf.mxu1  ;;  %v9029_v3 = vld [vmem:[%s12802_s0 + $0x788] ss:$12 sps:$4 sm:$0xff]  }
 0x270   :  { %vm5152_vm14 = vcmp.gt.f32.partialorder %v4294_v47, 0.0  ;;  %v5408_v62 = vmul.f32 0.2, %v4294_v47  ;;  %v4286_v17 = vadd.f32 %v4285_v30, %v3229_v31  ;;  %v5661_v2 = vsel %vm5149_vm13, %v4283_v29, %v5405_v61 }
 0x271   :  { %6944 = vst.msk [vmem:[%s12804_s3 + $0xd8] sm:$0xf] %vm6889_vm2, %v7991_v52  ;;  %v10842_v60 = vpop.f32.mrf.mxu0  ;;  %3576 = vmatmul.mubr.bf16.gmra.mxu0 %v9016_v8  ;;  %v8385_v53 = vpop.f32.mrf.mxu1  ;;  %8480 = vmatmul.mubr.msk.bf16.gmra.mxu1 %vm2598_vm0, %v9020_v6  ;;  %v7989_v33 = vpack.c.bf16 %v5661_v2, %v5661_v2  ;;  %v9028_v6 = vld [vmem:[%s12802_s0 + $0x6c4] ss:$12 sps:$4 sm:$0xff]  }
 0x272   :  { %v5664_v15 = vsel %vm5152_vm14, %v4294_v47, %v5408_v62  ;;  %vm5150_vm15 = vcmp.gt.f32.partialorder %v4286_v17, 0.0  ;;  %v5406_v7 = vmul.f32 0.2, %v4286_v17  ;;  %3583 = vmatprep.mubr.bf16.mxu0 %v9023_v44  ;;  %8483 = vmatprep.mubr.msk.bf16.mxu1 %vm2598_vm0, %v9024_v34  ;;  %v4307_v36 = vadd.f32 %v8385_v53, %v3250_v42  ;;  %v12900_v47 = vld [vmem:[#allocation69_spill] sm:$0xff]  ;;  %v12901_v34 = vld [vmem:[#allocation79_spill] sm:$0xff] }
 0x273   :  { %v7992_v20 = vpack.c.bf16 %v5664_v15, %v5664_v15  ;;  %v3387_v37 = vpop.f32.mrf.mxu0  ;;  %v4298_v19 = vpop.f32.mrf.mxu1  ;;  %6942 = vst.msk [vmem:[%s12804_s3 + $0xd0] sm:$0xf] %vm6889_vm2, %v7989_v33  ;;  %v3245_v44 = vadd.f32 %v10742_v38, %v12900_v47  ;;  %v3266_v52 = vadd.f32 %v10742_v38, %v12901_v34  ;;  %v12902_v53 = vld [vmem:[#allocation75_spill] sm:$0xff]  ;;  %v9034_v34 = vld [vmem:[%s12802_s0 + $0x7b8] ss:$12 sps:$4 sm:$0xff]  }
 0x274   :  { %v5662_v0 = vsel %vm5150_vm15, %v4286_v17, %v5406_v7  ;;  %v4299_v22 = vadd.f32 %v4298_v19, %v3242_v49  ;;  %vm5155_vm1 = vcmp.gt.f32.partialorder %v4307_v36, 0.0  ;;  %v5411_v29 = vmul.f32 0.2, %v4307_v36 }
 0x275   :  { %6945 = vst.msk [vmem:[%s12804_s3 + $0xdc] sm:$0xf] %vm6889_vm2, %v7992_v20  ;;  %v7990_v16 = vpack.c.bf16 %v5662_v0, %v5662_v0  ;;  %v10862_v26 = vpop.f32.mrf.mxu0  ;;  %v8386_v8 = vpop.f32.mrf.mxu1  ;;  %v3258_v33 = vadd.f32 %v10742_v38, %v12902_v53  ;;  %v12903_v0 = vld [vmem:[#allocation77_spill] sm:$0xff] }
 0x276   :  { %vm5153_vm3 = vcmp.gt.f32.partialorder %v4299_v22, 0.0  ;;  %v5409_v23 = vmul.f32 0.2, %v4299_v22  ;;  %v4310_v31 = vadd.f32 %v8386_v8, %v3253_v32  ;;  %v5667_v61 = vsel %vm5155_vm1, %v4307_v36, %v5411_v29 }
 0x277   :  { %6943 = vst.msk [vmem:[%s12804_s3 + $0xd4] sm:$0xf] %vm6889_vm2, %v7990_v16  ;;  %v3390_v48 = vpop.f32.mrf.mxu0  ;;  %v4301_v30 = vpop.f32.mrf.mxu1  ;;  %v7995_v62 = vpack.c.bf16 %v5667_v61, %v5667_v61 }
 0x278   :  { %v5665_v17 = vsel %vm5153_vm3, %v4299_v22, %v5409_v23  ;;  %vm5156_vm4 = vcmp.gt.f32.partialorder %v4310_v31, 0.0  ;;  %v5412_v28 = vmul.f32 0.2, %v4310_v31  ;;  %v4302_v40 = vadd.f32 %v4301_v30, %v3245_v44  ;;  %v9030_v23 = vld [vmem:[%s12802_s0 + $0x7a0] ss:$12 sps:$4 sm:$0xff]  }
 0x279   :  { %v7993_v49 = vpack.c.bf16 %v5665_v17, %v5665_v17  ;;  %v10878_v42 = vpop.f32.mrf.mxu0  ;;  %3584 = vmatmul.mubr.bf16.gmra.mxu0 %v9021_v27  ;;  %v8389_v2 = vpop.f32.mrf.mxu1  ;;  %8484 = vmatmul.mubr.msk.bf16.gmra.mxu1 %vm2598_vm0, %v9025_v12  ;;  %6948 = vst.msk [vmem:[%s12804_s3 + $0xe8] sm:$0xf] %vm6889_vm2, %v7995_v62  ;;  %v3261_v22 = vadd.f32 %v10742_v38, %v12903_v0  ;;  %v12904_v27 = vld [vmem:[#allocation81_spill] sm:$0xff] }
 0x27a   :  { %v5668_v15 = vsel %vm5156_vm4, %v4310_v31, %v5412_v28  ;;  %v4323_v7 = vadd.f32 %v8389_v2, %v3266_v52  ;;  %3591 = vmatprep.mubr.bf16.mxu0 %v9028_v6  ;;  %8487 = vmatprep.mubr.msk.bf16.mxu1 %vm2598_vm0, %v9029_v3  ;;  %vm5154_vm5 = vcmp.gt.f32.partialorder %v4302_v40, 0.0  ;;  %v5410_v36 = vmul.f32 0.2, %v4302_v40  ;;  %v9026_v6 = vld [vmem:[%s12802_s0 + $0x6c0] ss:$12 sps:$4 sm:$0xff]  }
 0x27b   :  { %6946 = vst.msk [vmem:[%s12804_s3 + $0xe0] sm:$0xf] %vm6889_vm2, %v7993_v49  ;;  %v7996_v20 = vpack.c.bf16 %v5668_v15, %v5668_v15  ;;  %v3395_v37 = vpop.f32.mrf.mxu0  ;;  %v4314_v19 = vpop.f32.mrf.mxu1  ;;  %v3269_v12 = vadd.f32 %v10742_v38, %v12904_v27  ;;  %v9033_v31 = vld [vmem:[%s12802_s0 + $0x6dc] ss:$12 sps:$4 sm:$0xff]   ;;  %v3282_v62 = vadd.f32 %v10742_v38, %v10289_v46 }
 0x27c   :  { %vm5159_vm6 = vcmp.gt.f32.partialorder %v4323_v7, 0.0  ;;  %v5415_v50 = vmul.f32 0.2, %v4323_v7  ;;  %v4315_v32 = vadd.f32 %v4314_v19, %v3258_v33  ;;  %v5666_v16 = vsel %vm5154_vm5, %v4302_v40, %v5410_v36  ;;  %v12905_v15 = vld [vmem:[#allocation83_spill] sm:$0xff] }
 0x27d   :  { %6949 = vst.msk [vmem:[%s12804_s3 + $0xec] sm:$0xf] %vm6889_vm2, %v7996_v20  ;;  %v10900_v29 = vpop.f32.mrf.mxu0  ;;  %v8390_v8 = vpop.f32.mrf.mxu1  ;;  %v7994_v3 = vpack.c.bf16 %v5666_v16, %v5666_v16  ;;  %v3285_v20 = vadd.f32 %v10742_v38, %v10301_v51  ;;  %v9031_v51 = vld [vmem:[%s12802_s0 + $0x6d8] ss:$12 sps:$4 sm:$0xff]  }
 0x27e   :  { %v5671_v47 = vsel %vm5159_vm6, %v4323_v7, %v5415_v50  ;;  %vm5157_vm7 = vcmp.gt.f32.partialorder %v4315_v32, 0.0  ;;  %v5413_v44 = vmul.f32 0.2, %v4315_v32  ;;  %v4326_v61 = vadd.f32 %v8390_v8, %v3269_v12  ;;  %v9035_v8 = vld [vmem:[%s12802_s0 + $0x7d0] ss:$12 sps:$4 sm:$0xff]  }
 0x27f   :  { %v7999_v52 = vpack.c.bf16 %v5671_v47, %v5671_v47  ;;  %v3398_v48 = vpop.f32.mrf.mxu0  ;;  %v4317_v30 = vpop.f32.mrf.mxu1  ;;  %6947 = vst.msk [vmem:[%s12804_s3 + $0xe4] sm:$0xf] %vm6889_vm2, %v7994_v3  ;;  %v3274_v7 = vadd.f32 %v10742_v38, %v12905_v15  ;;  %v9038_v47 = vld [vmem:[%s12802_s0 + $0x6f4] ss:$12 sps:$4 sm:$0xff]  }
 0x280   :  { %v5669_v17 = vsel %vm5157_vm7, %v4315_v32, %v5413_v44  ;;  %v4318_v28 = vadd.f32 %v4317_v30, %v3261_v22  ;;  %vm5160_vm8 = vcmp.gt.f32.partialorder %v4326_v61, 0.0  ;;  %v5416_v40 = vmul.f32 0.2, %v4326_v61  ;;  %v9039_v44 = vld [vmem:[%s12802_s0 + $0x7e8] ss:$12 sps:$4 sm:$0xff]  }
 0x281   :  { %6952 = vst.msk [vmem:[%s12804_s3 + $0xf8] sm:$0xf] %vm6889_vm2, %v7999_v52  ;;  %v7997_v49 = vpack.c.bf16 %v5669_v17, %v5669_v17  ;;  %v10924_v2 = vpop.f32.mrf.mxu0  ;;  %3592 = vmatmul.mubr.bf16.gmra.mxu0 %v9026_v6  ;;  %v8393_v53 = vpop.f32.mrf.mxu1  ;;  %8488 = vmatmul.mubr.msk.bf16.gmra.mxu1 %vm2598_vm0, %v9030_v23  ;;  %v12906_v6 = vld [vmem:[#allocation84_spill] sm:$0xff]  ;;  %v3290_v17 = vadd.f32 %v10742_v38, %v10333_v10 }
 0x282   :  { %vm5158_vm9 = vcmp.gt.f32.partialorder %v4318_v28, 0.0  ;;  %v5414_v46 = vmul.f32 0.2, %v4318_v28  ;;  %v4339_v33 = vadd.f32 %v8393_v53, %v3282_v62  ;;  %3599 = vmatprep.mubr.bf16.mxu0 %v9033_v31  ;;  %8491 = vmatprep.mubr.msk.bf16.mxu1 %vm2598_vm0, %v9034_v34  ;;  %v5672_v36 = vsel %vm5160_vm8, %v4326_v61, %v5416_v40 }
 0x283   :  { %6950 = vst.msk [vmem:[%s12804_s3 + $0xf0] sm:$0xf] %vm6889_vm2, %v7997_v49  ;;  %v3403_v37 = vpop.f32.mrf.mxu0  ;;  %v4330_v19 = vpop.f32.mrf.mxu1  ;;  %v8000_v50 = vpack.c.bf16 %v5672_v36, %v5672_v36  ;;  %v3277_v23 = vadd.f32 %v10742_v38, %v12906_v6  ;;  %v3301_v36 = vadd.f32 %v10742_v38, %v10391_v24  ;;  %v9044_v6 = vld [vmem:[%s12802_s0 + $0x818] ss:$12 sps:$4 sm:$0xff]  }
 0x284   :  { %v5670_v32 = vsel %vm5158_vm9, %v4318_v28, %v5414_v46  ;;  %vm5163_vm10 = vcmp.gt.f32.partialorder %v4339_v33, 0.0  ;;  %v5419_v0 = vmul.f32 0.2, %v4339_v33  ;;  %v4331_v27 = vadd.f32 %v4330_v19, %v3274_v7 }
 0x285   :  { %v7998_v22 = vpack.c.bf16 %v5670_v32, %v5670_v32  ;;  %v10936_v12 = vpop.f32.mrf.mxu0  ;;  %v8394_v16 = vpop.f32.mrf.mxu1  ;;  %6953 = vst.msk [vmem:[%s12804_s3 + $0xfc] sm:$0xf] %vm6889_vm2, %v8000_v50  ;;  %v3298_v28 = vadd.f32 %v10742_v38, %v10369_v9  ;;  %v9036_v50 = vld [vmem:[%s12802_s0 + $0x6f0] ss:$12 sps:$4 sm:$0xff]   ;;  %v9040_v32 = vld [vmem:[%s12802_s0 + $0x800] ss:$12 sps:$4 sm:$0xff]  }
 0x286   :  { %v5675_v31 = vsel %vm5163_vm10, %v4339_v33, %v5419_v0  ;;  %v4342_v3 = vadd.f32 %v8394_v16, %v3285_v20  ;;  %vm5161_vm11 = vcmp.gt.f32.partialorder %v4331_v27, 0.0  ;;  %v5417_v52 = vmul.f32 0.2, %v4331_v27  ;;  %v9043_v16 = vld [vmem:[%s12802_s0 + $0x70c] ss:$12 sps:$4 sm:$0xff]  }
 0x287   :  { %6951 = vst.msk [vmem:[%s12804_s3 + $0xf4] sm:$0xf] %vm6889_vm2, %v7998_v22  ;;  %v8003_v34 = vpack.c.bf16 %v5675_v31, %v5675_v31  ;;  %v3406_v61 = vpop.f32.mrf.mxu0  ;;  %v4333_v48 = vpop.f32.mrf.mxu1  ;;  %v3314_v31 = vadd.f32 %v10742_v38, %v10459_v18  ;;  %v3306_v18 = vadd.f32 %v10742_v38, %v10415_v58 }
 0x288   :  { %vm5164_vm12 = vcmp.gt.f32.partialorder %v4342_v3, 0.0  ;;  %v5420_v30 = vmul.f32 0.2, %v4342_v3  ;;  %v4334_v62 = vadd.f32 %v4333_v48, %v3277_v23  ;;  %v5673_v49 = vsel %vm5161_vm11, %v4331_v27, %v5417_v52 }
 0x289   :  { %6956 = vst.msk [vmem:[%s12804_s3 + $0x108] sm:$0xf] %vm6889_vm2, %v8003_v34  ;;  %v10968_v40 = vpop.f32.mrf.mxu0  ;;  %3600 = vmatmul.mubr.bf16.gmra.mxu0 %v9031_v51  ;;  %v8397_v53 = vpop.f32.mrf.mxu1  ;;  %8492 = vmatmul.mubr.msk.bf16.gmra.mxu1 %vm2598_vm0, %v9035_v8  ;;  %v8001_v46 = vpack.c.bf16 %v5673_v49, %v5673_v49  ;;  %v3293_v23 = vadd.f32 %v10742_v38, %v10353_v21 }
 0x28a   :  { %v5676_v33 = vsel %vm5164_vm12, %v4342_v3, %v5420_v30  ;;  %vm5162_vm13 = vcmp.gt.f32.partialorder %v4334_v62, 0.0  ;;  %v5418_v15 = vmul.f32 0.2, %v4334_v62  ;;  %3607 = vmatprep.mubr.bf16.mxu0 %v9038_v47  ;;  %8495 = vmatprep.mubr.msk.bf16.mxu1 %vm2598_vm0, %v9039_v44  ;;  %v4355_v9 = vadd.f32 %v8397_v53, %v3298_v28 }
 0x28b   :  { %v8004_v10 = vpack.c.bf16 %v5676_v33, %v5676_v33  ;;  %v3411_v7 = vpop.f32.mrf.mxu0  ;;  %v4346_v20 = vpop.f32.mrf.mxu1  ;;  %6954 = vst.msk [vmem:[%s12804_s3 + $0x100] sm:$0xf] %vm6889_vm2, %v8001_v46 }
 0x28c   :  { %v5674_v37 = vsel %vm5162_vm13, %v4334_v62, %v5418_v15  ;;  %v4347_v19 = vadd.f32 %v4346_v20, %v3290_v17  ;;  %vm5167_vm14 = vcmp.gt.f32.partialorder %v4355_v9, 0.0  ;;  %v5423_v0 = vmul.f32 0.2, %v4355_v9 }
 0x28d   :  { %6957 = vst.msk [vmem:[%s12804_s3 + $0x10c] sm:$0xf] %vm6889_vm2, %v8004_v10  ;;  %v8002_v24 = vpack.c.bf16 %v5674_v37, %v5674_v37  ;;  %v10988_v22 = vpop.f32.mrf.mxu0  ;;  %v8398_v27 = vpop.f32.mrf.mxu1  ;;  %v3309_v10 = vadd.f32 %v10742_v38, %v10427_v5  ;;  %v9041_v37 = vld [vmem:[%s12802_s0 + $0x708] ss:$12 sps:$4 sm:$0xff]   ;;  %v9045_v5 = vld [vmem:[%s12802_s0 + $0x830] ss:$12 sps:$4 sm:$0xff]  }
 0x28e   :  { %vm5165_vm15 = vcmp.gt.f32.partialorder %v4347_v19, 0.0  ;;  %v5421_v51 = vmul.f32 0.2, %v4347_v19  ;;  %v4358_v8 = vadd.f32 %v8398_v27, %v3301_v36  ;;  %v5679_v3 = vsel %vm5167_vm14, %v4355_v9, %v5423_v0 }
 0x28f   :  { %6955 = vst.msk [vmem:[%s12804_s3 + $0x104] sm:$0xf] %vm6889_vm2, %v8002_v24  ;;  %v3414_v47 = vpop.f32.mrf.mxu0  ;;  %v4349_v44 = vpop.f32.mrf.mxu1  ;;  %v8007_v34 = vpack.c.bf16 %v5679_v3, %v5679_v3  ;;  %v3317_v9 = vadd.f32 %v10742_v38, %v10479_v57  ;;  %v9048_v57 = vld [vmem:[%s12802_s0 + $0x724] ss:$12 sps:$4 sm:$0xff]   ;;  %v9049_v24 = vld [vmem:[%s12802_s0 + $0x848] ss:$12 sps:$4 sm:$0xff]  }
 0x290   :  { %v5677_v52 = vsel %vm5165_vm15, %v4347_v19, %v5421_v51  ;;  %vm5168_vm1 = vcmp.gt.f32.partialorder %v4358_v8, 0.0  ;;  %v5424_v61 = vmul.f32 0.2, %v4358_v8  ;;  %v4350_v30 = vadd.f32 %v4349_v44, %v3293_v23 }
 0x291   :  { %v8005_v48 = vpack.c.bf16 %v5677_v52, %v5677_v52  ;;  %v11004_v62 = vpop.f32.mrf.mxu0  ;;  %3608 = vmatmul.mubr.bf16.gmra.mxu0 %v9036_v50  ;;  %v8401_v21 = vpop.f32.mrf.mxu1  ;;  %8496 = vmatmul.mubr.msk.bf16.gmra.mxu1 %vm2598_vm0, %v9040_v32  ;;  %6960 = vst.msk [vmem:[%s12804_s3 + $0x118] sm:$0xf] %vm6889_vm2, %v8007_v34  ;;  %v3322_v52 = vadd.f32 %v10742_v38, %v10495_v59 }
 0x292   :  { %v5680_v17 = vsel %vm5168_vm1, %v4358_v8, %v5424_v61  ;;  %v4371_v28 = vadd.f32 %v8401_v21, %v3314_v31  ;;  %3615 = vmatprep.mubr.bf16.mxu0 %v9043_v16  ;;  %8499 = vmatprep.mubr.msk.bf16.mxu1 %vm2598_vm0, %v9044_v6  ;;  %vm5166_vm3 = vcmp.gt.f32.partialorder %v4350_v30, 0.0  ;;  %v5422_v53 = vmul.f32 0.2, %v4350_v30 }
 0x293   :  { %6958 = vst.msk [vmem:[%s12804_s3 + $0x110] sm:$0xf] %vm6889_vm2, %v8005_v48  ;;  %v8008_v49 = vpack.c.bf16 %v5680_v17, %v5680_v17  ;;  %v3419_v46 = vpop.f32.mrf.mxu0  ;;  %v4362_v58 = vpop.f32.mrf.mxu1  ;;  %v3330_v8 = vadd.f32 %v10742_v38, %v10541_v1  ;;  %v3333_v61 = vadd.f32 %v10742_v38, %v10553_v13  ;;  %v9046_v13 = vld [vmem:[%s12802_s0 + $0x720] ss:$12 sps:$4 sm:$0xff]  }
 0x294   :  { %vm5171_vm4 = vcmp.gt.f32.partialorder %v4371_v28, 0.0  ;;  %v5427_v33 = vmul.f32 0.2, %v4371_v28  ;;  %v4363_v15 = vadd.f32 %v4362_v58, %v3306_v18  ;;  %v5678_v7 = vsel %vm5166_vm3, %v4350_v30, %v5422_v53  ;;  %v9050_v58 = vld [vmem:[%s12802_s0 + $0x860] ss:$12 sps:$4 sm:$0xff]  }
 0x295   :  { %6961 = vst.msk [vmem:[%s12804_s3 + $0x11c] sm:$0xf] %vm6889_vm2, %v8008_v49  ;;  %v11026_v20 = vpop.f32.mrf.mxu0  ;;  %v8402_v36 = vpop.f32.mrf.mxu1  ;;  %v8006_v19 = vpack.c.bf16 %v5678_v7, %v5678_v7  ;;  %v9054_v7 = vld [vmem:[%s12802_s0 + $0x878] ss:$12 sps:$4 sm:$0xff]  }
 0x296   :  { %v5683_v50 = vsel %vm5171_vm4, %v4371_v28, %v5427_v33  ;;  %vm5169_vm5 = vcmp.gt.f32.partialorder %v4363_v15, 0.0  ;;  %v5425_v32 = vmul.f32 0.2, %v4363_v15  ;;  %v4374_v27 = vadd.f32 %v8402_v36, %v3317_v9  ;;  %v9053_v9 = vld [vmem:[%s12802_s0 + $0x73c] ss:$12 sps:$4 sm:$0xff]  }
 0x297   :  { %v8011_v0 = vpack.c.bf16 %v5683_v50, %v5683_v50  ;;  %v3422_v16 = vpop.f32.mrf.mxu0  ;;  %v4365_v51 = vpop.f32.mrf.mxu1  ;;  %6959 = vst.msk [vmem:[%s12804_s3 + $0x114] sm:$0xf] %vm6889_vm2, %v8006_v19  ;;  %v3325_v33 = vadd.f32 %v10742_v38, %v10517_v43  ;;  %v3338_v50 = vadd.f32 %v10742_v38, %v10585_v25 }
 0x298   :  { %v5681_v6 = vsel %vm5169_vm5, %v4363_v15, %v5425_v32  ;;  %v4366_v23 = vadd.f32 %v4365_v51, %v3309_v10  ;;  %vm5172_vm6 = vcmp.gt.f32.partialorder %v4374_v27, 0.0  ;;  %v5428_v3 = vmul.f32 0.2, %v4374_v27 }
 0x299   :  { %6964 = vst.msk [vmem:[%s12804_s3 + $0x128] sm:$0xf] %vm6889_vm2, %v8011_v0  ;;  %v8009_v31 = vpack.c.bf16 %v5681_v6, %v5681_v6  ;;  %v11050_v47 = vpop.f32.mrf.mxu0  ;;  %3616 = vmatmul.mubr.bf16.gmra.mxu0 %v9041_v37  ;;  %v8405_v44 = vpop.f32.mrf.mxu1  ;;  %8500 = vmatmul.mubr.msk.bf16.gmra.mxu1 %vm2598_vm0, %v9045_v5  ;;  %v3346_v32 = vadd.f32 %v10742_v38, %v10621_v41 }
 0x29a   :  { %vm5170_vm7 = vcmp.gt.f32.partialorder %v4366_v23, 0.0  ;;  %v5426_v1 = vmul.f32 0.2, %v4366_v23  ;;  %v4387_v34 = vadd.f32 %v8405_v44, %v3330_v8  ;;  %3623 = vmatprep.mubr.bf16.mxu0 %v9048_v57  ;;  %8503 = vmatprep.mubr.msk.bf16.mxu1 %vm2598_vm0, %v9049_v24  ;;  %v5684_v48 = vsel %vm5172_vm6, %v4374_v27, %v5428_v3 }
 0x29b   :  { %6962 = vst.msk [vmem:[%s12804_s3 + $0x120] sm:$0xf] %vm6889_vm2, %v8009_v31  ;;  %v3427_v30 = vpop.f32.mrf.mxu0  ;;  %v4378_v21 = vpop.f32.mrf.mxu1  ;;  %v8012_v18 = vpack.c.bf16 %v5684_v48, %v5684_v48  ;;  %v3349_v31 = vadd.f32 %v10742_v38, %v10643_v63 }
 0x29c   :  { %v5682_v17 = vsel %vm5170_vm7, %v4366_v23, %v5426_v1  ;;  %vm5175_vm8 = vcmp.gt.f32.partialorder %v4387_v34, 0.0  ;;  %v5431_v28 = vmul.f32 0.2, %v4387_v34  ;;  %v4379_v53 = vadd.f32 %v4378_v21, %v3322_v52  ;;  %v9051_v1 = vld [vmem:[%s12802_s0 + $0x738] ss:$12 sps:$4 sm:$0xff]  }
 0x29d   :  { %v8010_v49 = vpack.c.bf16 %v5682_v17, %v5682_v17  ;;  %v11062_v46 = vpop.f32.mrf.mxu0  ;;  %v8406_v59 = vpop.f32.mrf.mxu1  ;;  %6965 = vst.msk [vmem:[%s12804_s3 + $0x12c] sm:$0xf] %vm6889_vm2, %v8012_v18  ;;  %v9058_v30 = vld [vmem:[%s12802_s0 + $0x754] ss:$12 sps:$4 sm:$0xff]  }
 0x29e   :  { %v5687_v15 = vsel %vm5175_vm8, %v4387_v34, %v5431_v28  ;;  %v4390_v10 = vadd.f32 %v8406_v59, %v3333_v61  ;;  %vm5173_vm9 = vcmp.gt.f32.partialorder %v4379_v53, 0.0  ;;  %v5429_v36 = vmul.f32 0.2, %v4379_v53  ;;  %v9055_v34 = vld [vmem:[%s12802_s0 + $0x890] ss:$12 sps:$4 sm:$0xff]  }
 0x29f   :  { %6963 = vst.msk [vmem:[%s12804_s3 + $0x124] sm:$0xf] %vm6889_vm2, %v8010_v49  ;;  %v8015_v43 = vpack.c.bf16 %v5687_v15, %v5687_v15  ;;  %v3430_v37 = vpop.f32.mrf.mxu0  ;;  %v4381_v5 = vpop.f32.mrf.mxu1  ;;  %v9059_v17 = vld [vmem:[%s12802_s0 + $0x8a8] ss:$12 sps:$4 sm:$0xff]   ;;  %v3341_v28 = vadd.f32 %v10742_v38, %v10605_v35  ;;  %v3362_v49 = vadd.f32 %v10742_v38, %v10711_v55  ;;  %v3354_v55 = vadd.f32 %v10742_v38, %v10667_v11 }
 0x2a0   :  { %vm5176_vm10 = vcmp.gt.f32.partialorder %v4390_v10, 0.0  ;;  %v5432_v57 = vmul.f32 0.2, %v4390_v10  ;;  %v4382_v19 = vadd.f32 %v4381_v5, %v3325_v33  ;;  %v5685_v24 = vsel %vm5173_vm9, %v4379_v53, %v5429_v36 }
 0x2a1   :  { %6968 = vst.msk [vmem:[%s12804_s3 + $0x138] sm:$0xf] %vm6889_vm2, %v8015_v43  ;;  %v11094_v0 = vpop.f32.mrf.mxu0  ;;  %3624 = vmatmul.mubr.bf16.gmra.mxu0 %v9046_v13  ;;  %v8409_v27 = vpop.f32.mrf.mxu1  ;;  %8504 = vmatmul.mubr.msk.bf16.gmra.mxu1 %vm2598_vm0, %v9050_v58  ;;  %v8013_v16 = vpack.c.bf16 %v5685_v24, %v5685_v24  ;;  %v3365_v24 = vadd.f32 %v10742_v38, %v10731_v39  ;;  %v9063_v39 = vld [vmem:[%s12802_s0 + $0x76c] ss:$12 sps:$4 sm:$0xff]  }
 0x2a2   :  { %v5688_v51 = vsel %vm5176_vm10, %v4390_v10, %v5432_v57  ;;  %vm5174_vm11 = vcmp.gt.f32.partialorder %v4382_v19, 0.0  ;;  %v5430_v8 = vmul.f32 0.2, %v4382_v19  ;;  %3631 = vmatprep.mubr.bf16.mxu0 %v9053_v9  ;;  %8507 = vmatprep.mubr.msk.bf16.mxu1 %vm2598_vm0, %v9054_v7  ;;  %v4403_v41 = vadd.f32 %v8409_v27, %v3346_v32 }
 0x2a3   :  { %v8016_v25 = vpack.c.bf16 %v5688_v51, %v5688_v51  ;;  %v3435_v6 = vpop.f32.mrf.mxu0  ;;  %v4394_v23 = vpop.f32.mrf.mxu1  ;;  %6966 = vst.msk [vmem:[%s12804_s3 + $0x130] sm:$0xf] %vm6889_vm2, %v8013_v16  ;;  %v3357_v32 = vadd.f32 %v10742_v38, %v10679_v45  ;;  %v9060_v45 = vld [vmem:[%s12802_s0 + $0x8c0] ss:$12 sps:$4 sm:$0xff]  }
 0x2a4   :  { %v5686_v3 = vsel %vm5174_vm11, %v4382_v19, %v5430_v8  ;;  %v4395_v44 = vadd.f32 %v4394_v23, %v3338_v50  ;;  %vm5179_vm12 = vcmp.gt.f32.partialorder %v4403_v41, 0.0  ;;  %v5435_v52 = vmul.f32 0.2, %v4403_v41  ;;  %v9056_v8 = vld [vmem:[%s12802_s0 + $0x750] ss:$12 sps:$4 sm:$0xff]  }
 0x2a5   :  { %6969 = vst.msk [vmem:[%s12804_s3 + $0x13c] sm:$0xf] %vm6889_vm2, %v8016_v25  ;;  %v8014_v63 = vpack.c.bf16 %v5686_v3, %v5686_v3  ;;  %v11114_v61 = vpop.f32.mrf.mxu0  ;;  %v8410_v48 = vpop.f32.mrf.mxu1  ;;  %v9064_v23 = vld [vmem:[%s12802_s0 + $0x8d8] ss:$12 sps:$4 sm:$0xff]  }
 0x2a6   :  { %vm5177_vm13 = vcmp.gt.f32.partialorder %v4395_v44, 0.0  ;;  %v5433_v21 = vmul.f32 0.2, %v4395_v44  ;;  %v4406_v18 = vadd.f32 %v8410_v48, %v3349_v31  ;;  %v5691_v53 = vsel %vm5179_vm12, %v4403_v41, %v5435_v52 }
 0x2a7   :  { %6967 = vst.msk [vmem:[%s12804_s3 + $0x134] sm:$0xf] %vm6889_vm2, %v8014_v63  ;;  %v3438_v59 = vpop.f32.mrf.mxu0  ;;  %v4397_v13 = vpop.f32.mrf.mxu1  ;;  %v8019_v58 = vpack.c.bf16 %v5691_v53, %v5691_v53 }
 0x2a8   :  { %v5689_v33 = vsel %vm5177_vm13, %v4395_v44, %v5433_v21  ;;  %vm5180_vm14 = vcmp.gt.f32.partialorder %v4406_v18, 0.0  ;;  %v5436_v15 = vmul.f32 0.2, %v4406_v18  ;;  %v4398_v9 = vadd.f32 %v4397_v13, %v3341_v28 }
 0x2a9   :  { %v8017_v10 = vpack.c.bf16 %v5689_v33, %v5689_v33  ;;  %v11130_v7 = vpop.f32.mrf.mxu0  ;;  %3632 = vmatmul.mubr.bf16.gmra.mxu0 %v9051_v1  ;;  %v8413_v35 = vpop.f32.mrf.mxu1  ;;  %8508 = vmatmul.mubr.msk.bf16.gmra.mxu1 %vm2598_vm0, %v9055_v34  ;;  %6972 = vst.msk [vmem:[%s12804_s3 + $0x148] sm:$0xf] %vm6889_vm2, %v8019_v58  ;;  %v3378_v34 = vadd.f32 %v10742_v38, %v10798_v56 }
 0x2aa   :  { %v5692_v43 = vsel %vm5180_vm14, %v4406_v18, %v5436_v15  ;;  %v4419_v36 = vadd.f32 %v8413_v35, %v3362_v49  ;;  %3639 = vmatprep.mubr.bf16.mxu0 %v9058_v30  ;;  %8511 = vmatprep.mubr.msk.bf16.mxu1 %vm2598_vm0, %v9059_v17  ;;  %vm5178_vm15 = vcmp.gt.f32.partialorder %v4398_v9, 0.0  ;;  %v5434_v5 = vmul.f32 0.2, %v4398_v9 }
 0x2ab   :  { %6970 = vst.msk [vmem:[%s12804_s3 + $0x140] sm:$0xf] %vm6889_vm2, %v8017_v10  ;;  %v8020_v37 = vpack.c.bf16 %v5692_v43, %v5692_v43  ;;  %v3443_v57 = vpop.f32.mrf.mxu0  ;;  %v4410_v11 = vpop.f32.mrf.mxu1  ;;  %v3370_v28 = vadd.f32 %v10742_v38, %v10752_v14  ;;  %v3381_v49 = vadd.f32 %v10742_v38, %v10810_v54  ;;  %v9061_v54 = vld [vmem:[%s12802_s0 + $0x768] ss:$12 sps:$4 sm:$0xff]   ;;  %v3373_v43 = vadd.f32 %v10742_v38, %v10774_v4 }
 0x2ac   :  { %vm5183_vm1 = vcmp.gt.f32.partialorder %v4419_v36, 0.0  ;;  %v5439_v19 = vmul.f32 0.2, %v4419_v36  ;;  %v4411_v50 = vadd.f32 %v4410_v11, %v3354_v55  ;;  %v5690_v27 = vsel %vm5178_vm15, %v4398_v9, %v5434_v5  ;;  %v9065_v55 = vld [vmem:[%s12802_s0 + $0x8f0] ss:$12 sps:$4 sm:$0xff]  }
 0x2ad   :  { %6973 = vst.msk [vmem:[%s12804_s3 + $0x14c] sm:$0xf] %vm6889_vm2, %v8020_v37  ;;  %v11152_v16 = vpop.f32.mrf.mxu0  ;;  %v8414_v51 = vpop.f32.mrf.mxu1  ;;  %v8018_v25 = vpack.c.bf16 %v5690_v27, %v5690_v27  ;;  %v9068_v5 = vld [vmem:[%s12802_s0 + $0x784] ss:$12 sps:$4 sm:$0xff]   ;;  %v9069_v57 = vld [vmem:[%s12802_s0 + $0x908] ss:$12 sps:$4 sm:$0xff]   ;;  %v3386_v27 = vadd.f32 %v10742_v38, %v10842_v60 }
 0x2ae   :  { %v5695_v41 = vsel %vm5183_vm1, %v4419_v36, %v5439_v19  ;;  %vm5181_vm3 = vcmp.gt.f32.partialorder %v4411_v50, 0.0  ;;  %v5437_v6 = vmul.f32 0.2, %v4411_v50  ;;  %v4422_v3 = vadd.f32 %v8414_v51, %v3365_v24 }
 0x2af   :  { %v8023_v31 = vpack.c.bf16 %v5695_v41, %v5695_v41  ;;  %v3446_v44 = vpop.f32.mrf.mxu0  ;;  %v4413_v1 = vpop.f32.mrf.mxu1  ;;  %6971 = vst.msk [vmem:[%s12804_s3 + $0x144] sm:$0xf] %vm6889_vm2, %v8018_v25  ;;  %v3394_v51 = vadd.f32 %v10742_v38, %v10878_v42 }
 0x2b0   :  { %v5693_v63 = vsel %vm5181_vm3, %v4411_v50, %v5437_v6  ;;  %v4414_v52 = vadd.f32 %v4413_v1, %v3357_v32  ;;  %vm5184_vm4 = vcmp.gt.f32.partialorder %v4422_v3, 0.0  ;;  %v5440_v30 = vmul.f32 0.2, %v4422_v3 }
 0x2b1   :  { %6976 = vst.msk [vmem:[%s12804_s3 + $0x158] sm:$0xf] %vm6889_vm2, %v8023_v31  ;;  %v8021_v48 = vpack.c.bf16 %v5693_v63, %v5693_v63  ;;  %v11176_v21 = vpop.f32.mrf.mxu0  ;;  %3640 = vmatmul.mubr.bf16.gmra.mxu0 %v9056_v8  ;;  %v8417_v18 = vpop.f32.mrf.mxu1  ;;  %8512 = vmatmul.mubr.msk.bf16.gmra.mxu1 %vm2598_vm0, %v9060_v45  ;;  %v9070_v63 = vld [vmem:[%s12802_s0 + $0x920] ss:$12 sps:$4 sm:$0xff]  }
 0x2b2   :  { %vm5182_vm5 = vcmp.gt.f32.partialorder %v4414_v52, 0.0  ;;  %v5438_v56 = vmul.f32 0.2, %v4414_v52  ;;  %v4435_v17 = vadd.f32 %v8417_v18, %v3378_v34  ;;  %3647 = vmatprep.mubr.bf16.mxu0 %v9063_v39  ;;  %8515 = vmatprep.mubr.msk.bf16.mxu1 %vm2598_vm0, %v9064_v23  ;;  %v5696_v53 = vsel %vm5184_vm4, %v4422_v3, %v5440_v30  ;;  %v9066_v34 = vld [vmem:[%s12802_s0 + $0x780] ss:$12 sps:$4 sm:$0xff]  }
 0x2b3   :  { %6974 = vst.msk [vmem:[%s12804_s3 + $0x150] sm:$0xf] %vm6889_vm2, %v8021_v48  ;;  %v3451_v59 = vpop.f32.mrf.mxu0  ;;  %v4426_v13 = vpop.f32.mrf.mxu1  ;;  %v8024_v58 = vpack.c.bf16 %v5696_v53, %v5696_v53  ;;  %v3397_v3 = vadd.f32 %v10742_v38, %v10900_v29  ;;  %v9073_v30 = vld [vmem:[%s12802_s0 + $0x79c] ss:$12 sps:$4 sm:$0xff]  }
 0x2b4   :  { %v5694_v33 = vsel %vm5182_vm5, %v4414_v52, %v5438_v56  ;;  %vm5187_vm6 = vcmp.gt.f32.partialorder %v4435_v17, 0.0  ;;  %v5443_v15 = vmul.f32 0.2, %v4435_v17  ;;  %v4427_v9 = vadd.f32 %v4426_v13, %v3370_v28  ;;  %v11251_v28 = vld [vmem:[%s12803_s2] ss:$0 sm:$0xff] }
 0x2b5   :  { %v8022_v10 = vpack.c.bf16 %v5694_v33, %v5694_v33  ;;  %v11188_v35 = vpop.f32.mrf.mxu0  ;;  %v8418_v14 = vpop.f32.mrf.mxu1  ;;  %6977 = vst.msk [vmem:[%s12804_s3 + $0x15c] sm:$0xf] %vm6889_vm2, %v8024_v58  ;;  %v3410_v53 = vadd.f32 %v11251_v28, %v10968_v40  ;;  %v3402_v40 = vadd.f32 %v11251_v28, %v10924_v2 }
 0x2b6   :  { %v5699_v36 = vsel %vm5187_vm6, %v4435_v17, %v5443_v15  ;;  %v4438_v37 = vadd.f32 %v8418_v14, %v3381_v49  ;;  %vm5185_vm7 = vcmp.gt.f32.partialorder %v4427_v9, 0.0  ;;  %v5441_v11 = vmul.f32 0.2, %v4427_v9  ;;  %v9074_v17 = vld [vmem:[%s12802_s0 + $0x938] ss:$12 sps:$4 sm:$0xff]  }
 0x2b7   :  { %6975 = vst.msk [vmem:[%s12804_s3 + $0x154] sm:$0xf] %vm6889_vm2, %v8022_v10  ;;  %v8027_v4 = vpack.c.bf16 %v5699_v36, %v5699_v36  ;;  %v3454_v19 = vpop.f32.mrf.mxu0  ;;  %v4429_v50 = vpop.f32.mrf.mxu1  ;;  %v3389_v49 = vadd.f32 %v11251_v28, %v10862_v26 }
 0x2b8   :  { %vm5188_vm8 = vcmp.gt.f32.partialorder %v4438_v37, 0.0  ;;  %v5444_v32 = vmul.f32 0.2, %v4438_v37  ;;  %v4430_v24 = vadd.f32 %v4429_v50, %v3373_v43  ;;  %v5697_v8 = vsel %vm5185_vm7, %v4427_v9, %v5441_v11 }
 0x2b9   :  { %6980 = vst.msk [vmem:[%s12804_s3 + $0x168] sm:$0xf] %vm6889_vm2, %v8027_v4  ;;  %v11220_v45 = vpop.f32.mrf.mxu0  ;;  %3648 = vmatmul.mubr.bf16.gmra.mxu0 %v9061_v54  ;;  %v8421_v39 = vpop.f32.mrf.mxu1  ;;  %8516 = vmatmul.mubr.msk.bf16.gmra.mxu1 %vm2598_vm0, %v9065_v55  ;;  %v8025_v25 = vpack.c.bf16 %v5697_v8, %v5697_v8  ;;  %v3405_v11 = vadd.f32 %v11251_v28, %v10936_v12  ;;  %v9075_v12 = vld [vmem:[%s12802_s0 + $0x950] ss:$12 sps:$4 sm:$0xff]  }
 0x2ba   :  { %v5700_v41 = vsel %vm5188_vm8, %v4438_v37, %v5444_v32  ;;  %vm5186_vm9 = vcmp.gt.f32.partialorder %v4430_v24, 0.0  ;;  %v5442_v6 = vmul.f32 0.2, %v4430_v24  ;;  %3655 = vmatprep.mubr.bf16.mxu0 %v9068_v5  ;;  %8519 = vmatprep.mubr.msk.bf16.mxu1 %vm2598_vm0, %v9069_v57  ;;  %v4451_v42 = vadd.f32 %v8421_v39, %v3394_v51 }
 0x2bb   :  { %v8028_v60 = vpack.c.bf16 %v5700_v41, %v5700_v41  ;;  %v3459_v23 = vpop.f32.mrf.mxu0  ;;  %v4442_v31 = vpop.f32.mrf.mxu1  ;;  %6978 = vst.msk [vmem:[%s12804_s3 + $0x160] sm:$0xf] %vm6889_vm2, %v8025_v25  ;;  %v3413_v19 = vadd.f32 %v11251_v28, %v10988_v22  ;;  %v9078_v22 = vld [vmem:[%s12802_s0 + $0x7b4] ss:$12 sps:$4 sm:$0xff]  }
 0x2bc   :  { %v5698_v44 = vsel %vm5186_vm9, %v4430_v24, %v5442_v6  ;;  %v4443_v1 = vadd.f32 %v4442_v31, %v3386_v27  ;;  %vm5191_vm10 = vcmp.gt.f32.partialorder %v4451_v42, 0.0  ;;  %v5447_v29 = vmul.f32 0.2, %v4451_v42  ;;  %v9071_v27 = vld [vmem:[%s12802_s0 + $0x798] ss:$12 sps:$4 sm:$0xff]  }
 0x2bd   :  { %6981 = vst.msk [vmem:[%s12804_s3 + $0x16c] sm:$0xf] %vm6889_vm2, %v8028_v60  ;;  %v8026_v38 = vpack.c.bf16 %v5698_v44, %v5698_v44  ;;  %v11240_v52 = vpop.f32.mrf.mxu0  ;;  %v8422_v48 = vpop.f32.mrf.mxu1  ;;  %v9079_v25 = vld [vmem:[%s12802_s0 + $0x968] ss:$12 sps:$4 sm:$0xff]   ;;  %v3426_v23 = vadd.f32 %v11251_v28, %v11050_v47 }
 0x2be   :  { %vm5189_vm11 = vcmp.gt.f32.partialorder %v4443_v1, 0.0  ;;  %v5445_v18 = vmul.f32 0.2, %v4443_v1  ;;  %v4454_v56 = vadd.f32 %v8422_v48, %v3397_v3  ;;  %v5703_v59 = vsel %vm5191_vm10, %v4451_v42, %v5447_v29 }
 0x2bf   :  { %6979 = vst.msk [vmem:[%s12804_s3 + $0x164] sm:$0xf] %vm6889_vm2, %v8026_v38  ;;  %v3462_v13 = vpop.f32.mrf.mxu0  ;;  %v4445_v58 = vpop.f32.mrf.mxu1  ;;  %v8031_v33 = vpack.c.bf16 %v5703_v59, %v5703_v59  ;;  %v3418_v29 = vadd.f32 %v11251_v28, %v11004_v62  ;;  %v3429_v48 = vadd.f32 %v11251_v28, %v11062_v46  ;;  %v9076_v46 = vld [vmem:[%s12802_s0 + $0x7b0] ss:$12 sps:$4 sm:$0xff]  }
 0x2c0   :  { %v5701_v15 = vsel %vm5189_vm11, %v4443_v1, %v5445_v18  ;;  %vm5192_vm12 = vcmp.gt.f32.partialorder %v4454_v56, 0.0  ;;  %v5448_v10 = vmul.f32 0.2, %v4454_v56  ;;  %v4446_v14 = vadd.f32 %v4445_v58, %v3389_v49 }
 0x2c1   :  { %v8029_v9 = vpack.c.bf16 %v5701_v15, %v5701_v15  ;;  %v11261_v54 = vpop.f32.mrf.mxu0  ;;  %3656 = vmatmul.mubr.bf16.gmra.mxu0 %v9066_v34  ;;  %v8425_v26 = vpop.f32.mrf.mxu1  ;;  %8520 = vmatmul.mubr.msk.bf16.gmra.mxu1 %vm2598_vm0, %v9070_v63  ;;  %6984 = vst.msk [vmem:[%s12804_s3 + $0x178] sm:$0xf] %vm6889_vm2, %v8031_v33  ;;  %v9080_v33 = vld [vmem:[%s12802_s0 + $0x980] ss:$12 sps:$4 sm:$0xff]   ;;  %v3421_v15 = vadd.f32 %v11251_v28, %v11026_v20 }
 0x2c2   :  { %v5704_v55 = vsel %vm5192_vm12, %v4454_v56, %v5448_v10  ;;  %v4467_v43 = vadd.f32 %v8425_v26, %v3410_v53  ;;  %3663 = vmatprep.mubr.bf16.mxu0 %v9073_v30  ;;  %8523 = vmatprep.mubr.msk.bf16.mxu1 %vm2598_vm0, %v9074_v17  ;;  %vm5190_vm13 = vcmp.gt.f32.partialorder %v4446_v14, 0.0  ;;  %v5446_v37 = vmul.f32 0.2, %v4446_v14  ;;  %v9084_v26 = vld [vmem:[%s12802_s0 + $0x998] ss:$12 sps:$4 sm:$0xff]  }
 0x2c3   :  { %6982 = vst.msk [vmem:[%s12804_s3 + $0x170] sm:$0xf] %vm6889_vm2, %v8029_v9  ;;  %v8032_v36 = vpack.c.bf16 %v5704_v55, %v5704_v55  ;;  %v3467_v5 = vpop.f32.mrf.mxu0  ;;  %v4458_v2 = vpop.f32.mrf.mxu1 }
 0x2c4   :  { %vm5195_vm14 = vcmp.gt.f32.partialorder %v4467_v43, 0.0  ;;  %v5451_v57 = vmul.f32 0.2, %v4467_v43  ;;  %v4459_v4 = vadd.f32 %v4458_v2, %v3402_v40  ;;  %v5702_v50 = vsel %vm5190_vm13, %v4446_v14, %v5446_v37  ;;  %v9083_v14 = vld [vmem:[%s12802_s0 + $0x7cc] ss:$12 sps:$4 sm:$0xff]  }
 0x2c5   :  { %6985 = vst.msk [vmem:[%s12804_s3 + $0x17c] sm:$0xf] %vm6889_vm2, %v8032_v36  ;;  %v11283_v32 = vpop.f32.mrf.mxu0  ;;  %v8426_v24 = vpop.f32.mrf.mxu1  ;;  %v8030_v51 = vpack.c.bf16 %v5702_v50, %v5702_v50  ;;  %v3434_v5 = vadd.f32 %v11251_v28, %v11094_v0  ;;  %v3442_v2 = vadd.f32 %v11251_v28, %v11130_v7 }
 0x2c6   :  { %v5707_v8 = vsel %vm5195_vm14, %v4467_v43, %v5451_v57  ;;  %vm5193_vm15 = vcmp.gt.f32.partialorder %v4459_v4, 0.0  ;;  %v5449_v39 = vmul.f32 0.2, %v4459_v4  ;;  %v4470_v6 = vadd.f32 %v8426_v24, %v3413_v19 }
 0x2c7   :  { %v8035_v41 = vpack.c.bf16 %v5707_v8, %v5707_v8  ;;  %v3470_v60 = vpop.f32.mrf.mxu0  ;;  %v4461_v42 = vpop.f32.mrf.mxu1  ;;  %6983 = vst.msk [vmem:[%s12804_s3 + $0x174] sm:$0xf] %vm6889_vm2, %v8030_v51 }
 0x2c8   :  { %v5705_v31 = vsel %vm5193_vm15, %v4459_v4, %v5449_v39  ;;  %v4462_v3 = vadd.f32 %v4461_v42, %v3405_v11  ;;  %vm5196_vm1 = vcmp.gt.f32.partialorder %v4470_v6, 0.0  ;;  %v5452_v1 = vmul.f32 0.2, %v4470_v6  ;;  %v9081_v39 = vld [vmem:[%s12802_s0 + $0x7c8] ss:$12 sps:$4 sm:$0xff]  }
 0x2c9   :  { %6988 = vst.msk [vmem:[%s12804_s3 + $0x188] sm:$0xf] %vm6889_vm2, %v8035_v41  ;;  %v8033_v44 = vpack.c.bf16 %v5705_v31, %v5705_v31  ;;  %v11307_v34 = vpop.f32.mrf.mxu0  ;;  %3664 = vmatmul.mubr.bf16.gmra.mxu0 %v9071_v27  ;;  %v8429_v63 = vpop.f32.mrf.mxu1  ;;  %8524 = vmatmul.mubr.msk.bf16.gmra.mxu1 %vm2598_vm0, %v9075_v12  ;;  %v9088_v42 = vld [vmem:[%s12802_s0 + $0x7e4] ss:$12 sps:$4 sm:$0xff]  }
 0x2ca   :  { %vm5194_vm3 = vcmp.gt.f32.partialorder %v4462_v3, 0.0  ;;  %v5450_v47 = vmul.f32 0.2, %v4462_v3  ;;  %v4483_v38 = vadd.f32 %v8429_v63, %v3426_v23  ;;  %3671 = vmatprep.mubr.bf16.mxu0 %v9078_v22  ;;  %8527 = vmatprep.mubr.msk.bf16.mxu1 %vm2598_vm0, %v9079_v25  ;;  %v5708_v30 = vsel %vm5196_vm1, %v4470_v6, %v5452_v1  ;;  %v9085_v25 = vld [vmem:[%s12802_s0 + $0x9b0] ss:$12 sps:$4 sm:$0xff]  }
 0x2cb   :  { %6986 = vst.msk [vmem:[%s12804_s3 + $0x180] sm:$0xf] %vm6889_vm2, %v8033_v44  ;;  %v3475_v18 = vpop.f32.mrf.mxu0  ;;  %v4474_v56 = vpop.f32.mrf.mxu1  ;;  %v8036_v17 = vpack.c.bf16 %v5708_v30, %v5708_v30  ;;  %v3445_v22 = vadd.f32 %v11251_v28, %v11152_v16  ;;  %v3437_v44 = vadd.f32 %v11251_v28, %v11114_v61  ;;  %v3458_v1 = vadd.f32 %v11251_v28, %v11220_v45 }
 0x2cc   :  { %v5706_v49 = vsel %vm5194_vm3, %v4462_v3, %v5450_v47  ;;  %vm5199_vm4 = vcmp.gt.f32.partialorder %v4483_v38, 0.0  ;;  %v5455_v53 = vmul.f32 0.2, %v4483_v38  ;;  %v4475_v13 = vadd.f32 %v4474_v56, %v3418_v29  ;;  %v9089_v3 = vld [vmem:[%s12802_s0 + $0x9c8] ss:$12 sps:$4 sm:$0xff]  }
 0x2cd   :  { %v8034_v59 = vpack.c.bf16 %v5706_v49, %v5706_v49  ;;  %v11319_v58 = vpop.f32.mrf.mxu0  ;;  %v8430_v62 = vpop.f32.mrf.mxu1  ;;  %6989 = vst.msk [vmem:[%s12804_s3 + $0x18c] sm:$0xf] %vm6889_vm2, %v8036_v17  ;;  %v3450_v45 = vadd.f32 %v11251_v28, %v11176_v21 }
 0x2ce   :  { %v5711_v10 = vsel %vm5199_vm4, %v4483_v38, %v5455_v53  ;;  %v4486_v9 = vadd.f32 %v8430_v62, %v3429_v48  ;;  %vm5197_vm5 = vcmp.gt.f32.partialorder %v4475_v13, 0.0  ;;  %v5453_v40 = vmul.f32 0.2, %v4475_v13 }
 0x2cf   :  { %6987 = vst.msk [vmem:[%s12804_s3 + $0x184] sm:$0xf] %vm6889_vm2, %v8034_v59  ;;  %v8039_v20 = vpack.c.bf16 %v5711_v10, %v5711_v10  ;;  %v3478_v55 = vpop.f32.mrf.mxu0  ;;  %v4477_v43 = vpop.f32.mrf.mxu1  ;;  %v3461_v10 = vadd.f32 %v11251_v28, %v11240_v52  ;;  %v9093_v52 = vld [vmem:[%s12802_s0 + $0x7fc] ss:$12 sps:$4 sm:$0xff]  }
 0x2d0   :  { %vm5200_vm6 = vcmp.gt.f32.partialorder %v4486_v9, 0.0  ;;  %v5456_v36 = vmul.f32 0.2, %v4486_v9  ;;  %v4478_v37 = vadd.f32 %v4477_v43, %v3421_v15  ;;  %v5709_v57 = vsel %vm5197_vm5, %v4475_v13, %v5453_v40 }
 0x2d1   :  { %6992 = vst.msk [vmem:[%s12804_s3 + $0x198] sm:$0xf] %vm6889_vm2, %v8039_v20  ;;  %v11351_v4 = vpop.f32.mrf.mxu0  ;;  %3672 = vmatmul.mubr.bf16.gmra.mxu0 %v9076_v46  ;;  %v8433_v11 = vpop.f32.mrf.mxu1  ;;  %8528 = vmatmul.mubr.msk.bf16.gmra.mxu1 %vm2598_vm0, %v9080_v33  ;;  %v8037_v19 = vpack.c.bf16 %v5709_v57, %v5709_v57  ;;  %v3453_v15 = vadd.f32 %v11251_v28, %v11188_v35  ;;  %v9086_v20 = vld [vmem:[%s12802_s0 + $0x7e0] ss:$12 sps:$4 sm:$0xff]  }
 0x2d2   :  { %v5712_v50 = vsel %vm5200_vm6, %v4486_v9, %v5456_v36  ;;  %vm5198_vm7 = vcmp.gt.f32.partialorder %v4478_v37, 0.0  ;;  %v5454_v24 = vmul.f32 0.2, %v4478_v37  ;;  %3679 = vmatprep.mubr.bf16.mxu0 %v9083_v14  ;;  %8531 = vmatprep.mubr.msk.bf16.mxu1 %vm2598_vm0, %v9084_v26  ;;  %v4499_v7 = vadd.f32 %v8433_v11, %v3442_v2  ;;  %v9090_v35 = vld [vmem:[%s12802_s0 + $0x9e0] ss:$12 sps:$4 sm:$0xff]  }
 0x2d3   :  { %v8040_v0 = vpack.c.bf16 %v5712_v50, %v5712_v50  ;;  %v3483_v27 = vpop.f32.mrf.mxu0  ;;  %v4490_v12 = vpop.f32.mrf.mxu1  ;;  %6990 = vst.msk [vmem:[%s12804_s3 + $0x190] sm:$0xf] %vm6889_vm2, %v8037_v19  ;;  %v9094_v36 = vld [vmem:[%s12802_s0 + $0x9f8] ss:$12 sps:$4 sm:$0xff]   ;;  %v3474_v11 = vadd.f32 %v11251_v28, %v11307_v34 }
 0x2d4   :  { %v5710_v51 = vsel %vm5198_vm7, %v4478_v37, %v5454_v24  ;;  %v4491_v8 = vadd.f32 %v4490_v12, %v3434_v5  ;;  %vm5203_vm8 = vcmp.gt.f32.partialorder %v4499_v7, 0.0  ;;  %v5459_v41 = vmul.f32 0.2, %v4499_v7 }
 0x2d5   :  { %6993 = vst.msk [vmem:[%s12804_s3 + $0x19c] sm:$0xf] %vm6889_vm2, %v8040_v0  ;;  %v8038_v16 = vpack.c.bf16 %v5710_v51, %v5710_v51  ;;  %v11371_v6 = vpop.f32.mrf.mxu0  ;;  %v8434_v60 = vpop.f32.mrf.mxu1  ;;  %v3477_v51 = vadd.f32 %v11251_v28, %v11319_v58  ;;  %v9091_v58 = vld [vmem:[%s12802_s0 + $0x7f8] ss:$12 sps:$4 sm:$0xff]  }
 0x2d6   :  { %vm5201_vm9 = vcmp.gt.f32.partialorder %v4491_v8, 0.0  ;;  %v5457_v23 = vmul.f32 0.2, %v4491_v8  ;;  %v4502_v31 = vadd.f32 %v8434_v60, %v3445_v22  ;;  %v5715_v63 = vsel %vm5203_vm8, %v4499_v7, %v5459_v41 }
 0x2d7   :  { %6991 = vst.msk [vmem:[%s12804_s3 + $0x194] sm:$0xf] %vm6889_vm2, %v8038_v16  ;;  %v3486_v47 = vpop.f32.mrf.mxu0  ;;  %v4493_v38 = vpop.f32.mrf.mxu1  ;;  %v8043_v29 = vpack.c.bf16 %v5715_v63, %v5715_v63  ;;  %v3466_v22 = vadd.f32 %v11251_v28, %v11261_v54 }
 0x2d8   :  { %v5713_v48 = vsel %vm5201_vm9, %v4491_v8, %v5457_v23  ;;  %vm5204_vm10 = vcmp.gt.f32.partialorder %v4502_v31, 0.0  ;;  %v5460_v30 = vmul.f32 0.2, %v4502_v31  ;;  %v4494_v56 = vadd.f32 %v4493_v38, %v3437_v44  ;;  %v9098_v47 = vld [vmem:[%s12802_s0 + $0x814] ss:$12 sps:$4 sm:$0xff]  }
 0x2d9   :  { %v8041_v18 = vpack.c.bf16 %v5713_v48, %v5713_v48  ;;  %v11387_v17 = vpop.f32.mrf.mxu0  ;;  %3680 = vmatmul.mubr.bf16.gmra.mxu0 %v9081_v39  ;;  %v8437_v61 = vpop.f32.mrf.mxu1  ;;  %8532 = vmatmul.mubr.msk.bf16.gmra.mxu1 %vm2598_vm0, %v9085_v25  ;;  %6996 = vst.msk [vmem:[%s12804_s3 + $0x1a8] sm:$0xf] %vm6889_vm2, %v8043_v29  ;;  %v3469_v44 = vadd.f32 %v11251_v28, %v11283_v32  ;;  %v9099_v38 = vld [vmem:[%s12802_s0 + $0xa28] ss:$12 sps:$4 sm:$0xff]  }
 0x2da   :  { %v5716_v49 = vsel %vm5204_vm10, %v4502_v31, %v5460_v30  ;;  %v4515_v53 = vadd.f32 %v8437_v61, %v3458_v1  ;;  %3687 = vmatprep.mubr.bf16.mxu0 %v9088_v42  ;;  %8535 = vmatprep.mubr.msk.bf16.mxu1 %vm2598_vm0, %v9089_v3  ;;  %vm5202_vm11 = vcmp.gt.f32.partialorder %v4494_v56, 0.0  ;;  %v5458_v13 = vmul.f32 0.2, %v4494_v56  ;;  %v9095_v3 = vld [vmem:[%s12802_s0 + $0xa10] ss:$12 sps:$4 sm:$0xff]  }
 0x2db   :  { %6994 = vst.msk [vmem:[%s12804_s3 + $0x1a0] sm:$0xf] %vm6889_vm2, %v8041_v18  ;;  %v8044_v59 = vpack.c.bf16 %v5716_v49, %v5716_v49  ;;  %v3491_v62 = vpop.f32.mrf.mxu0  ;;  %v4506_v21 = vpop.f32.mrf.mxu1  ;;  %v3482_v61 = vadd.f32 %v11251_v28, %v11351_v4 }
 0x2dc   :  { %vm5207_vm12 = vcmp.gt.f32.partialorder %v4515_v53, 0.0  ;;  %v5463_v46 = vmul.f32 0.2, %v4515_v53  ;;  %v4507_v33 = vadd.f32 %v4506_v21, %v3450_v45  ;;  %v5714_v9 = vsel %vm5202_vm11, %v4494_v56, %v5458_v13 }
 0x2dd   :  { %6997 = vst.msk [vmem:[%s12804_s3 + $0x1ac] sm:$0xf] %vm6889_vm2, %v8044_v59  ;;  %v11409_v14 = vpop.f32.mrf.mxu0  ;;  %v8438_v26 = vpop.f32.mrf.mxu1  ;;  %v8042_v40 = vpack.c.bf16 %v5714_v9, %v5714_v9  ;;  %v3490_v45 = vadd.f32 %v11251_v28, %v11387_v17 }
 0x2de   :  { %v5719_v55 = vsel %vm5207_vm12, %v4515_v53, %v5463_v46  ;;  %vm5205_vm13 = vcmp.gt.f32.partialorder %v4507_v33, 0.0  ;;  %v5461_v43 = vmul.f32 0.2, %v4507_v33  ;;  %v4518_v5 = vadd.f32 %v8438_v26, %v3461_v10  ;;  %v9096_v26 = vld [vmem:[%s12802_s0 + $0x810] ss:$12 sps:$4 sm:$0xff]  }
 0x2df   :  { %v8047_v37 = vpack.c.bf16 %v5719_v55, %v5719_v55  ;;  %v3494_v2 = vpop.f32.mrf.mxu0  ;;  %v4509_v57 = vpop.f32.mrf.mxu1  ;;  %6995 = vst.msk [vmem:[%s12804_s3 + $0x1a4] sm:$0xf] %vm6889_vm2, %v8042_v40  ;;  %v9103_v55 = vld [vmem:[%s12802_s0 + $0x82c] ss:$12 sps:$4 sm:$0xff]  }
 0x2e0   :  { %v5717_v19 = vsel %vm5205_vm13, %v4507_v33, %v5461_v43  ;;  %v4510_v50 = vadd.f32 %v4509_v57, %v3453_v15  ;;  %vm5208_vm14 = vcmp.gt.f32.partialorder %v4518_v5, 0.0  ;;  %v5464_v0 = vmul.f32 0.2, %v4518_v5 }
 0x2e1   :  { %7000 = vst.msk [vmem:[%s12804_s3 + $0x1b8] sm:$0xf] %vm6889_vm2, %v8047_v37  ;;  %v8045_v24 = vpack.c.bf16 %v5717_v19, %v5717_v19  ;;  %v11433_v7 = vpop.f32.mrf.mxu0  ;;  %3688 = vmatmul.mubr.bf16.gmra.mxu0 %v9086_v20  ;;  %v8441_v27 = vpop.f32.mrf.mxu1  ;;  %8536 = vmatmul.mubr.msk.bf16.gmra.mxu1 %vm2598_vm0, %v9090_v35  ;;  %v3493_v15 = vadd.f32 %v11251_v28, %v11409_v14  ;;  %v9100_v20 = vld [vmem:[%s12802_s0 + $0xa40] ss:$12 sps:$4 sm:$0xff]   ;;  %v9104_v37 = vld [vmem:[%s12802_s0 + $0xa58] ss:$12 sps:$4 sm:$0xff]  }
 0x2e2   :  { %vm5206_vm15 = vcmp.gt.f32.partialorder %v4510_v50, 0.0  ;;  %v5462_v34 = vmul.f32 0.2, %v4510_v50  ;;  %v4531_v12 = vadd.f32 %v8441_v27, %v3474_v11  ;;  %3695 = vmatprep.mubr.bf16.mxu0 %v9093_v52  ;;  %8539 = vmatprep.mubr.msk.bf16.mxu1 %vm2598_vm0, %v9094_v36  ;;  %v5720_v8 = vsel %vm5208_vm14, %v4518_v5, %v5464_v0 }
 0x2e3   :  { %6998 = vst.msk [vmem:[%s12804_s3 + $0x1b0] sm:$0xf] %vm6889_vm2, %v8045_v24  ;;  %v3499_v39 = vpop.f32.mrf.mxu0  ;;  %v4522_v25 = vpop.f32.mrf.mxu1  ;;  %v8048_v16 = vpack.c.bf16 %v5720_v8, %v5720_v8  ;;  %v3485_v5 = vadd.f32 %v11251_v28, %v11371_v6  ;;  %v3498_v6 = vadd.f32 %v11251_v28, %v11433_v7 }
 0x2e4   :  { %v5718_v41 = vsel %vm5206_vm15, %v4510_v50, %v5462_v34  ;;  %vm5211_vm1 = vcmp.gt.f32.partialorder %v4531_v12, 0.0  ;;  %v5467_v60 = vmul.f32 0.2, %v4531_v12  ;;  %v4523_v23 = vadd.f32 %v4522_v25, %v3466_v22 }
 0x2e5   :  { %v8046_v42 = vpack.c.bf16 %v5718_v41, %v5718_v41  ;;  %v11445_v31 = vpop.f32.mrf.mxu0  ;;  %v8442_v54 = vpop.f32.mrf.mxu1  ;;  %7001 = vst.msk [vmem:[%s12804_s3 + $0x1bc] sm:$0xf] %vm6889_vm2, %v8048_v16 }
 0x2e6   :  { %v5723_v1 = vsel %vm5211_vm1, %v4531_v12, %v5467_v60  ;;  %v4534_v63 = vadd.f32 %v8442_v54, %v3477_v51  ;;  %vm5209_vm3 = vcmp.gt.f32.partialorder %v4523_v23, 0.0  ;;  %v5465_v29 = vmul.f32 0.2, %v4523_v23 }
 0x2e7   :  { %6999 = vst.msk [vmem:[%s12804_s3 + $0x1b4] sm:$0xf] %vm6889_vm2, %v8046_v42  ;;  %v8051_v32 = vpack.c.bf16 %v5723_v1, %v5723_v1  ;;  %v3502_v48 = vpop.f32.mrf.mxu0  ;;  %v4525_v30 = vpop.f32.mrf.mxu1  ;;  %v3501_v42 = vadd.f32 %v11251_v28, %v11445_v31  ;;  %v9105_v1 = vld [vmem:[%s12802_s0 + $0xa70] ss:$12 sps:$4 sm:$0xff]  }
 0x2e8   :  { %vm5212_vm4 = vcmp.gt.f32.partialorder %v4534_v63, 0.0  ;;  %v5468_v18 = vmul.f32 0.2, %v4534_v63  ;;  %v4526_v56 = vadd.f32 %v4525_v30, %v3469_v44  ;;  %v5721_v49 = vsel %vm5209_vm3, %v4523_v23, %v5465_v29  ;;  %v9101_v44 = vld [vmem:[%s12802_s0 + $0x828] ss:$12 sps:$4 sm:$0xff]  }
 0x2e9   :  { %7004 = vst.msk [vmem:[%s12804_s3 + $0x1c8] sm:$0xf] %vm6889_vm2, %v8051_v32  ;;  %v3505_v53 = vpop.f32.mrf.mxu0  ;;  %3696 = vmatmul.mubr.bf16.gmra.mxu0 %v9091_v58  ;;  %v8445_v59 = vpop.f32.mrf.mxu1  ;;  %8540 = vmatmul.mubr.msk.bf16.gmra.mxu1 %vm2598_vm0, %v9095_v3  ;;  %v8049_v13 = vpack.c.bf16 %v5721_v49, %v5721_v49  ;;  %v9108_v31 = vld [vmem:[%s12802_s0 + $0x844] ss:$12 sps:$4 sm:$0xff]   ;;  %v9109_v32 = vld [vmem:[%s12802_s0 + $0xa88] ss:$12 sps:$4 sm:$0xff]  }
 0x2ea   :  { %v5724_v62 = vsel %vm5212_vm4, %v4534_v63, %v5468_v18  ;;  %vm5210_vm5 = vcmp.gt.f32.partialorder %v4526_v56, 0.0  ;;  %v5466_v21 = vmul.f32 0.2, %v4526_v56  ;;  %3703 = vmatprep.mubr.bf16.mxu0 %v9098_v47  ;;  %8543 = vmatprep.mubr.msk.bf16.mxu1 %vm2598_vm0, %v9099_v38  ;;  %v4547_v17 = vadd.f32 %v8445_v59, %v3490_v45 }
 0x2eb   :  { %v8052_v4 = vpack.c.bf16 %v5724_v62, %v5724_v62  ;;  %v3507_v46 = vpop.f32.mrf.mxu0  ;;  %v4538_v33 = vpop.f32.mrf.mxu1  ;;  %7002 = vst.msk [vmem:[%s12804_s3 + $0x1c0] sm:$0xf] %vm6889_vm2, %v8049_v13  ;;  %v3506_v2 = vadd.f32 %v11251_v28, %v3505_v53 }
 0x2ec   :  { %v5722_v10 = vsel %vm5210_vm5, %v4526_v56, %v5466_v21  ;;  %v4539_v9 = vadd.f32 %v4538_v33, %v3482_v61  ;;  %vm5215_vm6 = vcmp.gt.f32.partialorder %v4547_v17, 0.0  ;;  %v5471_v35 = vmul.f32 0.2, %v4547_v17 }
 0x2ed   :  { %7005 = vst.msk [vmem:[%s12804_s3 + $0x1cc] sm:$0xf] %vm6889_vm2, %v8052_v4  ;;  %v8050_v14 = vpack.c.bf16 %v5722_v10, %v5722_v10  ;;  %v3508_v52 = vpop.f32.mrf.mxu0  ;;  %v8446_v40 = vpop.f32.mrf.mxu1 }
 0x2ee   :  { %vm5213_vm7 = vcmp.gt.f32.partialorder %v4539_v9, 0.0  ;;  %v5469_v43 = vmul.f32 0.2, %v4539_v9  ;;  %v4550_v36 = vadd.f32 %v8446_v40, %v3493_v15  ;;  %v5727_v57 = vsel %vm5215_vm6, %v4547_v17, %v5471_v35  ;;  %v9110_v40 = vld [vmem:[%s12802_s0 + $0xaa0] ss:$12 sps:$4 sm:$0xff]  }
 0x2ef   :  { %7003 = vst.msk [vmem:[%s12804_s3 + $0x1c4] sm:$0xf] %vm6889_vm2, %v8050_v14  ;;  %v3510_v11 = vpop.f32.mrf.mxu0  ;;  %v4541_v19 = vpop.f32.mrf.mxu1  ;;  %v8055_v50 = vpack.c.bf16 %v5727_v57, %v5727_v57  ;;  %v3509_v23 = vadd.f32 %v11251_v28, %v3508_v52 }
 0x2f0   :  { %v5725_v24 = vsel %vm5213_vm7, %v4539_v9, %v5469_v43  ;;  %vm5216_vm8 = vcmp.gt.f32.partialorder %v4550_v36, 0.0  ;;  %v5472_v0 = vmul.f32 0.2, %v4550_v36  ;;  %v4542_v34 = vadd.f32 %v4541_v19, %v3485_v5  ;;  %v9114_v43 = vld [vmem:[%s12802_s0 + $0xab8] ss:$12 sps:$4 sm:$0xff]  }
 0x2f1   :  { %v8053_v27 = vpack.c.bf16 %v5725_v24, %v5725_v24  ;;  %v3513_v12 = vpop.f32.mrf.mxu0  ;;  %3704 = vmatmul.mubr.bf16.gmra.mxu0 %v9096_v26  ;;  %v8449_v22 = vpop.f32.mrf.mxu1  ;;  %8544 = vmatmul.mubr.msk.bf16.gmra.mxu1 %vm2598_vm0, %v9100_v20  ;;  %7008 = vst.msk [vmem:[%s12804_s3 + $0x1d8] sm:$0xf] %vm6889_vm2, %v8055_v50  ;;  %v9106_v26 = vld [vmem:[%s12802_s0 + $0x840] ss:$12 sps:$4 sm:$0xff]  }
 0x2f2   :  { %v5728_v51 = vsel %vm5216_vm8, %v4550_v36, %v5472_v0  ;;  %v4563_v8 = vadd.f32 %v8449_v22, %v3506_v2  ;;  %3711 = vmatprep.mubr.bf16.mxu0 %v9103_v55  ;;  %8547 = vmatprep.mubr.msk.bf16.mxu1 %vm2598_vm0, %v9104_v37  ;;  %vm5214_vm9 = vcmp.gt.f32.partialorder %v4542_v34, 0.0  ;;  %v5470_v25 = vmul.f32 0.2, %v4542_v34  ;;  %v9113_v55 = vld [vmem:[%s12802_s0 + $0x85c] ss:$12 sps:$4 sm:$0xff]  }
 0x2f3   :  { %7006 = vst.msk [vmem:[%s12804_s3 + $0x1d0] sm:$0xf] %vm6889_vm2, %v8053_v27  ;;  %v8056_v39 = vpack.c.bf16 %v5728_v51, %v5728_v51  ;;  %v3515_v16 = vpop.f32.mrf.mxu0  ;;  %v4554_v7 = vpop.f32.mrf.mxu1  ;;  %v3514_v13 = vadd.f32 %v11251_v28, %v3513_v12 }
 0x2f4   :  { %vm5219_vm10 = vcmp.gt.f32.partialorder %v4563_v8, 0.0  ;;  %v5475_v41 = vmul.f32 0.2, %v4563_v8  ;;  %v4555_v60 = vadd.f32 %v4554_v7, %v3498_v6  ;;  %v5726_v54 = vsel %vm5214_vm9, %v4542_v34, %v5470_v25 }
 0x2f5   :  { %7009 = vst.msk [vmem:[%s12804_s3 + $0x1dc] sm:$0xf] %vm6889_vm2, %v8056_v39  ;;  %v3516_v58 = vpop.f32.mrf.mxu0  ;;  %v8450_v3 = vpop.f32.mrf.mxu1  ;;  %v8054_v63 = vpack.c.bf16 %v5726_v54, %v5726_v54  ;;  %v9115_v54 = vld [vmem:[%s12802_s0 + $0xad0] ss:$12 sps:$4 sm:$0xff]  }
 0x2f6   :  { %v5731_v47 = vsel %vm5219_vm10, %v4563_v8, %v5475_v41  ;;  %vm5217_vm11 = vcmp.gt.f32.partialorder %v4555_v60, 0.0  ;;  %v5473_v38 = vmul.f32 0.2, %v4555_v60  ;;  %v4566_v48 = vadd.f32 %v8450_v3, %v3509_v23  ;;  %v9111_v23 = vld [vmem:[%s12802_s0 + $0x858] ss:$12 sps:$4 sm:$0xff]  }
 0x2f7   :  { %v8059_v29 = vpack.c.bf16 %v5731_v47, %v5731_v47  ;;  %v3518_v30 = vpop.f32.mrf.mxu0  ;;  %v4557_v18 = vpop.f32.mrf.mxu1  ;;  %7007 = vst.msk [vmem:[%s12804_s3 + $0x1d4] sm:$0xf] %vm6889_vm2, %v8054_v63  ;;  %v3517_v20 = vadd.f32 %v11251_v28, %v3516_v58  ;;  %v9118_v58 = vld [vmem:[%s12802_s0 + $0x874] ss:$12 sps:$4 sm:$0xff]  }
 0x2f8   :  { %v5729_v56 = vsel %vm5217_vm11, %v4555_v60, %v5473_v38  ;;  %v4558_v61 = vadd.f32 %v4557_v18, %v3501_v42  ;;  %vm5220_vm12 = vcmp.gt.f32.partialorder %v4566_v48, 0.0  ;;  %v5476_v49 = vmul.f32 0.2, %v4566_v48 }
 0x2f9   :  { %7012 = vst.msk [vmem:[%s12804_s3 + $0x1e8] sm:$0xf] %vm6889_vm2, %v8059_v29  ;;  %v8057_v45 = vpack.c.bf16 %v5729_v56, %v5729_v56  ;;  %v3521_v53 = vpop.f32.mrf.mxu0  ;;  %3712 = vmatmul.mubr.bf16.gmra.mxu0 %v9101_v44  ;;  %v8453_v59 = vpop.f32.mrf.mxu1  ;;  %8548 = vmatmul.mubr.msk.bf16.gmra.mxu1 %vm2598_vm0, %v9105_v1 }
 0x2fa   :  { %vm5218_vm13 = vcmp.gt.f32.partialorder %v4558_v61, 0.0  ;;  %v5474_v62 = vmul.f32 0.2, %v4558_v61  ;;  %v3522_v21 = vadd.f32 %v11251_v28, %v3521_v53  ;;  %3719 = vmatprep.mubr.bf16.mxu0 %v9108_v31  ;;  %8551 = vmatprep.mubr.msk.bf16.mxu1 %vm2598_vm0, %v9109_v32  ;;  %v5732_v4 = vsel %vm5220_vm12, %v4566_v48, %v5476_v49  ;;  %v9119_v31 = vld [vmem:[%s12802_s0 + $0xae8] ss:$12 sps:$4 sm:$0xff]  }
 0x2fb   :  { %7010 = vst.msk [vmem:[%s12804_s3 + $0x1e0] sm:$0xf] %vm6889_vm2, %v8057_v45  ;;  %v3523_v17 = vpop.f32.mrf.mxu0  ;;  %v4570_v46 = vpop.f32.mrf.mxu1  ;;  %v8060_v33 = vpack.c.bf16 %v5732_v4, %v5732_v4  ;;  %v9120_v4 = vld [vmem:[%s12802_s0 + $0xb00] ss:$12 sps:$4 sm:$0xff]  }
 0x2fc   :  { %v5730_v15 = vsel %vm5218_vm13, %v4558_v61, %v5474_v62  ;;  %v4579_v10 = vadd.f32 %v8453_v59, %v3522_v21  ;;  %v4571_v9 = vadd.f32 %v4570_v46, %v3514_v13  ;;  %v9116_v21 = vld [vmem:[%s12802_s0 + $0x870] ss:$12 sps:$4 sm:$0xff]   ;;  %v9123_v17 = vld [vmem:[%s12802_s0 + $0x88c] ss:$12 sps:$4 sm:$0xff]  }
 0x2fd   :  { %v8058_v14 = vpack.c.bf16 %v5730_v15, %v5730_v15  ;;  %v3524_v35 = vpop.f32.mrf.mxu0  ;;  %v8454_v52 = vpop.f32.mrf.mxu1  ;;  %7013 = vst.msk [vmem:[%s12804_s3 + $0x1ec] sm:$0xf] %vm6889_vm2, %v8060_v33  ;;  %v9124_v15 = vld [vmem:[%s12802_s0 + $0xb18] ss:$12 sps:$4 sm:$0xff]  }
 0x2fe   :  { %vm5223_vm14 = vcmp.gt.f32.partialorder %v4579_v10, 0.0  ;;  %v5479_v36 = vmul.f32 0.2, %v4579_v10  ;;  %vm5221_vm15 = vcmp.gt.f32.partialorder %v4571_v9, 0.0  ;;  %v5477_v37 = vmul.f32 0.2, %v4571_v9 }
 0x2ff   :  { %7011 = vst.msk [vmem:[%s12804_s3 + $0x1e4] sm:$0xf] %vm6889_vm2, %v8058_v14  ;;  %v3525_v5 = vadd.f32 %v11251_v28, %v3524_v35  ;;  %v3526_v2 = vpop.f32.mrf.mxu0  ;;  %v4573_v57 = vpop.f32.mrf.mxu1 }
 0x300   :  { %v5735_v11 = vsel %vm5223_vm14, %v4579_v10, %v5479_v36  ;;  %v5733_v19 = vsel %vm5221_vm15, %v4571_v9, %v5477_v37  ;;  %v4574_v50 = vadd.f32 %v4573_v57, %v3517_v20 }
 0x301   :  { %v8063_v24 = vpack.c.bf16 %v5735_v11, %v5735_v11  ;;  %v8061_v0 = vpack.c.bf16 %v5733_v19, %v5733_v19  ;;  %v4582_v27 = vadd.f32 %v8454_v52, %v3525_v5  ;;  %v3529_v34 = vpop.f32.mrf.mxu0  ;;  %3720 = vmatmul.mubr.bf16.gmra.mxu0 %v9106_v26  ;;  %v8457_v12 = vpop.f32.mrf.mxu1  ;;  %8552 = vmatmul.mubr.msk.bf16.gmra.mxu1 %vm2598_vm0, %v9110_v40  ;;  %v9121_v19 = vld [vmem:[%s12802_s0 + $0x888] ss:$12 sps:$4 sm:$0xff]  }
 0x302   :  { %vm5222_vm1 = vcmp.gt.f32.partialorder %v4574_v50, 0.0  ;;  %v5478_v22 = vmul.f32 0.2, %v4574_v50  ;;  %v3530_v6 = vadd.f32 %v11251_v28, %v3529_v34  ;;  %3727 = vmatprep.mubr.bf16.mxu0 %v9113_v55  ;;  %8555 = vmatprep.mubr.msk.bf16.mxu1 %vm2598_vm0, %v9114_v43  ;;  %v9129_v34 = vld [vmem:[%s12802_s0 + $0xb48] ss:$12 sps:$4 sm:$0xff]  }
 0x303   :  { %7016 = vst.msk [vmem:[%s12804_s3 + $0x1f8] sm:$0xf] %vm6889_vm2, %v8063_v24  ;;  %7014 = vst.msk [vmem:[%s12804_s3 + $0x1f0] sm:$0xf] %vm6889_vm2, %v8061_v0  ;;  %vm5224_vm3 = vcmp.gt.f32.partialorder %v4582_v27, 0.0  ;;  %v3531_v8 = vpop.f32.mrf.mxu0  ;;  %v4586_v39 = vpop.f32.mrf.mxu1 }
 0x304   :  { %v5480_v51 = vmul.f32 0.2, %v4582_v27  ;;  %v5734_v25 = vsel %vm5222_vm1, %v4574_v50, %v5478_v22  ;;  %v4587_v16 = vadd.f32 %v4586_v39, %v3530_v6  ;;  %v9125_v50 = vld [vmem:[%s12802_s0 + $0xb30] ss:$12 sps:$4 sm:$0xff]  }
 0x305   :  { %v8062_v41 = vpack.c.bf16 %v5734_v25, %v5734_v25  ;;  %v3532_v60 = vpop.f32.mrf.mxu0  ;;  %v8458_v42 = vpop.f32.mrf.mxu1  ;;  %v9128_v24 = vld [vmem:[%s12802_s0 + $0x8a4] ss:$12 sps:$4 sm:$0xff]  }
 0x306   :  { %v5736_v7 = vsel %vm5224_vm3, %v4582_v27, %v5480_v51  ;;  %vm5225_vm4 = vcmp.gt.f32.partialorder %v4587_v16, 0.0  ;;  %v5481_v44 = vmul.f32 0.2, %v4587_v16  ;;  %v3533_v1 = vadd.f32 %v11251_v28, %v3532_v60 }
 0x307   :  { %v8064_v3 = vpack.c.bf16 %v5736_v7, %v5736_v7  ;;  %7015 = vst.msk [vmem:[%s12804_s3 + $0x1f4] sm:$0xf] %vm6889_vm2, %v8062_v41  ;;  %v3534_v63 = vpop.f32.mrf.mxu0  ;;  %v4589_v47 = vpop.f32.mrf.mxu1 }
 0x308   :  { %v5737_v38 = vsel %vm5225_vm4, %v4587_v16, %v5481_v44  ;;  %v4590_v32 = vadd.f32 %v4589_v47, %v3533_v1  ;;  %v9126_v44 = vld [vmem:[%s12802_s0 + $0x8a0] ss:$12 sps:$4 sm:$0xff]  }
 0x309   :  { %7017 = vst.msk [vmem:[%s12804_s3 + $0x1fc] sm:$0xf] %vm6889_vm2, %v8064_v3  ;;  %v8065_v29 = vpack.c.bf16 %v5737_v38, %v5737_v38  ;;  %v3537_v48 = vpop.f32.mrf.mxu0  ;;  %3728 = vmatmul.mubr.bf16.gmra.mxu0 %v9111_v23  ;;  %v11609_v30 = vpop.f32.mrf.mxu1  ;;  %8556 = vmatmul.mubr.msk.bf16.gmra.mxu1 %vm2598_vm0, %v9115_v54  ;;  %v9130_v1 = vld [vmem:[%s12802_s0 + $0xb60] ss:$12 sps:$4 sm:$0xff]   ;;  %v9134_v38 = vld [vmem:[%s12802_s0 + $0xb78] ss:$12 sps:$4 sm:$0xff]  }
 0x30a   :  { %vm5226_vm5 = vcmp.gt.f32.partialorder %v4590_v32, 0.0  ;;  %v5482_v18 = vmul.f32 0.2, %v4590_v32  ;;  %v3538_v56 = vadd.f32 %v11251_v28, %v3537_v48  ;;  %3735 = vmatprep.mubr.bf16.mxu0 %v9118_v58  ;;  %8559 = vmatprep.mubr.msk.bf16.mxu1 %vm2598_vm0, %v9119_v31  ;;  %v9133_v31 = vld [vmem:[%s12802_s0 + $0x8bc] ss:$12 sps:$4 sm:$0xff]  }
 0x30b   :  { %7018 = vst.msk [vmem:[%s12804_s3 + $0x200] sm:$0xf] %vm6889_vm2, %v8065_v29  ;;  %v3539_v61 = vpop.f32.mrf.mxu0  ;;  %v4602_v45 = vpop.f32.mrf.mxu1 }
 0x30c   :  { %v5738_v49 = vsel %vm5226_vm5, %v4590_v32, %v5482_v18  ;;  %v4595_v53 = vadd.f32 %v8457_v12, %v3538_v56 }
 0x30d   :  { %v8066_v59 = vpack.c.bf16 %v5738_v49, %v5738_v49  ;;  %v3540_v13 = vpop.f32.mrf.mxu0  ;;  %v11618_v62 = vpop.f32.mrf.mxu1 }
 0x30e   :  { %vm5227_vm6 = vcmp.gt.f32.partialorder %v4595_v53, 0.0  ;;  %v5483_v46 = vmul.f32 0.2, %v4595_v53  ;;  %v3541_v33 = vadd.f32 %v11251_v28, %v3540_v13 }
 0x30f   :  { %7019 = vst.msk [vmem:[%s12804_s3 + $0x204] sm:$0xf] %vm6889_vm2, %v8066_v59  ;;  %v3542_v10 = vpop.f32.mrf.mxu0  ;;  %v4605_v9 = vpop.f32.mrf.mxu1 }
 0x310   :  { %v5739_v26 = vsel %vm5227_vm6, %v4595_v53, %v5483_v46  ;;  %v4598_v20 = vadd.f32 %v8458_v42, %v3541_v33  ;;  %v9131_v46 = vld [vmem:[%s12802_s0 + $0x8b8] ss:$12 sps:$4 sm:$0xff]   ;;  %v9135_v33 = vld [vmem:[%s12802_s0 + $0xb90] ss:$12 sps:$4 sm:$0xff]  }
 0x311   :  { %v8067_v14 = vpack.c.bf16 %v5739_v26, %v5739_v26  ;;  %v3545_v35 = vpop.f32.mrf.mxu0  ;;  %3736 = vmatmul.mubr.bf16.gmra.mxu0 %v9116_v21  ;;  %v11637_v52 = vpop.f32.mrf.mxu1  ;;  %8560 = vmatmul.mubr.msk.bf16.gmra.mxu1 %vm2598_vm0, %v9120_v4  ;;  %v9139_v26 = vld [vmem:[%s12802_s0 + $0xba8] ss:$12 sps:$4 sm:$0xff]  }
 0x312   :  { %vm5228_vm7 = vcmp.gt.f32.partialorder %v4598_v20, 0.0  ;;  %v5484_v40 = vmul.f32 0.2, %v4598_v20  ;;  %v3546_v55 = vadd.f32 %v11251_v28, %v3545_v35  ;;  %3743 = vmatprep.mubr.bf16.mxu0 %v9123_v17  ;;  %8563 = vmatprep.mubr.msk.bf16.mxu1 %vm2598_vm0, %v9124_v15  ;;  %v9138_v15 = vld [vmem:[%s12802_s0 + $0x8d4] ss:$12 sps:$4 sm:$0xff]  }
 0x313   :  { %7020 = vst.msk [vmem:[%s12804_s3 + $0x208] sm:$0xf] %vm6889_vm2, %v8067_v14  ;;  %v3547_v43 = vpop.f32.mrf.mxu0  ;;  %v11646_v36 = vpop.f32.mrf.mxu1 }
 0x314   :  { %v5740_v37 = vsel %vm5228_vm7, %v4598_v20, %v5484_v40  ;;  %v4603_v5 = vadd.f32 %v4602_v45, %v3546_v55 }
 0x315   :  { %v8068_v2 = vpack.c.bf16 %v5740_v37, %v5740_v37  ;;  %v3548_v57 = vpop.f32.mrf.mxu0  ;;  %v11648_v11 = vpop.f32.mrf.mxu1  ;;  %v11743_v37 = vld [vmem:[%s12803_s2] ss:$0 sm:$0xff] }
 0x316   :  { %vm5229_vm8 = vcmp.gt.f32.partialorder %v4603_v5, 0.0  ;;  %v5485_v0 = vmul.f32 0.2, %v4603_v5  ;;  %v3549_v27 = vadd.f32 %v11251_v28, %v3548_v57 }
 0x317   :  { %7021 = vst.msk [vmem:[%s12804_s3 + $0x20c] sm:$0xf] %vm6889_vm2, %v8068_v2  ;;  %v3550_v12 = vpop.f32.mrf.mxu0  ;;  %v11667_v22 = vpop.f32.mrf.mxu1 }
 0x318   :  { %v5741_v6 = vsel %vm5229_vm8, %v4603_v5, %v5485_v0  ;;  %v4606_v51 = vadd.f32 %v4605_v9, %v3549_v27  ;;  %v9140_v12 = vld [vmem:[%s12802_s0 + $0xbc0] ss:$12 sps:$4 sm:$0xff]  }
 0x319   :  { %v8069_v8 = vpack.c.bf16 %v5741_v6, %v5741_v6  ;;  %v3553_v39 = vpop.f32.mrf.mxu0  ;;  %3744 = vmatmul.mubr.bf16.gmra.mxu0 %v9121_v19  ;;  %v11669_v25 = vpop.f32.mrf.mxu1  ;;  %8564 = vmatmul.mubr.msk.bf16.gmra.mxu1 %vm2598_vm0, %v9125_v50 }
 0x31a   :  { %vm5230_vm9 = vcmp.gt.f32.partialorder %v4606_v51, 0.0  ;;  %v5486_v16 = vmul.f32 0.2, %v4606_v51  ;;  %v3554_v7 = vadd.f32 %v11251_v28, %v3553_v39  ;;  %3751 = vmatprep.mubr.bf16.mxu0 %v9128_v24  ;;  %8567 = vmatprep.mubr.msk.bf16.mxu1 %vm2598_vm0, %v9129_v34  ;;  %v9136_v34 = vld [vmem:[%s12802_s0 + $0x8d0] ss:$12 sps:$4 sm:$0xff]  }
 0x31b   :  { %7022 = vst.msk [vmem:[%s12804_s3 + $0x210] sm:$0xf] %vm6889_vm2, %v8069_v8  ;;  %v3555_v41 = vpop.f32.mrf.mxu0  ;;  %v11678_v60 = vpop.f32.mrf.mxu1 }
 0x31c   :  { %v5742_v42 = vsel %vm5230_vm9, %v4606_v51, %v5486_v16  ;;  %v4611_v23 = vadd.f32 %v11609_v30, %v3554_v7  ;;  %v9144_v51 = vld [vmem:[%s12802_s0 + $0xbd8] ss:$12 sps:$4 sm:$0xff]  }
 0x31d   :  { %v8070_v54 = vpack.c.bf16 %v5742_v42, %v5742_v42  ;;  %v3556_v58 = vpop.f32.mrf.mxu0  ;;  %v11681_v3 = vpop.f32.mrf.mxu1 }
 0x31e   :  { %vm5231_vm10 = vcmp.gt.f32.partialorder %v4611_v23, 0.0  ;;  %v5487_v63 = vmul.f32 0.2, %v4611_v23  ;;  %v3557_v47 = vadd.f32 %v11251_v28, %v3556_v58 }
 0x31f   :  { %7023 = vst.msk [vmem:[%s12804_s3 + $0x214] sm:$0xf] %vm6889_vm2, %v8070_v54  ;;  %v3558_v32 = vpop.f32.mrf.mxu0  ;;  %v11700_v29 = vpop.f32.mrf.mxu1 }
 0x320   :  { %v5743_v48 = vsel %vm5231_vm10, %v4611_v23, %v5487_v63  ;;  %v4614_v30 = vadd.f32 %v11618_v62, %v3557_v47  ;;  %v9141_v32 = vld [vmem:[%s12802_s0 + $0x8e8] ss:$12 sps:$4 sm:$0xff]  }
 0x321   :  { %v8071_v18 = vpack.c.bf16 %v5743_v48, %v5743_v48  ;;  %v3561_v56 = vpop.f32.mrf.mxu0  ;;  %3752 = vmatmul.mubr.bf16.gmra.mxu0 %v9126_v44  ;;  %v11703_v61 = vpop.f32.mrf.mxu1  ;;  %8568 = vmatmul.mubr.msk.bf16.gmra.mxu1 %vm2598_vm0, %v9130_v1  ;;  %v9145_v48 = vld [vmem:[%s12802_s0 + $0xbf0] ss:$12 sps:$4 sm:$0xff]  }
 0x322   :  { %vm5232_vm11 = vcmp.gt.f32.partialorder %v4614_v30, 0.0  ;;  %v5488_v45 = vmul.f32 0.2, %v4614_v30  ;;  %v3562_v49 = vadd.f32 %v11251_v28, %v3561_v56  ;;  %3759 = vmatprep.mubr.bf16.mxu0 %v9133_v31  ;;  %8571 = vmatprep.mubr.msk.bf16.mxu1 %vm2598_vm0, %v9134_v38 }
 0x323   :  { %7024 = vst.msk [vmem:[%s12804_s3 + $0x218] sm:$0xf] %vm6889_vm2, %v8071_v18  ;;  %v3563_v53 = vpop.f32.mrf.mxu0  ;;  %v11712_v59 = vpop.f32.mrf.mxu1 }
 0x324   :  { %v5744_v13 = vsel %vm5232_vm11, %v4614_v30, %v5488_v45  ;;  %v4619_v62 = vadd.f32 %v11646_v36, %v3562_v49 }
 0x325   :  { %v8072_v21 = vpack.c.bf16 %v5744_v13, %v5744_v13  ;;  %v3564_v4 = vpop.f32.mrf.mxu0  ;;  %v11715_v17 = vpop.f32.mrf.mxu1 }
 0x326   :  { %vm5233_vm12 = vcmp.gt.f32.partialorder %v4619_v62, 0.0  ;;  %v5489_v10 = vmul.f32 0.2, %v4619_v62  ;;  %v3565_v9 = vadd.f32 %v11251_v28, %v3564_v4 }
 0x327   :  { %7025 = vst.msk [vmem:[%s12804_s3 + $0x21c] sm:$0xf] %vm6889_vm2, %v8072_v21  ;;  %v3566_v20 = vpop.f32.mrf.mxu0  ;;  %v11734_v14 = vpop.f32.mrf.mxu1 }
 0x328   :  { %v5745_v35 = vsel %vm5233_vm12, %v4619_v62, %v5489_v10  ;;  %v4622_v40 = vadd.f32 %v11667_v22, %v3565_v9  ;;  %v9143_v22 = vld [vmem:[%s12802_s0 + $0x8ec] ss:$12 sps:$4 sm:$0xff]  }
 0x329   :  { %v8073_v55 = vpack.c.bf16 %v5745_v35, %v5745_v35  ;;  %v3569_v43 = vpop.f32.mrf.mxu0  ;;  %3760 = vmatmul.mubr.bf16.gmra.mxu0 %v9131_v46  ;;  %v11737_v36 = vpop.f32.mrf.mxu1  ;;  %8572 = vmatmul.mubr.msk.bf16.gmra.mxu1 %vm2598_vm0, %v9135_v33 }
 0x32a   :  { %vm5234_vm13 = vcmp.gt.f32.partialorder %v4622_v40, 0.0  ;;  %v5490_v28 = vmul.f32 0.2, %v4622_v40  ;;  %v3570_v5 = vadd.f32 %v11743_v37, %v3569_v43  ;;  %3767 = vmatprep.mubr.bf16.mxu0 %v9138_v15  ;;  %8575 = vmatprep.mubr.msk.bf16.mxu1 %vm2598_vm0, %v9139_v26 }
 0x32b   :  { %7026 = vst.msk [vmem:[%s12804_s3 + $0x220] sm:$0xf] %vm6889_vm2, %v8073_v55  ;;  %v3571_v2 = vpop.f32.mrf.mxu0  ;;  %v11751_v57 = vpop.f32.mrf.mxu1 }
 0x32c   :  { %v5746_v19 = vsel %vm5234_vm13, %v4622_v40, %v5490_v28  ;;  %v4627_v50 = vadd.f32 %v11637_v52, %v3570_v5 }
 0x32d   :  { %v8074_v24 = vpack.c.bf16 %v5746_v19, %v5746_v19  ;;  %v3572_v0 = vpop.f32.mrf.mxu0  ;;  %v11754_v27 = vpop.f32.mrf.mxu1 }
 0x32e   :  { %vm5235_vm14 = vcmp.gt.f32.partialorder %v4627_v50, 0.0  ;;  %v5491_v6 = vmul.f32 0.2, %v4627_v50  ;;  %v3573_v52 = vadd.f32 %v11743_v37, %v3572_v0 }
 0x32f   :  { %7027 = vst.msk [vmem:[%s12804_s3 + $0x224] sm:$0xf] %vm6889_vm2, %v8074_v24  ;;  %v3574_v8 = vpop.f32.mrf.mxu0  ;;  %v11773_v39 = vpop.f32.mrf.mxu1 }
 0x330   :  { %v5747_v16 = vsel %vm5235_vm14, %v4627_v50, %v5491_v6  ;;  %v4630_v7 = vadd.f32 %v11648_v11, %v3573_v52 }
 0x331   :  { %v8075_v41 = vpack.c.bf16 %v5747_v16, %v5747_v16  ;;  %v3577_v42 = vpop.f32.mrf.mxu0  ;;  %3768 = vmatmul.mubr.bf16.gmra.mxu0 %v9136_v34  ;;  %v11776_v23 = vpop.f32.mrf.mxu1  ;;  %8576 = vmatmul.mubr.msk.bf16.gmra.mxu1 %vm2598_vm0, %v9140_v12 }
 0x332   :  { %vm5236_vm15 = vcmp.gt.f32.partialorder %v4630_v7, 0.0  ;;  %v5492_v54 = vmul.f32 0.2, %v4630_v7  ;;  %v3578_v58 = vadd.f32 %v11743_v37, %v3577_v42  ;;  %3775 = vmatprep.mubr.bf16.mxu0 %v9143_v22  ;;  %8579 = vmatprep.mubr.msk.bf16.mxu1 %vm2598_vm0, %v9144_v51 }
 0x333   :  { %7028 = vst.msk [vmem:[%s12804_s3 + $0x228] sm:$0xf] %vm6889_vm2, %v8075_v41  ;;  %v3579_v11 = vpop.f32.mrf.mxu0  ;;  %v11785_v44 = vpop.f32.mrf.mxu1 }
 0x334   :  { %v5748_v1 = vsel %vm5236_vm15, %v4630_v7, %v5492_v54  ;;  %v4635_v31 = vadd.f32 %v11678_v60, %v3578_v58 }
 0x335   :  { %v8076_v63 = vpack.c.bf16 %v5748_v1, %v5748_v1  ;;  %v3580_v47 = vpop.f32.mrf.mxu0  ;;  %v11788_v38 = vpop.f32.mrf.mxu1 }
 0x336   :  { %vm5237_vm1 = vcmp.gt.f32.partialorder %v4635_v31, 0.0  ;;  %v5493_v30 = vmul.f32 0.2, %v4635_v31  ;;  %v3581_v18 = vadd.f32 %v11743_v37, %v3580_v47 }
 0x337   :  { %7029 = vst.msk [vmem:[%s12804_s3 + $0x22c] sm:$0xf] %vm6889_vm2, %v8076_v63  ;;  %v3582_v60 = vpop.f32.mrf.mxu0  ;;  %v11801_v56 = vpop.f32.mrf.mxu1 }
 0x338   :  { %v5749_v45 = vsel %vm5237_vm1, %v4635_v31, %v5493_v30  ;;  %v4638_v49 = vadd.f32 %v11700_v29, %v3581_v18 }
 0x339   :  { %v8077_v53 = vpack.c.bf16 %v5749_v45, %v5749_v45  ;;  %v3585_v13 = vpop.f32.mrf.mxu0  ;;  %3776 = vmatmul.mubr.bf16.gmra.mxu0 %v9141_v32  ;;  %v11804_v62 = vpop.f32.mrf.mxu1  ;;  %8580 = vmatmul.mubr.msk.bf16.gmra.mxu1 %vm2598_vm0, %v9145_v48 }
 0x33a   :  { %vm5238_vm3 = vcmp.gt.f32.partialorder %v4638_v49, 0.0  ;;  %v5494_v21 = vmul.f32 0.2, %v4638_v49  ;;  %v3586_v4 = vadd.f32 %v11743_v37, %v3585_v13 }
 0x33b   :  { %7030 = vst.msk [vmem:[%s12804_s3 + $0x230] sm:$0xf] %vm6889_vm2, %v8077_v53  ;;  %v3587_v46 = vpop.f32.mrf.mxu0  ;;  %v11812_v33 = vpop.f32.mrf.mxu1 }
 0x33c   :  { %v5750_v29 = vsel %vm5238_vm3, %v4638_v49, %v5494_v21  ;;  %v4643_v15 = vadd.f32 %v11669_v25, %v3586_v4 }
 0x33d   :  { %v8078_v10 = vpack.c.bf16 %v5750_v29, %v5750_v29  ;;  %v3588_v9 = vpop.f32.mrf.mxu0  ;;  %v11815_v26 = vpop.f32.mrf.mxu1 }
 0x33e   :  { %vm5239_vm0 = vcmp.gt.f32.partialorder %v4643_v15, 0.0  ;;  %v5495_v20 = vmul.f32 0.2, %v4643_v15  ;;  %v3589_v35 = vadd.f32 %v11743_v37, %v3588_v9 }
 0x33f   :  { %7031 = vst.msk [vmem:[%s12804_s3 + $0x234] sm:$0xf] %vm6889_vm2, %v8078_v10  ;;  %v3590_v40 = vpop.f32.mrf.mxu0  ;;  %v11822_v55 = vpop.f32.mrf.mxu1 }
 0x340   :  { %v5751_v43 = vsel %vm5239_vm0, %v4643_v15, %v5495_v20  ;;  %v4646_v28 = vadd.f32 %v11681_v3, %v3589_v35 }
 0x341   :  { %v8079_v25 = vpack.c.bf16 %v5751_v43, %v5751_v43  ;;  %v3593_v5 = vpop.f32.mrf.mxu0  ;;  %v11825_v2 = vpop.f32.mrf.mxu1 }
 0x342   :  { %vm5240_vm4 = vcmp.gt.f32.partialorder %v4646_v28, 0.0  ;;  %v5496_v19 = vmul.f32 0.2, %v4646_v28  ;;  %v3594_v50 = vadd.f32 %v11743_v37, %v3593_v5 }
 0x343   :  { %7032 = vst.msk [vmem:[%s12804_s3 + $0x238] sm:$0xf] %vm6889_vm2, %v8079_v25  ;;  %v3595_v24 = vpop.f32.mrf.mxu0  ;;  %v11832_v0 = vpop.f32.mrf.mxu1 }
 0x344   :  { %v5752_v34 = vsel %vm5240_vm4, %v4646_v28, %v5496_v19  ;;  %v4651_v12 = vadd.f32 %v11712_v59, %v3594_v50 }
 0x345   :  { %v8080_v3 = vpack.c.bf16 %v5752_v34, %v5752_v34  ;;  %v3596_v22 = vpop.f32.mrf.mxu0  ;;  %v11835_v6 = vpop.f32.mrf.mxu1 }
 0x346   :  { %vm5241_vm5 = vcmp.gt.f32.partialorder %v4651_v12, 0.0  ;;  %v5497_v52 = vmul.f32 0.2, %v4651_v12  ;;  %v3597_v51 = vadd.f32 %v11743_v37, %v3596_v22 }
 0x347   :  { %7033 = vst.msk [vmem:[%s12804_s3 + $0x23c] sm:$0xf] %vm6889_vm2, %v8080_v3  ;;  %v3598_v8 = vpop.f32.mrf.mxu0  ;;  %v11842_v16 = vpop.f32.mrf.mxu1 }
 0x348   :  { %v5753_v7 = vsel %vm5241_vm5, %v4651_v12, %v5497_v52  ;;  %v4654_v41 = vadd.f32 %v11734_v14, %v3597_v51 }
 0x349   :  { %v8081_v59 = vpack.c.bf16 %v5753_v7, %v5753_v7  ;;  %v3601_v42 = vpop.f32.mrf.mxu0  ;;  %v11845_v54 = vpop.f32.mrf.mxu1 }
 0x34a   :  { %vm5242_vm6 = vcmp.gt.f32.partialorder %v4654_v41, 0.0  ;;  %v5498_v58 = vmul.f32 0.2, %v4654_v41  ;;  %v3602_v11 = vadd.f32 %v11743_v37, %v3601_v42 }
 0x34b   :  { %7034 = vst.msk [vmem:[%s12804_s3 + $0x240] sm:$0xf] %vm6889_vm2, %v8081_v59  ;;  %v3603_v1 = vpop.f32.mrf.mxu0  ;;  %v11852_v31 = vpop.f32.mrf.mxu1 }
 0x34c   :  { %v5754_v63 = vsel %vm5242_vm6, %v4654_v41, %v5498_v58  ;;  %v4659_v47 = vadd.f32 %v11703_v61, %v3602_v11 }
 0x34d   :  { %v8082_v14 = vpack.c.bf16 %v5754_v63, %v5754_v63  ;;  %v3604_v32 = vpop.f32.mrf.mxu0  ;;  %v11855_v48 = vpop.f32.mrf.mxu1 }
 0x34e   :  { %vm5243_vm7 = vcmp.gt.f32.partialorder %v4659_v47, 0.0  ;;  %v5499_v30 = vmul.f32 0.2, %v4659_v47  ;;  %v3605_v18 = vadd.f32 %v11743_v37, %v3604_v32 }
 0x34f   :  { %7035 = vst.msk [vmem:[%s12804_s3 + $0x244] sm:$0xf] %vm6889_vm2, %v8082_v14  ;;  %v3606_v60 = vpop.f32.mrf.mxu0  ;;  %v11862_v45 = vpop.f32.mrf.mxu1 }
 0x350   :  { %v5755_v49 = vsel %vm5243_vm7, %v4659_v47, %v5499_v30  ;;  %v4662_v53 = vadd.f32 %v11715_v17, %v3605_v18 }
 0x351   :  { %v8083_v61 = vpack.c.bf16 %v5755_v49, %v5755_v49  ;;  %v3609_v13 = vpop.f32.mrf.mxu0  ;;  %v11865_v21 = vpop.f32.mrf.mxu1 }
 0x352   :  { %vm5244_vm8 = vcmp.gt.f32.partialorder %v4662_v53, 0.0  ;;  %v5500_v4 = vmul.f32 0.2, %v4662_v53  ;;  %v3610_v46 = vadd.f32 %v11743_v37, %v3609_v13 }
 0x353   :  { %7036 = vst.msk [vmem:[%s12804_s3 + $0x248] sm:$0xf] %vm6889_vm2, %v8083_v61  ;;  %v3611_v29 = vpop.f32.mrf.mxu0  ;;  %v11872_v15 = vpop.f32.mrf.mxu1 }
 0x354   :  { %v5756_v10 = vsel %vm5244_vm8, %v4662_v53, %v5500_v4  ;;  %v4667_v9 = vadd.f32 %v11751_v57, %v3610_v46 }
 0x355   :  { %v8084_v17 = vpack.c.bf16 %v5756_v10, %v5756_v10  ;;  %v3612_v20 = vpop.f32.mrf.mxu0  ;;  %v11875_v35 = vpop.f32.mrf.mxu1 }
 0x356   :  { %vm5245_vm9 = vcmp.gt.f32.partialorder %v4667_v9, 0.0  ;;  %v5501_v40 = vmul.f32 0.2, %v4667_v9  ;;  %v3613_v43 = vadd.f32 %v11743_v37, %v3612_v20 }
 0x357   :  { %7037 = vst.msk [vmem:[%s12804_s3 + $0x24c] sm:$0xf] %vm6889_vm2, %v8084_v17  ;;  %v3614_v28 = vpop.f32.mrf.mxu0  ;;  %v11882_v25 = vpop.f32.mrf.mxu1 }
 0x358   :  { %v5757_v5 = vsel %vm5245_vm9, %v4667_v9, %v5501_v40  ;;  %v4670_v19 = vadd.f32 %v11773_v39, %v3613_v43 }
 0x359   :  { %v8085_v57 = vpack.c.bf16 %v5757_v5, %v5757_v5  ;;  %v3617_v50 = vpop.f32.mrf.mxu0  ;;  %v11885_v24 = vpop.f32.mrf.mxu1 }
 0x35a   :  { %vm5246_vm10 = vcmp.gt.f32.partialorder %v4670_v19, 0.0  ;;  %v5502_v34 = vmul.f32 0.2, %v4670_v19  ;;  %v3618_v12 = vadd.f32 %v11743_v37, %v3617_v50 }
 0x35b   :  { %7038 = vst.msk [vmem:[%s12804_s3 + $0x250] sm:$0xf] %vm6889_vm2, %v8085_v57  ;;  %v3619_v3 = vpop.f32.mrf.mxu0  ;;  %v11892_v22 = vpop.f32.mrf.mxu1 }
 0x35c   :  { %v5758_v52 = vsel %vm5246_vm10, %v4670_v19, %v5502_v34  ;;  %v4675_v51 = vadd.f32 %v11737_v36, %v3618_v12  ;;  %v12915_v12 = vld [vmem:[#allocation2_spill] sm:$0xff] }
 0x35d   :  { %v8086_v39 = vpack.c.bf16 %v5758_v52, %v5758_v52  ;;  %v3620_v8 = vpop.f32.mrf.mxu0  ;;  %v11895_v7 = vpop.f32.mrf.mxu1  ;;  %v11939_v3 = vadd.f32 %v11743_v37, %v12915_v12 }
 0x35e   :  { %12907 = vst [vmem:[#allocation47_spill] sm:$0xff] %v11895_v7  ;;  %vm5247_vm11 = vcmp.gt.f32.partialorder %v4675_v51, 0.0  ;;  %v5503_v41 = vmul.f32 0.2, %v4675_v51  ;;  %v3621_v59 = vadd.f32 %v11743_v37, %v3620_v8  ;;  %v12966_v7 = vld [vmem:[#allocation39_spill] sm:$0xff] }
 0x35f   :  { %7039 = vst.msk [vmem:[%s12804_s3 + $0x254] sm:$0xf] %vm6889_vm2, %v8086_v39  ;;  %v3622_v42 = vpop.f32.mrf.mxu0  ;;  %v11902_v58 = vpop.f32.mrf.mxu1  ;;  %v12916_v39 = vld [vmem:[#allocation3_spill] sm:$0xff] }
 0x360   :  { %v5759_v11 = vsel %vm5247_vm11, %v4675_v51, %v5503_v41  ;;  %v4678_v1 = vadd.f32 %v11754_v27, %v3621_v59  ;;  %v11944_v8 = vadd.f32 %v11743_v37, %v12916_v39  ;;  %v12917_v41 = vld [vmem:[#allocation4_spill] sm:$0xff] }
 0x361   :  { %v8087_v36 = vpack.c.bf16 %v5759_v11, %v5759_v11  ;;  %v3625_v63 = vpop.f32.mrf.mxu0  ;;  %v11905_v47 = vpop.f32.mrf.mxu1  ;;  %v11948_v59 = vadd.f32 %v11743_v37, %v12917_v41  ;;  %v12919_v11 = vld [vmem:[#allocation6_spill] sm:$0xff]  ;;  %v12931_v39 = vld [vmem:[#allocation16_spill] sm:$0xff] }
 0x362   :  { %12908 = vst [vmem:[#allocation55_spill] sm:$0xff] %v11905_v47  ;;  %vm5248_vm12 = vcmp.gt.f32.partialorder %v4678_v1, 0.0  ;;  %v5504_v14 = vmul.f32 0.2, %v4678_v1  ;;  %v3626_v32 = vadd.f32 %v11743_v37, %v3625_v63  ;;  %v12006_v41 = vadd.f32 %v11743_v37, %v12931_v39 }
 0x363   :  { %7040 = vst.msk [vmem:[%s12804_s3 + $0x258] sm:$0xf] %vm6889_vm2, %v8087_v36  ;;  %v3627_v30 = vpop.f32.mrf.mxu0  ;;  %v11912_v18 = vpop.f32.mrf.mxu1 }
 0x364   :  { %12909 = vst [vmem:[#allocation51_spill] sm:$0xff] %v11912_v18  ;;  %v5760_v60 = vsel %vm5248_vm12, %v4678_v1, %v5504_v14  ;;  %v4683_v49 = vadd.f32 %v11785_v44, %v3626_v32  ;;  %v11956_v1 = vadd.f32 %v11743_v37, %v12919_v11  ;;  %v12921_v14 = vld [vmem:[#allocation7_spill] sm:$0xff]  ;;  %v12922_v30 = vld [vmem:[#allocation8_spill] sm:$0xff]  ;;  %v12962_v18 = vld [vmem:[#allocation37_spill] sm:$0xff] }
 0x365   :  { %v8088_v27 = vpack.c.bf16 %v5760_v60, %v5760_v60  ;;  %v3628_v53 = vpop.f32.mrf.mxu0  ;;  %v11915_v61 = vpop.f32.mrf.mxu1  ;;  %v11966_v32 = vadd.f32 %v11743_v37, %v12921_v14  ;;  %v11970_v60 = vadd.f32 %v11743_v37, %v12922_v30  ;;  %v12934_v30 = vld [vmem:[#allocation18_spill] sm:$0xff] }
 0x366   :  { %12910 = vst [vmem:[#allocation53_spill] sm:$0xff] %v11915_v61  ;;  %vm5249_vm13 = vcmp.gt.f32.partialorder %v4683_v49, 0.0  ;;  %v5505_v13 = vmul.f32 0.2, %v4683_v49  ;;  %v3629_v4 = vadd.f32 %v11743_v37, %v3628_v53  ;;  %v12923_v53 = vld [vmem:[#allocation9_spill] sm:$0xff] }
 0x367   :  { %7041 = vst.msk [vmem:[%s12804_s3 + $0x25c] sm:$0xf] %vm6889_vm2, %v8088_v27  ;;  %v3630_v46 = vpop.f32.mrf.mxu0  ;;  %v11922_v29 = vpop.f32.mrf.mxu1 }
 0x368   :  { %12911 = vst [vmem:[#allocation57_spill] sm:$0xff] %v11922_v29  ;;  %v5761_v10 = vsel %vm5249_vm13, %v4683_v49, %v5505_v13  ;;  %v4686_v9 = vadd.f32 %v11801_v56, %v3629_v4  ;;  %v11975_v13 = vadd.f32 %v11743_v37, %v12923_v53  ;;  %v12924_v4 = vld [vmem:[#allocation10_spill] sm:$0xff] }
 0x369   :  { %v8089_v44 = vpack.c.bf16 %v5761_v10, %v5761_v10  ;;  %v3633_v17 = vpop.f32.mrf.mxu0  ;;  %v11925_v20 = vpop.f32.mrf.mxu1  ;;  %v11979_v46 = vadd.f32 %v11743_v37, %v12924_v4  ;;  %v12925_v10 = vld [vmem:[#allocation11_spill] sm:$0xff] }
 0x36a   :  { %12912 = vst [vmem:[#allocation63_spill] sm:$0xff] %v11925_v20  ;;  %vm5250_vm14 = vcmp.gt.f32.partialorder %v4686_v9, 0.0  ;;  %v5506_v40 = vmul.f32 0.2, %v4686_v9  ;;  %v3634_v43 = vadd.f32 %v11743_v37, %v3633_v17  ;;  %v12947_v20 = vld [vmem:[#allocation29_spill] sm:$0xff] }
 0x36b   :  { %7042 = vst.msk [vmem:[%s12804_s3 + $0x260] sm:$0xf] %vm6889_vm2, %v8089_v44  ;;  %v3635_v28 = vpop.f32.mrf.mxu0  ;;  %v11932_v5 = vpop.f32.mrf.mxu1 }
 0x36c   :  { %12913 = vst [vmem:[#allocation59_spill] sm:$0xff] %v11932_v5  ;;  %v5762_v19 = vsel %vm5250_vm14, %v4686_v9, %v5506_v40  ;;  %v4691_v57 = vadd.f32 %v11776_v23, %v3634_v43  ;;  %v12918_v23 = vld [vmem:[#allocation5_spill] sm:$0xff]  ;;  %v11983_v9 = vadd.f32 %v11743_v37, %v12925_v10  ;;  %v12927_v43 = vld [vmem:[#allocation12_spill] sm:$0xff]  ;;  %v12935_v10 = vld [vmem:[#allocation19_spill] sm:$0xff] }
 0x36d   :  { %v8090_v56 = vpack.c.bf16 %v5762_v19, %v5762_v19  ;;  %v3636_v50 = vpop.f32.mrf.mxu0  ;;  %v11935_v34 = vpop.f32.mrf.mxu1  ;;  %v11952_v42 = vadd.f32 %v11743_v37, %v12918_v23  ;;  %v11989_v28 = vadd.f32 %v11743_v37, %v12927_v43  ;;  %v12936_v43 = vld [vmem:[#allocation20_spill] sm:$0xff]  ;;  %v12948_v5 = vld [vmem:[#allocation30_spill] sm:$0xff] }
 0x36e   :  { %12914 = vst [vmem:[#allocation65_spill] sm:$0xff] %v11935_v34  ;;  %vm5251_vm15 = vcmp.gt.f32.partialorder %v4691_v57, 0.0  ;;  %v5507_v52 = vmul.f32 0.2, %v4691_v57  ;;  %v3637_v51 = vadd.f32 %v11743_v37, %v3636_v50  ;;  %v12929_v50 = vld [vmem:[#allocation14_spill] sm:$0xff] }
 0x36f   :  { %7043 = vst.msk [vmem:[%s12804_s3 + $0x264] sm:$0xf] %vm6889_vm2, %v8090_v56  ;;  %v3638_v36 = vpop.f32.mrf.mxu0  ;;  %v11962_v63 = vpop.f32.mrf.mxu1  ;;  %v11998_v12 = vadd.f32 %v11743_v37, %v12929_v50 }
 0x370   :  { %12920 = vst [vmem:[#allocation61_spill] sm:$0xff] %v11962_v63  ;;  %v5763_v49 = vsel %vm5251_vm15, %v4691_v57, %v5507_v52  ;;  %v4694_v27 = vadd.f32 %v11788_v38, %v3637_v51  ;;  %v12928_v57 = vld [vmem:[#allocation13_spill] sm:$0xff]  ;;  %v12930_v52 = vld [vmem:[#allocation15_spill] sm:$0xff]  ;;  %v12075_v63 = vadd.f32 %v11743_v37, %v12947_v20 }
 0x371   :  { %v8091_v44 = vpack.c.bf16 %v5763_v49, %v5763_v49  ;;  %v3641_v17 = vpop.f32.mrf.mxu0  ;;  %v11985_v40 = vpop.f32.mrf.mxu1  ;;  %v11994_v56 = vadd.f32 %v11743_v37, %v12928_v57  ;;  %v12002_v51 = vadd.f32 %v11743_v37, %v12930_v52  ;;  %v12933_v36 = vld [vmem:[#allocation17_spill] sm:$0xff]  ;;  %v12020_v49 = vadd.f32 %v11743_v37, %v12934_v30 }
 0x372   :  { %12926 = vst [vmem:[#allocation67_spill] sm:$0xff] %v11985_v40  ;;  %vm5252_vm1 = vcmp.gt.f32.partialorder %v4694_v27, 0.0  ;;  %v5508_v38 = vmul.f32 0.2, %v4694_v27  ;;  %v3642_v19 = vadd.f32 %v11743_v37, %v3641_v17  ;;  %v12016_v14 = vadd.f32 %v11743_v37, %v12933_v36  ;;  %v12937_v57 = vld [vmem:[#allocation21_spill] sm:$0xff]  ;;  %v12939_v36 = vld [vmem:[#allocation22_spill] sm:$0xff] }
 0x373   :  { %7044 = vst.msk [vmem:[%s12804_s3 + $0x268] sm:$0xf] %vm6889_vm2, %v8091_v44  ;;  %v3643_v23 = vpop.f32.mrf.mxu0  ;;  %v12012_v11 = vpop.f32.mrf.mxu1  ;;  %v12025_v17 = vadd.f32 %v11743_v37, %v12935_v10  ;;  %v12029_v44 = vadd.f32 %v11743_v37, %v12936_v43  ;;  %v12033_v50 = vadd.f32 %v11743_v37, %v12937_v57  ;;  %v12941_v10 = vld [vmem:[#allocation24_spill] sm:$0xff]  ;;  %v12945_v40 = vld [vmem:[#allocation27_spill] sm:$0xff] }
 0x374   :  { %12932 = vst [vmem:[#allocation71_spill] sm:$0xff] %v12012_v11  ;;  %v5764_v53 = vsel %vm5252_vm1, %v4694_v27, %v5508_v38  ;;  %v4699_v4 = vadd.f32 %v11812_v33, %v3642_v19  ;;  %v12039_v27 = vadd.f32 %v11743_v37, %v12939_v36  ;;  %v12940_v19 = vld [vmem:[#allocation23_spill] sm:$0xff]  ;;  %v12048_v43 = vadd.f32 %v11743_v37, %v12941_v10  ;;  %v12946_v11 = vld [vmem:[#allocation28_spill] sm:$0xff] }
 0x375   :  { %v8092_v52 = vpack.c.bf16 %v5764_v53, %v5764_v53  ;;  %v3644_v39 = vpop.f32.mrf.mxu0  ;;  %v12035_v23 = vpop.f32.mrf.mxu1  ;;  %v12044_v30 = vadd.f32 %v11743_v37, %v12940_v19  ;;  %v12942_v53 = vld [vmem:[#allocation25_spill] sm:$0xff]  ;;  %v12066_v10 = vadd.f32 %v11743_v37, %v12945_v40 }
 0x376   :  { %12938 = vst [vmem:[#allocation73_spill] sm:$0xff] %v12035_v23  ;;  %vm5253_vm3 = vcmp.gt.f32.partialorder %v4699_v4, 0.0  ;;  %v5509_v33 = vmul.f32 0.2, %v4699_v4  ;;  %v3645_v38 = vadd.f32 %v11743_v37, %v3644_v39  ;;  %v12052_v57 = vadd.f32 %v11743_v37, %v12942_v53  ;;  %v12943_v23 = vld [vmem:[#allocation26_spill] sm:$0xff] }
 0x377   :  { %v12056_v36 = vadd.f32 %v11743_v37, %v12943_v23  ;;  %7045 = vst.msk [vmem:[%s12804_s3 + $0x26c] sm:$0xf] %vm6889_vm2, %v8092_v52  ;;  %v3646_v39 = vpop.f32.mrf.mxu0  ;;  %v12062_v19 = vpop.f32.mrf.mxu1  ;;  %v12070_v53 = vadd.f32 %v11743_v37, %v12946_v11  ;;  %v12079_v52 = vadd.f32 %v11743_v37, %v12948_v5  ;;  %v12952_v11 = vld [vmem:[#allocation32_spill] sm:$0xff] }
 0x378   :  { %12944 = vst [vmem:[#allocation69_spill] sm:$0xff] %v12062_v19  ;;  %v5765_v34 = vsel %vm5253_vm3, %v4699_v4, %v5509_v33  ;;  %v4702_v23 = vadd.f32 %v11822_v55, %v3645_v38  ;;  %v12949_v39 = vld [vmem:[#allocation31_spill] sm:$0xff]  ;;  %v12089_v4 = vadd.f32 %v11743_v37, %v12952_v11  ;;  %v12953_v33 = vld [vmem:[#allocation33_spill] sm:$0xff]  ;;  %v12955_v38 = vld [vmem:[#allocation34_spill] sm:$0xff] }
 0x379   :  { %v12083_v19 = vadd.f32 %v11743_v37, %v12949_v39  ;;  %v8093_v40 = vpack.c.bf16 %v5765_v34, %v5765_v34  ;;  %v3649_v61 = vpop.f32.mrf.mxu0  ;;  %v12085_v47 = vpop.f32.mrf.mxu1  ;;  %v12094_v5 = vadd.f32 %v11743_v37, %v12953_v33  ;;  %v12098_v39 = vadd.f32 %v11743_v37, %v12955_v38  ;;  %v12957_v34 = vld [vmem:[#allocation35_spill] sm:$0xff] }
 0x37a   :  { %12951 = vst [vmem:[#allocation75_spill] sm:$0xff] %v12085_v47  ;;  %vm5254_vm0 = vcmp.gt.f32.partialorder %v4702_v23, 0.0  ;;  %v5510_v55 = vmul.f32 0.2, %v4702_v23  ;;  %v3650_v20 = vadd.f32 %v11743_v37, %v3649_v61  ;;  %v12102_v29 = vadd.f32 %v11743_v37, %v12957_v34  ;;  %v12959_v47 = vld [vmem:[#allocation36_spill] sm:$0xff] }
 0x37b   :  { %12950 = vst [vmem:[#allocation79_spill] sm:$0xff] %v12083_v19  ;;  %12954 = vst [vmem:[#allocation77_spill] sm:$0xff] %v12094_v5  ;;  %v12106_v11 = vadd.f32 %v11743_v37, %v12959_v47  ;;  %v3651_v61 = vpop.f32.mrf.mxu0  ;;  %v12112_v33 = vpop.f32.mrf.mxu1  ;;  %v12116_v38 = vadd.f32 %v11743_v37, %v12962_v18  ;;  %v12968_v19 = vld [vmem:[#allocation40_spill] sm:$0xff] }
 0x37c   :  { %12956 = vst [vmem:[#allocation81_spill] sm:$0xff] %v12098_v39  ;;  %12958 = vst [vmem:[#allocation83_spill] sm:$0xff] %v12102_v29  ;;  %v12964_v39 = vld [vmem:[#allocation38_spill] sm:$0xff]  ;;  %v5766_v29 = vsel %vm5254_vm0, %v4702_v23, %v5510_v55  ;;  %v4707_v47 = vadd.f32 %v11804_v62, %v3650_v20  ;;  %v12969_v61 = vld [vmem:[#allocation41_spill] sm:$0xff] }
 0x37d   :  { %12960 = vst [vmem:[#allocation84_spill] sm:$0xff] %v12106_v11  ;;  %7046 = vst.msk [vmem:[%s12804_s3 + $0x270] sm:$0xf] %vm6889_vm2, %v8093_v40  ;;  %v12120_v34 = vadd.f32 %v11743_v37, %v12964_v39  ;;  %v12125_v11 = vadd.f32 %v11743_v37, %v12966_v7  ;;  %v12129_v40 = vadd.f32 %v11743_v37, %v12968_v19  ;;  %v12135_v5 = vpop.f32.mrf.mxu1  ;;  %v12972_v39 = vld [vmem:[#allocation42_spill] sm:$0xff]  ;;  %v12974_v55 = vld [vmem:[#allocation43_spill] sm:$0xff] }
 0x37e   :  { %12961 = vst [vmem:[#allocation2_spill] sm:$0xff] %v12112_v33  ;;  %12963 = vst [vmem:[#allocation3_spill] sm:$0xff] %v12116_v38  ;;  %v12133_v33 = vadd.f32 %v11743_v37, %v12969_v61  ;;  %v8094_v18 = vpack.c.bf16 %v5766_v29, %v5766_v29  ;;  %v3652_v38 = vpop.f32.mrf.mxu0  ;;  %v12139_v23 = vadd.f32 %v11743_v37, %v12972_v39  ;;  %vm5255_vm4 = vcmp.gt.f32.partialorder %v4707_v47, 0.0  ;;  %v12976_v20 = vld [vmem:[#allocation44_spill] sm:$0xff]  ;;  %v12978_v29 = vld [vmem:[#allocation45_spill] sm:$0xff] }
 0x37f   :  { %12965 = vst [vmem:[#allocation4_spill] sm:$0xff] %v12120_v34  ;;  %12967 = vst [vmem:[#allocation5_spill] sm:$0xff] %v12125_v11  ;;  %v5511_v62 = vmul.f32 0.2, %v4707_v47  ;;  %v3653_v7 = vadd.f32 %v11743_v37, %v3652_v38  ;;  %v12144_v19 = vadd.f32 %v11743_v37, %v12974_v55  ;;  %v12148_v61 = vadd.f32 %v11743_v37, %v12976_v20  ;;  %v12162_v55 = vpop.f32.mrf.mxu1 }
 0x380   :  { %12970 = vst [vmem:[#allocation6_spill] sm:$0xff] %v12133_v33  ;;  %12971 = vst [vmem:[#allocation7_spill] sm:$0xff] %v12135_v5  ;;  %v12152_v11 = vadd.f32 %v11743_v37, %v12978_v29  ;;  %v12980_v5 = vld [vmem:[#allocation46_spill] sm:$0xff]  ;;  %v3654_v38 = vpop.f32.mrf.mxu0  ;;  %v12988_v33 = vld [vmem:[#allocation52_spill] sm:$0xff] }
 0x381   :  { %12973 = vst [vmem:[#allocation8_spill] sm:$0xff] %v12139_v23  ;;  %12975 = vst [vmem:[#allocation9_spill] sm:$0xff] %v12144_v19  ;;  %v12156_v39 = vadd.f32 %v11743_v37, %v12980_v5  ;;  %v12983_v19 = vld [vmem:[#allocation48_spill] sm:$0xff]  ;;  %v12985_v23 = vld [vmem:[#allocation49_spill] sm:$0xff]  ;;  %v4710_v5 = vadd.f32 %v11815_v26, %v3653_v7  ;;  %v8521_v34 = vpop.f32.mrf.mxu1 }
 0x382   :  { %12977 = vst [vmem:[#allocation10_spill] sm:$0xff] %v12148_v61  ;;  %12979 = vst [vmem:[#allocation11_spill] sm:$0xff] %v12152_v11  ;;  %v12166_v20 = vadd.f32 %v11743_v37, %v12983_v19  ;;  %v12170_v29 = vadd.f32 %v11743_v37, %v12985_v23  ;;  %v5767_v11 = vsel %vm5255_vm4, %v4707_v47, %v5511_v62  ;;  %v12990_v38 = vld [vmem:[#allocation54_spill] sm:$0xff]  ;;  %v12992_v62 = vld [vmem:[#allocation56_spill] sm:$0xff] }
 0x383   :  { %12981 = vst [vmem:[#allocation12_spill] sm:$0xff] %v12156_v39  ;;  %7047 = vst.msk [vmem:[%s12804_s3 + $0x274] sm:$0xf] %vm6889_vm2, %v8094_v18  ;;  %v12986_v39 = vld [vmem:[#allocation50_spill] sm:$0xff]  ;;  %v12179_v18 = vadd.f32 %v11743_v37, %v12988_v33  ;;  %v8095_v19 = vpack.c.bf16 %v5767_v11, %v5767_v11  ;;  %vm5256_vm5 = vcmp.gt.f32.partialorder %v4710_v5, 0.0  ;;  %v4851_v26 = vadd.f32 %v8521_v34, %v11948_v59  ;;  %v4842_v34 = vpop.f32.mrf.mxu1 }
 0x384   :  { %12982 = vst [vmem:[#allocation13_spill] sm:$0xff] %v12162_v55  ;;  %12984 = vst [vmem:[#allocation14_spill] sm:$0xff] %v12166_v20  ;;  %v12175_v61 = vadd.f32 %v11743_v37, %v12986_v39  ;;  %v12183_v55 = vadd.f32 %v11743_v37, %v12990_v38  ;;  %v3657_v20 = vpop.f32.mrf.mxu0  ;;  %v5512_v23 = vmul.f32 0.2, %v4710_v5  ;;  %v12189_v7 = vadd.f32 %v11743_v37, %v12992_v62  ;;  %v12994_v39 = vld [vmem:[#allocation58_spill] sm:$0xff] }
 0x385   :  { %12989 = vst [vmem:[#allocation16_spill] sm:$0xff] %v12179_v18  ;;  %v3658_v47 = vadd.f32 %v11743_v37, %v3657_v20  ;;  %v12193_v33 = vadd.f32 %v11743_v37, %v12994_v39  ;;  %v12996_v18 = vld [vmem:[#allocation60_spill] sm:$0xff]  ;;  %v12998_v11 = vld [vmem:[#allocation62_spill] sm:$0xff]  ;;  %7048 = vst.msk [vmem:[%s12804_s3 + $0x278] sm:$0xf] %vm6889_vm2, %v8095_v19  ;;  %vm5291_vm6 = vcmp.gt.f32.partialorder %v4851_v26, 0.0  ;;  %v8522_v19 = vpop.f32.mrf.mxu1 }
 0x386   :  { %12987 = vst [vmem:[#allocation15_spill] sm:$0xff] %v12175_v61  ;;  %12991 = vst [vmem:[#allocation17_spill] sm:$0xff] %v12183_v55  ;;  %v12197_v38 = vadd.f32 %v11743_v37, %v12996_v18  ;;  %v12201_v55 = vadd.f32 %v11743_v37, %v12998_v11  ;;  %v3659_v59 = vpop.f32.mrf.mxu0  ;;  %v5768_v20 = vsel %vm5256_vm5, %v4710_v5, %v5512_v23  ;;  %v5547_v39 = vmul.f32 0.2, %v4851_v26 }
 0x387   :  { %12993 = vst [vmem:[#allocation18_spill] sm:$0xff] %v12189_v7  ;;  %12995 = vst [vmem:[#allocation19_spill] sm:$0xff] %v12193_v33  ;;  %v4715_v62 = vadd.f32 %v11832_v0, %v3658_v47  ;;  %v13000_v33 = vld [vmem:[#allocation64_spill] sm:$0xff]  ;;  %v4843_v7 = vadd.f32 %v4842_v34, %v11939_v3 }
 0x388   :  { %12997 = vst [vmem:[#allocation20_spill] sm:$0xff] %v12197_v38  ;;  %12999 = vst [vmem:[#allocation21_spill] sm:$0xff] %v12201_v55  ;;  %v12210_v18 = vadd.f32 %v11743_v37, %v13000_v33  ;;  %v13001_v38 = vld [vmem:[#allocation66_spill] sm:$0xff]  ;;  %v8096_v55 = vpack.c.bf16 %v5768_v20, %v5768_v20  ;;  %v3660_v61 = vpop.f32.mrf.mxu0  ;;  %v5803_v5 = vsel %vm5291_vm6, %v4851_v26, %v5547_v39  ;;  %v4845_v20 = vpop.f32.mrf.mxu1  ;;  %v13003_v3 = vld [vmem:[#allocation68_spill] sm:$0xff] }
 0x389   :  { %v12214_v11 = vadd.f32 %v11743_v37, %v13001_v38  ;;  %vm5257_vm7 = vcmp.gt.f32.partialorder %v4715_v62, 0.0  ;;  %v5513_v59 = vmul.f32 0.2, %v4715_v62  ;;  %v3661_v0 = vadd.f32 %v11743_v37, %v3660_v61 }
 0x38a   :  { %7049 = vst.msk [vmem:[%s12804_s3 + $0x27c] sm:$0xf] %vm6889_vm2, %v8096_v55  ;;  %v8131_v23 = vpack.c.bf16 %v5803_v5, %v5803_v5  ;;  %vm5289_vm8 = vcmp.gt.f32.partialorder %v4843_v7, 0.0  ;;  %v5545_v47 = vmul.f32 0.2, %v4843_v7  ;;  %v4854_v33 = vadd.f32 %v8522_v19, %v11952_v42  ;;  %v3662_v38 = vpop.f32.mrf.mxu0  ;;  %v8525_v5 = vpop.f32.mrf.mxu1 }
 0x38b   :  { %13002 = vst [vmem:[#allocation22_spill] sm:$0xff] %v12214_v11  ;;  %v12225_v34 = vadd.f32 %v11743_v37, %v13003_v3  ;;  %v5769_v11 = vsel %vm5257_vm7, %v4715_v62, %v5513_v59  ;;  %v4718_v26 = vadd.f32 %v11842_v16, %v3661_v0  ;;  %v4846_v61 = vadd.f32 %v4845_v20, %v11944_v8  ;;  %v13004_v0 = vld [vmem:[#allocation70_spill] sm:$0xff] }
 0x38c   :  { %v8097_v39 = vpack.c.bf16 %v5769_v11, %v5769_v11  ;;  %7084 = vst.msk [vmem:[%s12804_s3 + $0x308] sm:$0xf] %vm6889_vm2, %v8131_v23  ;;  %v5801_v55 = vsel %vm5289_vm8, %v4843_v7, %v5545_v47  ;;  %vm5292_vm9 = vcmp.gt.f32.partialorder %v4854_v33, 0.0  ;;  %v5548_v42 = vmul.f32 0.2, %v4854_v33  ;;  %v3665_v19 = vpop.f32.mrf.mxu0  ;;  %v4858_v59 = vpop.f32.mrf.mxu1 }
 0x38d   :  { %v8129_v38 = vpack.c.bf16 %v5801_v55, %v5801_v55  ;;  %vm5258_vm10 = vcmp.gt.f32.partialorder %v4718_v26, 0.0  ;;  %v5514_v3 = vmul.f32 0.2, %v4718_v26  ;;  %vm5290_vm11 = vcmp.gt.f32.partialorder %v4846_v61, 0.0 }
 0x38e   :  { %7050 = vst.msk [vmem:[%s12804_s3 + $0x280] sm:$0xf] %vm6889_vm2, %v8097_v39  ;;  %v5804_v16 = vsel %vm5292_vm9, %v4854_v33, %v5548_v42  ;;  %v5546_v8 = vmul.f32 0.2, %v4846_v61  ;;  %v3666_v62 = vadd.f32 %v11743_v37, %v3665_v19  ;;  %v4867_v11 = vadd.f32 %v8525_v5, %v11970_v60  ;;  %v3667_v7 = vpop.f32.mrf.mxu0  ;;  %v8526_v19 = vpop.f32.mrf.mxu1 }
 0x38f   :  { %v12241_v23 = vadd.f32 %v11743_v37, %v13004_v0  ;;  %7082 = vst.msk [vmem:[%s12804_s3 + $0x300] sm:$0xf] %vm6889_vm2, %v8129_v38  ;;  %v5770_v47 = vsel %vm5258_vm10, %v4718_v26, %v5514_v3  ;;  %v8132_v20 = vpack.c.bf16 %v5804_v16, %v5804_v16  ;;  %v4859_v33 = vadd.f32 %v4858_v59, %v11956_v1  ;;  %v13005_v16 = vld [vmem:[#allocation72_spill] sm:$0xff] }
 0x390   :  { %v8098_v39 = vpack.c.bf16 %v5770_v47, %v5770_v47  ;;  %v5802_v55 = vsel %vm5290_vm11, %v4846_v61, %v5546_v8  ;;  %v4723_v42 = vadd.f32 %v11825_v2, %v3666_v62  ;;  %vm5295_vm12 = vcmp.gt.f32.partialorder %v4867_v11, 0.0  ;;  %v3668_v60 = vpop.f32.mrf.mxu0  ;;  %v4861_v3 = vpop.f32.mrf.mxu1 }
 0x391   :  { %7085 = vst.msk [vmem:[%s12804_s3 + $0x30c] sm:$0xf] %vm6889_vm2, %v8132_v20  ;;  %v8130_v5 = vpack.c.bf16 %v5802_v55, %v5802_v55  ;;  %v5551_v7 = vmul.f32 0.2, %v4867_v11  ;;  %vm5293_vm13 = vcmp.gt.f32.partialorder %v4859_v33, 0.0  ;;  %v3669_v2 = vadd.f32 %v11743_v37, %v3668_v60 }
 0x392   :  { %v5549_v38 = vmul.f32 0.2, %v4859_v33  ;;  %7051 = vst.msk [vmem:[%s12804_s3 + $0x284] sm:$0xf] %vm6889_vm2, %v8098_v39  ;;  %vm5259_vm14 = vcmp.gt.f32.partialorder %v4723_v42, 0.0  ;;  %v4870_v26 = vadd.f32 %v8526_v19, %v11975_v13  ;;  %v3670_v61 = vpop.f32.mrf.mxu0  ;;  %v12261_v8 = vadd.f32 %v11743_v37, %v13005_v16  ;;  %v8529_v60 = vpop.f32.mrf.mxu1 }
 0x393   :  { %v5515_v1 = vmul.f32 0.2, %v4723_v42  ;;  %7083 = vst.msk [vmem:[%s12804_s3 + $0x304] sm:$0xf] %vm6889_vm2, %v8130_v5  ;;  %v5807_v62 = vsel %vm5295_vm12, %v4867_v11, %v5551_v7  ;;  %v4862_v0 = vadd.f32 %v4861_v3, %v11966_v32  ;;  %v4726_v13 = vadd.f32 %v11835_v6, %v3669_v2  ;;  %v13006_v5 = vld [vmem:[#allocation74_spill] sm:$0xff] }
 0x394   :  { %v5805_v59 = vsel %vm5293_vm13, %v4859_v33, %v5549_v38  ;;  %v8135_v20 = vpack.c.bf16 %v5807_v62, %v5807_v62  ;;  %v3673_v55 = vpop.f32.mrf.mxu0  ;;  %vm5296_vm15 = vcmp.gt.f32.partialorder %v4870_v26, 0.0  ;;  %v5552_v61 = vmul.f32 0.2, %v4870_v26 }
 0x395   :  { %v5771_v47 = vsel %vm5259_vm14, %v4723_v42, %v5515_v1  ;;  %v8133_v39 = vpack.c.bf16 %v5805_v59, %v5805_v59  ;;  %vm5294_vm1 = vcmp.gt.f32.partialorder %v4862_v0, 0.0  ;;  %vm5260_vm3 = vcmp.gt.f32.partialorder %v4726_v13, 0.0  ;;  %v4874_v42 = vpop.f32.mrf.mxu1 }
 0x396   :  { %v8099_v19 = vpack.c.bf16 %v5771_v47, %v5771_v47  ;;  %7088 = vst.msk [vmem:[%s12804_s3 + $0x318] sm:$0xf] %vm6889_vm2, %v8135_v20  ;;  %v5516_v32 = vmul.f32 0.2, %v4726_v13  ;;  %v5550_v11 = vmul.f32 0.2, %v4862_v0  ;;  %v3674_v6 = vadd.f32 %v11743_v37, %v3673_v55  ;;  %v3675_v33 = vpop.f32.mrf.mxu0 }
 0x397   :  { %7086 = vst.msk [vmem:[%s12804_s3 + $0x310] sm:$0xf] %vm6889_vm2, %v8133_v39  ;;  %v12281_v7 = vadd.f32 %v11743_v37, %v13006_v5  ;;  %v5808_v38 = vsel %vm5296_vm15, %v4870_v26, %v5552_v61  ;;  %v4883_v1 = vadd.f32 %v8529_v60, %v11989_v28  ;;  %v4875_v2 = vadd.f32 %v4874_v42, %v11979_v46  ;;  %v8530_v20 = vpop.f32.mrf.mxu1  ;;  %v13007_v61 = vld [vmem:[#allocation76_spill] sm:$0xff] }
 0x398   :  { %7052 = vst.msk [vmem:[%s12804_s3 + $0x288] sm:$0xf] %vm6889_vm2, %v8099_v19  ;;  %v5772_v3 = vsel %vm5260_vm3, %v4726_v13, %v5516_v32  ;;  %v8136_v16 = vpack.c.bf16 %v5808_v38, %v5808_v38  ;;  %v5806_v62 = vsel %vm5294_vm1, %v4862_v0, %v5550_v11  ;;  %v4731_v59 = vadd.f32 %v11852_v31, %v3674_v6  ;;  %v3676_v47 = vpop.f32.mrf.mxu0 }
 0x399   :  { %v8100_v39 = vpack.c.bf16 %v5772_v3, %v5772_v3  ;;  %v8134_v55 = vpack.c.bf16 %v5806_v62, %v5806_v62  ;;  %vm5299_vm0 = vcmp.gt.f32.partialorder %v4883_v1, 0.0  ;;  %v5555_v33 = vmul.f32 0.2, %v4883_v1  ;;  %v4877_v13 = vpop.f32.mrf.mxu1 }
 0x39a   :  { %7089 = vst.msk [vmem:[%s12804_s3 + $0x31c] sm:$0xf] %vm6889_vm2, %v8136_v16  ;;  %vm5261_vm4 = vcmp.gt.f32.partialorder %v4731_v59, 0.0  ;;  %v5517_v28 = vmul.f32 0.2, %v4731_v59  ;;  %vm5297_vm5 = vcmp.gt.f32.partialorder %v4875_v2, 0.0  ;;  %v3678_v26 = vpop.f32.mrf.mxu0  ;;  %v3677_v0 = vadd.f32 %v11743_v37, %v3676_v47 }
 0x39b   :  { %v5553_v46 = vmul.f32 0.2, %v4875_v2  ;;  %7053 = vst.msk [vmem:[%s12804_s3 + $0x28c] sm:$0xf] %vm6889_vm2, %v8100_v39  ;;  %7087 = vst.msk [vmem:[%s12804_s3 + $0x314] sm:$0xf] %vm6889_vm2, %v8134_v55  ;;  %v5811_v31 = vsel %vm5299_vm0, %v4883_v1, %v5555_v33  ;;  %v4886_v60 = vadd.f32 %v8530_v20, %v11994_v56  ;;  %v4878_v19 = vadd.f32 %v4877_v13, %v11983_v9  ;;  %v8533_v38 = vpop.f32.mrf.mxu1 }
 0x39c   :  { %v12308_v32 = vadd.f32 %v11743_v37, %v13007_v61  ;;  %v5773_v11 = vsel %vm5261_vm4, %v4731_v59, %v5517_v28  ;;  %v8139_v6 = vpack.c.bf16 %v5811_v31, %v5811_v31  ;;  %v3681_v5 = vpop.f32.mrf.mxu0  ;;  %v4734_v62 = vadd.f32 %v11862_v45, %v3677_v0  ;;  %v13008_v39 = vld [vmem:[#allocation78_spill] sm:$0xff] }
 0x39d   :  { %v5809_v42 = vsel %vm5297_vm5, %v4875_v2, %v5553_v46  ;;  %v8101_v3 = vpack.c.bf16 %v5773_v11, %v5773_v11  ;;  %vm5300_vm6 = vcmp.gt.f32.partialorder %v4886_v60, 0.0  ;;  %v5556_v9 = vmul.f32 0.2, %v4886_v60  ;;  %v4890_v47 = vpop.f32.mrf.mxu1 }
 0x39e   :  { %v8137_v16 = vpack.c.bf16 %v5809_v42, %v5809_v42  ;;  %7092 = vst.msk [vmem:[%s12804_s3 + $0x328] sm:$0xf] %vm6889_vm2, %v8139_v6  ;;  %vm5298_vm7 = vcmp.gt.f32.partialorder %v4878_v19, 0.0  ;;  %v5554_v56 = vmul.f32 0.2, %v4878_v19  ;;  %v3682_v1 = vadd.f32 %v11743_v37, %v3681_v5  ;;  %v3683_v59 = vpop.f32.mrf.mxu0  ;;  %v13009_v5 = vld [vmem:[#allocation80_spill] sm:$0xff] }
 0x39f   :  { %7054 = vst.msk [vmem:[%s12804_s3 + $0x290] sm:$0xf] %vm6889_vm2, %v8101_v3  ;;  %vm5262_vm8 = vcmp.gt.f32.partialorder %v4734_v62, 0.0  ;;  %v5518_v45 = vmul.f32 0.2, %v4734_v62  ;;  %v4899_v2 = vadd.f32 %v8533_v38, %v12006_v41  ;;  %v4891_v20 = vadd.f32 %v4890_v47, %v11998_v12  ;;  %v8534_v13 = vpop.f32.mrf.mxu1 }
 0x3a0   :  { %7090 = vst.msk [vmem:[%s12804_s3 + $0x320] sm:$0xf] %vm6889_vm2, %v8137_v16  ;;  %v12328_v55 = vadd.f32 %v11743_v37, %v13008_v39  ;;  %v5812_v33 = vsel %vm5300_vm6, %v4886_v60, %v5556_v9  ;;  %v5810_v28 = vsel %vm5298_vm7, %v4878_v19, %v5554_v56  ;;  %v4739_v46 = vadd.f32 %v11845_v54, %v3682_v1  ;;  %v3684_v26 = vpop.f32.mrf.mxu0 }
 0x3a1   :  { %v5774_v31 = vsel %vm5262_vm8, %v4734_v62, %v5518_v45  ;;  %v8140_v0 = vpack.c.bf16 %v5812_v33, %v5812_v33  ;;  %v8138_v61 = vpack.c.bf16 %v5810_v28, %v5810_v28  ;;  %vm5303_vm9 = vcmp.gt.f32.partialorder %v4899_v2, 0.0  ;;  %v4893_v12 = vpop.f32.mrf.mxu1 }
 0x3a2   :  { %v8102_v11 = vpack.c.bf16 %v5774_v31, %v5774_v31  ;;  %vm5263_vm10 = vcmp.gt.f32.partialorder %v4739_v46, 0.0  ;;  %v5519_v6 = vmul.f32 0.2, %v4739_v46  ;;  %v5559_v41 = vmul.f32 0.2, %v4899_v2  ;;  %v3686_v42 = vpop.f32.mrf.mxu0 }
 0x3a3   :  { %7093 = vst.msk [vmem:[%s12804_s3 + $0x32c] sm:$0xf] %vm6889_vm2, %v8140_v0  ;;  %7091 = vst.msk [vmem:[%s12804_s3 + $0x324] sm:$0xf] %vm6889_vm2, %v8138_v61  ;;  %vm5301_vm11 = vcmp.gt.f32.partialorder %v4891_v20, 0.0  ;;  %v3685_v60 = vadd.f32 %v11743_v37, %v3684_v26  ;;  %v4902_v19 = vadd.f32 %v8534_v13, %v12016_v14  ;;  %v12343_v38 = vadd.f32 %v11743_v37, %v13009_v5  ;;  %v8537_v56 = vpop.f32.mrf.mxu1 }
 0x3a4   :  { %v5557_v54 = vmul.f32 0.2, %v4891_v20  ;;  %7055 = vst.msk [vmem:[%s12804_s3 + $0x294] sm:$0xf] %vm6889_vm2, %v8102_v11  ;;  %v5775_v3 = vsel %vm5263_vm10, %v4739_v46, %v5519_v6  ;;  %v5815_v16 = vsel %vm5303_vm9, %v4899_v2, %v5559_v41  ;;  %v4894_v62 = vadd.f32 %v4893_v12, %v12002_v51  ;;  %v3689_v9 = vpop.f32.mrf.mxu0 }
 0x3a5   :  { %v8103_v1 = vpack.c.bf16 %v5775_v3, %v5775_v3  ;;  %v8143_v59 = vpack.c.bf16 %v5815_v16, %v5815_v16  ;;  %v4742_v14 = vadd.f32 %v11855_v48, %v3685_v60  ;;  %vm5304_vm12 = vcmp.gt.f32.partialorder %v4902_v19, 0.0  ;;  %v4906_v28 = vpop.f32.mrf.mxu1 }
 0x3a6   :  { %v5813_v47 = vsel %vm5301_vm11, %v4891_v20, %v5557_v54  ;;  %v5560_v39 = vmul.f32 0.2, %v4902_v19  ;;  %vm5302_vm13 = vcmp.gt.f32.partialorder %v4894_v62, 0.0  ;;  %v3691_v33 = vpop.f32.mrf.mxu0  ;;  %v5558_v2 = vmul.f32 0.2, %v4894_v62  ;;  %v13010_v20 = vld [vmem:[#allocation82_spill] sm:$0xff] }
 0x3a7   :  { %v8141_v45 = vpack.c.bf16 %v5813_v47, %v5813_v47  ;;  %7056 = vst.msk [vmem:[%s12804_s3 + $0x298] sm:$0xf] %vm6889_vm2, %v8103_v1  ;;  %7096 = vst.msk [vmem:[%s12804_s3 + $0x338] sm:$0xf] %vm6889_vm2, %v8143_v59  ;;  %vm5264_vm14 = vcmp.gt.f32.partialorder %v4742_v14, 0.0  ;;  %v3690_v48 = vadd.f32 %v11743_v37, %v3689_v9  ;;  %v12363_v46 = vadd.f32 %v11743_v37, %v13010_v20  ;;  %v8538_v61 = vpop.f32.mrf.mxu1 }
 0x3a8   :  { %v5520_v51 = vmul.f32 0.2, %v4742_v14  ;;  %v5816_v26 = vsel %vm5304_vm12, %v4902_v19, %v5560_v39  ;;  %v4915_v13 = vadd.f32 %v8537_v56, %v12029_v44  ;;  %v4907_v31 = vadd.f32 %v4906_v28, %v12020_v49  ;;  %v3692_v0 = vpop.f32.mrf.mxu0  ;;  %v12388_v19 = vld [vmem:[%s12803_s2] ss:$0 sm:$0xff] }
 0x3a9   :  { %7094 = vst.msk [vmem:[%s12804_s3 + $0x330] sm:$0xf] %vm6889_vm2, %v8141_v45  ;;  %v8144_v6 = vpack.c.bf16 %v5816_v26, %v5816_v26  ;;  %v5814_v41 = vsel %vm5302_vm13, %v4894_v62, %v5558_v2  ;;  %v4747_v42 = vadd.f32 %v11872_v15, %v3690_v48  ;;  %v4909_v5 = vpop.f32.mrf.mxu1  ;;  %v3693_v3 = vadd.f32 %v12388_v19, %v3692_v0 }
 0x3aa   :  { %v5776_v11 = vsel %vm5264_vm14, %v4742_v14, %v5520_v51  ;;  %v8142_v12 = vpack.c.bf16 %v5814_v41, %v5814_v41  ;;  %vm5307_vm15 = vcmp.gt.f32.partialorder %v4915_v13, 0.0  ;;  %v5563_v54 = vmul.f32 0.2, %v4915_v13  ;;  %v3694_v60 = vpop.f32.mrf.mxu0 }
 0x3ab   :  { %v8104_v37 = vpack.c.bf16 %v5776_v11, %v5776_v11  ;;  %7097 = vst.msk [vmem:[%s12804_s3 + $0x33c] sm:$0xf] %vm6889_vm2, %v8144_v6  ;;  %vm5265_vm1 = vcmp.gt.f32.partialorder %v4747_v42, 0.0  ;;  %v5521_v49 = vmul.f32 0.2, %v4747_v42  ;;  %vm5305_vm3 = vcmp.gt.f32.partialorder %v4907_v31, 0.0  ;;  %v8541_v56 = vpop.f32.mrf.mxu1 }
 0x3ac   :  { %v5561_v44 = vmul.f32 0.2, %v4907_v31  ;;  %7095 = vst.msk [vmem:[%s12804_s3 + $0x334] sm:$0xf] %vm6889_vm2, %v8142_v12  ;;  %v5819_v15 = vsel %vm5307_vm15, %v4915_v13, %v5563_v54  ;;  %v4918_v16 = vadd.f32 %v8538_v61, %v12033_v50  ;;  %v4910_v62 = vadd.f32 %v4909_v5, %v12025_v17  ;;  %v3697_v9 = vpop.f32.mrf.mxu0 }
 0x3ad   :  { %7057 = vst.msk [vmem:[%s12804_s3 + $0x29c] sm:$0xf] %vm6889_vm2, %v8104_v37  ;;  %v5777_v1 = vsel %vm5265_vm1, %v4747_v42, %v5521_v49  ;;  %v8147_v59 = vpack.c.bf16 %v5819_v15, %v5819_v15  ;;  %v3698_v14 = vadd.f32 %v12388_v19, %v3697_v9  ;;  %v4750_v33 = vadd.f32 %v11882_v25, %v3693_v3  ;;  %v4922_v51 = vpop.f32.mrf.mxu1 }
 0x3ae   :  { %v5817_v47 = vsel %vm5305_vm3, %v4907_v31, %v5561_v44  ;;  %v8105_v45 = vpack.c.bf16 %v5777_v1, %v5777_v1  ;;  %vm5308_vm0 = vcmp.gt.f32.partialorder %v4918_v16, 0.0  ;;  %v3699_v28 = vpop.f32.mrf.mxu0  ;;  %v5564_v17 = vmul.f32 0.2, %v4918_v16 }
 0x3af   :  { %v8145_v39 = vpack.c.bf16 %v5817_v47, %v5817_v47  ;;  %7100 = vst.msk [vmem:[%s12804_s3 + $0x348] sm:$0xf] %vm6889_vm2, %v8147_v59  ;;  %vm5306_vm4 = vcmp.gt.f32.partialorder %v4910_v62, 0.0  ;;  %v5562_v50 = vmul.f32 0.2, %v4910_v62  ;;  %v4755_v2 = vadd.f32 %v11865_v21, %v3698_v14  ;;  %v8542_v13 = vpop.f32.mrf.mxu1 }
 0x3b0   :  { %7058 = vst.msk [vmem:[%s12804_s3 + $0x2a0] sm:$0xf] %vm6889_vm2, %v8105_v45  ;;  %vm5266_vm5 = vcmp.gt.f32.partialorder %v4750_v33, 0.0  ;;  %v5522_v25 = vmul.f32 0.2, %v4750_v33  ;;  %v4931_v48 = vadd.f32 %v8541_v56, %v12048_v43  ;;  %v4923_v20 = vadd.f32 %v4922_v51, %v12039_v27  ;;  %v3700_v26 = vpop.f32.mrf.mxu0 }
 0x3b1   :  { %7098 = vst.msk [vmem:[%s12804_s3 + $0x340] sm:$0xf] %vm6889_vm2, %v8145_v39  ;;  %v5820_v21 = vsel %vm5308_vm0, %v4918_v16, %v5564_v17  ;;  %v5818_v31 = vsel %vm5306_vm4, %v4910_v62, %v5562_v50  ;;  %vm5267_vm6 = vcmp.gt.f32.partialorder %v4755_v2, 0.0  ;;  %v5523_v0 = vmul.f32 0.2, %v4755_v2  ;;  %v4925_v42 = vpop.f32.mrf.mxu1 }
 0x3b2   :  { %v5778_v61 = vsel %vm5266_vm5, %v4750_v33, %v5522_v25  ;;  %v8148_v11 = vpack.c.bf16 %v5820_v21, %v5820_v21  ;;  %v8146_v6 = vpack.c.bf16 %v5818_v31, %v5818_v31  ;;  %vm5311_vm7 = vcmp.gt.f32.partialorder %v4931_v48, 0.0  ;;  %v3702_v41 = vpop.f32.mrf.mxu0 }
 0x3b3   :  { %v8106_v37 = vpack.c.bf16 %v5778_v61, %v5778_v61  ;;  %v5779_v12 = vsel %vm5267_vm6, %v4755_v2, %v5523_v0  ;;  %v5567_v54 = vmul.f32 0.2, %v4931_v48  ;;  %vm5309_vm8 = vcmp.gt.f32.partialorder %v4923_v20, 0.0  ;;  %v8545_v44 = vpop.f32.mrf.mxu1 }
 0x3b4   :  { %7101 = vst.msk [vmem:[%s12804_s3 + $0x34c] sm:$0xf] %vm6889_vm2, %v8148_v11  ;;  %7099 = vst.msk [vmem:[%s12804_s3 + $0x344] sm:$0xf] %vm6889_vm2, %v8146_v6  ;;  %v8107_v27 = vpack.c.bf16 %v5779_v12, %v5779_v12  ;;  %v5565_v43 = vmul.f32 0.2, %v4923_v20  ;;  %v3701_v60 = vadd.f32 %v12388_v19, %v3700_v26  ;;  %v4934_v5 = vadd.f32 %v8542_v13, %v12052_v57  ;;  %v3705_v49 = vpop.f32.mrf.mxu0 }
 0x3b5   :  { %7059 = vst.msk [vmem:[%s12804_s3 + $0x2a4] sm:$0xf] %vm6889_vm2, %v8106_v37  ;;  %v5823_v15 = vsel %vm5311_vm7, %v4931_v48, %v5567_v54  ;;  %v4926_v3 = vadd.f32 %v4925_v42, %v12044_v30  ;;  %v3706_v16 = vadd.f32 %v12388_v19, %v3705_v49  ;;  %v4947_v62 = vadd.f32 %v8545_v44, %v12070_v53  ;;  %v4938_v59 = vpop.f32.mrf.mxu1 }
 0x3b6   :  { %7060 = vst.msk [vmem:[%s12804_s3 + $0x2a8] sm:$0xf] %vm6889_vm2, %v8107_v27  ;;  %v8151_v57 = vpack.c.bf16 %v5823_v15, %v5823_v15  ;;  %v5821_v9 = vsel %vm5309_vm8, %v4923_v20, %v5565_v43  ;;  %v4758_v56 = vadd.f32 %v11875_v35, %v3701_v60  ;;  %vm5312_vm9 = vcmp.gt.f32.partialorder %v4934_v5, 0.0  ;;  %v3707_v1 = vpop.f32.mrf.mxu0 }
 0x3b7   :  { %v8149_v47 = vpack.c.bf16 %v5821_v9, %v5821_v9  ;;  %v5568_v14 = vmul.f32 0.2, %v4934_v5  ;;  %vm5310_vm10 = vcmp.gt.f32.partialorder %v4926_v3, 0.0  ;;  %v5566_v30 = vmul.f32 0.2, %v4926_v3  ;;  %v8546_v33 = vpop.f32.mrf.mxu1 }
 0x3b8   :  { %7104 = vst.msk [vmem:[%s12804_s3 + $0x358] sm:$0xf] %vm6889_vm2, %v8151_v57  ;;  %vm5268_vm11 = vcmp.gt.f32.partialorder %v4758_v56, 0.0  ;;  %v5524_v53 = vmul.f32 0.2, %v4758_v56  ;;  %v4763_v45 = vadd.f32 %v11892_v22, %v3706_v16  ;;  %vm5315_vm12 = vcmp.gt.f32.partialorder %v4947_v62, 0.0  ;;  %v3708_v39 = vpop.f32.mrf.mxu0 }
 0x3b9   :  { %7102 = vst.msk [vmem:[%s12804_s3 + $0x350] sm:$0xf] %vm6889_vm2, %v8149_v47  ;;  %v5824_v35 = vsel %vm5312_vm9, %v4934_v5, %v5568_v14  ;;  %v5822_v28 = vsel %vm5310_vm10, %v4926_v3, %v5566_v30  ;;  %v5571_v51 = vmul.f32 0.2, %v4947_v62  ;;  %v4939_v17 = vadd.f32 %v4938_v59, %v12056_v36  ;;  %v4941_v20 = vpop.f32.mrf.mxu1 }
 0x3ba   :  { %v5780_v50 = vsel %vm5268_vm11, %v4758_v56, %v5524_v53  ;;  %v8152_v2 = vpack.c.bf16 %v5824_v35, %v5824_v35  ;;  %v8150_v25 = vpack.c.bf16 %v5822_v28, %v5822_v28  ;;  %vm5269_vm13 = vcmp.gt.f32.partialorder %v4763_v45, 0.0  ;;  %v3710_v48 = vpop.f32.mrf.mxu0 }
 0x3bb   :  { %v8108_v22 = vpack.c.bf16 %v5780_v50, %v5780_v50  ;;  %v5525_v26 = vmul.f32 0.2, %v4763_v45  ;;  %v5827_v13 = vsel %vm5315_vm12, %v4947_v62, %v5571_v51  ;;  %vm5313_vm14 = vcmp.gt.f32.partialorder %v4939_v17, 0.0  ;;  %v8549_v11 = vpop.f32.mrf.mxu1  ;;  %v13012_v51 = vld [vmem:[#allocation79_spill] sm:$0xff] }
 0x3bc   :  { %7105 = vst.msk [vmem:[%s12804_s3 + $0x35c] sm:$0xf] %vm6889_vm2, %v8152_v2  ;;  %7103 = vst.msk [vmem:[%s12804_s3 + $0x354] sm:$0xf] %vm6889_vm2, %v8150_v25  ;;  %v8155_v36 = vpack.c.bf16 %v5827_v13, %v5827_v13  ;;  %v5569_v21 = vmul.f32 0.2, %v4939_v17  ;;  %v3709_v31 = vadd.f32 %v12388_v19, %v3708_v39  ;;  %v4950_v0 = vadd.f32 %v8546_v33, %v12075_v63  ;;  %v3713_v61 = vpop.f32.mrf.mxu0 }
 0x3bd   :  { %7061 = vst.msk [vmem:[%s12804_s3 + $0x2ac] sm:$0xf] %vm6889_vm2, %v8108_v22  ;;  %v5781_v6 = vsel %vm5269_vm13, %v4763_v45, %v5525_v26  ;;  %v4942_v41 = vadd.f32 %v4941_v20, %v12066_v10  ;;  %v3714_v42 = vadd.f32 %v12388_v19, %v3713_v61  ;;  %v4963_v37 = vadd.f32 %v8549_v11, %v12089_v4  ;;  %v4954_v43 = vpop.f32.mrf.mxu1  ;;  %v13011_v45 = vld [vmem:[#allocation77_spill] sm:$0xff]  ;;  %v13013_v2 = vld [vmem:[#allocation84_spill] sm:$0xff]  ;;  %v13014_v22 = vld [vmem:[#allocation47_spill] sm:$0xff] }
 0x3be   :  { %v8109_v12 = vpack.c.bf16 %v5781_v6, %v5781_v6  ;;  %7108 = vst.msk [vmem:[%s12804_s3 + $0x368] sm:$0xf] %vm6889_vm2, %v8155_v36  ;;  %v5825_v63 = vsel %vm5313_vm14, %v4939_v17, %v5569_v21  ;;  %v4766_v54 = vadd.f32 %v11902_v58, %v3709_v31  ;;  %vm5316_vm15 = vcmp.gt.f32.partialorder %v4950_v0, 0.0  ;;  %v3715_v27 = vpop.f32.mrf.mxu0  ;;  %v13015_v11 = vld [vmem:[#allocation51_spill] sm:$0xff] }
 0x3bf   :  { %v8153_v60 = vpack.c.bf16 %v5825_v63, %v5825_v63  ;;  %v5572_v5 = vmul.f32 0.2, %v4950_v0  ;;  %vm5314_vm1 = vcmp.gt.f32.partialorder %v4942_v41, 0.0  ;;  %v5570_v10 = vmul.f32 0.2, %v4942_v41  ;;  %v8550_v15 = vpop.f32.mrf.mxu1 }
 0x3c0   :  { %7062 = vst.msk [vmem:[%s12804_s3 + $0x2b0] sm:$0xf] %vm6889_vm2, %v8109_v12  ;;  %vm5270_vm3 = vcmp.gt.f32.partialorder %v4766_v54, 0.0  ;;  %v5526_v4 = vmul.f32 0.2, %v4766_v54  ;;  %v4771_v49 = vadd.f32 %v11885_v24, %v3714_v42  ;;  %vm5319_vm0 = vcmp.gt.f32.partialorder %v4963_v37, 0.0  ;;  %v3716_v44 = vpop.f32.mrf.mxu0 }
 0x3c1   :  { %7106 = vst.msk [vmem:[%s12804_s3 + $0x360] sm:$0xf] %vm6889_vm2, %v8153_v60  ;;  %v5828_v58 = vsel %vm5316_vm15, %v4950_v0, %v5572_v5  ;;  %v5826_v3 = vsel %vm5314_vm1, %v4942_v41, %v5570_v10  ;;  %v5575_v16 = vmul.f32 0.2, %v4963_v37  ;;  %v4955_v62 = vadd.f32 %v4954_v43, %v12079_v52  ;;  %v4957_v59 = vpop.f32.mrf.mxu1 }
 0x3c2   :  { %v5782_v57 = vsel %vm5270_vm3, %v4766_v54, %v5526_v4  ;;  %v8156_v9 = vpack.c.bf16 %v5828_v58, %v5828_v58  ;;  %v8154_v56 = vpack.c.bf16 %v5826_v3, %v5826_v3  ;;  %vm5271_vm4 = vcmp.gt.f32.partialorder %v4771_v49, 0.0  ;;  %v3718_v1 = vpop.f32.mrf.mxu0  ;;  %v13016_v54 = vld [vmem:[#allocation81_spill] sm:$0xff] }
 0x3c3   :  { %v8110_v24 = vpack.c.bf16 %v5782_v57, %v5782_v57  ;;  %v5527_v47 = vmul.f32 0.2, %v4771_v49  ;;  %v5831_v14 = vsel %vm5319_vm0, %v4963_v37, %v5575_v16  ;;  %vm5317_vm5 = vcmp.gt.f32.partialorder %v4955_v62, 0.0  ;;  %v8553_v35 = vpop.f32.mrf.mxu1 }
 0x3c4   :  { %7109 = vst.msk [vmem:[%s12804_s3 + $0x36c] sm:$0xf] %vm6889_vm2, %v8156_v9  ;;  %7107 = vst.msk [vmem:[%s12804_s3 + $0x364] sm:$0xf] %vm6889_vm2, %v8154_v56  ;;  %v8159_v52 = vpack.c.bf16 %v5831_v14, %v5831_v14  ;;  %v5573_v30 = vmul.f32 0.2, %v4955_v62  ;;  %v3717_v53 = vadd.f32 %v12388_v19, %v3716_v44  ;;  %v4966_v39 = vadd.f32 %v8550_v15, %v13011_v45  ;;  %v3721_v33 = vpop.f32.mrf.mxu0 }
 0x3c5   :  { %7063 = vst.msk [vmem:[%s12804_s3 + $0x2b4] sm:$0xf] %vm6889_vm2, %v8110_v24  ;;  %v5783_v28 = vsel %vm5271_vm4, %v4771_v49, %v5527_v47  ;;  %v4958_v17 = vadd.f32 %v4957_v59, %v13012_v51  ;;  %v3722_v50 = vadd.f32 %v12388_v19, %v3721_v33  ;;  %v4979_v25 = vadd.f32 %v8553_v35, %v13013_v2  ;;  %v4970_v36 = vpop.f32.mrf.mxu1  ;;  %v13018_v59 = vld [vmem:[#allocation83_spill] sm:$0xff] }
 0x3c6   :  { %v8111_v48 = vpack.c.bf16 %v5783_v28, %v5783_v28  ;;  %7112 = vst.msk [vmem:[%s12804_s3 + $0x378] sm:$0xf] %vm6889_vm2, %v8159_v52  ;;  %v5829_v20 = vsel %vm5317_vm5, %v4955_v62, %v5573_v30  ;;  %v4774_v26 = vadd.f32 %v13014_v22, %v3717_v53  ;;  %vm5320_vm6 = vcmp.gt.f32.partialorder %v4966_v39, 0.0  ;;  %v3723_v13 = vpop.f32.mrf.mxu0  ;;  %v13017_v62 = vld [vmem:[#allocation3_spill] sm:$0xff]  ;;  %v13019_v53 = vld [vmem:[#allocation57_spill] sm:$0xff] }
 0x3c7   :  { %v8157_v21 = vpack.c.bf16 %v5829_v20, %v5829_v20  ;;  %v5576_v31 = vmul.f32 0.2, %v4966_v39  ;;  %vm5318_vm7 = vcmp.gt.f32.partialorder %v4958_v17, 0.0  ;;  %v5574_v0 = vmul.f32 0.2, %v4958_v17  ;;  %v8554_v42 = vpop.f32.mrf.mxu1 }
 0x3c8   :  { %7064 = vst.msk [vmem:[%s12804_s3 + $0x2b8] sm:$0xf] %vm6889_vm2, %v8111_v48  ;;  %vm5272_vm8 = vcmp.gt.f32.partialorder %v4774_v26, 0.0  ;;  %v5528_v61 = vmul.f32 0.2, %v4774_v26  ;;  %v4779_v6 = vadd.f32 %v13015_v11, %v3722_v50  ;;  %vm5323_vm9 = vcmp.gt.f32.partialorder %v4979_v25, 0.0  ;;  %v3724_v41 = vpop.f32.mrf.mxu0 }
 0x3c9   :  { %7110 = vst.msk [vmem:[%s12804_s3 + $0x370] sm:$0xf] %vm6889_vm2, %v8157_v21  ;;  %v5832_v37 = vsel %vm5320_vm6, %v4966_v39, %v5576_v31  ;;  %v5830_v12 = vsel %vm5318_vm7, %v4958_v17, %v5574_v0  ;;  %v5579_v63 = vmul.f32 0.2, %v4979_v25  ;;  %v4971_v27 = vadd.f32 %v4970_v36, %v13016_v54  ;;  %v4973_v4 = vpop.f32.mrf.mxu1  ;;  %v13020_v17 = vld [vmem:[#allocation55_spill] sm:$0xff] }
 0x3ca   :  { %v5784_v43 = vsel %vm5272_vm8, %v4774_v26, %v5528_v61  ;;  %v8160_v60 = vpack.c.bf16 %v5832_v37, %v5832_v37  ;;  %v8158_v5 = vpack.c.bf16 %v5830_v12, %v5830_v12  ;;  %vm5273_vm10 = vcmp.gt.f32.partialorder %v4779_v6, 0.0  ;;  %v3726_v10 = vpop.f32.mrf.mxu0  ;;  %v13021_v26 = vld [vmem:[#allocation4_spill] sm:$0xff] }
 0x3cb   :  { %v8112_v49 = vpack.c.bf16 %v5784_v43, %v5784_v43  ;;  %v5529_v44 = vmul.f32 0.2, %v4779_v6  ;;  %v5835_v15 = vsel %vm5323_vm9, %v4979_v25, %v5579_v63  ;;  %vm5321_vm11 = vcmp.gt.f32.partialorder %v4971_v27, 0.0  ;;  %v8557_v56 = vpop.f32.mrf.mxu1  ;;  %v13022_v63 = vld [vmem:[#allocation6_spill] sm:$0xff] }
 0x3cc   :  { %7113 = vst.msk [vmem:[%s12804_s3 + $0x37c] sm:$0xf] %vm6889_vm2, %v8160_v60  ;;  %7111 = vst.msk [vmem:[%s12804_s3 + $0x374] sm:$0xf] %vm6889_vm2, %v8158_v5  ;;  %v8163_v58 = vpack.c.bf16 %v5835_v15, %v5835_v15  ;;  %v5577_v3 = vmul.f32 0.2, %v4971_v27  ;;  %v3725_v16 = vadd.f32 %v12388_v19, %v3724_v41  ;;  %v4982_v57 = vadd.f32 %v8554_v42, %v13017_v62  ;;  %v3729_v9 = vpop.f32.mrf.mxu0 }
 0x3cd   :  { %7065 = vst.msk [vmem:[%s12804_s3 + $0x2bc] sm:$0xf] %vm6889_vm2, %v8112_v49  ;;  %v5785_v1 = vsel %vm5273_vm10, %v4779_v6, %v5529_v44  ;;  %v4974_v24 = vadd.f32 %v4973_v4, %v13018_v59  ;;  %v3730_v47 = vadd.f32 %v12388_v19, %v3729_v9  ;;  %v4995_v14 = vadd.f32 %v8557_v56, %v12129_v40  ;;  %v4986_v33 = vpop.f32.mrf.mxu1  ;;  %v13023_v5 = vld [vmem:[#allocation5_spill] sm:$0xff]  ;;  %v13024_v49 = vld [vmem:[#allocation10_spill] sm:$0xff] }
 0x3ce   :  { %v8113_v52 = vpack.c.bf16 %v5785_v1, %v5785_v1  ;;  %7116 = vst.msk [vmem:[%s12804_s3 + $0x388] sm:$0xf] %vm6889_vm2, %v8163_v58  ;;  %v5833_v30 = vsel %vm5321_vm11, %v4971_v27, %v5577_v3  ;;  %v4782_v45 = vadd.f32 %v13019_v53, %v3725_v16  ;;  %vm5324_vm12 = vcmp.gt.f32.partialorder %v4982_v57, 0.0  ;;  %v3731_v39 = vpop.f32.mrf.mxu0  ;;  %v13025_v3 = vld [vmem:[#allocation53_spill] sm:$0xff] }
 0x3cf   :  { %v8161_v35 = vpack.c.bf16 %v5833_v30, %v5833_v30  ;;  %v5580_v28 = vmul.f32 0.2, %v4982_v57  ;;  %vm5322_vm13 = vcmp.gt.f32.partialorder %v4974_v24, 0.0  ;;  %v5578_v51 = vmul.f32 0.2, %v4974_v24  ;;  %v8558_v25 = vpop.f32.mrf.mxu1  ;;  %v13027_v39 = vld [vmem:[#allocation8_spill] sm:$0xff] }
 0x3d0   :  { %7066 = vst.msk [vmem:[%s12804_s3 + $0x2c0] sm:$0xf] %vm6889_vm2, %v8113_v52  ;;  %vm5274_vm14 = vcmp.gt.f32.partialorder %v4782_v45, 0.0  ;;  %v5530_v40 = vmul.f32 0.2, %v4782_v45  ;;  %v4787_v50 = vadd.f32 %v13020_v17, %v3730_v47  ;;  %vm5327_vm15 = vcmp.gt.f32.partialorder %v4995_v14, 0.0  ;;  %v3732_v2 = vpop.f32.mrf.mxu0 }
 0x3d1   :  { %7114 = vst.msk [vmem:[%s12804_s3 + $0x380] sm:$0xf] %vm6889_vm2, %v8161_v35  ;;  %v5836_v48 = vsel %vm5324_vm12, %v4982_v57, %v5580_v28  ;;  %v5834_v20 = vsel %vm5322_vm13, %v4974_v24, %v5578_v51  ;;  %v5583_v22 = vmul.f32 0.2, %v4995_v14  ;;  %v4987_v13 = vadd.f32 %v4986_v33, %v13021_v26  ;;  %v4989_v61 = vpop.f32.mrf.mxu1  ;;  %v13026_v24 = vld [vmem:[#allocation59_spill] sm:$0xff] }
 0x3d2   :  { %v5786_v36 = vsel %vm5274_vm14, %v4782_v45, %v5530_v40  ;;  %v8164_v21 = vpack.c.bf16 %v5836_v48, %v5836_v48  ;;  %v8162_v31 = vpack.c.bf16 %v5834_v20, %v5834_v20  ;;  %vm5275_vm1 = vcmp.gt.f32.partialorder %v4787_v50, 0.0  ;;  %v3734_v0 = vpop.f32.mrf.mxu0  ;;  %v13028_v26 = vld [vmem:[#allocation11_spill] sm:$0xff] }
 0x3d3   :  { %v8114_v11 = vpack.c.bf16 %v5786_v36, %v5786_v36  ;;  %v5531_v6 = vmul.f32 0.2, %v4787_v50  ;;  %v5839_v41 = vsel %vm5327_vm15, %v4995_v14, %v5583_v22  ;;  %vm5325_vm3 = vcmp.gt.f32.partialorder %v4987_v13, 0.0  ;;  %v8561_v43 = vpop.f32.mrf.mxu1  ;;  %v13029_v0 = vld [vmem:[#allocation9_spill] sm:$0xff] }
 0x3d4   :  { %7117 = vst.msk [vmem:[%s12804_s3 + $0x38c] sm:$0xf] %vm6889_vm2, %v8164_v21  ;;  %7115 = vst.msk [vmem:[%s12804_s3 + $0x384] sm:$0xf] %vm6889_vm2, %v8162_v31  ;;  %v8167_v42 = vpack.c.bf16 %v5839_v41, %v5839_v41  ;;  %v5581_v37 = vmul.f32 0.2, %v4987_v13  ;;  %v3733_v12 = vadd.f32 %v12388_v19, %v3732_v2  ;;  %v4998_v54 = vadd.f32 %v8558_v25, %v13022_v63  ;;  %v3737_v27 = vpop.f32.mrf.mxu0 }
 0x3d5   :  { %7067 = vst.msk [vmem:[%s12804_s3 + $0x2c4] sm:$0xf] %vm6889_vm2, %v8114_v11  ;;  %v5787_v60 = vsel %vm5275_vm1, %v4787_v50, %v5531_v6  ;;  %v4990_v10 = vadd.f32 %v4989_v61, %v13023_v5  ;;  %v3738_v4 = vadd.f32 %v12388_v19, %v3737_v27  ;;  %v5011_v44 = vadd.f32 %v8561_v43, %v13024_v49  ;;  %v5002_v57 = vpop.f32.mrf.mxu1  ;;  %v13031_v5 = vld [vmem:[#allocation63_spill] sm:$0xff] }
 0x3d6   :  { %v8115_v15 = vpack.c.bf16 %v5787_v60, %v5787_v60  ;;  %7120 = vst.msk [vmem:[%s12804_s3 + $0x398] sm:$0xf] %vm6889_vm2, %v8167_v42  ;;  %v5837_v58 = vsel %vm5325_vm3, %v4987_v13, %v5581_v37  ;;  %v4790_v16 = vadd.f32 %v13025_v3, %v3733_v12  ;;  %vm5328_vm0 = vcmp.gt.f32.partialorder %v4998_v54, 0.0  ;;  %v3739_v62 = vpop.f32.mrf.mxu0  ;;  %v13030_v37 = vld [vmem:[#allocation61_spill] sm:$0xff]  ;;  %v13032_v3 = vld [vmem:[#allocation12_spill] sm:$0xff] }
 0x3d7   :  { %v8165_v9 = vpack.c.bf16 %v5837_v58, %v5837_v58  ;;  %v5584_v56 = vmul.f32 0.2, %v4998_v54  ;;  %vm5326_vm4 = vcmp.gt.f32.partialorder %v4990_v10, 0.0  ;;  %v5582_v1 = vmul.f32 0.2, %v4990_v10  ;;  %v8562_v52 = vpop.f32.mrf.mxu1 }
 0x3d8   :  { %7068 = vst.msk [vmem:[%s12804_s3 + $0x2c8] sm:$0xf] %vm6889_vm2, %v8115_v15  ;;  %vm5276_vm5 = vcmp.gt.f32.partialorder %v4790_v16, 0.0  ;;  %v5532_v59 = vmul.f32 0.2, %v4790_v16  ;;  %v4795_v47 = vadd.f32 %v13026_v24, %v3738_v4  ;;  %vm5331_vm6 = vcmp.gt.f32.partialorder %v5011_v44, 0.0  ;;  %v3740_v14 = vpop.f32.mrf.mxu0 }
 0x3d9   :  { %7118 = vst.msk [vmem:[%s12804_s3 + $0x390] sm:$0xf] %vm6889_vm2, %v8165_v9  ;;  %v5840_v30 = vsel %vm5328_vm0, %v4998_v54, %v5584_v56  ;;  %v5838_v53 = vsel %vm5326_vm4, %v4990_v10, %v5582_v1  ;;  %v5587_v45 = vmul.f32 0.2, %v5011_v44  ;;  %v5003_v33 = vadd.f32 %v5002_v57, %v13027_v39  ;;  %v5005_v17 = vpop.f32.mrf.mxu1 }
 0x3da   :  { %v5788_v35 = vsel %vm5276_vm5, %v4790_v16, %v5532_v59  ;;  %v8168_v28 = vpack.c.bf16 %v5840_v30, %v5840_v30  ;;  %v8166_v51 = vpack.c.bf16 %v5838_v53, %v5838_v53  ;;  %vm5277_vm7 = vcmp.gt.f32.partialorder %v4795_v47, 0.0  ;;  %v3742_v40 = vpop.f32.mrf.mxu0  ;;  %v13033_v53 = vld [vmem:[#allocation15_spill] sm:$0xff] }
 0x3db   :  { %v8116_v50 = vpack.c.bf16 %v5788_v35, %v5788_v35  ;;  %v5533_v2 = vmul.f32 0.2, %v4795_v47  ;;  %v5843_v25 = vsel %vm5331_vm6, %v5011_v44, %v5587_v45  ;;  %vm5329_vm8 = vcmp.gt.f32.partialorder %v5003_v33, 0.0  ;;  %v8565_v21 = vpop.f32.mrf.mxu1 }
 0x3dc   :  { %7121 = vst.msk [vmem:[%s12804_s3 + $0x39c] sm:$0xf] %vm6889_vm2, %v8168_v28  ;;  %7119 = vst.msk [vmem:[%s12804_s3 + $0x394] sm:$0xf] %vm6889_vm2, %v8166_v51  ;;  %v8171_v48 = vpack.c.bf16 %v5843_v25, %v5843_v25  ;;  %v5585_v20 = vmul.f32 0.2, %v5003_v33  ;;  %v3741_v22 = vadd.f32 %v12388_v19, %v3740_v14  ;;  %v5014_v13 = vadd.f32 %v8562_v52, %v13028_v26  ;;  %v3745_v36 = vpop.f32.mrf.mxu0 }
 0x3dd   :  { %7069 = vst.msk [vmem:[%s12804_s3 + $0x2cc] sm:$0xf] %vm6889_vm2, %v8116_v50  ;;  %v5789_v31 = vsel %vm5277_vm7, %v4795_v47, %v5533_v2  ;;  %v5006_v61 = vadd.f32 %v5005_v17, %v13029_v0  ;;  %v3746_v11 = vadd.f32 %v12388_v19, %v3745_v36  ;;  %v5027_v6 = vadd.f32 %v8565_v21, %v12170_v29  ;;  %v5018_v54 = vpop.f32.mrf.mxu1  ;;  %v13034_v28 = vld [vmem:[#allocation14_spill] sm:$0xff]  ;;  %v13037_v0 = vld [vmem:[#allocation71_spill] sm:$0xff] }
 0x3de   :  { %v8117_v41 = vpack.c.bf16 %v5789_v31, %v5789_v31  ;;  %7124 = vst.msk [vmem:[%s12804_s3 + $0x3a8] sm:$0xf] %vm6889_vm2, %v8171_v48  ;;  %v5841_v42 = vsel %vm5329_vm8, %v5003_v33, %v5585_v20  ;;  %v4798_v12 = vadd.f32 %v13030_v37, %v3741_v22  ;;  %vm5332_vm9 = vcmp.gt.f32.partialorder %v5014_v13, 0.0  ;;  %v3747_v63 = vpop.f32.mrf.mxu0  ;;  %v13035_v17 = vld [vmem:[#allocation18_spill] sm:$0xff]  ;;  %v13036_v48 = vld [vmem:[#allocation65_spill] sm:$0xff] }
 0x3df   :  { %v8169_v27 = vpack.c.bf16 %v5841_v42, %v5841_v42  ;;  %v5588_v43 = vmul.f32 0.2, %v5014_v13  ;;  %vm5330_vm10 = vcmp.gt.f32.partialorder %v5006_v61, 0.0  ;;  %v5586_v60 = vmul.f32 0.2, %v5006_v61  ;;  %v8566_v49 = vpop.f32.mrf.mxu1 }
 0x3e0   :  { %7070 = vst.msk [vmem:[%s12804_s3 + $0x2d0] sm:$0xf] %vm6889_vm2, %v8117_v41  ;;  %vm5278_vm11 = vcmp.gt.f32.partialorder %v4798_v12, 0.0  ;;  %v5534_v29 = vmul.f32 0.2, %v4798_v12  ;;  %v4803_v10 = vadd.f32 %v13031_v5, %v3746_v11  ;;  %vm5335_vm12 = vcmp.gt.f32.partialorder %v5027_v6, 0.0  ;;  %v3748_v4 = vpop.f32.mrf.mxu0 }
 0x3e1   :  { %7122 = vst.msk [vmem:[%s12804_s3 + $0x3a0] sm:$0xf] %vm6889_vm2, %v8169_v27  ;;  %v5844_v44 = vsel %vm5332_vm9, %v5014_v13, %v5588_v43  ;;  %v5842_v15 = vsel %vm5330_vm10, %v5006_v61, %v5586_v60  ;;  %v5591_v58 = vmul.f32 0.2, %v5027_v6  ;;  %v5019_v16 = vadd.f32 %v5018_v54, %v13032_v3  ;;  %v5021_v1 = vpop.f32.mrf.mxu1 }
 0x3e2   :  { %v5790_v62 = vsel %vm5278_vm11, %v4798_v12, %v5534_v29  ;;  %v8172_v57 = vpack.c.bf16 %v5844_v44, %v5844_v44  ;;  %v8170_v9 = vpack.c.bf16 %v5842_v15, %v5842_v15  ;;  %vm5279_vm13 = vcmp.gt.f32.partialorder %v4803_v10, 0.0  ;;  %v3750_v56 = vpop.f32.mrf.mxu0  ;;  %v13038_v12 = vld [vmem:[#allocation16_spill] sm:$0xff] }
 0x3e3   :  { %v8118_v59 = vpack.c.bf16 %v5790_v62, %v5790_v62  ;;  %v5535_v24 = vmul.f32 0.2, %v4803_v10  ;;  %v5847_v47 = vsel %vm5335_vm12, %v5027_v6, %v5591_v58  ;;  %vm5333_vm14 = vcmp.gt.f32.partialorder %v5019_v16, 0.0  ;;  %v8569_v33 = vpop.f32.mrf.mxu1  ;;  %v13039_v58 = vld [vmem:[#allocation19_spill] sm:$0xff] }
 0x3e4   :  { %7125 = vst.msk [vmem:[%s12804_s3 + $0x3ac] sm:$0xf] %vm6889_vm2, %v8172_v57  ;;  %7123 = vst.msk [vmem:[%s12804_s3 + $0x3a4] sm:$0xf] %vm6889_vm2, %v8170_v9  ;;  %v8175_v14 = vpack.c.bf16 %v5847_v47, %v5847_v47  ;;  %v5589_v52 = vmul.f32 0.2, %v5019_v16  ;;  %v3749_v30 = vadd.f32 %v12388_v19, %v3748_v4  ;;  %v5030_v45 = vadd.f32 %v8566_v49, %v13033_v53  ;;  %v3753_v39 = vpop.f32.mrf.mxu0 }
 0x3e5   :  { %7071 = vst.msk [vmem:[%s12804_s3 + $0x2d4] sm:$0xf] %vm6889_vm2, %v8118_v59  ;;  %v5791_v35 = vsel %vm5279_vm13, %v4803_v10, %v5535_v24  ;;  %v5022_v51 = vadd.f32 %v5021_v1, %v13034_v28  ;;  %v3754_v40 = vadd.f32 %v12388_v19, %v3753_v39  ;;  %v5043_v50 = vadd.f32 %v8569_v33, %v13035_v17  ;;  %v5034_v26 = vpop.f32.mrf.mxu1  ;;  %v13040_v9 = vld [vmem:[#allocation17_spill] sm:$0xff] }
 0x3e6   :  { %v8119_v2 = vpack.c.bf16 %v5791_v35, %v5791_v35  ;;  %7128 = vst.msk [vmem:[%s12804_s3 + $0x3b8] sm:$0xf] %vm6889_vm2, %v8175_v14  ;;  %v5845_v25 = vsel %vm5333_vm14, %v5019_v16, %v5589_v52  ;;  %v4806_v20 = vadd.f32 %v13036_v48, %v3749_v30  ;;  %vm5336_vm15 = vcmp.gt.f32.partialorder %v5030_v45, 0.0  ;;  %v3755_v22 = vpop.f32.mrf.mxu0  ;;  %v13041_v14 = vld [vmem:[#allocation69_spill] sm:$0xff]  ;;  %v13042_v35 = vld [vmem:[#allocation67_spill] sm:$0xff] }
 0x3e7   :  { %v8173_v13 = vpack.c.bf16 %v5845_v25, %v5845_v25  ;;  %v5592_v36 = vmul.f32 0.2, %v5030_v45  ;;  %vm5334_vm1 = vcmp.gt.f32.partialorder %v5022_v51, 0.0  ;;  %v5590_v21 = vmul.f32 0.2, %v5022_v51  ;;  %v8570_v6 = vpop.f32.mrf.mxu1  ;;  %v13043_v25 = vld [vmem:[#allocation20_spill] sm:$0xff] }
 0x3e8   :  { %7072 = vst.msk [vmem:[%s12804_s3 + $0x2d8] sm:$0xf] %vm6889_vm2, %v8119_v2  ;;  %vm5280_vm3 = vcmp.gt.f32.partialorder %v4806_v20, 0.0  ;;  %v5536_v31 = vmul.f32 0.2, %v4806_v20  ;;  %v4811_v61 = vadd.f32 %v13037_v0, %v3754_v40  ;;  %vm5339_vm0 = vcmp.gt.f32.partialorder %v5043_v50, 0.0  ;;  %v3756_v11 = vpop.f32.mrf.mxu0 }
 0x3e9   :  { %7126 = vst.msk [vmem:[%s12804_s3 + $0x3b0] sm:$0xf] %vm6889_vm2, %v8173_v13  ;;  %v5848_v41 = vsel %vm5336_vm15, %v5030_v45, %v5592_v36  ;;  %v5846_v42 = vsel %vm5334_vm1, %v5022_v51, %v5590_v21  ;;  %v5595_v37 = vmul.f32 0.2, %v5043_v50  ;;  %v5035_v63 = vadd.f32 %v5034_v26, %v13038_v12  ;;  %v5037_v29 = vpop.f32.mrf.mxu1 }
 0x3ea   :  { %v5792_v54 = vsel %vm5280_vm3, %v4806_v20, %v5536_v31  ;;  %v8176_v27 = vpack.c.bf16 %v5848_v41, %v5848_v41  ;;  %v8174_v43 = vpack.c.bf16 %v5846_v42, %v5846_v42  ;;  %vm5281_vm4 = vcmp.gt.f32.partialorder %v4811_v61, 0.0  ;;  %v3758_v60 = vpop.f32.mrf.mxu0  ;;  %v13044_v41 = vld [vmem:[#allocation22_spill] sm:$0xff] }
 0x3eb   :  { %v8120_v5 = vpack.c.bf16 %v5792_v54, %v5792_v54  ;;  %v5537_v10 = vmul.f32 0.2, %v4811_v61  ;;  %v5851_v4 = vsel %vm5339_vm0, %v5043_v50, %v5595_v37  ;;  %vm5337_vm5 = vcmp.gt.f32.partialorder %v5035_v63, 0.0  ;;  %v8573_v62 = vpop.f32.mrf.mxu1  ;;  %v13045_v54 = vld [vmem:[#allocation21_spill] sm:$0xff] }
 0x3ec   :  { %7129 = vst.msk [vmem:[%s12804_s3 + $0x3bc] sm:$0xf] %vm6889_vm2, %v8176_v27  ;;  %7127 = vst.msk [vmem:[%s12804_s3 + $0x3b4] sm:$0xf] %vm6889_vm2, %v8174_v43  ;;  %v8179_v49 = vpack.c.bf16 %v5851_v4, %v5851_v4  ;;  %v5593_v44 = vmul.f32 0.2, %v5035_v63  ;;  %v3757_v15 = vadd.f32 %v12388_v19, %v3756_v11  ;;  %v5046_v3 = vadd.f32 %v8570_v6, %v13039_v58  ;;  %v3761_v16 = vpop.f32.mrf.mxu0 }
 0x3ed   :  { %7073 = vst.msk [vmem:[%s12804_s3 + $0x2dc] sm:$0xf] %vm6889_vm2, %v8120_v5  ;;  %v5793_v57 = vsel %vm5281_vm4, %v4811_v61, %v5537_v10  ;;  %v5038_v56 = vadd.f32 %v5037_v29, %v13040_v9  ;;  %v3762_v1 = vadd.f32 %v12388_v19, %v3761_v16  ;;  %v5059_v59 = vadd.f32 %v8573_v62, %v12210_v18  ;;  %v5050_v53 = vpop.f32.mrf.mxu1  ;;  %v13046_v10 = vld [vmem:[#allocation73_spill] sm:$0xff]  ;;  %v13047_v16 = vld [vmem:[#allocation2_spill] sm:$0xff] }
 0x3ee   :  { %v8121_v24 = vpack.c.bf16 %v5793_v57, %v5793_v57  ;;  %7132 = vst.msk [vmem:[%s12804_s3 + $0x3c8] sm:$0xf] %vm6889_vm2, %v8179_v49  ;;  %v5849_v47 = vsel %vm5337_vm5, %v5035_v63, %v5593_v44  ;;  %v4814_v52 = vadd.f32 %v13041_v14, %v3757_v15  ;;  %vm5340_vm6 = vcmp.gt.f32.partialorder %v5046_v3, 0.0  ;;  %v3763_v30 = vpop.f32.mrf.mxu0 }
 0x3ef   :  { %v8177_v45 = vpack.c.bf16 %v5849_v47, %v5849_v47  ;;  %v5596_v39 = vmul.f32 0.2, %v5046_v3  ;;  %vm5338_vm7 = vcmp.gt.f32.partialorder %v5038_v56, 0.0  ;;  %v5594_v33 = vmul.f32 0.2, %v5038_v56  ;;  %v8574_v40 = vpop.f32.mrf.mxu1 }
 0x3f0   :  { %7074 = vst.msk [vmem:[%s12804_s3 + $0x2e0] sm:$0xf] %vm6889_vm2, %v8121_v24  ;;  %vm5282_vm8 = vcmp.gt.f32.partialorder %v4814_v52, 0.0  ;;  %v5538_v18 = vmul.f32 0.2, %v4814_v52  ;;  %v4819_v28 = vadd.f32 %v13042_v35, %v3762_v1  ;;  %vm5343_vm9 = vcmp.gt.f32.partialorder %v5059_v59, 0.0  ;;  %v3764_v51 = vpop.f32.mrf.mxu0 }
 0x3f1   :  { %7130 = vst.msk [vmem:[%s12804_s3 + $0x3c0] sm:$0xf] %vm6889_vm2, %v8177_v45  ;;  %v5852_v17 = vsel %vm5340_vm6, %v5046_v3, %v5596_v39  ;;  %v5850_v50 = vsel %vm5338_vm7, %v5038_v56, %v5594_v33  ;;  %v5599_v2 = vmul.f32 0.2, %v5059_v59  ;;  %v5051_v48 = vadd.f32 %v5050_v53, %v13043_v25  ;;  %v5053_v36 = vpop.f32.mrf.mxu1 }
 0x3f2   :  { %v5794_v20 = vsel %vm5282_vm8, %v4814_v52, %v5538_v18  ;;  %v8180_v22 = vpack.c.bf16 %v5852_v17, %v5852_v17  ;;  %v8178_v26 = vpack.c.bf16 %v5850_v50, %v5850_v50  ;;  %vm5283_vm10 = vcmp.gt.f32.partialorder %v4819_v28, 0.0  ;;  %v3766_v13 = vpop.f32.mrf.mxu0 }
 0x3f3   :  { %v8122_v21 = vpack.c.bf16 %v5794_v20, %v5794_v20  ;;  %v5539_v31 = vmul.f32 0.2, %v4819_v28  ;;  %v5855_v0 = vsel %vm5343_vm9, %v5059_v59, %v5599_v2  ;;  %vm5341_vm11 = vcmp.gt.f32.partialorder %v5051_v48, 0.0  ;;  %v8577_v12 = vpop.f32.mrf.mxu1  ;;  %v13048_v20 = vld [vmem:[#allocation13_spill] sm:$0xff] }
 0x3f4   :  { %7133 = vst.msk [vmem:[%s12804_s3 + $0x3cc] sm:$0xf] %vm6889_vm2, %v8180_v22  ;;  %7131 = vst.msk [vmem:[%s12804_s3 + $0x3c4] sm:$0xf] %vm6889_vm2, %v8178_v26  ;;  %v8183_v61 = vpack.c.bf16 %v5855_v0, %v5855_v0  ;;  %v5597_v11 = vmul.f32 0.2, %v5051_v48  ;;  %v3765_v6 = vadd.f32 %v12388_v19, %v3764_v51  ;;  %v5062_v42 = vadd.f32 %v8574_v40, %v13044_v41  ;;  %v3769_v37 = vpop.f32.mrf.mxu0 }
 0x3f5   :  { %7075 = vst.msk [vmem:[%s12804_s3 + $0x2e4] sm:$0xf] %vm6889_vm2, %v8122_v21  ;;  %v5795_v63 = vsel %vm5283_vm10, %v4819_v28, %v5539_v31  ;;  %v5054_v27 = vadd.f32 %v5053_v36, %v13045_v54  ;;  %v3770_v43 = vadd.f32 %v12388_v19, %v3769_v37  ;;  %v5075_v60 = vadd.f32 %v8577_v12, %v12261_v8  ;;  %v5066_v44 = vpop.f32.mrf.mxu1  ;;  %v13049_v31 = vld [vmem:[#allocation75_spill] sm:$0xff] }
 0x3f6   :  { %v8123_v29 = vpack.c.bf16 %v5795_v63, %v5795_v63  ;;  %7136 = vst.msk [vmem:[%s12804_s3 + $0x3d8] sm:$0xf] %vm6889_vm2, %v8183_v61  ;;  %v5853_v5 = vsel %vm5341_vm11, %v5051_v48, %v5597_v11  ;;  %v4822_v4 = vadd.f32 %v13046_v10, %v3765_v6  ;;  %vm5344_vm12 = vcmp.gt.f32.partialorder %v5062_v42, 0.0  ;;  %v3771_v49 = vpop.f32.mrf.mxu0 }
 0x3f7   :  { %v8181_v15 = vpack.c.bf16 %v5853_v5, %v5853_v5  ;;  %v5600_v58 = vmul.f32 0.2, %v5062_v42  ;;  %vm5342_vm13 = vcmp.gt.f32.partialorder %v5054_v27, 0.0  ;;  %v5598_v3 = vmul.f32 0.2, %v5054_v27  ;;  %v8578_v9 = vpop.f32.mrf.mxu1 }
 0x3f8   :  { %7076 = vst.msk [vmem:[%s12804_s3 + $0x2e8] sm:$0xf] %vm6889_vm2, %v8123_v29  ;;  %vm5284_vm14 = vcmp.gt.f32.partialorder %v4822_v4, 0.0  ;;  %v5540_v8 = vmul.f32 0.2, %v4822_v4  ;;  %v4827_v62 = vadd.f32 %v13047_v16, %v3770_v43  ;;  %vm5347_vm15 = vcmp.gt.f32.partialorder %v5075_v60, 0.0  ;;  %v3772_v57 = vpop.f32.mrf.mxu0 }
 0x3f9   :  { %7134 = vst.msk [vmem:[%s12804_s3 + $0x3d0] sm:$0xf] %vm6889_vm2, %v8181_v15  ;;  %v5856_v56 = vsel %vm5344_vm12, %v5062_v42, %v5600_v58  ;;  %v5854_v1 = vsel %vm5342_vm13, %v5054_v27, %v5598_v3  ;;  %v5603_v59 = vmul.f32 0.2, %v5075_v60  ;;  %v5067_v24 = vadd.f32 %v5066_v44, %v12225_v34  ;;  %v5069_v53 = vpop.f32.mrf.mxu1 }
 0x3fa   :  { %v5796_v47 = vsel %vm5284_vm14, %v4822_v4, %v5540_v8  ;;  %v8184_v14 = vpack.c.bf16 %v5856_v56, %v5856_v56  ;;  %v8182_v52 = vpack.c.bf16 %v5854_v1, %v5854_v1  ;;  %vm5285_vm1 = vcmp.gt.f32.partialorder %v4827_v62, 0.0  ;;  %v3774_v30 = vpop.f32.mrf.mxu0  ;;  %v13050_v8 = vld [vmem:[#allocation7_spill] sm:$0xff] }
 0x3fb   :  { %v8124_v45 = vpack.c.bf16 %v5796_v47, %v5796_v47  ;;  %v5541_v39 = vmul.f32 0.2, %v4827_v62  ;;  %v5859_v33 = vsel %vm5347_vm15, %v5075_v60, %v5603_v59  ;;  %vm5345_vm3 = vcmp.gt.f32.partialorder %v5067_v24, 0.0  ;;  %v8581_v40 = vpop.f32.mrf.mxu1 }
 0x3fc   :  { %7137 = vst.msk [vmem:[%s12804_s3 + $0x3dc] sm:$0xf] %vm6889_vm2, %v8184_v14  ;;  %7135 = vst.msk [vmem:[%s12804_s3 + $0x3d4] sm:$0xf] %vm6889_vm2, %v8182_v52  ;;  %v8187_v34 = vpack.c.bf16 %v5859_v33, %v5859_v33  ;;  %v5601_v18 = vmul.f32 0.2, %v5067_v24  ;;  %v3773_v35 = vadd.f32 %v12388_v19, %v3772_v57  ;;  %v5078_v28 = vadd.f32 %v8578_v9, %v12281_v7  ;;  %v3777_v51 = vpop.f32.mrf.mxu0 }
 0x3fd   :  { %7077 = vst.msk [vmem:[%s12804_s3 + $0x2ec] sm:$0xf] %vm6889_vm2, %v8124_v45  ;;  %v5797_v17 = vsel %vm5285_vm1, %v4827_v62, %v5541_v39  ;;  %v5070_v50 = vadd.f32 %v5069_v53, %v12241_v23  ;;  %v3778_v2 = vadd.f32 %v12388_v19, %v3777_v51  ;;  %v5091_v25 = vadd.f32 %v8581_v40, %v12343_v38  ;;  %v5082_v13 = vpop.f32.mrf.mxu1 }
 0x3fe   :  { %v8125_v48 = vpack.c.bf16 %v5797_v17, %v5797_v17  ;;  %7140 = vst.msk [vmem:[%s12804_s3 + $0x3e8] sm:$0xf] %vm6889_vm2, %v8187_v34  ;;  %v5857_v7 = vsel %vm5345_vm3, %v5067_v24, %v5601_v18  ;;  %v4830_v22 = vadd.f32 %v13048_v20, %v3773_v35  ;;  %vm5348_vm0 = vcmp.gt.f32.partialorder %v5078_v28, 0.0  ;;  %v3779_v26 = vpop.f32.mrf.mxu0 }
 0x3ff   :  { %v8185_v36 = vpack.c.bf16 %v5857_v7, %v5857_v7  ;;  %v5604_v21 = vmul.f32 0.2, %v5078_v28  ;;  %vm5346_vm4 = vcmp.gt.f32.partialorder %v5070_v50, 0.0  ;;  %v5602_v23 = vmul.f32 0.2, %v5070_v50  ;;  %v8582_v11 = vpop.f32.mrf.mxu1 }
 0x400   :  { %7078 = vst.msk [vmem:[%s12804_s3 + $0x2f0] sm:$0xf] %vm6889_vm2, %v8125_v48  ;;  %vm5286_vm5 = vcmp.gt.f32.partialorder %v4830_v22, 0.0  ;;  %v5542_v38 = vmul.f32 0.2, %v4830_v22  ;;  %v4835_v0 = vadd.f32 %v13049_v31, %v3778_v2  ;;  %vm5351_vm6 = vcmp.gt.f32.partialorder %v5091_v25, 0.0  ;;  %v3780_v61 = vpop.f32.mrf.mxu0 }
 0x401   :  { %7138 = vst.msk [vmem:[%s12804_s3 + $0x3e0] sm:$0xf] %vm6889_vm2, %v8185_v36  ;;  %v5860_v6 = vsel %vm5348_vm0, %v5078_v28, %v5604_v21  ;;  %v5858_v41 = vsel %vm5346_vm4, %v5070_v50, %v5602_v23  ;;  %v5607_v42 = vmul.f32 0.2, %v5091_v25  ;;  %v5083_v37 = vadd.f32 %v5082_v13, %v12308_v32  ;;  %v5085_v43 = vpop.f32.mrf.mxu1 }
 0x402   :  { %v5798_v12 = vsel %vm5286_vm5, %v4830_v22, %v5542_v38  ;;  %v8188_v63 = vpack.c.bf16 %v5860_v6, %v5860_v6  ;;  %v8186_v54 = vpack.c.bf16 %v5858_v41, %v5858_v41  ;;  %vm5287_vm7 = vcmp.gt.f32.partialorder %v4835_v0, 0.0  ;;  %v3782_v27 = vpop.f32.mrf.mxu0 }
 0x403   :  { %v8126_v60 = vpack.c.bf16 %v5798_v12, %v5798_v12  ;;  %v5543_v29 = vmul.f32 0.2, %v4835_v0  ;;  %v5863_v5 = vsel %vm5351_vm6, %v5091_v25, %v5607_v42  ;;  %vm5349_vm8 = vcmp.gt.f32.partialorder %v5083_v37, 0.0 }
 0x404   :  { %7141 = vst.msk [vmem:[%s12804_s3 + $0x3ec] sm:$0xf] %vm6889_vm2, %v8188_v63  ;;  %7139 = vst.msk [vmem:[%s12804_s3 + $0x3e4] sm:$0xf] %vm6889_vm2, %v8186_v54  ;;  %v8191_v32 = vpack.c.bf16 %v5863_v5, %v5863_v5  ;;  %v5605_v10 = vmul.f32 0.2, %v5083_v37  ;;  %v3781_v4 = vadd.f32 %v12388_v19, %v3780_v61  ;;  %v5094_v49 = vadd.f32 %v8582_v11, %v12363_v46 }
 0x405   :  { %7079 = vst.msk [vmem:[%s12804_s3 + $0x2f4] sm:$0xf] %vm6889_vm2, %v8126_v60  ;;  %v5799_v44 = vsel %vm5287_vm7, %v4835_v0, %v5543_v29  ;;  %v5086_v15 = vadd.f32 %v5085_v43, %v12328_v55 }
 0x406   :  { %v8127_v58 = vpack.c.bf16 %v5799_v44, %v5799_v44  ;;  %7144 = vst.msk [vmem:[%s12804_s3 + $0x3f8] sm:$0xf] %vm6889_vm2, %v8191_v32  ;;  %v5861_v3 = vsel %vm5349_vm8, %v5083_v37, %v5605_v10  ;;  %v4838_v16 = vadd.f32 %v13050_v8, %v3781_v4  ;;  %vm5352_vm9 = vcmp.gt.f32.partialorder %v5094_v49, 0.0 }
 0x407   :  { %v8189_v19 = vpack.c.bf16 %v5861_v3, %v5861_v3  ;;  %v5608_v46 = vmul.f32 0.2, %v5094_v49  ;;  %vm5350_vm10 = vcmp.gt.f32.partialorder %v5086_v15, 0.0  ;;  %v5606_v62 = vmul.f32 0.2, %v5086_v15 }
 0x408   :  { %7080 = vst.msk [vmem:[%s12804_s3 + $0x2f8] sm:$0xf] %vm6889_vm2, %v8127_v58  ;;  %vm5288_vm11 = vcmp.gt.f32.partialorder %v4838_v16, 0.0  ;;  %v5544_v55 = vmul.f32 0.2, %v4838_v16 }
 0x409   :  { %7142 = vst.msk [vmem:[%s12804_s3 + $0x3f0] sm:$0xf] %vm6889_vm2, %v8189_v19  ;;  %v5864_v57 = vsel %vm5352_vm9, %v5094_v49, %v5608_v46  ;;  %v5862_v9 = vsel %vm5350_vm10, %v5086_v15, %v5606_v62 }
 0x40a   :  { %v5800_v56 = vsel %vm5288_vm11, %v4838_v16, %v5544_v55  ;;  %v8192_v1 = vpack.c.bf16 %v5864_v57, %v5864_v57  ;;  %v8190_v59 = vpack.c.bf16 %v5862_v9, %v5862_v9 }
 0x40b   :  { %v8128_v24 = vpack.c.bf16 %v5800_v56, %v5800_v56 }
 0x40c   :  { %7145 = vst.msk [vmem:[%s12804_s3 + $0x3fc] sm:$0xf] %vm6889_vm2, %v8192_v1  ;;  %7143 = vst.msk [vmem:[%s12804_s3 + $0x3f4] sm:$0xf] %vm6889_vm2, %v8190_v59 }
 0x40d   :  { %7081 = vst.msk [vmem:[%s12804_s3 + $0x2fc] sm:$0xf] %vm6889_vm2, %v8128_v24 }

// kernel: _lambda_.8
= control target key start
LH: loop header
LB: loop body
LE: loop exit
PB: predicated region body
PF: predicated region fallthrough
CT: control target
= control target key end

     0   :  { %v1694_v0 = vmov 0   ;;  %vm1271_vm2 = vcmask 60416   ;;  %s2312_s1 = inlined_call_operand.vmem [shape: bf16[256,8], index: 1, kind: input, shape index: {}]   ;;  %s2313_s0 = inlined_call_operand.vmem [shape: bf16[512,256], index: 0, kind: input, shape index: {}]   ;;  %s2314_s2 = inlined_call_operand.vmem [shape: f32[1,8], index: 2, kind: input, shape index: {}]   ;;  %s2315_s3 = inlined_call_operand.vmem [shape: bf16[512,8], index: 3, kind: output, shape index: {}]  }
   0x1   :  { %534 = vmatprep.subr.bf16.mxu0 %v1694_v0  ;;  %1549 = vmatprep.subr.bf16.mxu1 %v1694_v0  ;;  %v1582_v1 = vld [vmem:[%s2312_s1 + $0x38] sm:$0xff]   ;;  %v1583_v2 = vld [vmem:[%s2312_s1 + $0x30] sm:$0xff]   ;;  %v1584_v3 = vld [vmem:[%s2312_s1 + $0x28] sm:$0xff]  }
   0x2   :  { %535 = vmatpush1.bf16.msra.mxu0 %v1582_v1  ;;  %1565 = vmatpush1.bf16.msra.mxu1 %v1582_v1  ;;  %v1585_v4 = vld [vmem:[%s2312_s1 + $0x20] sm:$0xff]   ;;  %v1586_v5 = vld [vmem:[%s2312_s1 + $0x18] sm:$0xff]   ;;  %v1587_v7 = vld [vmem:[%s2312_s1 + $0x10] sm:$0xff]  }
   0x3   :  { %536 = vmatprep.subr.bf16.mxu0 %v1694_v0  ;;  %1550 = vmatprep.subr.bf16.mxu1 %v1694_v0  ;;  %v1600_v6 = vld [vmem:[%s2313_s0 + $0x4] ss:$8 sps:$4 sm:$0xff]   ;;  %v1590_v11 = vld [vmem:[%s2312_s1 + $0x78] sm:$0xff]   ;;  %v1591_v12 = vld [vmem:[%s2312_s1 + $0x70] sm:$0xff]  }
   0x4   :  { %v1603_v8 = vld [vmem:[%s2313_s0 + $0x104] ss:$8 sps:$4 sm:$0xff]   ;;  %566 = vmatprep.mubr.bf16.mxu0 %v1600_v6  ;;  %v1594_v15 = vld [vmem:[%s2312_s1 + $0x58] sm:$0xff]   ;;  %v1595_v16 = vld [vmem:[%s2312_s1 + $0x50] sm:$0xff]  }
   0x5   :  { %694 = vmatprep.mubr.bf16.mxu1 %v1603_v8  ;;  %v1588_v9 = vld [vmem:[%s2312_s1 + $0x8] sm:$0xff]   ;;  %v1589_v10 = vld [vmem:[%s2312_s1] sm:$0xff]   ;;  %v1604_v21 = vld [vmem:[%s2313_s0 + $0x14] ss:$8 sps:$4 sm:$0xff]  }
   0x6   :  { %537 = vmatpush1.bf16.msra.mxu0 %v1583_v2  ;;  %1566 = vmatpush1.bf16.msra.mxu1 %v1583_v2  ;;  %v1592_v13 = vld [vmem:[%s2312_s1 + $0x68] sm:$0xff]   ;;  %v1593_v14 = vld [vmem:[%s2312_s1 + $0x60] sm:$0xff]   ;;  %v1606_v22 = vld [vmem:[%s2313_s0 + $0x114] ss:$8 sps:$4 sm:$0xff]  }
   0x7   :  { %538 = vmatprep.subr.bf16.mxu0 %v1694_v0  ;;  %1551 = vmatprep.subr.bf16.mxu1 %v1694_v0  ;;  %v1596_v17 = vld [vmem:[%s2312_s1 + $0x48] sm:$0xff]   ;;  %v1597_v18 = vld [vmem:[%s2312_s1 + $0x40] sm:$0xff]   ;;  %v1608_v23 = vld [vmem:[%s2313_s0 + $0x10] ss:$8 sps:$4 sm:$0xff]  }
   0x8   :  { %v1598_v19 = vld [vmem:[%s2313_s0] ss:$8 sps:$4 sm:$0xff]   ;;  %v1609_v24 = vld [vmem:[%s2313_s0 + $0x110] ss:$8 sps:$4 sm:$0xff]   ;;  %v1610_v25 = vld [vmem:[%s2313_s0 + $0x24] ss:$8 sps:$4 sm:$0xff]  }
   0x9   :  { %v1601_v20 = vld [vmem:[%s2313_s0 + $0x100] ss:$8 sps:$4 sm:$0xff]   ;;  %v1612_v26 = vld [vmem:[%s2313_s0 + $0x124] ss:$8 sps:$4 sm:$0xff]   ;;  %v1616_v29 = vld [vmem:[%s2313_s0 + $0x34] ss:$8 sps:$4 sm:$0xff]  }
   0xa   :  { %539 = vmatpush1.bf16.msra.mxu0 %v1584_v3  ;;  %1567 = vmatpush1.bf16.msra.mxu1 %v1584_v3  ;;  %v1614_v27 = vld [vmem:[%s2313_s0 + $0x20] ss:$8 sps:$4 sm:$0xff]   ;;  %v1618_v30 = vld [vmem:[%s2313_s0 + $0x134] ss:$8 sps:$4 sm:$0xff]   ;;  %v1620_v31 = vld [vmem:[%s2313_s0 + $0x30] ss:$8 sps:$4 sm:$0xff]  }
   0xb   :  { %540 = vmatprep.subr.bf16.mxu0 %v1694_v0  ;;  %1552 = vmatprep.subr.bf16.mxu1 %v1694_v0  ;;  %v1615_v28 = vld [vmem:[%s2313_s0 + $0x120] ss:$8 sps:$4 sm:$0xff]   ;;  %v1621_v32 = vld [vmem:[%s2313_s0 + $0x130] ss:$8 sps:$4 sm:$0xff]   ;;  %v1622_v33 = vld [vmem:[%s2313_s0 + $0x44] ss:$8 sps:$4 sm:$0xff]  }
   0xc   :  { %v1624_v34 = vld [vmem:[%s2313_s0 + $0x144] ss:$8 sps:$4 sm:$0xff]   ;;  %v1626_v35 = vld [vmem:[%s2313_s0 + $0x40] ss:$8 sps:$4 sm:$0xff]   ;;  %v1628_v37 = vld [vmem:[%s2313_s0 + $0x54] ss:$8 sps:$4 sm:$0xff]  }
   0xd   :  { %v1627_v36 = vld [vmem:[%s2313_s0 + $0x140] ss:$8 sps:$4 sm:$0xff]   ;;  %v1630_v38 = vld [vmem:[%s2313_s0 + $0x154] ss:$8 sps:$4 sm:$0xff]   ;;  %v1632_v39 = vld [vmem:[%s2313_s0 + $0x50] ss:$8 sps:$4 sm:$0xff]  }
   0xe   :  { %541 = vmatpush1.bf16.msra.mxu0 %v1585_v4  ;;  %1568 = vmatpush1.bf16.msra.mxu1 %v1585_v4  ;;  %v1633_v40 = vld [vmem:[%s2313_s0 + $0x150] ss:$8 sps:$4 sm:$0xff]   ;;  %v1634_v41 = vld [vmem:[%s2313_s0 + $0x64] ss:$8 sps:$4 sm:$0xff]   ;;  %v1638_v43 = vld [vmem:[%s2313_s0 + $0x60] ss:$8 sps:$4 sm:$0xff]  }
   0xf   :  { %542 = vmatprep.subr.bf16.mxu0 %v1694_v0  ;;  %1553 = vmatprep.subr.bf16.mxu1 %v1694_v0  ;;  %v1636_v42 = vld [vmem:[%s2313_s0 + $0x164] ss:$8 sps:$4 sm:$0xff]   ;;  %v1639_v44 = vld [vmem:[%s2313_s0 + $0x160] ss:$8 sps:$4 sm:$0xff]   ;;  %v1640_v45 = vld [vmem:[%s2313_s0 + $0x74] ss:$8 sps:$4 sm:$0xff]  }
  0x10   :  { %v1642_v46 = vld [vmem:[%s2313_s0 + $0x174] ss:$8 sps:$4 sm:$0xff]   ;;  %v1644_v47 = vld [vmem:[%s2313_s0 + $0x70] ss:$8 sps:$4 sm:$0xff]   ;;  %v1646_v49 = vld [vmem:[%s2313_s0 + $0x84] ss:$8 sps:$4 sm:$0xff]  }
  0x11   :  { %v1645_v48 = vld [vmem:[%s2313_s0 + $0x170] ss:$8 sps:$4 sm:$0xff]   ;;  %v1648_v50 = vld [vmem:[%s2313_s0 + $0x184] ss:$8 sps:$4 sm:$0xff]   ;;  %v1650_v51 = vld [vmem:[%s2313_s0 + $0x80] ss:$8 sps:$4 sm:$0xff]  }
  0x12   :  { %543 = vmatpush1.bf16.msra.mxu0 %v1586_v5  ;;  %1569 = vmatpush1.bf16.msra.mxu1 %v1586_v5  ;;  %v1651_v52 = vld [vmem:[%s2313_s0 + $0x180] ss:$8 sps:$4 sm:$0xff]   ;;  %v1652_v53 = vld [vmem:[%s2313_s0 + $0x94] ss:$8 sps:$4 sm:$0xff]   ;;  %v1656_v55 = vld [vmem:[%s2313_s0 + $0x90] ss:$8 sps:$4 sm:$0xff]  }
  0x13   :  { %544 = vmatprep.subr.bf16.mxu0 %v1694_v0  ;;  %1554 = vmatprep.subr.bf16.mxu1 %v1694_v0  ;;  %v1654_v54 = vld [vmem:[%s2313_s0 + $0x194] ss:$8 sps:$4 sm:$0xff]   ;;  %v1657_v56 = vld [vmem:[%s2313_s0 + $0x190] ss:$8 sps:$4 sm:$0xff]   ;;  %v1658_v57 = vld [vmem:[%s2313_s0 + $0xa4] ss:$8 sps:$4 sm:$0xff]  }
  0x14   :  { %v1660_v58 = vld [vmem:[%s2313_s0 + $0x1a4] ss:$8 sps:$4 sm:$0xff]   ;;  %v1662_v59 = vld [vmem:[%s2313_s0 + $0xa0] ss:$8 sps:$4 sm:$0xff]   ;;  %v1664_v61 = vld [vmem:[%s2313_s0 + $0xb4] ss:$8 sps:$4 sm:$0xff]  }
  0x15   :  { %v1663_v60 = vld [vmem:[%s2313_s0 + $0x1a0] ss:$8 sps:$4 sm:$0xff]   ;;  %v1666_v62 = vld [vmem:[%s2313_s0 + $0x1b4] ss:$8 sps:$4 sm:$0xff]   ;;  %v1668_v63 = vld [vmem:[%s2313_s0 + $0xb0] ss:$8 sps:$4 sm:$0xff]  }
  0x16   :  { %545 = vmatpush1.bf16.msra.mxu0 %v1587_v7  ;;  %1570 = vmatpush1.bf16.msra.mxu1 %v1587_v7  ;;  %v1670_v1 = vld [vmem:[%s2313_s0 + $0xc4] ss:$8 sps:$4 sm:$0xff]   ;;  %v1674_v3 = vld [vmem:[%s2313_s0 + $0xc0] ss:$8 sps:$4 sm:$0xff]   ;;  %v1676_v5 = vld [vmem:[%s2313_s0 + $0xd4] ss:$8 sps:$4 sm:$0xff]  }
  0x17   :  { %546 = vmatprep.subr.bf16.mxu0 %v1694_v0  ;;  %1555 = vmatprep.subr.bf16.mxu1 %v1694_v0  ;;  %v1672_v2 = vld [vmem:[%s2313_s0 + $0x1c4] ss:$8 sps:$4 sm:$0xff]   ;;  %v1675_v4 = vld [vmem:[%s2313_s0 + $0x1c0] ss:$8 sps:$4 sm:$0xff]   ;;  %v1678_v6 = vld [vmem:[%s2313_s0 + $0x1d4] ss:$8 sps:$4 sm:$0xff]  }
  0x18   :  { %v1680_v7 = vld [vmem:[%s2313_s0 + $0xd0] ss:$8 sps:$4 sm:$0xff]  }
  0x19   :  { %v1681_v8 = vld [vmem:[%s2313_s0 + $0x1d0] ss:$8 sps:$4 sm:$0xff]  }
  0x1a   :  { %547 = vmatpush1.bf16.msra.mxu0 %v1588_v9  ;;  %1571 = vmatpush1.bf16.msra.mxu1 %v1588_v9  ;;  %v1682_v9 = vld [vmem:[%s2313_s0 + $0xe4] ss:$8 sps:$4 sm:$0xff]  }
  0x1b   :  { %548 = vmatprep.subr.bf16.mxu0 %v1694_v0  ;;  %1556 = vmatprep.subr.bf16.mxu1 %v1694_v0 }
  0x1e   :  { %549 = vmatpush1.bf16.msra.mxu0 %v1589_v10  ;;  %1572 = vmatpush1.bf16.msra.mxu1 %v1589_v10  ;;  %v1684_v10 = vld [vmem:[%s2313_s0 + $0x1e4] ss:$8 sps:$4 sm:$0xff]  }
  0x1f   :  { %550 = vmatprep.subr.bf16.mxu0 %v1694_v0  ;;  %1557 = vmatprep.subr.bf16.mxu1 %v1694_v0 }
  0x22   :  { %551 = vmatpush2.bf16.msra.mxu0 %v1590_v11  ;;  %1573 = vmatpush2.bf16.msra.mxu1 %v1590_v11  ;;  %v1686_v11 = vld [vmem:[%s2313_s0 + $0xe0] ss:$8 sps:$4 sm:$0xff]  }
  0x23   :  { %552 = vmatprep.subr.bf16.mxu0 %v1694_v0  ;;  %1558 = vmatprep.subr.bf16.mxu1 %v1694_v0 }
  0x26   :  { %553 = vmatpush2.bf16.msra.mxu0 %v1591_v12  ;;  %1574 = vmatpush2.bf16.msra.mxu1 %v1591_v12  ;;  %v1687_v12 = vld [vmem:[%s2313_s0 + $0x1e0] ss:$8 sps:$4 sm:$0xff]  }
  0x27   :  { %554 = vmatprep.subr.bf16.mxu0 %v1694_v0  ;;  %1559 = vmatprep.subr.bf16.mxu1 %v1694_v0 }
  0x2a   :  { %555 = vmatpush2.bf16.msra.mxu0 %v1592_v13  ;;  %1575 = vmatpush2.bf16.msra.mxu1 %v1592_v13  ;;  %v1688_v13 = vld [vmem:[%s2313_s0 + $0xf4] ss:$8 sps:$4 sm:$0xff]  }
  0x2b   :  { %556 = vmatprep.subr.bf16.mxu0 %v1694_v0  ;;  %1560 = vmatprep.subr.bf16.mxu1 %v1694_v0 }
  0x2e   :  { %557 = vmatpush2.bf16.msra.mxu0 %v1593_v14  ;;  %1576 = vmatpush2.bf16.msra.mxu1 %v1593_v14  ;;  %v1690_v14 = vld [vmem:[%s2313_s0 + $0x1f4] ss:$8 sps:$4 sm:$0xff]  }
  0x2f   :  { %558 = vmatprep.subr.bf16.mxu0 %v1694_v0  ;;  %1561 = vmatprep.subr.bf16.mxu1 %v1694_v0 }
  0x32   :  { %559 = vmatpush2.bf16.msra.mxu0 %v1594_v15  ;;  %1577 = vmatpush2.bf16.msra.mxu1 %v1594_v15  ;;  %v1692_v15 = vld [vmem:[%s2313_s0 + $0xf0] ss:$8 sps:$4 sm:$0xff]  }
  0x33   :  { %560 = vmatprep.subr.bf16.mxu0 %v1694_v0  ;;  %1562 = vmatprep.subr.bf16.mxu1 %v1694_v0 }
  0x36   :  { %561 = vmatpush2.bf16.msra.mxu0 %v1595_v16  ;;  %1578 = vmatpush2.bf16.msra.mxu1 %v1595_v16  ;;  %v1693_v16 = vld [vmem:[%s2313_s0 + $0x1f0] ss:$8 sps:$4 sm:$0xff]  }
  0x37   :  { %562 = vmatprep.subr.bf16.mxu0 %v1694_v0  ;;  %1563 = vmatprep.subr.bf16.mxu1 %v1694_v0 }
  0x3a   :  { %563 = vmatpush2.bf16.msra.mxu0 %v1596_v17  ;;  %1579 = vmatpush2.bf16.msra.mxu1 %v1596_v17  ;;  %v1990_v17 = vld [vmem:[%s2314_s2] ss:$0 sm:$0xff] }
  0x3b   :  { %564 = vmatprep.subr.bf16.mxu0 %v1694_v0  ;;  %1564 = vmatprep.subr.bf16.mxu1 %v1694_v0  ;;  %v1669_v0 = vld [vmem:[%s2313_s0 + $0x1b0] ss:$8 sps:$4 sm:$0xff]  }
  0x3e   :  { %565 = vmatpush2.bf16.msra.mxu0 %v1597_v18  ;;  %1580 = vmatpush2.bf16.msra.mxu1 %v1597_v18 }
  0x41   :  { %567 = vmatmul.mubr.bf16.vlgmr.msra.gmra.mxu0 %v1598_v19  ;;  %695 = vmatmul.mubr.bf16.vlgmr.msra.gmra.mxu1 %v1601_v20 }
  0x42   :  { %574 = vmatprep.mubr.bf16.mxu0 %v1604_v21  ;;  %702 = vmatprep.mubr.bf16.mxu1 %v1606_v22 }
  0x49   :  { %575 = vmatmul.mubr.bf16.gmra.mxu0 %v1608_v23  ;;  %703 = vmatmul.mubr.bf16.gmra.mxu1 %v1609_v24 }
  0x4a   :  { %582 = vmatprep.mubr.bf16.mxu0 %v1610_v25  ;;  %710 = vmatprep.mubr.bf16.mxu1 %v1612_v26 }
  0x51   :  { %583 = vmatmul.mubr.bf16.gmra.mxu0 %v1614_v27  ;;  %711 = vmatmul.mubr.bf16.gmra.mxu1 %v1615_v28 }
  0x52   :  { %590 = vmatprep.mubr.bf16.mxu0 %v1616_v29  ;;  %718 = vmatprep.mubr.bf16.mxu1 %v1618_v30 }
  0x59   :  { %591 = vmatmul.mubr.bf16.gmra.mxu0 %v1620_v31  ;;  %719 = vmatmul.mubr.bf16.gmra.mxu1 %v1621_v32 }
  0x5a   :  { %598 = vmatprep.mubr.bf16.mxu0 %v1622_v33  ;;  %726 = vmatprep.mubr.bf16.mxu1 %v1624_v34 }
  0x61   :  { %599 = vmatmul.mubr.bf16.gmra.mxu0 %v1626_v35  ;;  %727 = vmatmul.mubr.bf16.gmra.mxu1 %v1627_v36 }
  0x62   :  { %606 = vmatprep.mubr.bf16.mxu0 %v1628_v37  ;;  %734 = vmatprep.mubr.bf16.mxu1 %v1630_v38 }
  0x69   :  { %607 = vmatmul.mubr.bf16.gmra.mxu0 %v1632_v39  ;;  %735 = vmatmul.mubr.bf16.gmra.mxu1 %v1633_v40 }
  0x6a   :  { %614 = vmatprep.mubr.bf16.mxu0 %v1634_v41  ;;  %742 = vmatprep.mubr.bf16.mxu1 %v1636_v42 }
  0x71   :  { %615 = vmatmul.mubr.bf16.gmra.mxu0 %v1638_v43  ;;  %743 = vmatmul.mubr.bf16.gmra.mxu1 %v1639_v44 }
  0x72   :  { %622 = vmatprep.mubr.bf16.mxu0 %v1640_v45  ;;  %750 = vmatprep.mubr.bf16.mxu1 %v1642_v46 }
  0x79   :  { %623 = vmatmul.mubr.bf16.gmra.mxu0 %v1644_v47  ;;  %751 = vmatmul.mubr.bf16.gmra.mxu1 %v1645_v48 }
  0x7a   :  { %630 = vmatprep.mubr.bf16.mxu0 %v1646_v49  ;;  %758 = vmatprep.mubr.bf16.mxu1 %v1648_v50 }
  0x81   :  { %631 = vmatmul.mubr.bf16.gmra.mxu0 %v1650_v51  ;;  %759 = vmatmul.mubr.bf16.gmra.mxu1 %v1651_v52 }
  0x82   :  { %638 = vmatprep.mubr.bf16.mxu0 %v1652_v53  ;;  %766 = vmatprep.mubr.bf16.mxu1 %v1654_v54 }
  0x89   :  { %639 = vmatmul.mubr.bf16.gmra.mxu0 %v1656_v55  ;;  %767 = vmatmul.mubr.bf16.gmra.mxu1 %v1657_v56 }
  0x8a   :  { %646 = vmatprep.mubr.bf16.mxu0 %v1658_v57  ;;  %774 = vmatprep.mubr.bf16.mxu1 %v1660_v58 }
  0x91   :  { %647 = vmatmul.mubr.bf16.gmra.mxu0 %v1662_v59  ;;  %775 = vmatmul.mubr.bf16.gmra.mxu1 %v1663_v60 }
  0x92   :  { %654 = vmatprep.mubr.bf16.mxu0 %v1664_v61  ;;  %782 = vmatprep.mubr.bf16.mxu1 %v1666_v62 }
  0x99   :  { %655 = vmatmul.mubr.bf16.gmra.mxu0 %v1668_v63  ;;  %783 = vmatmul.mubr.bf16.gmra.mxu1 %v1669_v0 }
  0x9a   :  { %662 = vmatprep.mubr.bf16.mxu0 %v1670_v1  ;;  %790 = vmatprep.mubr.bf16.mxu1 %v1672_v2 }
  0xa1   :  { %663 = vmatmul.mubr.bf16.gmra.mxu0 %v1674_v3  ;;  %791 = vmatmul.mubr.bf16.gmra.mxu1 %v1675_v4 }
  0xa2   :  { %670 = vmatprep.mubr.bf16.mxu0 %v1676_v5  ;;  %798 = vmatprep.mubr.bf16.mxu1 %v1678_v6 }
  0xa9   :  { %671 = vmatmul.mubr.bf16.gmra.mxu0 %v1680_v7  ;;  %799 = vmatmul.mubr.bf16.gmra.mxu1 %v1681_v8 }
  0xaa   :  { %678 = vmatprep.mubr.bf16.mxu0 %v1682_v9  ;;  %806 = vmatprep.mubr.bf16.mxu1 %v1684_v10 }
  0xb1   :  { %679 = vmatmul.mubr.bf16.gmra.mxu0 %v1686_v11  ;;  %807 = vmatmul.mubr.bf16.gmra.mxu1 %v1687_v12 }
  0xb2   :  { %686 = vmatprep.mubr.bf16.mxu0 %v1688_v13  ;;  %814 = vmatprep.mubr.bf16.mxu1 %v1690_v14 }
  0xb9   :  { %687 = vmatmul.mubr.bf16.gmra.mxu0 %v1692_v15  ;;  %815 = vmatmul.mubr.bf16.gmra.mxu1 %v1693_v16 }
 0x101   :  { %v568_v18 = vpop.f32.mrf.mxu0  ;;  %v696_v19 = vpop.f32.mrf.mxu1 }
 0x102   :  { %v569_v20 = vadd.f32 %v1990_v17, %v568_v18  ;;  %v697_v21 = vadd.f32 %v1990_v17, %v696_v19 }
 0x103   :  { %v570_v22 = vpop.f32.mrf.mxu0  ;;  %v698_v23 = vpop.f32.mrf.mxu1 }
 0x104   :  { %vm823_vm0 = vcmp.gt.f32.partialorder %v569_v20, 0.0  ;;  %v887_v24 = vmul.f32 0.2, %v569_v20  ;;  %vm855_vm1 = vcmp.gt.f32.partialorder %v697_v21, 0.0  ;;  %v919_v25 = vmul.f32 0.2, %v697_v21 }
 0x105   :  { %v571_v26 = vpop.f32.mrf.mxu0  ;;  %v699_v27 = vpop.f32.mrf.mxu1 }
 0x106   :  { %v951_v28 = vsel %vm823_vm0, %v569_v20, %v887_v24  ;;  %v983_v29 = vsel %vm855_vm1, %v697_v21, %v919_v25  ;;  %v572_v30 = vadd.f32 %v1990_v17, %v571_v26  ;;  %v700_v31 = vadd.f32 %v1990_v17, %v699_v27 }
 0x107   :  { %v1485_v32 = vpack.c.bf16 %v951_v28, %v951_v28  ;;  %v1517_v33 = vpack.c.bf16 %v983_v29, %v983_v29  ;;  %v573_v34 = vpop.f32.mrf.mxu0  ;;  %v701_v35 = vpop.f32.mrf.mxu1 }
 0x108   :  { %vm824_vm3 = vcmp.gt.f32.partialorder %v572_v30, 0.0  ;;  %v888_v36 = vmul.f32 0.2, %v572_v30  ;;  %vm856_vm4 = vcmp.gt.f32.partialorder %v700_v31, 0.0  ;;  %v920_v37 = vmul.f32 0.2, %v700_v31 }
 0x109   :  { %1272 = vst.msk [vmem:[%s2315_s3] sm:$0xf] %vm1271_vm2, %v1485_v32  ;;  %1304 = vst.msk [vmem:[%s2315_s3 + $0x80] sm:$0xf] %vm1271_vm2, %v1517_v33  ;;  %v576_v38 = vpop.f32.mrf.mxu0  ;;  %v704_v39 = vpop.f32.mrf.mxu1 }
 0x10a   :  { %v952_v40 = vsel %vm824_vm3, %v572_v30, %v888_v36  ;;  %v984_v41 = vsel %vm856_vm4, %v700_v31, %v920_v37  ;;  %v577_v42 = vadd.f32 %v1990_v17, %v576_v38  ;;  %v705_v43 = vadd.f32 %v1990_v17, %v704_v39 }
 0x10b   :  { %v1486_v44 = vpack.c.bf16 %v952_v40, %v952_v40  ;;  %v1518_v45 = vpack.c.bf16 %v984_v41, %v984_v41  ;;  %v578_v46 = vpop.f32.mrf.mxu0  ;;  %v706_v47 = vpop.f32.mrf.mxu1 }
 0x10c   :  { %vm825_vm5 = vcmp.gt.f32.partialorder %v577_v42, 0.0  ;;  %v889_v48 = vmul.f32 0.2, %v577_v42  ;;  %vm857_vm6 = vcmp.gt.f32.partialorder %v705_v43, 0.0  ;;  %v921_v49 = vmul.f32 0.2, %v705_v43 }
 0x10d   :  { %1273 = vst.msk [vmem:[%s2315_s3 + $0x4] sm:$0xf] %vm1271_vm2, %v1486_v44  ;;  %1305 = vst.msk [vmem:[%s2315_s3 + $0x84] sm:$0xf] %vm1271_vm2, %v1518_v45  ;;  %v579_v50 = vpop.f32.mrf.mxu0  ;;  %v707_v51 = vpop.f32.mrf.mxu1 }
 0x10e   :  { %v953_v52 = vsel %vm825_vm5, %v577_v42, %v889_v48  ;;  %v985_v53 = vsel %vm857_vm6, %v705_v43, %v921_v49  ;;  %v580_v54 = vadd.f32 %v1990_v17, %v579_v50  ;;  %v708_v55 = vadd.f32 %v1990_v17, %v707_v51 }
 0x10f   :  { %v1487_v56 = vpack.c.bf16 %v953_v52, %v953_v52  ;;  %v1519_v57 = vpack.c.bf16 %v985_v53, %v985_v53  ;;  %v581_v58 = vpop.f32.mrf.mxu0  ;;  %v709_v59 = vpop.f32.mrf.mxu1 }
 0x110   :  { %vm826_vm7 = vcmp.gt.f32.partialorder %v580_v54, 0.0  ;;  %v890_v60 = vmul.f32 0.2, %v580_v54  ;;  %vm858_vm8 = vcmp.gt.f32.partialorder %v708_v55, 0.0  ;;  %v922_v61 = vmul.f32 0.2, %v708_v55 }
 0x111   :  { %1274 = vst.msk [vmem:[%s2315_s3 + $0x8] sm:$0xf] %vm1271_vm2, %v1487_v56  ;;  %1306 = vst.msk [vmem:[%s2315_s3 + $0x88] sm:$0xf] %vm1271_vm2, %v1519_v57  ;;  %v584_v62 = vpop.f32.mrf.mxu0  ;;  %v712_v63 = vpop.f32.mrf.mxu1 }
 0x112   :  { %v954_v0 = vsel %vm826_vm7, %v580_v54, %v890_v60  ;;  %v986_v1 = vsel %vm858_vm8, %v708_v55, %v922_v61  ;;  %v585_v2 = vadd.f32 %v1990_v17, %v584_v62  ;;  %v713_v3 = vadd.f32 %v1990_v17, %v712_v63 }
 0x113   :  { %v1488_v4 = vpack.c.bf16 %v954_v0, %v954_v0  ;;  %v1520_v5 = vpack.c.bf16 %v986_v1, %v986_v1  ;;  %v586_v6 = vpop.f32.mrf.mxu0  ;;  %v714_v7 = vpop.f32.mrf.mxu1 }
 0x114   :  { %vm827_vm9 = vcmp.gt.f32.partialorder %v585_v2, 0.0  ;;  %v891_v8 = vmul.f32 0.2, %v585_v2  ;;  %vm859_vm10 = vcmp.gt.f32.partialorder %v713_v3, 0.0  ;;  %v923_v9 = vmul.f32 0.2, %v713_v3 }
 0x115   :  { %1275 = vst.msk [vmem:[%s2315_s3 + $0xc] sm:$0xf] %vm1271_vm2, %v1488_v4  ;;  %1307 = vst.msk [vmem:[%s2315_s3 + $0x8c] sm:$0xf] %vm1271_vm2, %v1520_v5  ;;  %v587_v10 = vpop.f32.mrf.mxu0  ;;  %v715_v11 = vpop.f32.mrf.mxu1 }
 0x116   :  { %v955_v12 = vsel %vm827_vm9, %v585_v2, %v891_v8  ;;  %v987_v13 = vsel %vm859_vm10, %v713_v3, %v923_v9  ;;  %v588_v14 = vadd.f32 %v1990_v17, %v587_v10  ;;  %v716_v15 = vadd.f32 %v1990_v17, %v715_v11 }
 0x117   :  { %v1489_v16 = vpack.c.bf16 %v955_v12, %v955_v12  ;;  %v1521_v18 = vpack.c.bf16 %v987_v13, %v987_v13  ;;  %v589_v19 = vpop.f32.mrf.mxu0  ;;  %v717_v20 = vpop.f32.mrf.mxu1 }
 0x118   :  { %vm828_vm11 = vcmp.gt.f32.partialorder %v588_v14, 0.0  ;;  %v892_v21 = vmul.f32 0.2, %v588_v14  ;;  %vm860_vm12 = vcmp.gt.f32.partialorder %v716_v15, 0.0  ;;  %v924_v22 = vmul.f32 0.2, %v716_v15 }
 0x119   :  { %1276 = vst.msk [vmem:[%s2315_s3 + $0x10] sm:$0xf] %vm1271_vm2, %v1489_v16  ;;  %1308 = vst.msk [vmem:[%s2315_s3 + $0x90] sm:$0xf] %vm1271_vm2, %v1521_v18  ;;  %v592_v23 = vpop.f32.mrf.mxu0  ;;  %v720_v24 = vpop.f32.mrf.mxu1 }
 0x11a   :  { %v956_v25 = vsel %vm828_vm11, %v588_v14, %v892_v21  ;;  %v988_v26 = vsel %vm860_vm12, %v716_v15, %v924_v22  ;;  %v593_v27 = vadd.f32 %v1990_v17, %v592_v23  ;;  %v721_v28 = vadd.f32 %v1990_v17, %v720_v24 }
 0x11b   :  { %v1490_v29 = vpack.c.bf16 %v956_v25, %v956_v25  ;;  %v1522_v30 = vpack.c.bf16 %v988_v26, %v988_v26  ;;  %v594_v31 = vpop.f32.mrf.mxu0  ;;  %v722_v32 = vpop.f32.mrf.mxu1 }
 0x11c   :  { %vm829_vm13 = vcmp.gt.f32.partialorder %v593_v27, 0.0  ;;  %v893_v33 = vmul.f32 0.2, %v593_v27  ;;  %vm861_vm14 = vcmp.gt.f32.partialorder %v721_v28, 0.0  ;;  %v925_v34 = vmul.f32 0.2, %v721_v28 }
 0x11d   :  { %1277 = vst.msk [vmem:[%s2315_s3 + $0x14] sm:$0xf] %vm1271_vm2, %v1490_v29  ;;  %1309 = vst.msk [vmem:[%s2315_s3 + $0x94] sm:$0xf] %vm1271_vm2, %v1522_v30  ;;  %v595_v35 = vpop.f32.mrf.mxu0  ;;  %v723_v36 = vpop.f32.mrf.mxu1 }
 0x11e   :  { %v957_v37 = vsel %vm829_vm13, %v593_v27, %v893_v33  ;;  %v989_v38 = vsel %vm861_vm14, %v721_v28, %v925_v34  ;;  %v596_v39 = vadd.f32 %v1990_v17, %v595_v35  ;;  %v724_v40 = vadd.f32 %v1990_v17, %v723_v36 }
 0x11f   :  { %v1491_v41 = vpack.c.bf16 %v957_v37, %v957_v37  ;;  %v1523_v42 = vpack.c.bf16 %v989_v38, %v989_v38  ;;  %v597_v43 = vpop.f32.mrf.mxu0  ;;  %v725_v44 = vpop.f32.mrf.mxu1 }
 0x120   :  { %vm830_vm15 = vcmp.gt.f32.partialorder %v596_v39, 0.0  ;;  %v894_v45 = vmul.f32 0.2, %v596_v39  ;;  %vm862_vm0 = vcmp.gt.f32.partialorder %v724_v40, 0.0  ;;  %v926_v46 = vmul.f32 0.2, %v724_v40 }
 0x121   :  { %1278 = vst.msk [vmem:[%s2315_s3 + $0x18] sm:$0xf] %vm1271_vm2, %v1491_v41  ;;  %1310 = vst.msk [vmem:[%s2315_s3 + $0x98] sm:$0xf] %vm1271_vm2, %v1523_v42  ;;  %v600_v47 = vpop.f32.mrf.mxu0  ;;  %v728_v48 = vpop.f32.mrf.mxu1 }
 0x122   :  { %v958_v49 = vsel %vm830_vm15, %v596_v39, %v894_v45  ;;  %v990_v50 = vsel %vm862_vm0, %v724_v40, %v926_v46  ;;  %v601_v51 = vadd.f32 %v1990_v17, %v600_v47  ;;  %v729_v52 = vadd.f32 %v1990_v17, %v728_v48 }
 0x123   :  { %v1492_v53 = vpack.c.bf16 %v958_v49, %v958_v49  ;;  %v1524_v54 = vpack.c.bf16 %v990_v50, %v990_v50  ;;  %v602_v55 = vpop.f32.mrf.mxu0  ;;  %v730_v56 = vpop.f32.mrf.mxu1 }
 0x124   :  { %vm831_vm1 = vcmp.gt.f32.partialorder %v601_v51, 0.0  ;;  %v895_v57 = vmul.f32 0.2, %v601_v51  ;;  %vm863_vm3 = vcmp.gt.f32.partialorder %v729_v52, 0.0  ;;  %v927_v58 = vmul.f32 0.2, %v729_v52 }
 0x125   :  { %1279 = vst.msk [vmem:[%s2315_s3 + $0x1c] sm:$0xf] %vm1271_vm2, %v1492_v53  ;;  %1311 = vst.msk [vmem:[%s2315_s3 + $0x9c] sm:$0xf] %vm1271_vm2, %v1524_v54  ;;  %v603_v59 = vpop.f32.mrf.mxu0  ;;  %v731_v60 = vpop.f32.mrf.mxu1 }
 0x126   :  { %v959_v61 = vsel %vm831_vm1, %v601_v51, %v895_v57  ;;  %v991_v62 = vsel %vm863_vm3, %v729_v52, %v927_v58  ;;  %v604_v63 = vadd.f32 %v1990_v17, %v603_v59  ;;  %v732_v0 = vadd.f32 %v1990_v17, %v731_v60 }
 0x127   :  { %v1493_v1 = vpack.c.bf16 %v959_v61, %v959_v61  ;;  %v1525_v2 = vpack.c.bf16 %v991_v62, %v991_v62  ;;  %v605_v3 = vpop.f32.mrf.mxu0  ;;  %v733_v4 = vpop.f32.mrf.mxu1 }
 0x128   :  { %vm832_vm4 = vcmp.gt.f32.partialorder %v604_v63, 0.0  ;;  %v896_v5 = vmul.f32 0.2, %v604_v63  ;;  %vm864_vm5 = vcmp.gt.f32.partialorder %v732_v0, 0.0  ;;  %v928_v6 = vmul.f32 0.2, %v732_v0 }
 0x129   :  { %1280 = vst.msk [vmem:[%s2315_s3 + $0x20] sm:$0xf] %vm1271_vm2, %v1493_v1  ;;  %1312 = vst.msk [vmem:[%s2315_s3 + $0xa0] sm:$0xf] %vm1271_vm2, %v1525_v2  ;;  %v608_v7 = vpop.f32.mrf.mxu0  ;;  %v736_v8 = vpop.f32.mrf.mxu1 }
 0x12a   :  { %v960_v9 = vsel %vm832_vm4, %v604_v63, %v896_v5  ;;  %v992_v10 = vsel %vm864_vm5, %v732_v0, %v928_v6  ;;  %v609_v11 = vadd.f32 %v1990_v17, %v608_v7  ;;  %v737_v12 = vadd.f32 %v1990_v17, %v736_v8 }
 0x12b   :  { %v1494_v13 = vpack.c.bf16 %v960_v9, %v960_v9  ;;  %v1526_v14 = vpack.c.bf16 %v992_v10, %v992_v10  ;;  %v610_v15 = vpop.f32.mrf.mxu0  ;;  %v738_v16 = vpop.f32.mrf.mxu1 }
 0x12c   :  { %vm833_vm6 = vcmp.gt.f32.partialorder %v609_v11, 0.0  ;;  %v897_v18 = vmul.f32 0.2, %v609_v11  ;;  %vm865_vm7 = vcmp.gt.f32.partialorder %v737_v12, 0.0  ;;  %v929_v19 = vmul.f32 0.2, %v737_v12 }
 0x12d   :  { %1281 = vst.msk [vmem:[%s2315_s3 + $0x24] sm:$0xf] %vm1271_vm2, %v1494_v13  ;;  %1313 = vst.msk [vmem:[%s2315_s3 + $0xa4] sm:$0xf] %vm1271_vm2, %v1526_v14  ;;  %v611_v20 = vpop.f32.mrf.mxu0  ;;  %v739_v21 = vpop.f32.mrf.mxu1 }
 0x12e   :  { %v961_v22 = vsel %vm833_vm6, %v609_v11, %v897_v18  ;;  %v993_v23 = vsel %vm865_vm7, %v737_v12, %v929_v19  ;;  %v612_v24 = vadd.f32 %v1990_v17, %v611_v20  ;;  %v740_v25 = vadd.f32 %v1990_v17, %v739_v21 }
 0x12f   :  { %v1495_v26 = vpack.c.bf16 %v961_v22, %v961_v22  ;;  %v1527_v27 = vpack.c.bf16 %v993_v23, %v993_v23  ;;  %v613_v28 = vpop.f32.mrf.mxu0  ;;  %v741_v29 = vpop.f32.mrf.mxu1 }
 0x130   :  { %vm834_vm8 = vcmp.gt.f32.partialorder %v612_v24, 0.0  ;;  %v898_v30 = vmul.f32 0.2, %v612_v24  ;;  %vm866_vm9 = vcmp.gt.f32.partialorder %v740_v25, 0.0  ;;  %v930_v31 = vmul.f32 0.2, %v740_v25 }
 0x131   :  { %1282 = vst.msk [vmem:[%s2315_s3 + $0x28] sm:$0xf] %vm1271_vm2, %v1495_v26  ;;  %1314 = vst.msk [vmem:[%s2315_s3 + $0xa8] sm:$0xf] %vm1271_vm2, %v1527_v27  ;;  %v616_v32 = vpop.f32.mrf.mxu0  ;;  %v744_v33 = vpop.f32.mrf.mxu1 }
 0x132   :  { %v962_v34 = vsel %vm834_vm8, %v612_v24, %v898_v30  ;;  %v994_v35 = vsel %vm866_vm9, %v740_v25, %v930_v31  ;;  %v617_v36 = vadd.f32 %v1990_v17, %v616_v32  ;;  %v745_v37 = vadd.f32 %v1990_v17, %v744_v33 }
 0x133   :  { %v1496_v38 = vpack.c.bf16 %v962_v34, %v962_v34  ;;  %v1528_v39 = vpack.c.bf16 %v994_v35, %v994_v35  ;;  %v618_v40 = vpop.f32.mrf.mxu0  ;;  %v746_v41 = vpop.f32.mrf.mxu1 }
 0x134   :  { %vm835_vm10 = vcmp.gt.f32.partialorder %v617_v36, 0.0  ;;  %v899_v42 = vmul.f32 0.2, %v617_v36  ;;  %vm867_vm11 = vcmp.gt.f32.partialorder %v745_v37, 0.0  ;;  %v931_v43 = vmul.f32 0.2, %v745_v37 }
 0x135   :  { %1283 = vst.msk [vmem:[%s2315_s3 + $0x2c] sm:$0xf] %vm1271_vm2, %v1496_v38  ;;  %1315 = vst.msk [vmem:[%s2315_s3 + $0xac] sm:$0xf] %vm1271_vm2, %v1528_v39  ;;  %v619_v44 = vpop.f32.mrf.mxu0  ;;  %v747_v45 = vpop.f32.mrf.mxu1 }
 0x136   :  { %v963_v46 = vsel %vm835_vm10, %v617_v36, %v899_v42  ;;  %v995_v47 = vsel %vm867_vm11, %v745_v37, %v931_v43  ;;  %v620_v48 = vadd.f32 %v1990_v17, %v619_v44  ;;  %v748_v49 = vadd.f32 %v1990_v17, %v747_v45 }
 0x137   :  { %v1497_v50 = vpack.c.bf16 %v963_v46, %v963_v46  ;;  %v1529_v51 = vpack.c.bf16 %v995_v47, %v995_v47  ;;  %v621_v52 = vpop.f32.mrf.mxu0  ;;  %v749_v53 = vpop.f32.mrf.mxu1 }
 0x138   :  { %vm836_vm12 = vcmp.gt.f32.partialorder %v620_v48, 0.0  ;;  %v900_v54 = vmul.f32 0.2, %v620_v48  ;;  %vm868_vm13 = vcmp.gt.f32.partialorder %v748_v49, 0.0  ;;  %v932_v55 = vmul.f32 0.2, %v748_v49 }
 0x139   :  { %1284 = vst.msk [vmem:[%s2315_s3 + $0x30] sm:$0xf] %vm1271_vm2, %v1497_v50  ;;  %1316 = vst.msk [vmem:[%s2315_s3 + $0xb0] sm:$0xf] %vm1271_vm2, %v1529_v51  ;;  %v624_v56 = vpop.f32.mrf.mxu0  ;;  %v752_v57 = vpop.f32.mrf.mxu1 }
 0x13a   :  { %v964_v58 = vsel %vm836_vm12, %v620_v48, %v900_v54  ;;  %v996_v59 = vsel %vm868_vm13, %v748_v49, %v932_v55  ;;  %v625_v60 = vadd.f32 %v1990_v17, %v624_v56  ;;  %v753_v61 = vadd.f32 %v1990_v17, %v752_v57 }
 0x13b   :  { %v1498_v62 = vpack.c.bf16 %v964_v58, %v964_v58  ;;  %v1530_v63 = vpack.c.bf16 %v996_v59, %v996_v59  ;;  %v626_v0 = vpop.f32.mrf.mxu0  ;;  %v754_v1 = vpop.f32.mrf.mxu1 }
 0x13c   :  { %vm837_vm14 = vcmp.gt.f32.partialorder %v625_v60, 0.0  ;;  %v901_v2 = vmul.f32 0.2, %v625_v60  ;;  %vm869_vm15 = vcmp.gt.f32.partialorder %v753_v61, 0.0  ;;  %v933_v3 = vmul.f32 0.2, %v753_v61 }
 0x13d   :  { %1285 = vst.msk [vmem:[%s2315_s3 + $0x34] sm:$0xf] %vm1271_vm2, %v1498_v62  ;;  %1317 = vst.msk [vmem:[%s2315_s3 + $0xb4] sm:$0xf] %vm1271_vm2, %v1530_v63  ;;  %v627_v4 = vpop.f32.mrf.mxu0  ;;  %v755_v5 = vpop.f32.mrf.mxu1 }
 0x13e   :  { %v965_v6 = vsel %vm837_vm14, %v625_v60, %v901_v2  ;;  %v997_v7 = vsel %vm869_vm15, %v753_v61, %v933_v3  ;;  %v628_v8 = vadd.f32 %v1990_v17, %v627_v4  ;;  %v756_v9 = vadd.f32 %v1990_v17, %v755_v5 }
 0x13f   :  { %v1499_v10 = vpack.c.bf16 %v965_v6, %v965_v6  ;;  %v1531_v11 = vpack.c.bf16 %v997_v7, %v997_v7  ;;  %v629_v12 = vpop.f32.mrf.mxu0  ;;  %v757_v13 = vpop.f32.mrf.mxu1 }
 0x140   :  { %vm838_vm0 = vcmp.gt.f32.partialorder %v628_v8, 0.0  ;;  %v902_v14 = vmul.f32 0.2, %v628_v8  ;;  %vm870_vm1 = vcmp.gt.f32.partialorder %v756_v9, 0.0  ;;  %v934_v15 = vmul.f32 0.2, %v756_v9 }
 0x141   :  { %1286 = vst.msk [vmem:[%s2315_s3 + $0x38] sm:$0xf] %vm1271_vm2, %v1499_v10  ;;  %1318 = vst.msk [vmem:[%s2315_s3 + $0xb8] sm:$0xf] %vm1271_vm2, %v1531_v11  ;;  %v632_v16 = vpop.f32.mrf.mxu0  ;;  %v760_v18 = vpop.f32.mrf.mxu1 }
 0x142   :  { %v966_v19 = vsel %vm838_vm0, %v628_v8, %v902_v14  ;;  %v998_v20 = vsel %vm870_vm1, %v756_v9, %v934_v15  ;;  %v633_v21 = vadd.f32 %v1990_v17, %v632_v16  ;;  %v761_v22 = vadd.f32 %v1990_v17, %v760_v18 }
 0x143   :  { %v1500_v23 = vpack.c.bf16 %v966_v19, %v966_v19  ;;  %v1532_v24 = vpack.c.bf16 %v998_v20, %v998_v20  ;;  %v634_v25 = vpop.f32.mrf.mxu0  ;;  %v762_v26 = vpop.f32.mrf.mxu1 }
 0x144   :  { %vm839_vm3 = vcmp.gt.f32.partialorder %v633_v21, 0.0  ;;  %v903_v27 = vmul.f32 0.2, %v633_v21  ;;  %vm871_vm4 = vcmp.gt.f32.partialorder %v761_v22, 0.0  ;;  %v935_v28 = vmul.f32 0.2, %v761_v22 }
 0x145   :  { %1287 = vst.msk [vmem:[%s2315_s3 + $0x3c] sm:$0xf] %vm1271_vm2, %v1500_v23  ;;  %1319 = vst.msk [vmem:[%s2315_s3 + $0xbc] sm:$0xf] %vm1271_vm2, %v1532_v24  ;;  %v635_v29 = vpop.f32.mrf.mxu0  ;;  %v763_v30 = vpop.f32.mrf.mxu1 }
 0x146   :  { %v967_v31 = vsel %vm839_vm3, %v633_v21, %v903_v27  ;;  %v999_v32 = vsel %vm871_vm4, %v761_v22, %v935_v28  ;;  %v636_v33 = vadd.f32 %v1990_v17, %v635_v29  ;;  %v764_v34 = vadd.f32 %v1990_v17, %v763_v30 }
 0x147   :  { %v1501_v35 = vpack.c.bf16 %v967_v31, %v967_v31  ;;  %v1533_v36 = vpack.c.bf16 %v999_v32, %v999_v32  ;;  %v637_v37 = vpop.f32.mrf.mxu0  ;;  %v765_v38 = vpop.f32.mrf.mxu1 }
 0x148   :  { %vm840_vm5 = vcmp.gt.f32.partialorder %v636_v33, 0.0  ;;  %v904_v39 = vmul.f32 0.2, %v636_v33  ;;  %vm872_vm6 = vcmp.gt.f32.partialorder %v764_v34, 0.0  ;;  %v936_v40 = vmul.f32 0.2, %v764_v34 }
 0x149   :  { %1288 = vst.msk [vmem:[%s2315_s3 + $0x40] sm:$0xf] %vm1271_vm2, %v1501_v35  ;;  %1320 = vst.msk [vmem:[%s2315_s3 + $0xc0] sm:$0xf] %vm1271_vm2, %v1533_v36  ;;  %v640_v41 = vpop.f32.mrf.mxu0  ;;  %v768_v42 = vpop.f32.mrf.mxu1 }
 0x14a   :  { %v968_v43 = vsel %vm840_vm5, %v636_v33, %v904_v39  ;;  %v1000_v44 = vsel %vm872_vm6, %v764_v34, %v936_v40  ;;  %v641_v45 = vadd.f32 %v1990_v17, %v640_v41  ;;  %v769_v46 = vadd.f32 %v1990_v17, %v768_v42 }
 0x14b   :  { %v1502_v47 = vpack.c.bf16 %v968_v43, %v968_v43  ;;  %v1534_v48 = vpack.c.bf16 %v1000_v44, %v1000_v44  ;;  %v642_v49 = vpop.f32.mrf.mxu0  ;;  %v770_v50 = vpop.f32.mrf.mxu1 }
 0x14c   :  { %vm841_vm7 = vcmp.gt.f32.partialorder %v641_v45, 0.0  ;;  %v905_v51 = vmul.f32 0.2, %v641_v45  ;;  %vm873_vm8 = vcmp.gt.f32.partialorder %v769_v46, 0.0  ;;  %v937_v52 = vmul.f32 0.2, %v769_v46 }
 0x14d   :  { %1289 = vst.msk [vmem:[%s2315_s3 + $0x44] sm:$0xf] %vm1271_vm2, %v1502_v47  ;;  %1321 = vst.msk [vmem:[%s2315_s3 + $0xc4] sm:$0xf] %vm1271_vm2, %v1534_v48  ;;  %v643_v53 = vpop.f32.mrf.mxu0  ;;  %v771_v54 = vpop.f32.mrf.mxu1 }
 0x14e   :  { %v969_v55 = vsel %vm841_vm7, %v641_v45, %v905_v51  ;;  %v1001_v56 = vsel %vm873_vm8, %v769_v46, %v937_v52  ;;  %v644_v57 = vadd.f32 %v1990_v17, %v643_v53  ;;  %v772_v58 = vadd.f32 %v1990_v17, %v771_v54 }
 0x14f   :  { %v1503_v59 = vpack.c.bf16 %v969_v55, %v969_v55  ;;  %v1535_v60 = vpack.c.bf16 %v1001_v56, %v1001_v56  ;;  %v645_v61 = vpop.f32.mrf.mxu0  ;;  %v773_v62 = vpop.f32.mrf.mxu1 }
 0x150   :  { %vm842_vm9 = vcmp.gt.f32.partialorder %v644_v57, 0.0  ;;  %v906_v63 = vmul.f32 0.2, %v644_v57  ;;  %vm874_vm10 = vcmp.gt.f32.partialorder %v772_v58, 0.0  ;;  %v938_v0 = vmul.f32 0.2, %v772_v58 }
 0x151   :  { %1290 = vst.msk [vmem:[%s2315_s3 + $0x48] sm:$0xf] %vm1271_vm2, %v1503_v59  ;;  %1322 = vst.msk [vmem:[%s2315_s3 + $0xc8] sm:$0xf] %vm1271_vm2, %v1535_v60  ;;  %v648_v1 = vpop.f32.mrf.mxu0  ;;  %v776_v2 = vpop.f32.mrf.mxu1 }
 0x152   :  { %v970_v3 = vsel %vm842_vm9, %v644_v57, %v906_v63  ;;  %v1002_v4 = vsel %vm874_vm10, %v772_v58, %v938_v0  ;;  %v649_v5 = vadd.f32 %v1990_v17, %v648_v1  ;;  %v777_v6 = vadd.f32 %v1990_v17, %v776_v2 }
 0x153   :  { %v1504_v7 = vpack.c.bf16 %v970_v3, %v970_v3  ;;  %v1536_v8 = vpack.c.bf16 %v1002_v4, %v1002_v4  ;;  %v650_v9 = vpop.f32.mrf.mxu0  ;;  %v778_v10 = vpop.f32.mrf.mxu1 }
 0x154   :  { %vm843_vm11 = vcmp.gt.f32.partialorder %v649_v5, 0.0  ;;  %v907_v11 = vmul.f32 0.2, %v649_v5  ;;  %vm875_vm12 = vcmp.gt.f32.partialorder %v777_v6, 0.0  ;;  %v939_v12 = vmul.f32 0.2, %v777_v6 }
 0x155   :  { %1291 = vst.msk [vmem:[%s2315_s3 + $0x4c] sm:$0xf] %vm1271_vm2, %v1504_v7  ;;  %1323 = vst.msk [vmem:[%s2315_s3 + $0xcc] sm:$0xf] %vm1271_vm2, %v1536_v8  ;;  %v651_v13 = vpop.f32.mrf.mxu0  ;;  %v779_v14 = vpop.f32.mrf.mxu1 }
 0x156   :  { %v971_v15 = vsel %vm843_vm11, %v649_v5, %v907_v11  ;;  %v1003_v16 = vsel %vm875_vm12, %v777_v6, %v939_v12  ;;  %v652_v18 = vadd.f32 %v1990_v17, %v651_v13  ;;  %v780_v19 = vadd.f32 %v1990_v17, %v779_v14 }
 0x157   :  { %v1505_v20 = vpack.c.bf16 %v971_v15, %v971_v15  ;;  %v1537_v21 = vpack.c.bf16 %v1003_v16, %v1003_v16  ;;  %v653_v22 = vpop.f32.mrf.mxu0  ;;  %v781_v23 = vpop.f32.mrf.mxu1 }
 0x158   :  { %vm844_vm13 = vcmp.gt.f32.partialorder %v652_v18, 0.0  ;;  %v908_v24 = vmul.f32 0.2, %v652_v18  ;;  %vm876_vm14 = vcmp.gt.f32.partialorder %v780_v19, 0.0  ;;  %v940_v25 = vmul.f32 0.2, %v780_v19 }
 0x159   :  { %1292 = vst.msk [vmem:[%s2315_s3 + $0x50] sm:$0xf] %vm1271_vm2, %v1505_v20  ;;  %1324 = vst.msk [vmem:[%s2315_s3 + $0xd0] sm:$0xf] %vm1271_vm2, %v1537_v21  ;;  %v656_v26 = vpop.f32.mrf.mxu0  ;;  %v784_v27 = vpop.f32.mrf.mxu1 }
 0x15a   :  { %v972_v28 = vsel %vm844_vm13, %v652_v18, %v908_v24  ;;  %v1004_v29 = vsel %vm876_vm14, %v780_v19, %v940_v25  ;;  %v657_v30 = vadd.f32 %v1990_v17, %v656_v26  ;;  %v785_v31 = vadd.f32 %v1990_v17, %v784_v27 }
 0x15b   :  { %v1506_v32 = vpack.c.bf16 %v972_v28, %v972_v28  ;;  %v1538_v33 = vpack.c.bf16 %v1004_v29, %v1004_v29  ;;  %v658_v34 = vpop.f32.mrf.mxu0  ;;  %v786_v35 = vpop.f32.mrf.mxu1 }
 0x15c   :  { %vm845_vm15 = vcmp.gt.f32.partialorder %v657_v30, 0.0  ;;  %v909_v36 = vmul.f32 0.2, %v657_v30  ;;  %vm877_vm0 = vcmp.gt.f32.partialorder %v785_v31, 0.0  ;;  %v941_v37 = vmul.f32 0.2, %v785_v31 }
 0x15d   :  { %1293 = vst.msk [vmem:[%s2315_s3 + $0x54] sm:$0xf] %vm1271_vm2, %v1506_v32  ;;  %1325 = vst.msk [vmem:[%s2315_s3 + $0xd4] sm:$0xf] %vm1271_vm2, %v1538_v33  ;;  %v659_v38 = vpop.f32.mrf.mxu0  ;;  %v787_v39 = vpop.f32.mrf.mxu1 }
 0x15e   :  { %v973_v40 = vsel %vm845_vm15, %v657_v30, %v909_v36  ;;  %v1005_v41 = vsel %vm877_vm0, %v785_v31, %v941_v37  ;;  %v660_v42 = vadd.f32 %v1990_v17, %v659_v38  ;;  %v788_v43 = vadd.f32 %v1990_v17, %v787_v39 }
 0x15f   :  { %v1507_v44 = vpack.c.bf16 %v973_v40, %v973_v40  ;;  %v1539_v45 = vpack.c.bf16 %v1005_v41, %v1005_v41  ;;  %v661_v46 = vpop.f32.mrf.mxu0  ;;  %v789_v47 = vpop.f32.mrf.mxu1 }
 0x160   :  { %vm846_vm1 = vcmp.gt.f32.partialorder %v660_v42, 0.0  ;;  %v910_v48 = vmul.f32 0.2, %v660_v42  ;;  %vm878_vm3 = vcmp.gt.f32.partialorder %v788_v43, 0.0  ;;  %v942_v49 = vmul.f32 0.2, %v788_v43 }
 0x161   :  { %1294 = vst.msk [vmem:[%s2315_s3 + $0x58] sm:$0xf] %vm1271_vm2, %v1507_v44  ;;  %1326 = vst.msk [vmem:[%s2315_s3 + $0xd8] sm:$0xf] %vm1271_vm2, %v1539_v45  ;;  %v664_v50 = vpop.f32.mrf.mxu0  ;;  %v792_v51 = vpop.f32.mrf.mxu1 }
 0x162   :  { %v974_v52 = vsel %vm846_vm1, %v660_v42, %v910_v48  ;;  %v1006_v53 = vsel %vm878_vm3, %v788_v43, %v942_v49  ;;  %v665_v54 = vadd.f32 %v1990_v17, %v664_v50  ;;  %v793_v55 = vadd.f32 %v1990_v17, %v792_v51 }
 0x163   :  { %v1508_v56 = vpack.c.bf16 %v974_v52, %v974_v52  ;;  %v1540_v57 = vpack.c.bf16 %v1006_v53, %v1006_v53  ;;  %v666_v58 = vpop.f32.mrf.mxu0  ;;  %v794_v59 = vpop.f32.mrf.mxu1 }
 0x164   :  { %vm847_vm4 = vcmp.gt.f32.partialorder %v665_v54, 0.0  ;;  %v911_v60 = vmul.f32 0.2, %v665_v54  ;;  %vm879_vm5 = vcmp.gt.f32.partialorder %v793_v55, 0.0  ;;  %v943_v61 = vmul.f32 0.2, %v793_v55 }
 0x165   :  { %1295 = vst.msk [vmem:[%s2315_s3 + $0x5c] sm:$0xf] %vm1271_vm2, %v1508_v56  ;;  %1327 = vst.msk [vmem:[%s2315_s3 + $0xdc] sm:$0xf] %vm1271_vm2, %v1540_v57  ;;  %v667_v62 = vpop.f32.mrf.mxu0  ;;  %v795_v63 = vpop.f32.mrf.mxu1 }
 0x166   :  { %v975_v0 = vsel %vm847_vm4, %v665_v54, %v911_v60  ;;  %v1007_v1 = vsel %vm879_vm5, %v793_v55, %v943_v61  ;;  %v668_v2 = vadd.f32 %v1990_v17, %v667_v62  ;;  %v796_v3 = vadd.f32 %v1990_v17, %v795_v63 }
 0x167   :  { %v1509_v4 = vpack.c.bf16 %v975_v0, %v975_v0  ;;  %v1541_v5 = vpack.c.bf16 %v1007_v1, %v1007_v1  ;;  %v669_v6 = vpop.f32.mrf.mxu0  ;;  %v797_v7 = vpop.f32.mrf.mxu1 }
 0x168   :  { %vm848_vm6 = vcmp.gt.f32.partialorder %v668_v2, 0.0  ;;  %v912_v8 = vmul.f32 0.2, %v668_v2  ;;  %vm880_vm7 = vcmp.gt.f32.partialorder %v796_v3, 0.0  ;;  %v944_v9 = vmul.f32 0.2, %v796_v3 }
 0x169   :  { %1296 = vst.msk [vmem:[%s2315_s3 + $0x60] sm:$0xf] %vm1271_vm2, %v1509_v4  ;;  %1328 = vst.msk [vmem:[%s2315_s3 + $0xe0] sm:$0xf] %vm1271_vm2, %v1541_v5  ;;  %v672_v10 = vpop.f32.mrf.mxu0  ;;  %v800_v11 = vpop.f32.mrf.mxu1 }
 0x16a   :  { %v976_v12 = vsel %vm848_vm6, %v668_v2, %v912_v8  ;;  %v1008_v13 = vsel %vm880_vm7, %v796_v3, %v944_v9  ;;  %v673_v14 = vadd.f32 %v1990_v17, %v672_v10  ;;  %v801_v15 = vadd.f32 %v1990_v17, %v800_v11 }
 0x16b   :  { %v1510_v16 = vpack.c.bf16 %v976_v12, %v976_v12  ;;  %v1542_v18 = vpack.c.bf16 %v1008_v13, %v1008_v13  ;;  %v674_v19 = vpop.f32.mrf.mxu0  ;;  %v802_v20 = vpop.f32.mrf.mxu1 }
 0x16c   :  { %vm849_vm8 = vcmp.gt.f32.partialorder %v673_v14, 0.0  ;;  %v913_v21 = vmul.f32 0.2, %v673_v14  ;;  %vm881_vm9 = vcmp.gt.f32.partialorder %v801_v15, 0.0  ;;  %v945_v22 = vmul.f32 0.2, %v801_v15 }
 0x16d   :  { %1297 = vst.msk [vmem:[%s2315_s3 + $0x64] sm:$0xf] %vm1271_vm2, %v1510_v16  ;;  %1329 = vst.msk [vmem:[%s2315_s3 + $0xe4] sm:$0xf] %vm1271_vm2, %v1542_v18  ;;  %v675_v23 = vpop.f32.mrf.mxu0  ;;  %v803_v24 = vpop.f32.mrf.mxu1 }
 0x16e   :  { %v977_v25 = vsel %vm849_vm8, %v673_v14, %v913_v21  ;;  %v1009_v26 = vsel %vm881_vm9, %v801_v15, %v945_v22  ;;  %v676_v27 = vadd.f32 %v1990_v17, %v675_v23  ;;  %v804_v28 = vadd.f32 %v1990_v17, %v803_v24 }
 0x16f   :  { %v1511_v29 = vpack.c.bf16 %v977_v25, %v977_v25  ;;  %v1543_v30 = vpack.c.bf16 %v1009_v26, %v1009_v26  ;;  %v677_v31 = vpop.f32.mrf.mxu0  ;;  %v805_v32 = vpop.f32.mrf.mxu1 }
 0x170   :  { %vm850_vm10 = vcmp.gt.f32.partialorder %v676_v27, 0.0  ;;  %v914_v33 = vmul.f32 0.2, %v676_v27  ;;  %vm882_vm11 = vcmp.gt.f32.partialorder %v804_v28, 0.0  ;;  %v946_v34 = vmul.f32 0.2, %v804_v28 }
 0x171   :  { %1298 = vst.msk [vmem:[%s2315_s3 + $0x68] sm:$0xf] %vm1271_vm2, %v1511_v29  ;;  %1330 = vst.msk [vmem:[%s2315_s3 + $0xe8] sm:$0xf] %vm1271_vm2, %v1543_v30  ;;  %v680_v35 = vpop.f32.mrf.mxu0  ;;  %v808_v36 = vpop.f32.mrf.mxu1 }
 0x172   :  { %v978_v37 = vsel %vm850_vm10, %v676_v27, %v914_v33  ;;  %v1010_v38 = vsel %vm882_vm11, %v804_v28, %v946_v34  ;;  %v681_v39 = vadd.f32 %v1990_v17, %v680_v35  ;;  %v809_v40 = vadd.f32 %v1990_v17, %v808_v36 }
 0x173   :  { %v1512_v41 = vpack.c.bf16 %v978_v37, %v978_v37  ;;  %v1544_v42 = vpack.c.bf16 %v1010_v38, %v1010_v38  ;;  %v682_v43 = vpop.f32.mrf.mxu0  ;;  %v810_v44 = vpop.f32.mrf.mxu1 }
 0x174   :  { %vm851_vm12 = vcmp.gt.f32.partialorder %v681_v39, 0.0  ;;  %v915_v45 = vmul.f32 0.2, %v681_v39  ;;  %vm883_vm13 = vcmp.gt.f32.partialorder %v809_v40, 0.0  ;;  %v947_v46 = vmul.f32 0.2, %v809_v40 }
 0x175   :  { %1299 = vst.msk [vmem:[%s2315_s3 + $0x6c] sm:$0xf] %vm1271_vm2, %v1512_v41  ;;  %1331 = vst.msk [vmem:[%s2315_s3 + $0xec] sm:$0xf] %vm1271_vm2, %v1544_v42  ;;  %v683_v47 = vpop.f32.mrf.mxu0  ;;  %v811_v48 = vpop.f32.mrf.mxu1 }
 0x176   :  { %v979_v49 = vsel %vm851_vm12, %v681_v39, %v915_v45  ;;  %v1011_v50 = vsel %vm883_vm13, %v809_v40, %v947_v46  ;;  %v684_v51 = vadd.f32 %v1990_v17, %v683_v47  ;;  %v812_v52 = vadd.f32 %v1990_v17, %v811_v48 }
 0x177   :  { %v1513_v53 = vpack.c.bf16 %v979_v49, %v979_v49  ;;  %v1545_v54 = vpack.c.bf16 %v1011_v50, %v1011_v50  ;;  %v685_v55 = vpop.f32.mrf.mxu0  ;;  %v813_v56 = vpop.f32.mrf.mxu1 }
 0x178   :  { %vm852_vm14 = vcmp.gt.f32.partialorder %v684_v51, 0.0  ;;  %v916_v57 = vmul.f32 0.2, %v684_v51  ;;  %vm884_vm15 = vcmp.gt.f32.partialorder %v812_v52, 0.0  ;;  %v948_v58 = vmul.f32 0.2, %v812_v52 }
 0x179   :  { %1300 = vst.msk [vmem:[%s2315_s3 + $0x70] sm:$0xf] %vm1271_vm2, %v1513_v53  ;;  %1332 = vst.msk [vmem:[%s2315_s3 + $0xf0] sm:$0xf] %vm1271_vm2, %v1545_v54  ;;  %v688_v59 = vpop.f32.mrf.mxu0  ;;  %v816_v60 = vpop.f32.mrf.mxu1 }
 0x17a   :  { %v980_v61 = vsel %vm852_vm14, %v684_v51, %v916_v57  ;;  %v1012_v62 = vsel %vm884_vm15, %v812_v52, %v948_v58  ;;  %v689_v63 = vadd.f32 %v1990_v17, %v688_v59  ;;  %v817_v0 = vadd.f32 %v1990_v17, %v816_v60 }
 0x17b   :  { %v1514_v1 = vpack.c.bf16 %v980_v61, %v980_v61  ;;  %v1546_v2 = vpack.c.bf16 %v1012_v62, %v1012_v62  ;;  %v690_v3 = vpop.f32.mrf.mxu0  ;;  %v818_v4 = vpop.f32.mrf.mxu1 }
 0x17c   :  { %vm853_vm0 = vcmp.gt.f32.partialorder %v689_v63, 0.0  ;;  %v917_v5 = vmul.f32 0.2, %v689_v63  ;;  %vm885_vm1 = vcmp.gt.f32.partialorder %v817_v0, 0.0  ;;  %v949_v6 = vmul.f32 0.2, %v817_v0 }
 0x17d   :  { %1301 = vst.msk [vmem:[%s2315_s3 + $0x74] sm:$0xf] %vm1271_vm2, %v1514_v1  ;;  %1333 = vst.msk [vmem:[%s2315_s3 + $0xf4] sm:$0xf] %vm1271_vm2, %v1546_v2  ;;  %v691_v7 = vpop.f32.mrf.mxu0  ;;  %v819_v8 = vpop.f32.mrf.mxu1 }
 0x17e   :  { %v981_v9 = vsel %vm853_vm0, %v689_v63, %v917_v5  ;;  %v1013_v10 = vsel %vm885_vm1, %v817_v0, %v949_v6  ;;  %v692_v11 = vadd.f32 %v1990_v17, %v691_v7  ;;  %v820_v12 = vadd.f32 %v1990_v17, %v819_v8 }
 0x17f   :  { %v1515_v13 = vpack.c.bf16 %v981_v9, %v981_v9  ;;  %v1547_v14 = vpack.c.bf16 %v1013_v10, %v1013_v10  ;;  %v693_v15 = vpop.f32.mrf.mxu0  ;;  %v821_v16 = vpop.f32.mrf.mxu1 }
 0x180   :  { %vm854_vm3 = vcmp.gt.f32.partialorder %v692_v11, 0.0  ;;  %v918_v18 = vmul.f32 0.2, %v692_v11  ;;  %vm886_vm4 = vcmp.gt.f32.partialorder %v820_v12, 0.0  ;;  %v950_v19 = vmul.f32 0.2, %v820_v12 }
 0x181   :  { %1302 = vst.msk [vmem:[%s2315_s3 + $0x78] sm:$0xf] %vm1271_vm2, %v1515_v13  ;;  %1334 = vst.msk [vmem:[%s2315_s3 + $0xf8] sm:$0xf] %vm1271_vm2, %v1547_v14 }
 0x182   :  { %v982_v20 = vsel %vm854_vm3, %v692_v11, %v918_v18  ;;  %v1014_v17 = vsel %vm886_vm4, %v820_v12, %v950_v19 }
 0x183   :  { %v1516_v21 = vpack.c.bf16 %v982_v20, %v982_v20  ;;  %v1548_v22 = vpack.c.bf16 %v1014_v17, %v1014_v17 }
 0x185   :  { %1303 = vst.msk [vmem:[%s2315_s3 + $0x7c] sm:$0xf] %vm1271_vm2, %v1516_v21  ;;  %1335 = vst.msk [vmem:[%s2315_s3 + $0xfc] sm:$0xf] %vm1271_vm2, %v1548_v22 }

// kernel: _lambda_.9
= control target key start
LH: loop header
LB: loop body
LE: loop exit
PB: predicated region body
PF: predicated region fallthrough
CT: control target
= control target key end

     0   :  { %vm139_vm0 = vcmask 1043456   ;;  %vm114_vm1 = vcmask 588800   ;;  %vm352_vm4 = vcmask 27648   ;;  %s644_s1 = inlined_call_operand.vmem [shape: bf16[72,4], index: 1, kind: input, shape index: {}]   ;;  %s645_s0 = inlined_call_operand.vmem [shape: bf16[128,72], index: 0, kind: input, shape index: {}]   ;;  %s646_s2 = inlined_call_operand.vmem [shape: f32[1,4], index: 2, kind: input, shape index: {}]   ;;  %s647_s3 = inlined_call_operand.vmem [shape: bf16[128,4], index: 3, kind: output, shape index: {}]  }
   0x1   :  { %v478_v0 = vld [vmem:[%s644_s1 + $0x20] ss:$0 sps:$4 sm:$0xff]   ;;  %v479_v1 = vld [vmem:[%s644_s1 + $0x18] sm:$0xff]   ;;  %v480_v3 = vld [vmem:[%s644_s1 + $0x10] sm:$0xff]  }
   0x2   :  { %476 = vmatprep.subr.msk.bf16.mxu0 %vm139_vm0, %v478_v0  ;;  %477 = vmatprep.subr.msk.bf16.mxu1 %vm139_vm0, %v478_v0  ;;  %v141_v2 = vsel %vm139_vm0, %v478_v0, 0  ;;  %v483_v4 = vld [vmem:[%s645_s0] sm:$0xff]   ;;  %v481_v6 = vld [vmem:[%s644_s1 + $0x8] sm:$0xff]   ;;  %v487_v10 = vld [vmem:[%s645_s0 + $0x10] sm:$0xff]  }
   0x3   :  { %441 = vmatpush3.bf16.msra.mxu0 %v141_v2  ;;  %471 = vmatpush3.bf16.msra.mxu1 %v141_v2  ;;  %v484_v5 = vld [vmem:[%s645_s0 + $0x20] sm:$0xff]   ;;  %v485_v8 = vld [vmem:[%s645_s0 + $0x8] sm:$0xff]   ;;  %v488_v11 = vld [vmem:[%s645_s0 + $0x30] sm:$0xff]  }
   0x4   :  { %442 = vmatprep.subr.bf16.mxu0 %v479_v1  ;;  %467 = vmatprep.subr.bf16.mxu1 %v479_v1  ;;  %v482_v7 = vld [vmem:[%s644_s1] sm:$0xff]   ;;  %v486_v9 = vld [vmem:[%s645_s0 + $0x28] sm:$0xff]   ;;  %v489_v12 = vld [vmem:[%s645_s0 + $0x18] sm:$0xff]  }
   0x5   :  { %450 = vmatprep.mubr.msk.bf16.mxu0 %vm114_vm1, %v483_v4  ;;  %458 = vmatprep.mubr.msk.bf16.mxu1 %vm114_vm1, %v484_v5  ;;  %v490_v13 = vld [vmem:[%s645_s0 + $0x38] sm:$0xff]   ;;  %v561_v14 = vld [vmem:[%s646_s2] ss:$0 sm:$0xff] }
   0x7   :  { %443 = vmatpush3.bf16.msra.mxu0 %v479_v1  ;;  %472 = vmatpush3.bf16.msra.mxu1 %v479_v1 }
   0x8   :  { %444 = vmatprep.subr.bf16.mxu0 %v480_v3  ;;  %468 = vmatprep.subr.bf16.mxu1 %v480_v3 }
   0xb   :  { %445 = vmatpush3.bf16.msra.mxu0 %v480_v3  ;;  %473 = vmatpush3.bf16.msra.mxu1 %v480_v3 }
   0xc   :  { %446 = vmatprep.subr.bf16.mxu0 %v481_v6  ;;  %469 = vmatprep.subr.bf16.mxu1 %v481_v6 }
   0xf   :  { %447 = vmatpush3.bf16.msra.mxu0 %v481_v6  ;;  %474 = vmatpush3.bf16.msra.mxu1 %v481_v6 }
  0x10   :  { %448 = vmatprep.subr.bf16.mxu0 %v482_v7  ;;  %470 = vmatprep.subr.bf16.mxu1 %v482_v7 }
  0x13   :  { %449 = vmatpush3.bf16.msra.mxu0 %v482_v7  ;;  %475 = vmatpush3.bf16.msra.mxu1 %v482_v7 }
  0x16   :  { %451 = vmatmul.mubr.msk.bf16.vlgmr.msra.gmra.mxu0 %vm114_vm1, %v485_v8  ;;  %459 = vmatmul.mubr.msk.bf16.vlgmr.msra.gmra.mxu1 %vm114_vm1, %v486_v9 }
  0x17   :  { %454 = vmatprep.mubr.msk.bf16.mxu0 %vm114_vm1, %v487_v10  ;;  %462 = vmatprep.mubr.msk.bf16.mxu1 %vm114_vm1, %v488_v11 }
  0x1e   :  { %455 = vmatmul.mubr.msk.bf16.gmra.mxu0 %vm114_vm1, %v489_v12  ;;  %463 = vmatmul.mubr.msk.bf16.gmra.mxu1 %vm114_vm1, %v490_v13 }
  0xd6   :  { %v452_v15 = vpop.f32.mrf.mxu0  ;;  %v460_v16 = vpop.f32.mrf.mxu1 }
  0xd7   :  { %v186_v17 = vadd.f32 %v452_v15, %v561_v14  ;;  %v218_v18 = vadd.f32 %v460_v16, %v561_v14 }
  0xd8   :  { %v177_v19 = vpop.f32.mrf.mxu0  ;;  %v209_v20 = vpop.f32.mrf.mxu1 }
  0xd9   :  { %vm242_vm2 = vcmp.gt.f32.partialorder %v186_v17, 0.0  ;;  %v258_v21 = vmul.f32 0.2, %v186_v17  ;;  %vm250_vm3 = vcmp.gt.f32.partialorder %v218_v18, 0.0  ;;  %v266_v22 = vmul.f32 0.2, %v218_v18 }
  0xda   :  { %v178_v23 = vadd.f32 %v561_v14, %v177_v19  ;;  %v210_v24 = vadd.f32 %v561_v14, %v209_v20  ;;  %v453_v25 = vpop.f32.mrf.mxu0  ;;  %v461_v26 = vpop.f32.mrf.mxu1 }
  0xdb   :  { %v274_v27 = vsel %vm242_vm2, %v186_v17, %v258_v21  ;;  %v282_v28 = vsel %vm250_vm3, %v218_v18, %v266_v22  ;;  %v189_v29 = vadd.f32 %v453_v25, %v561_v14  ;;  %v221_v30 = vadd.f32 %v461_v26, %v561_v14 }
  0xdc   :  { %v413_v31 = vpack.c.bf16 %v274_v27, %v274_v27  ;;  %v421_v32 = vpack.c.bf16 %v282_v28, %v282_v28  ;;  %vm240_vm5 = vcmp.gt.f32.partialorder %v178_v23, 0.0  ;;  %v256_v33 = vmul.f32 0.2, %v178_v23  ;;  %v180_v34 = vpop.f32.mrf.mxu0  ;;  %v212_v35 = vpop.f32.mrf.mxu1 }
  0xdd   :  { %vm248_vm6 = vcmp.gt.f32.partialorder %v210_v24, 0.0  ;;  %v264_v36 = vmul.f32 0.2, %v210_v24  ;;  %vm243_vm7 = vcmp.gt.f32.partialorder %v189_v29, 0.0  ;;  %v259_v37 = vmul.f32 0.2, %v189_v29 }
  0xde   :  { %355 = vst.msk [vmem:[%s647_s3 + $0x8] sm:$0xf] %vm352_vm4, %v413_v31  ;;  %363 = vst.msk [vmem:[%s647_s3 + $0x28] sm:$0xf] %vm352_vm4, %v421_v32  ;;  %v272_v38 = vsel %vm240_vm5, %v178_v23, %v256_v33  ;;  %vm251_vm8 = vcmp.gt.f32.partialorder %v221_v30, 0.0  ;;  %v181_v40 = vadd.f32 %v561_v14, %v180_v34  ;;  %v456_v41 = vpop.f32.mrf.mxu0  ;;  %v464_v42 = vpop.f32.mrf.mxu1  ;;  %v213_v46 = vadd.f32 %v561_v14, %v212_v35 }
  0xdf   :  { %v267_v39 = vmul.f32 0.2, %v221_v30  ;;  %v411_v43 = vpack.c.bf16 %v272_v38, %v272_v38  ;;  %v280_v44 = vsel %vm248_vm6, %v210_v24, %v264_v36  ;;  %v275_v45 = vsel %vm243_vm7, %v189_v29, %v259_v37 }
  0xe0   :  { %v419_v47 = vpack.c.bf16 %v280_v44, %v280_v44  ;;  %v414_v48 = vpack.c.bf16 %v275_v45, %v275_v45  ;;  %vm241_vm9 = vcmp.gt.f32.partialorder %v181_v40, 0.0  ;;  %v193_v50 = vpop.f32.mrf.mxu0  ;;  %v225_v51 = vpop.f32.mrf.mxu1  ;;  %v257_v53 = vmul.f32 0.2, %v181_v40 }
  0xe1   :  { %v283_v49 = vsel %vm251_vm8, %v221_v30, %v267_v39  ;;  %353 = vst.msk [vmem:[%s647_s3] sm:$0xf] %vm352_vm4, %v411_v43  ;;  %vm249_vm10 = vcmp.gt.f32.partialorder %v213_v46, 0.0  ;;  %v265_v54 = vmul.f32 0.2, %v213_v46  ;;  %v202_v55 = vadd.f32 %v456_v41, %v561_v14 }
  0xe2   :  { %v422_v52 = vpack.c.bf16 %v283_v49, %v283_v49  ;;  %361 = vst.msk [vmem:[%s647_s3 + $0x20] sm:$0xf] %vm352_vm4, %v419_v47  ;;  %356 = vst.msk [vmem:[%s647_s3 + $0xc] sm:$0xf] %vm352_vm4, %v414_v48  ;;  %v234_v56 = vadd.f32 %v464_v42, %v561_v14  ;;  %v194_v57 = vadd.f32 %v561_v14, %v193_v50  ;;  %v457_v59 = vpop.f32.mrf.mxu0  ;;  %v465_v60 = vpop.f32.mrf.mxu1 }
  0xe3   :  { %v226_v58 = vadd.f32 %v561_v14, %v225_v51  ;;  %v273_v61 = vsel %vm241_vm9, %v181_v40, %v257_v53  ;;  %v281_v62 = vsel %vm249_vm10, %v213_v46, %v265_v54  ;;  %v205_v63 = vadd.f32 %v457_v59, %v561_v14 }
  0xe4   :  { %364 = vst.msk [vmem:[%s647_s3 + $0x2c] sm:$0xf] %vm352_vm4, %v422_v52  ;;  %v237_v0 = vadd.f32 %v465_v60, %v561_v14  ;;  %v412_v1 = vpack.c.bf16 %v273_v61, %v273_v61  ;;  %v420_v2 = vpack.c.bf16 %v281_v62, %v281_v62  ;;  %vm246_vm11 = vcmp.gt.f32.partialorder %v202_v55, 0.0  ;;  %v196_v8 = vpop.f32.mrf.mxu0  ;;  %v228_v13 = vpop.f32.mrf.mxu1 }
  0xe5   :  { %v262_v3 = vmul.f32 0.2, %v202_v55  ;;  %vm254_vm12 = vcmp.gt.f32.partialorder %v234_v56, 0.0  ;;  %v270_v4 = vmul.f32 0.2, %v234_v56  ;;  %vm244_vm13 = vcmp.gt.f32.partialorder %v194_v57, 0.0 }
  0xe6   :  { %v260_v5 = vmul.f32 0.2, %v194_v57  ;;  %354 = vst.msk [vmem:[%s647_s3 + $0x4] sm:$0xf] %vm352_vm4, %v412_v1  ;;  %362 = vst.msk [vmem:[%s647_s3 + $0x24] sm:$0xf] %vm352_vm4, %v420_v2  ;;  %v197_v21 = vadd.f32 %v561_v14, %v196_v8  ;;  %v229_v23 = vadd.f32 %v561_v14, %v228_v13 }
  0xe7   :  { %v278_v6 = vsel %vm246_vm11, %v202_v55, %v262_v3  ;;  %vm252_vm14 = vcmp.gt.f32.partialorder %v226_v58, 0.0  ;;  %v268_v7 = vmul.f32 0.2, %v226_v58  ;;  %vm247_vm15 = vcmp.gt.f32.partialorder %v205_v63, 0.0 }
  0xe8   :  { %v417_v9 = vpack.c.bf16 %v278_v6, %v278_v6  ;;  %v286_v10 = vsel %vm254_vm12, %v234_v56, %v270_v4  ;;  %v276_v11 = vsel %vm244_vm13, %v194_v57, %v260_v5  ;;  %v263_v12 = vmul.f32 0.2, %v205_v63 }
  0xe9   :  { %v425_v15 = vpack.c.bf16 %v286_v10, %v286_v10  ;;  %v415_v16 = vpack.c.bf16 %v276_v11, %v276_v11  ;;  %v284_v17 = vsel %vm252_vm14, %v226_v58, %v268_v7  ;;  %vm255_vm0 = vcmp.gt.f32.partialorder %v237_v0, 0.0 }
  0xea   :  { %359 = vst.msk [vmem:[%s647_s3 + $0x18] sm:$0xf] %vm352_vm4, %v417_v9  ;;  %v423_v18 = vpack.c.bf16 %v284_v17, %v284_v17  ;;  %v279_v19 = vsel %vm247_vm15, %v205_v63, %v263_v12  ;;  %v271_v20 = vmul.f32 0.2, %v237_v0  ;;  %vm245_vm1 = vcmp.gt.f32.partialorder %v197_v21, 0.0 }
  0xeb   :  { %367 = vst.msk [vmem:[%s647_s3 + $0x38] sm:$0xf] %vm352_vm4, %v425_v15  ;;  %357 = vst.msk [vmem:[%s647_s3 + $0x10] sm:$0xf] %vm352_vm4, %v415_v16  ;;  %v418_v22 = vpack.c.bf16 %v279_v19, %v279_v19  ;;  %v261_v25 = vmul.f32 0.2, %v197_v21 }
  0xec   :  { %365 = vst.msk [vmem:[%s647_s3 + $0x30] sm:$0xf] %vm352_vm4, %v423_v18  ;;  %v287_v24 = vsel %vm255_vm0, %v237_v0, %v271_v20  ;;  %vm253_vm2 = vcmp.gt.f32.partialorder %v229_v23, 0.0  ;;  %v269_v27 = vmul.f32 0.2, %v229_v23 }
  0xed   :  { %360 = vst.msk [vmem:[%s647_s3 + $0x1c] sm:$0xf] %vm352_vm4, %v418_v22  ;;  %v426_v26 = vpack.c.bf16 %v287_v24, %v287_v24  ;;  %v277_v28 = vsel %vm245_vm1, %v197_v21, %v261_v25 }
  0xee   :  { %v416_v14 = vpack.c.bf16 %v277_v28, %v277_v28  ;;  %v285_v29 = vsel %vm253_vm2, %v229_v23, %v269_v27 }
  0xef   :  { %368 = vst.msk [vmem:[%s647_s3 + $0x3c] sm:$0xf] %vm352_vm4, %v426_v26  ;;  %v424_v30 = vpack.c.bf16 %v285_v29, %v285_v29 }
  0xf0   :  { %358 = vst.msk [vmem:[%s647_s3 + $0x14] sm:$0xf] %vm352_vm4, %v416_v14 }
  0xf1   :  { %366 = vst.msk [vmem:[%s647_s3 + $0x34] sm:$0xf] %vm352_vm4, %v424_v30 }

// kernel: _lambda_.10
= control target key start
LH: loop header
LB: loop body
LE: loop exit
PB: predicated region body
PF: predicated region fallthrough
CT: control target
= control target key end

     0   :  { %vm68_vm0 = vcmask 523264   ;;  %vm152_vm2 = vcmask 27648   ;;  %s259_s1 = inlined_call_operand.vmem [shape: bf16[64,4], index: 1, kind: input, shape index: {}]   ;;  %s260_s0 = inlined_call_operand.vmem [shape: bf16[32,64], index: 0, kind: input, shape index: {}]   ;;  %s261_s2 = inlined_call_operand.vmem [shape: f32[1,4], index: 2, kind: input, shape index: {}]   ;;  %s262_s3 = inlined_call_operand.vmem [shape: bf16[32,4], index: 3, kind: output, shape index: {}]  }
   0x1   :  { %v196_v0 = vld [vmem:[%s259_s1 + $0x18] sm:$0xff]   ;;  %v197_v1 = vld [vmem:[%s259_s1 + $0x10] sm:$0xff]   ;;  %v198_v2 = vld [vmem:[%s259_s1 + $0x8] sm:$0xff]  }
   0x2   :  { %184 = vmatprep.subr.bf16.mxu0 %v196_v0  ;;  %v200_v3 = vld [vmem:[%s260_s0] sm:$0xff]   ;;  %v201_v5 = vld [vmem:[%s260_s0 + $0x8] sm:$0xff]  }
   0x3   :  { %185 = vmatpush3.bf16.msra.mxu0 %v196_v0  ;;  %192 = vmatprep.mubr.msk.bf16.mxu0 %vm68_vm0, %v200_v3  ;;  %v199_v4 = vld [vmem:[%s259_s1] sm:$0xff]  }
   0x4   :  { %186 = vmatprep.subr.bf16.mxu0 %v197_v1  ;;  %v161_v6 = vld [vmem:[%s261_s2] ss:$0 sm:$0xff] }
   0x7   :  { %187 = vmatpush3.bf16.msra.mxu0 %v197_v1 }
   0x8   :  { %188 = vmatprep.subr.bf16.mxu0 %v198_v2 }
   0xb   :  { %189 = vmatpush3.bf16.msra.mxu0 %v198_v2 }
   0xc   :  { %190 = vmatprep.subr.bf16.mxu0 %v199_v4 }
   0xf   :  { %191 = vmatpush3.bf16.msra.mxu0 %v199_v4 }
  0x12   :  { %193 = vmatmul.mubr.msk.bf16.vlgmr.msra.gmra.mxu0 %vm68_vm0, %v201_v5 }
  0xd2   :  { %v194_v7 = vpop.f32.mrf.mxu0 }
  0xd3   :  { %v118_v8 = vadd.f32 %v194_v7, %v161_v6 }
  0xd4   :  { %v109_v9 = vpop.f32.mrf.mxu0 }
  0xd5   :  { %vm126_vm1 = vcmp.gt.f32.partialorder %v118_v8, 0.0  ;;  %v130_v10 = vmul.f32 0.2, %v118_v8  ;;  %v110_v11 = vadd.f32 %v161_v6, %v109_v9 }
  0xd6   :  { %v195_v12 = vpop.f32.mrf.mxu0 }
  0xd7   :  { %v134_v13 = vsel %vm126_vm1, %v118_v8, %v130_v10  ;;  %vm124_vm3 = vcmp.gt.f32.partialorder %v110_v11, 0.0  ;;  %v128_v14 = vmul.f32 0.2, %v110_v11  ;;  %v121_v15 = vadd.f32 %v195_v12, %v161_v6 }
  0xd8   :  { %v176_v16 = vpack.c.bf16 %v134_v13, %v134_v13  ;;  %v112_v17 = vpop.f32.mrf.mxu0 }
  0xd9   :  { %v132_v18 = vsel %vm124_vm3, %v110_v11, %v128_v14  ;;  %vm127_vm4 = vcmp.gt.f32.partialorder %v121_v15, 0.0  ;;  %v131_v19 = vmul.f32 0.2, %v121_v15  ;;  %v113_v20 = vadd.f32 %v161_v6, %v112_v17 }
  0xda   :  { %155 = vst.msk [vmem:[%s262_s3 + $0x8] sm:$0xf] %vm152_vm2, %v176_v16  ;;  %v174_v21 = vpack.c.bf16 %v132_v18, %v132_v18 }
  0xdb   :  { %v135_v22 = vsel %vm127_vm4, %v121_v15, %v131_v19  ;;  %vm125_vm5 = vcmp.gt.f32.partialorder %v113_v20, 0.0  ;;  %v129_v23 = vmul.f32 0.2, %v113_v20 }
  0xdc   :  { %153 = vst.msk [vmem:[%s262_s3] sm:$0xf] %vm152_vm2, %v174_v21  ;;  %v177_v24 = vpack.c.bf16 %v135_v22, %v135_v22 }
  0xdd   :  { %v133_v25 = vsel %vm125_vm5, %v113_v20, %v129_v23 }
  0xde   :  { %156 = vst.msk [vmem:[%s262_s3 + $0xc] sm:$0xf] %vm152_vm2, %v177_v24  ;;  %v175_v26 = vpack.c.bf16 %v133_v25, %v133_v25 }
  0xe0   :  { %154 = vst.msk [vmem:[%s262_s3 + $0x4] sm:$0xf] %vm152_vm2, %v175_v26 }

// kernel: _lambda_.11
= control target key start
LH: loop header
LB: loop body
LE: loop exit
PB: predicated region body
PF: predicated region fallthrough
CT: control target
= control target key end

     0   :  { %v146_v0 = vmov 0.0   ;;  %vm147_vm0 = vmmov 0   ;;  %vm57_vm1 = vcmask 523264   ;;  %vm107_vm2 = vcmask 1024   ;;  %s189_s1 = inlined_call_operand.vmem [shape: bf16[64,1], index: 1, kind: input, shape index: {}]   ;;  %s190_s2 = inlined_call_operand.<no memory space> [shape: f32[1,1], index: 2, kind: input, shape index: {}]   ;;  %s191_s0 = inlined_call_operand.vmem [shape: bf16[2,64], index: 0, kind: input, shape index: {}]   ;;  %s192_s3 = inlined_call_operand.vmem [shape: f32[2,1], index: 3, kind: output, shape index: {}]  }
   0x1   :  { %124 = vmatprep.subr.bf16.mxu0 %v146_v0  ;;  %v138_v1 = vld [vmem:[%s189_s1 + $0x18] sm:$0xff]   ;;  %132 = vmatprep.mubr.msk.bf16.mxu0 %vm147_vm0, %v146_v0  ;;  %v8_v2 = vstv %s190_s2  ;;  %v139_v3 = vld [vmem:[%s189_s1 + $0x10] sm:$0xff]   ;;  %v140_v4 = vld [vmem:[%s189_s1 + $0x8] sm:$0xff]  }
   0x2   :  { %9 = vst [vmem:[#allocation2] sm:$0x1] %v8_v2  ;;  %125 = vmatpush3.bf16.msra.mxu0 %v138_v1  ;;  %v141_v5 = vld [vmem:[%s189_s1] sm:$0xff]  }
   0x3   :  { %126 = vmatprep.subr.bf16.mxu0 %v146_v0  ;;  %v17_v6 = vld [vmem:[%s191_s0] sm:$0x1] }
   0x6   :  { %127 = vmatpush3.bf16.msra.mxu0 %v139_v3 }
   0x7   :  { %128 = vmatprep.subr.bf16.mxu0 %v146_v0 }
   0x9   :  { %v113_v7 = vld [vmem:[#allocation2] ss:$0 sm:$0xff] }
   0xa   :  { %129 = vmatpush3.bf16.msra.mxu0 %v140_v4 }
   0xb   :  { %130 = vmatprep.subr.bf16.mxu0 %v146_v0 }
   0xe   :  { %131 = vmatpush3.bf16.msra.mxu0 %v141_v5 }
  0x11   :  { %133 = vmatmul.mubr.msk.bf16.vlgmr.msra.gmra.mxu0 %vm57_vm1, %v17_v6 }
  0xd1   :  { %v95_v8 = vpop.f32.mrf.mxu0 }
  0xd2   :  { %v96_v9 = vadd.f32 %v113_v7, %v95_v8 }
  0xd3   :  { %v134_v10 = vpop.f32.mrf.mxu0 }
  0xd4   :  { %v101_v11 = vsub.f32 0.0, %v96_v9 }
  0xd5   :  { %v98_v12 = vpop.f32.mrf.mxu0 }
  0xd6   :  { %v102_v13 = vmul.f32 1.442695, %v101_v11 }
  0xd7   :  { %v135_v14 = vpop.f32.mrf.mxu0 }
  0xd8   :  { %142 = vpow2.f32 %v102_v13 }
  0xe5   :  { %v143_v15 = vpop.eup %142 }
  0xe6   :  { %v104_v16 = vadd.f32 1.0, %v143_v15 }
  0xe8   :  { %144 = vrcp.f32 %v104_v16 }
  0xf5   :  { %v145_v17 = vpop.eup %144 }
  0xf6   :  { %108 = vst.msk [vmem:[%s192_s3] sm:$0x3] %vm107_vm2, %v145_v17 }

</bundles_post_ra>
